<compile_context>
chip_gen: v7x
topology: tpu7x:2x2x1
jax: 0.10.0
libtpu: 0.0.40
codegen_flags: <defaults>
</compile_context>

<pallas_src>
import functools
import numpy as np

import jax
import jax.numpy as jnp
from jax import lax
from jax.experimental import pallas as pl
from jax.experimental.pallas import tpu as pltpu

CH = 128      # channels (module default)
K = 3         # kernel_size (module default)
CROP = 255    # x[:, :, 255:-255]


def _elu(v):
    # ELU(alpha=1).  No clamp: exp's inf on the positive side is discarded by
    # the select and cannot turn into NaN.
    return jnp.where(v > 0.0, v, jnp.exp(v) - 1.0)


# ------------------------------ fused kernel -------------------------------

def _denoise_kernel(xcols_ref, w1_ref, b1_ref, we2_ref, w31_ref, wd2_ref,
                    wlast_ref, bstk_ref, o_ref,
                    p1_ref, p2_ref, a3p_ref, d1p_ref):
    f32, bf16 = jnp.float32, jnp.bfloat16
    Lq = xcols_ref.shape[1]          # L // 4
    n_p2 = Lq - 2                    # pooled length after encode stage 2
    n_a3 = Lq - 4                    # encoder output length
    n_d1 = Lq - 2                    # ConvT1 output length
    n_d2 = Lq - 1                    # paired rows of the Decode-2 output
    n_r = o_ref.shape[1]             # (L - 2*CROP - 2) // 4 output rows
    S1 = (CROP - 3) // 4             # = 63 for CROP=255 (crop phase offset)

    dot = functools.partial(jnp.dot, preferred_element_type=f32)

    def cat(*xs):
        return jnp.concatenate(xs, axis=-1)

    # ---- Encode 1: Conv1d(1->128) + ELU + MaxPool(2) -----------------------
    # mod-4 de-interleaved im2col (Lq, 12) @ block-diagonal (12, 4*CH); the
    # pool is an elementwise max of lane-quarter pairs, ELU hoisted after it.
    # p1_ref holds the paired layout  [p1[2i] | p1[2i+1]]  in 256 lanes.
    a1 = dot(xcols_ref[0], w1_ref[...]) + b1_ref[...]              # (Lq, 4*CH)
    p1_ref[:, 0:CH] = _elu(jnp.maximum(a1[:, 0:CH], a1[:, CH:2 * CH]))
    p1_ref[:, CH:2 * CH] = _elu(jnp.maximum(a1[:, 2 * CH:3 * CH],
                                            a1[:, 3 * CH:4 * CH]))

    # ---- Encode 2: Conv1d(128->128) + ELU + MaxPool(2) ---------------------
    # One (n, 512) x (512, 256) dot; output lanes [0:128]=a2[2u], [128:256]=a2[2u+1].
    lhs2 = cat(p1_ref[pl.ds(0, n_p2), :],
               p1_ref[pl.ds(1, n_p2), :]).astype(bf16)
    a2 = dot(lhs2, we2_ref[...]) + bstk_ref[0:1, :]
    p2_ref[pl.ds(0, n_p2), :] = _elu(jnp.maximum(a2[:, 0:CH], a2[:, CH:2 * CH]))

    # ---- Encode 3: Conv1d(128->128) + ELU -> zero-halo buffer --------------
    # One K-concatenated (n, 384) x (384, 128) dot.
    lhs3 = cat(p2_ref[pl.ds(0, n_a3), :], p2_ref[pl.ds(1, n_a3), :],
               p2_ref[pl.ds(2, n_a3), :]).astype(bf16)
    a3 = dot(lhs3, w31_ref[0]) + bstk_ref[1:2, 0:CH]
    zeros8 = jnp.zeros((8, CH), f32)
    a3p_ref[pl.ds(0, 8), :] = zeros8          # leading halo (rows 0..1 stay 0)
    a3p_ref[pl.ds(Lq - 8, 8), :] = zeros8     # trailing halo (last 2 rows stay 0)
    a3p_ref[pl.ds(2, n_a3), :] = _elu(a3)

    # ---- Decode 1: ConvTranspose1d(128->128) + ELU -------------------------
    lhsd1 = cat(a3p_ref[pl.ds(0, n_d1), :], a3p_ref[pl.ds(1, n_d1), :],
                a3p_ref[pl.ds(2, n_d1), :]).astype(bf16)
    d1 = dot(lhsd1, w31_ref[1]) + bstk_ref[1:2, CH:2 * CH]
    d1p_ref[pl.ds(0, 8), :] = zeros8          # leading halo (row 0 stays 0)
    d1p_ref[pl.ds(Lq - 8, 8), :] = zeros8     # trailing halo (last row stays 0)
    d1p_ref[pl.ds(1, n_d1), :] = _elu(d1)

    # ---- Decode 2: Upsample(x2) folded into ConvT(128->128) + ELU ----------
    # One (n, 256) x (256, 256) dot; output lanes [0:128]=d2[2m], [128:256]=d2[2m+1].
    lhsd2 = cat(d1p_ref[pl.ds(0, n_d2), :],
                d1p_ref[pl.ds(1, n_d2), :]).astype(bf16)
    d2 = _elu(dot(lhsd2, wd2_ref[...]) + bstk_ref[2:3, :])         # (n_d2, 256)

    # ---- Decode 3: Upsample(x2) + ConvT(128->1) + crop ---------------------
    # Full-length (n_d2, 256) x (256, 8) projection first, then the crop shift
    # (S1 / S1+1, sublane-misaligned) is applied on the tiny 8-lane result.
    out8 = dot(d2.astype(bf16), wlast_ref[...])                    # (n_d2, 8)
    out4 = (out8[S1:S1 + n_r, 0:4] + out8[S1 + 1:S1 + 1 + n_r, 4:8]
            + bstk_ref[3:4, 0:4])
    # TODO(synk): lane-dense (4, n_r) output layout (in-kernel transpose)
    # skipped — writeback is only 2 KiB per grid step.
    o_ref[0] = out4.astype(o_ref.dtype)


# ------------------------------ weight prep --------------------------------

def _prep_inputs(x_ncl, p):
    """De-interleaved im2col input + fused / folded (bf16) weights."""
    B, cin, L = x_ncl.shape
    assert cin == 1 and L % 4 == 0 and L > 2 * CROP + 2
    Lq = L // 4
    bf16 = jnp.bfloat16

    # x -> (B, Lq, 12) with xcols[b, i, 3q+k] = x[b, 4i + q + k]  (zero-padded)
    xf = x_ncl[:, 0, :].astype(jnp.float32)
    xpad = jnp.pad(xf, ((0, 0), (0, 4)))
    cols = [xpad[:, q + k::4][:, :Lq] for q in range(4) for k in range(K)]
    xcols = jnp.stack(cols, axis=-1)

    # Encode stage 1: block-diagonal weight over the 4 parity streams (f32, K=12).
    w1k = jnp.transpose(p['e1_w'], (2, 1, 0))[:, 0, :]             # (K, CH)
    w1big = jnp.zeros((4 * K, 4 * CH), jnp.float32)
    for q in range(4):
        w1big = w1big.at[K * q:K * (q + 1), CH * q:CH * (q + 1)].set(w1k)
    b1big = jnp.tile(p['e1_b'], (4,))[None, :]                     # (1, 4*CH)

    zcc = jnp.zeros((CH, CH), jnp.float32)

    # Encode 2 (conv + pool folded): paired-lane, K-concatenated -> (512, 256).
    W2 = jnp.transpose(p['e2_w'], (2, 1, 0))                       # (K, Cin, Cout)
    w_e2 = jnp.concatenate(
        [jnp.block([[W2[0], zcc], [W2[1], W2[0]]]),
         jnp.block([[W2[2], W2[1]], [zcc, W2[2]]])], axis=0).astype(bf16)

    # Encode 3 / Decode 1: K-concatenated 3-tap weights -> (384, 128) each.
    W3 = jnp.transpose(p['e3_w'], (2, 1, 0)).reshape(K * CH, CH)
    Wd1 = jnp.transpose(p['d1_w'][:, :, ::-1], (2, 0, 1)).reshape(K * CH, CH)
    w31 = jnp.stack([W3, Wd1]).astype(bf16)                        # (2, 384, CH)

    # Decode 2 with the x2 nearest upsample folded in, paired-lane output:
    #   d2[2m]   = d1p[m](M1+M2) + d1p[m+1]M0
    #   d2[2m+1] = d1p[m]M2      + d1p[m+1](M0+M1)
    M = jnp.transpose(p['d2_w'], (2, 0, 1))                        # un-flipped taps
    w_d2 = jnp.concatenate(
        [jnp.concatenate([M[1] + M[2], M[2]], axis=1),
         jnp.concatenate([M[0], M[0] + M[1]], axis=1)], axis=0).astype(bf16)

    # Final ConvT(128->1): upsample + crop folded into a (256, 8) projection.
    # out[4i+q] = d2_pair[i+63] @ WU[:, q] + d2_pair[i+64] @ WV[:, q]
    v = p['d3_w'][:, 0, :]                                         # (CH, K)
    zc = jnp.zeros((CH,), jnp.float32)
    w0, w1, w2 = v[:, 0], v[:, 1], v[:, 2]
    WU = jnp.concatenate([jnp.stack([w2, zc, zc, zc], axis=1),
                          jnp.stack([w0 + w1, w1 + w2, w2, zc], axis=1)], axis=0)
    WV = jnp.concatenate([jnp.stack([zc, w0, w0 + w1, w1 + w2], axis=1),
                          jnp.stack([zc, zc, zc, w0], axis=1)], axis=0)
    w_last = jnp.concatenate([WU, WV], axis=1).astype(bf16)        # (2*CH, 8)

    # Biases (f32), one (4, 2*CH) table.
    blast4 = jnp.zeros((2 * CH,), jnp.float32).at[0:4].set(p['d3_b'][0])
    bstk = jnp.stack([jnp.concatenate([p['e2_b'], p['e2_b']]),
                      jnp.concatenate([p['e3_b'], p['d1_b']]),
                      jnp.concatenate([p['d2_b'], p['d2_b']]),
                      blast4])

    return xcols, w1big, b1big, w_e2, w31, w_d2, w_last, bstk


# --------------------------------- forward ---------------------------------

@jax.jit
def denoise_forward(x_ncl, p):
    """x_ncl: (B, 1, L) as in PyTorch; returns (B, 1, L - 2*CROP - 2)."""
    B, _, L = x_ncl.shape
    Lq = L // 4
    out_len = L - 2 * CROP - 2
    n_r = out_len // 4
    assert out_len > 0 and out_len % 4 == 0

    args = _prep_inputs(x_ncl, p)

    out = pl.pallas_call(
        _denoise_kernel,
        out_shape=jax.ShapeDtypeStruct((B, n_r, 4), jnp.float32),
        grid_spec=pltpu.PrefetchScalarGridSpec(
            num_scalar_prefetch=0,
            grid=(B,),
            in_specs=[
                pl.BlockSpec((1, Lq, 4 * K), lambda b: (b, 0, 0)),       # xcols
                pl.BlockSpec((4 * K, 4 * CH), lambda b: (0, 0)),         # w1big (f32)
                pl.BlockSpec((1, 4 * CH), lambda b: (0, 0)),             # b1big
                pl.BlockSpec((4 * CH, 2 * CH), lambda b: (0, 0)),        # w_e2 (bf16)
                pl.BlockSpec((2, K * CH, CH), lambda b: (0, 0, 0)),      # w31  (bf16)
                pl.BlockSpec((2 * CH, 2 * CH), lambda b: (0, 0)),        # w_d2 (bf16)
                pl.BlockSpec((2 * CH, 8), lambda b: (0, 0)),             # w_last
                pl.BlockSpec((4, 2 * CH), lambda b: (0, 0)),             # bstk
            ],
            out_specs=pl.BlockSpec((1, n_r, 4), lambda b: (b, 0, 0)),
            scratch_shapes=[pltpu.VMEM((Lq, 2 * CH), jnp.float32),  # p1 (paired)
                            pltpu.VMEM((Lq, CH), jnp.float32),      # p2
                            pltpu.VMEM((Lq, CH), jnp.float32),      # a3 (+halo)
                            pltpu.VMEM((Lq, CH), jnp.float32)],     # d1 (+halo)
        ),
        compiler_params=pltpu.CompilerParams(
            dimension_semantics=("parallel",)),
    )(*args)

    # TODO(synk): the PyTorch forward's print('Denoise shape', ...) is a
    # host-side debug print and is intentionally omitted.
    # TODO(synk): BB>1 batches per grid step would amortize per-step overhead
    # for large B; with B=2 one step per TensorCore (v7x) is already optimal.
    return out.reshape(B, out_len)[:, None, :]                     # (B, 1, out)


# --------------------------- plain-JAX reference ---------------------------

def denoise_reference(x_ncl, p):
    x = jnp.transpose(x_ncl, (0, 2, 1)).astype(jnp.float32)

    def conv(h, w_pt, b, act):
        wk = jnp.transpose(w_pt, (2, 1, 0))
        o = lax.conv_general_dilated(h, wk, (1,), 'VALID',
                                     dimension_numbers=('NWC', 'WIO', 'NWC'))
        o = o + b[None, None, :]
        return _elu(o) if act else o

    def convT(h, w_pt, b, act):
        k = w_pt.shape[2]
        wk = jnp.transpose(w_pt[:, :, ::-1], (2, 0, 1))
        hp = jnp.pad(h, ((0, 0), (k - 1, k - 1), (0, 0)))
        o = lax.conv_general_dilated(hp, wk, (1,), 'VALID',
                                     dimension_numbers=('NWC', 'WIO', 'NWC'))
        o = o + b[None, None, :]
        return _elu(o) if act else o

    def pool(h):
        b, l, c = h.shape
        n = l // 2
        return h[:, :2 * n, :].reshape(b, n, 2, c).max(axis=2)

    def up(h):
        return jnp.repeat(h, 2, axis=1)

    h = pool(conv(x, p['e1_w'], p['e1_b'], True))
    h = pool(conv(h, p['e2_w'], p['e2_b'], True))
    h = conv(h, p['e3_w'], p['e3_b'], True)
    h = up(convT(h, p['d1_w'], p['d1_b'], True))
    h = up(convT(h, p['d2_w'], p['d2_b'], True))
    h = convT(h, p['d3_w'], p['d3_b'], False)
    h = h[:, CROP:-CROP, :]
    return jnp.transpose(h, (0, 2, 1))


# ------------------------------- parameters --------------------------------

def init_params(key):
    ks = jax.random.split(key, 12)

    def u(k, shape, fan_in):
        s = 1.0 / np.sqrt(fan_in)
        return jax.random.uniform(k, shape, jnp.float32, -s, s)

    p = {}
    # Encode: nn.Conv1d weights, PyTorch layout (Cout, Cin, K)
    p['e1_w'] = u(ks[0], (CH, 1, K), 1 * K);   p['e1_b'] = u(ks[1], (CH,), 1 * K)
    p['e2_w'] = u(ks[2], (CH, CH, K), CH * K); p['e2_b'] = u(ks[3], (CH,), CH * K)
    p['e3_w'] = u(ks[4], (CH, CH, K), CH * K); p['e3_b'] = u(ks[5], (CH,), CH * K)
    # Decode: nn.ConvTranspose1d weights, PyTorch layout (Cin, Cout, K)
    p['d1_w'] = u(ks[6], (CH, CH, K), CH * K); p['d1_b'] = u(ks[7], (CH,), CH * K)
    p['d2_w'] = u(ks[8], (CH, CH, K), CH * K); p['d2_b'] = u(ks[9], (CH,), CH * K)
    p['d3_w'] = u(ks[10], (CH, 1, K), CH * K); p['d3_b'] = u(ks[11], (1,), CH * K)
    return p


# ----------------------------------- main -----------------------------------

if __name__ == "__main__":
    key = jax.random.PRNGKey(0)
    k_x, k_p = jax.random.split(key)

    B, L = 2, 1024                     # L=1024 -> encode 252 -> decode 1022 -> crop 512
    x = jax.random.normal(k_x, (B, 1, L), jnp.float32)   # PyTorch-style (N, C, L)
    params = init_params(k_p)

    out = jax.block_until_ready(denoise_forward(x, params))

    assert out.shape == (B, 1, L - 2 * CROP - 2), out.shape
    assert bool(jnp.all(jnp.isfinite(out)))

    # numeric check against a plain-JAX (lax.conv) reference of the same graph;
    # tolerance accounts for bf16 MXU operands (f32 accumulation).
    ref = denoise_reference(x, params)
    np.testing.assert_allclose(np.asarray(out), np.asarray(ref),
                               rtol=2e-2, atol=2e-2)

    print("KERNEL_OK")
</pallas_src>

<mosaic_0001>
module attributes {stable_mosaic.version = 11 : i64} {
  func.func @_denoise_kernel(%arg0: i32, %arg1: memref<1x256x12xf32, #tpu.memory_space<vmem>>, %arg2: memref<12x512xf32, #tpu.memory_space<vmem>>, %arg3: memref<1x512xf32, #tpu.memory_space<vmem>>, %arg4: memref<512x256xbf16, #tpu.memory_space<vmem>>, %arg5: memref<2x384x128xbf16, #tpu.memory_space<vmem>>, %arg6: memref<256x256xbf16, #tpu.memory_space<vmem>>, %arg7: memref<256x8xbf16, #tpu.memory_space<vmem>>, %arg8: memref<4x256xf32, #tpu.memory_space<vmem>>, %arg9: memref<1x128x4xf32, #tpu.memory_space<vmem>>, %arg10: memref<256x256xf32, #tpu.memory_space<vmem>>, %arg11: memref<256x128xf32, #tpu.memory_space<vmem>>, %arg12: memref<256x128xf32, #tpu.memory_space<vmem>>, %arg13: memref<256x128xf32, #tpu.memory_space<vmem>>) attributes {dimension_semantics = [#tpu.dimension_semantics<parallel>], iteration_bounds = array<i64: 2>, scalar_prefetch = 0 : i64, scratch_operands = 4 : i64, tpu.core_type = #tpu.core_type<tc>, window_params = [{transform_indices = @transform_0, window_bounds = array<i64: 1, 256, 12>}, {pipeline_mode = #tpu.pipeline_mode<synchronous>, transform_indices = @transform_1, window_bounds = array<i64: 12, 512>}, {pipeline_mode = #tpu.pipeline_mode<synchronous>, transform_indices = @transform_2, window_bounds = array<i64: 1, 512>}, {pipeline_mode = #tpu.pipeline_mode<synchronous>, transform_indices = @transform_3, window_bounds = array<i64: 512, 256>}, {pipeline_mode = #tpu.pipeline_mode<synchronous>, transform_indices = @transform_4, window_bounds = array<i64: 2, 384, 128>}, {pipeline_mode = #tpu.pipeline_mode<synchronous>, transform_indices = @transform_5, window_bounds = array<i64: 256, 256>}, {pipeline_mode = #tpu.pipeline_mode<synchronous>, transform_indices = @transform_6, window_bounds = array<i64: 256, 8>}, {pipeline_mode = #tpu.pipeline_mode<synchronous>, transform_indices = @transform_7, window_bounds = array<i64: 4, 256>}, {transform_indices = @transform_8, window_bounds = array<i64: 1, 128, 4>}]} {
    %c0 = arith.constant 0 : index
    %c0_0 = arith.constant 0 : index
    %c0_1 = arith.constant 0 : index
    %0 = vector.load %arg1[%c0, %c0_0, %c0_1] : memref<1x256x12xf32, #tpu.memory_space<vmem>>, vector<1x256x12xf32>
    %1 = vector.shape_cast %0 : vector<1x256x12xf32> to vector<256x12xf32>
    %c0_2 = arith.constant 0 : index
    %c0_3 = arith.constant 0 : index
    %2 = vector.load %arg2[%c0_2, %c0_3] : memref<12x512xf32, #tpu.memory_space<vmem>>, vector<12x512xf32>
    %cst = arith.constant dense<0.000000e+00> : vector<256x512xf32>
    %3 = tpu.matmul %1, %2, %cst {dimension_numbers = #tpu.dot_dimension_numbers<[1], [0], [0], [1], [0, 0, 1, 1], [], []>} : vector<256x12xf32>, vector<12x512xf32>, vector<256x512xf32> -> vector<256x512xf32>
    %c0_4 = arith.constant 0 : index
    %c0_5 = arith.constant 0 : index
    %4 = vector.load %arg3[%c0_4, %c0_5] : memref<1x512xf32, #tpu.memory_space<vmem>>, vector<1x512xf32>
    %5 = vector.broadcast %4 : vector<1x512xf32> to vector<256x512xf32>
    %6 = arith.addf %3, %5 : vector<256x512xf32>
    %7 = vector.extract_strided_slice %6 {offsets = [0, 0], sizes = [256, 128], strides = [1, 1]} : vector<256x512xf32> to vector<256x128xf32>
    %8 = vector.extract_strided_slice %6 {offsets = [0, 128], sizes = [256, 128], strides = [1, 1]} : vector<256x512xf32> to vector<256x128xf32>
    %9 = arith.maximumf %7, %8 : vector<256x128xf32>
    %cst_6 = arith.constant 0.000000e+00 : f32
    %10 = vector.broadcast %cst_6 : f32 to vector<256x128xf32>
    %11 = arith.cmpf ogt, %9, %10 : vector<256x128xf32>
    %12 = math.exp %9 : vector<256x128xf32>
    %cst_7 = arith.constant 1.000000e+00 : f32
    %13 = vector.broadcast %cst_7 : f32 to vector<256x128xf32>
    %14 = arith.subf %12, %13 : vector<256x128xf32>
    %15 = arith.select %11, %9, %14 : vector<256x128xi1>, vector<256x128xf32>
    %c0_8 = arith.constant 0 : index
    %c0_9 = arith.constant 0 : index
    %16 = vector.load %arg10[%c0_8, %c0_9] : memref<256x256xf32, #tpu.memory_space<vmem>>, vector<256x128xf32>
    tpu.vector_store %arg10[%c0_8, %c0_9], %15 {strides = array<i32>} : memref<256x256xf32, #tpu.memory_space<vmem>>, vector<256x128xf32>,
    %17 = vector.extract_strided_slice %6 {offsets = [0, 256], sizes = [256, 128], strides = [1, 1]} : vector<256x512xf32> to vector<256x128xf32>
    %18 = vector.extract_strided_slice %6 {offsets = [0, 384], sizes = [256, 128], strides = [1, 1]} : vector<256x512xf32> to vector<256x128xf32>
    %19 = arith.maximumf %17, %18 : vector<256x128xf32>
    %cst_10 = arith.constant 0.000000e+00 : f32
    %20 = vector.broadcast %cst_10 : f32 to vector<256x128xf32>
    %21 = arith.cmpf ogt, %19, %20 : vector<256x128xf32>
    %22 = math.exp %19 : vector<256x128xf32>
    %cst_11 = arith.constant 1.000000e+00 : f32
    %23 = vector.broadcast %cst_11 : f32 to vector<256x128xf32>
    %24 = arith.subf %22, %23 : vector<256x128xf32>
    %25 = arith.select %21, %19, %24 : vector<256x128xi1>, vector<256x128xf32>
    %c0_12 = arith.constant 0 : index
    %c128 = arith.constant 128 : index
    %26 = vector.load %arg10[%c0_12, %c128] : memref<256x256xf32, #tpu.memory_space<vmem>>, vector<256x128xf32>
    tpu.vector_store %arg10[%c0_12, %c128], %25 {strides = array<i32>} : memref<256x256xf32, #tpu.memory_space<vmem>>, vector<256x128xf32>,
    %c0_13 = arith.constant 0 : index
    %c0_14 = arith.constant 0 : index
    %27 = vector.load %arg10[%c0_13, %c0_14] : memref<256x256xf32, #tpu.memory_space<vmem>>, vector<254x256xf32>
    %c1 = arith.constant 1 : index
    %c0_15 = arith.constant 0 : index
    %28 = vector.load %arg10[%c1, %c0_15] : memref<256x256xf32, #tpu.memory_space<vmem>>, vector<254x256xf32>
    %29 = tpu.concatenate %27, %28 in 1 : vector<254x256xf32>, vector<254x256xf32> -> vector<254x512xf32>
    %30 = arith.truncf %29 : vector<254x512xf32> to vector<254x512xbf16>
    %c0_16 = arith.constant 0 : index
    %c0_17 = arith.constant 0 : index
    %31 = vector.load %arg4[%c0_16, %c0_17] : memref<512x256xbf16, #tpu.memory_space<vmem>>, vector<512x256xbf16>
    %cst_18 = arith.constant dense<0.000000e+00> : vector<254x256xf32>
    %32 = tpu.matmul %30, %31, %cst_18 {dimension_numbers = #tpu.dot_dimension_numbers<[1], [0], [0], [1], [0, 0, 1, 1], [], []>} : vector<254x512xbf16>, vector<512x256xbf16>, vector<254x256xf32> -> vector<254x256xf32>
    %c0_19 = arith.constant 0 : index
    %c0_20 = arith.constant 0 : index
    %33 = vector.load %arg8[%c0_19, %c0_20] : memref<4x256xf32, #tpu.memory_space<vmem>>, vector<1x256xf32>
    %34 = vector.broadcast %33 : vector<1x256xf32> to vector<254x256xf32>
    %35 = arith.addf %32, %34 : vector<254x256xf32>
    %36 = vector.extract_strided_slice %35 {offsets = [0, 0], sizes = [254, 128], strides = [1, 1]} : vector<254x256xf32> to vector<254x128xf32>
    %37 = vector.extract_strided_slice %35 {offsets = [0, 128], sizes = [254, 128], strides = [1, 1]} : vector<254x256xf32> to vector<254x128xf32>
    %38 = arith.maximumf %36, %37 : vector<254x128xf32>
    %cst_21 = arith.constant 0.000000e+00 : f32
    %39 = vector.broadcast %cst_21 : f32 to vector<254x128xf32>
    %40 = arith.cmpf ogt, %38, %39 : vector<254x128xf32>
    %41 = math.exp %38 : vector<254x128xf32>
    %cst_22 = arith.constant 1.000000e+00 : f32
    %42 = vector.broadcast %cst_22 : f32 to vector<254x128xf32>
    %43 = arith.subf %41, %42 : vector<254x128xf32>
    %44 = arith.select %40, %38, %43 : vector<254x128xi1>, vector<254x128xf32>
    %c0_23 = arith.constant 0 : index
    %c0_24 = arith.constant 0 : index
    %45 = vector.load %arg11[%c0_23, %c0_24] : memref<256x128xf32, #tpu.memory_space<vmem>>, vector<254x128xf32>
    tpu.vector_store %arg11[%c0_23, %c0_24], %44 {strides = array<i32>} : memref<256x128xf32, #tpu.memory_space<vmem>>, vector<254x128xf32>,
    %c0_25 = arith.constant 0 : index
    %c0_26 = arith.constant 0 : index
    %46 = vector.load %arg11[%c0_25, %c0_26] : memref<256x128xf32, #tpu.memory_space<vmem>>, vector<252x128xf32>
    %c1_27 = arith.constant 1 : index
    %c0_28 = arith.constant 0 : index
    %47 = vector.load %arg11[%c1_27, %c0_28] : memref<256x128xf32, #tpu.memory_space<vmem>>, vector<252x128xf32>
    %c2 = arith.constant 2 : index
    %c0_29 = arith.constant 0 : index
    %48 = vector.load %arg11[%c2, %c0_29] : memref<256x128xf32, #tpu.memory_space<vmem>>, vector<252x128xf32>
    %49 = tpu.concatenate %46, %47, %48 in 1 : vector<252x128xf32>, vector<252x128xf32>, vector<252x128xf32> -> vector<252x384xf32>
    %50 = arith.truncf %49 : vector<252x384xf32> to vector<252x384xbf16>
    %c0_30 = arith.constant 0 : index
    %c0_31 = arith.constant 0 : index
    %c0_32 = arith.constant 0 : index
    %51 = vector.load %arg5[%c0_30, %c0_31, %c0_32] : memref<2x384x128xbf16, #tpu.memory_space<vmem>>, vector<1x384x128xbf16>
    %52 = vector.shape_cast %51 : vector<1x384x128xbf16> to vector<384x128xbf16>
    %cst_33 = arith.constant dense<0.000000e+00> : vector<252x128xf32>
    %53 = tpu.matmul %50, %52, %cst_33 {dimension_numbers = #tpu.dot_dimension_numbers<[1], [0], [0], [1], [0, 0, 1, 1], [], []>} : vector<252x384xbf16>, vector<384x128xbf16>, vector<252x128xf32> -> vector<252x128xf32>
    %c1_34 = arith.constant 1 : index
    %c0_35 = arith.constant 0 : index
    %54 = vector.load %arg8[%c1_34, %c0_35] : memref<4x256xf32, #tpu.memory_space<vmem>>, vector<1x128xf32>
    %55 = vector.broadcast %54 : vector<1x128xf32> to vector<252x128xf32>
    %56 = arith.addf %53, %55 : vector<252x128xf32>
    %cst_36 = arith.constant 0.000000e+00 : f32
    %57 = vector.broadcast %cst_36 : f32 to vector<8x128xf32>
    %c0_37 = arith.constant 0 : index
    %c0_38 = arith.constant 0 : index
    %58 = vector.load %arg12[%c0_37, %c0_38] : memref<256x128xf32, #tpu.memory_space<vmem>>, vector<8x128xf32>
    tpu.vector_store %arg12[%c0_37, %c0_38], %57 {strides = array<i32>} : memref<256x128xf32, #tpu.memory_space<vmem>>, vector<8x128xf32>,
    %c248 = arith.constant 248 : index
    %c0_39 = arith.constant 0 : index
    %59 = vector.load %arg12[%c248, %c0_39] : memref<256x128xf32, #tpu.memory_space<vmem>>, vector<8x128xf32>
    tpu.vector_store %arg12[%c248, %c0_39], %57 {strides = array<i32>} : memref<256x128xf32, #tpu.memory_space<vmem>>, vector<8x128xf32>,
    %cst_40 = arith.constant 0.000000e+00 : f32
    %60 = vector.broadcast %cst_40 : f32 to vector<252x128xf32>
    %61 = arith.cmpf ogt, %56, %60 : vector<252x128xf32>
    %62 = math.exp %56 : vector<252x128xf32>
    %cst_41 = arith.constant 1.000000e+00 : f32
    %63 = vector.broadcast %cst_41 : f32 to vector<252x128xf32>
    %64 = arith.subf %62, %63 : vector<252x128xf32>
    %65 = arith.select %61, %56, %64 : vector<252x128xi1>, vector<252x128xf32>
    %c2_42 = arith.constant 2 : index
    %c0_43 = arith.constant 0 : index
    %66 = vector.load %arg12[%c2_42, %c0_43] : memref<256x128xf32, #tpu.memory_space<vmem>>, vector<252x128xf32>
    tpu.vector_store %arg12[%c2_42, %c0_43], %65 {strides = array<i32>} : memref<256x128xf32, #tpu.memory_space<vmem>>, vector<252x128xf32>,
    %c0_44 = arith.constant 0 : index
    %c0_45 = arith.constant 0 : index
    %67 = vector.load %arg12[%c0_44, %c0_45] : memref<256x128xf32, #tpu.memory_space<vmem>>, vector<254x128xf32>
    %c1_46 = arith.constant 1 : index
    %c0_47 = arith.constant 0 : index
    %68 = vector.load %arg12[%c1_46, %c0_47] : memref<256x128xf32, #tpu.memory_space<vmem>>, vector<254x128xf32>
    %c2_48 = arith.constant 2 : index
    %c0_49 = arith.constant 0 : index
    %69 = vector.load %arg12[%c2_48, %c0_49] : memref<256x128xf32, #tpu.memory_space<vmem>>, vector<254x128xf32>
    %70 = tpu.concatenate %67, %68, %69 in 1 : vector<254x128xf32>, vector<254x128xf32>, vector<254x128xf32> -> vector<254x384xf32>
    %71 = arith.truncf %70 : vector<254x384xf32> to vector<254x384xbf16>
    %c1_50 = arith.constant 1 : index
    %c0_51 = arith.constant 0 : index
    %c0_52 = arith.constant 0 : index
    %72 = vector.load %arg5[%c1_50, %c0_51, %c0_52] : memref<2x384x128xbf16, #tpu.memory_space<vmem>>, vector<1x384x128xbf16>
    %73 = vector.shape_cast %72 : vector<1x384x128xbf16> to vector<384x128xbf16>
    %cst_53 = arith.constant dense<0.000000e+00> : vector<254x128xf32>
    %74 = tpu.matmul %71, %73, %cst_53 {dimension_numbers = #tpu.dot_dimension_numbers<[1], [0], [0], [1], [0, 0, 1, 1], [], []>} : vector<254x384xbf16>, vector<384x128xbf16>, vector<254x128xf32> -> vector<254x128xf32>
    %c1_54 = arith.constant 1 : index
    %c128_55 = arith.constant 128 : index
    %75 = vector.load %arg8[%c1_54, %c128_55] : memref<4x256xf32, #tpu.memory_space<vmem>>, vector<1x128xf32>
    %76 = vector.broadcast %75 : vector<1x128xf32> to vector<254x128xf32>
    %77 = arith.addf %74, %76 : vector<254x128xf32>
    %c0_56 = arith.constant 0 : index
    %c0_57 = arith.constant 0 : index
    %78 = vector.load %arg13[%c0_56, %c0_57] : memref<256x128xf32, #tpu.memory_space<vmem>>, vector<8x128xf32>
    tpu.vector_store %arg13[%c0_56, %c0_57], %57 {strides = array<i32>} : memref<256x128xf32, #tpu.memory_space<vmem>>, vector<8x128xf32>,
    %c248_58 = arith.constant 248 : index
    %c0_59 = arith.constant 0 : index
    %79 = vector.load %arg13[%c248_58, %c0_59] : memref<256x128xf32, #tpu.memory_space<vmem>>, vector<8x128xf32>
    tpu.vector_store %arg13[%c248_58, %c0_59], %57 {strides = array<i32>} : memref<256x128xf32, #tpu.memory_space<vmem>>, vector<8x128xf32>,
    %cst_60 = arith.constant 0.000000e+00 : f32
    %80 = vector.broadcast %cst_60 : f32 to vector<254x128xf32>
    %81 = arith.cmpf ogt, %77, %80 : vector<254x128xf32>
    %82 = math.exp %77 : vector<254x128xf32>
    %cst_61 = arith.constant 1.000000e+00 : f32
    %83 = vector.broadcast %cst_61 : f32 to vector<254x128xf32>
    %84 = arith.subf %82, %83 : vector<254x128xf32>
    %85 = arith.select %81, %77, %84 : vector<254x128xi1>, vector<254x128xf32>
    %c1_62 = arith.constant 1 : index
    %c0_63 = arith.constant 0 : index
    %86 = vector.load %arg13[%c1_62, %c0_63] : memref<256x128xf32, #tpu.memory_space<vmem>>, vector<254x128xf32>
    tpu.vector_store %arg13[%c1_62, %c0_63], %85 {strides = array<i32>} : memref<256x128xf32, #tpu.memory_space<vmem>>, vector<254x128xf32>,
    %c0_64 = arith.constant 0 : index
    %c0_65 = arith.constant 0 : index
    %87 = vector.load %arg13[%c0_64, %c0_65] : memref<256x128xf32, #tpu.memory_space<vmem>>, vector<255x128xf32>
    %c1_66 = arith.constant 1 : index
    %c0_67 = arith.constant 0 : index
    %88 = vector.load %arg13[%c1_66, %c0_67] : memref<256x128xf32, #tpu.memory_space<vmem>>, vector<255x128xf32>
    %89 = tpu.concatenate %87, %88 in 1 : vector<255x128xf32>, vector<255x128xf32> -> vector<255x256xf32>
    %90 = arith.truncf %89 : vector<255x256xf32> to vector<255x256xbf16>
    %c0_68 = arith.constant 0 : index
    %c0_69 = arith.constant 0 : index
    %91 = vector.load %arg6[%c0_68, %c0_69] : memref<256x256xbf16, #tpu.memory_space<vmem>>, vector<256x256xbf16>
    %cst_70 = arith.constant dense<0.000000e+00> : vector<255x256xf32>
    %92 = tpu.matmul %90, %91, %cst_70 {dimension_numbers = #tpu.dot_dimension_numbers<[1], [0], [0], [1], [0, 0, 1, 1], [], []>} : vector<255x256xbf16>, vector<256x256xbf16>, vector<255x256xf32> -> vector<255x256xf32>
    %c2_71 = arith.constant 2 : index
    %c0_72 = arith.constant 0 : index
    %93 = vector.load %arg8[%c2_71, %c0_72] : memref<4x256xf32, #tpu.memory_space<vmem>>, vector<1x256xf32>
    %94 = vector.broadcast %93 : vector<1x256xf32> to vector<255x256xf32>
    %95 = arith.addf %92, %94 : vector<255x256xf32>
    %cst_73 = arith.constant 0.000000e+00 : f32
    %96 = vector.broadcast %cst_73 : f32 to vector<255x256xf32>
    %97 = arith.cmpf ogt, %95, %96 : vector<255x256xf32>
    %98 = math.exp %95 : vector<255x256xf32>
    %cst_74 = arith.constant 1.000000e+00 : f32
    %99 = vector.broadcast %cst_74 : f32 to vector<255x256xf32>
    %100 = arith.subf %98, %99 : vector<255x256xf32>
    %101 = arith.select %97, %95, %100 : vector<255x256xi1>, vector<255x256xf32>
    %102 = arith.truncf %101 : vector<255x256xf32> to vector<255x256xbf16>
    %c0_75 = arith.constant 0 : index
    %c0_76 = arith.constant 0 : index
    %103 = vector.load %arg7[%c0_75, %c0_76] : memref<256x8xbf16, #tpu.memory_space<vmem>>, vector<256x8xbf16>
    %cst_77 = arith.constant dense<0.000000e+00> : vector<255x8xf32>
    %104 = tpu.matmul %102, %103, %cst_77 {dimension_numbers = #tpu.dot_dimension_numbers<[1], [0], [0], [1], [0, 0, 1, 1], [], []>} : vector<255x256xbf16>, vector<256x8xbf16>, vector<255x8xf32> -> vector<255x8xf32>
    %105 = vector.extract_strided_slice %104 {offsets = [63, 0], sizes = [128, 4], strides = [1, 1]} : vector<255x8xf32> to vector<128x4xf32>
    %106 = vector.extract_strided_slice %104 {offsets = [64, 4], sizes = [128, 4], strides = [1, 1]} : vector<255x8xf32> to vector<128x4xf32>
    %107 = arith.addf %105, %106 : vector<128x4xf32>
    %c3 = arith.constant 3 : index
    %c0_78 = arith.constant 0 : index
    %108 = vector.load %arg8[%c3, %c0_78] : memref<4x256xf32, #tpu.memory_space<vmem>>, vector<1x4xf32>
    %109 = vector.broadcast %108 : vector<1x4xf32> to vector<128x4xf32>
    %110 = arith.addf %107, %109 : vector<128x4xf32>
    %c0_79 = arith.constant 0 : index
    %c0_80 = arith.constant 0 : index
    %c0_81 = arith.constant 0 : index
    %111 = vector.load %arg9[%c0_79, %c0_80, %c0_81] : memref<1x128x4xf32, #tpu.memory_space<vmem>>, vector<1x128x4xf32>
    %112 = vector.shape_cast %111 : vector<1x128x4xf32> to vector<128x4xf32>
    %113 = vector.shape_cast %110 : vector<128x4xf32> to vector<1x128x4xf32>
    tpu.vector_store %arg9[%c0_79, %c0_80, %c0_81], %113 {strides = array<i32>} : memref<1x128x4xf32, #tpu.memory_space<vmem>>, vector<1x128x4xf32>,
    return
  }
  func.func @transform_0(%arg0: i32) -> (i32, i32, i32) {
    %c0_i32 = arith.constant 0 : i32
    %c0_i32_0 = arith.constant 0 : i32
    %c0_i32_1 = arith.constant 0 : i32
    return %arg0, %c0_i32, %c0_i32_0 : i32, i32, i32
  }
  func.func @transform_1(%arg0: i32) -> (i32, i32) {
    %c0_i32 = arith.constant 0 : i32
    %c0_i32_0 = arith.constant 0 : i32
    %c0_i32_1 = arith.constant 0 : i32
    return %c0_i32, %c0_i32_0 : i32, i32
  }
  func.func @transform_2(%arg0: i32) -> (i32, i32) {
    %c0_i32 = arith.constant 0 : i32
    %c0_i32_0 = arith.constant 0 : i32
    %c0_i32_1 = arith.constant 0 : i32
    return %c0_i32, %c0_i32_0 : i32, i32
  }
  func.func @transform_3(%arg0: i32) -> (i32, i32) {
    %c0_i32 = arith.constant 0 : i32
    %c0_i32_0 = arith.constant 0 : i32
    %c0_i32_1 = arith.constant 0 : i32
    return %c0_i32, %c0_i32_0 : i32, i32
  }
  func.func @transform_4(%arg0: i32) -> (i32, i32, i32) {
    %c0_i32 = arith.constant 0 : i32
    %c0_i32_0 = arith.constant 0 : i32
    %c0_i32_1 = arith.constant 0 : i32
    %c0_i32_2 = arith.constant 0 : i32
    return %c0_i32, %c0_i32_0, %c0_i32_1 : i32, i32, i32
  }
  func.func @transform_5(%arg0: i32) -> (i32, i32) {
    %c0_i32 = arith.constant 0 : i32
    %c0_i32_0 = arith.constant 0 : i32
    %c0_i32_1 = arith.constant 0 : i32
    return %c0_i32, %c0_i32_0 : i32, i32
  }
  func.func @transform_6(%arg0: i32) -> (i32, i32) {
    %c0_i32 = arith.constant 0 : i32
    %c0_i32_0 = arith.constant 0 : i32
    %c0_i32_1 = arith.constant 0 : i32
    return %c0_i32, %c0_i32_0 : i32, i32
  }
  func.func @transform_7(%arg0: i32) -> (i32, i32) {
    %c0_i32 = arith.constant 0 : i32
    %c0_i32_0 = arith.constant 0 : i32
    %c0_i32_1 = arith.constant 0 : i32
    return %c0_i32, %c0_i32_0 : i32, i32
  }
  func.func @transform_8(%arg0: i32) -> (i32, i32, i32) {
    %c0_i32 = arith.constant 0 : i32
    %c0_i32_0 = arith.constant 0 : i32
    %c0_i32_1 = arith.constant 0 : i32
    return %arg0, %c0_i32, %c0_i32_0 : i32, i32, i32
  }
}

</mosaic_0001>

<bundles_post_ra>
// kernel: tile.8
= control target key start
LH: loop header
LB: loop body
LE: loop exit
PB: predicated region body
PF: predicated region fallthrough
CT: control target
= control target key end

     0   :  { %s22_s0 = inlined_call_operand.vmem [shape: f32[128], index: 0, kind: input, shape index: {}]   ;;  %s23_s1 = inlined_call_operand.vmem [shape: f32[4,128], index: 1, kind: output, shape index: {}]  }
   0x1   :  { %v4_v0 = vld [vmem:[%s22_s0] ss:$0 sm:$0xff] }
   0x2   :  { %5 = vst [vmem:[%s23_s1] sm:$0xf] %v4_v0 }

// kernel: denoise_forward.1
= control target key start
LH: loop header
LB: loop body
LE: loop exit
PB: predicated region body
PF: predicated region fallthrough
CT: control target
= control target key end

     0   :  { %s7741_s27 = smov 0   ;;  %s11345_s0 = inlined_call_operand.vmem [shape: f32[2,256,12], index: 0, kind: input, shape index: {}]   ;;  %s11346_s1 = inlined_call_operand.vmem [shape: f32[12,512], index: 1, kind: input, shape index: {}]   ;;  %s11347_s2 = inlined_call_operand.vmem [shape: f32[1,512], index: 2, kind: input, shape index: {}]   ;;  %s11348_s3 = inlined_call_operand.vmem [shape: bf16[512,256], index: 3, kind: input, shape index: {}]   ;;  %s11349_s4 = inlined_call_operand.vmem [shape: bf16[2,384,128], index: 4, kind: input, shape index: {}]   ;;  %s11350_s5 = inlined_call_operand.vmem [shape: bf16[256,256], index: 5, kind: input, shape index: {}]   ;;  %s11351_s6 = inlined_call_operand.vmem [shape: bf16[256,8], index: 6, kind: input, shape index: {}]   ;;  %s11352_s7 = inlined_call_operand.vmem [shape: f32[4,256], index: 7, kind: input, shape index: {}]   ;;  %s11353_s8 = inlined_call_operand.vmem [shape: f32[2,128,4], index: 8, kind: output, shape index: {}]  }
   0x1 LB: > { %s5881_s28 = sadd.s32 4294967295, %s7691_s27   ;;  %p5885_p0 = scmp.ge.s32.totalorder %s7691_s27, 1  ;;  %s7691_s27 = sphi %s7741_s27, %s18_s27  }
   0x2   : > { %p262_p1 = scmp.lt.s32.totalorder %s7691_s27, 3 }
   0x4   : > { %p263_p2 = pnand %p5885_p0, %p262_p1 }
   0x6   : > { %266 = sbr.rel (%p263_p2) target bundleno = 1970 (0x7b2), region = 52 }
   0xd   : > { %v340_v0 = vld [vmem:[%s11346_s1 + $0x8] sm:$0xff]  ;;  %vm466_vm0 = vcmask 1043456   ;;  %v342_v2 = vld [vmem:[%s11346_s1 + $0x18] sm:$0xff]  ;;  %vm7693_vm1 = vmmov 1   ;;  %v339_v6 = vld [vmem:[%s11346_s1] sm:$0xff]  ;;  %p7768_p3 = scmp.lt.s32.totalorder %s5881_s28, 1 }
   0xe   : > { %v344_v1 = vld [vmem:[%s11346_s1 + $0x28] sm:$0xf]  ;;  %vm7758_vm2 = vmpackc.low %vm466_vm0, %vm7693_vm1  ;;  %v346_v5 = vld [vmem:[%s11346_s1 + $0x38] sm:$0xf]  ;;  %v7694_v11 = vmov 0.0   ;;  %vm369_vm3 = vcmask 97280  }
   0xf   : > { %v6878_v3 = vpack.c.bf16 %v344_v1, %v340_v0  ;;  %v6884_v7 = vpack.c.bf16 %v346_v5, %v342_v2  ;;  %v343_v8 = vld [vmem:[%s11346_s1 + $0x20] sm:$0xf]  ;;  %v341_v9 = vld [vmem:[%s11346_s1 + $0x10] sm:$0xff]  ;;  %543 = vmatprep.mubr.f32.mxu0 %v7694_v11  ;;  %3497 = vst [vmem:[#allocation4] sm:$0xff] %v7694_v11  ;;  %3498 = vst [vmem:[#allocation4 + $0xf8] sm:$0xff] %v7694_v11  ;;  %800 = vmatprep.mubr.f32.mxu1 %v7694_v11  ;;  %s11623_s28 = smov (!%p7768_p3, %s5881_s28), 1 }
  0x10   : > { %v345_v10 = vld [vmem:[%s11346_s1 + $0x30] sm:$0xf]  ;;  %4355 = vst [vmem:[#allocation5] sm:$0xff] %v7694_v11  ;;  %4356 = vst [vmem:[#allocation5 + $0xf8] sm:$0xff] %v7694_v11  ;;  %v6881_v12 = vpack.c.bf16 %v343_v8, %v339_v6  ;;  %v7031_v14 = vld [vmem:[%s11348_s3 + $0x4] ss:$8 sps:$4 sm:$0xff]  }
  0x11   : > { %6880 = vmatprep.subr.msk.bf16.mxu0 %vm7758_vm2, %v6878_v3  ;;  %v6887_v13 = vpack.c.bf16 %v345_v10, %v341_v9  ;;  %6886 = vmatprep.subr.msk.bf16.mxu1 %vm7758_vm2, %v6884_v7  ;;  %s6396_s26 = sshll.u32 %s11623_s28, 8  ;;  %v7029_v15 = vld [vmem:[%s11348_s3] ss:$8 sps:$4 sm:$0xff]   ;;  %v7034_v17 = vld [vmem:[%s11348_s3 + $0x14] ss:$8 sps:$4 sm:$0xff]   ;;  %vm1573_vm1 = vcmask 1046528  }
  0x12   : > { %6883 = vmatpush1.bf16.msk.msra.mxu0 %vm7758_vm2, %v6881_v12  ;;  %s7806_s9 = scalar_lea.vmem %s11345_s0, %s6396_s26  ;;  %v7032_v19 = vld [vmem:[%s11348_s3 + $0x10] ss:$8 sps:$4 sm:$0xff]   ;;  %v7037_v20 = vld [vmem:[%s11348_s3 + $0x24] ss:$8 sps:$4 sm:$0xff]   ;;  %v7035_v22 = vld [vmem:[%s11348_s3 + $0x20] ss:$8 sps:$4 sm:$0xff]  }
  0x13   : > { %6889 = vmatpush1.bf16.msk.msra.mxu1 %vm7758_vm2, %v6887_v13  ;;  %2224 = vmatprep.subr.bf16.mxu0 %v7031_v14  ;;  %v307_v16 = vld [vmem:[%s7806_s9] sm:$0xff]  ;;  %v308_v18 = vld [vmem:[%s7806_s9 + $0x8] sm:$0xff]  ;;  %v309_v21 = vld [vmem:[%s7806_s9 + $0x10] sm:$0xff]  ;;  %s7695_s20 = smov 124   ;;  %s6397_s21 = sshll.u32 %s11623_s28, 7 }
  0x14   : > { %v310_v23 = vld [vmem:[%s7806_s9 + $0x18] sm:$0xff]  ;;  %v311_v26 = vld [vmem:[%s7806_s9 + $0x20] sm:$0xff]  ;;  %v312_v29 = vld [vmem:[%s7806_s9 + $0x28] sm:$0xff]  ;;  %s11275_s26 = scalar_lea.vmem %s11353_s8, %s6397_s21 }
  0x15   : > { %5892 = vmatmul.mubr.msk.f32.vlgmr.msra.gmra.mrb[0].mxu0 %vm369_vm3, %v307_v16  ;;  %v7040_v24 = vld [vmem:[%s11348_s3 + $0x34] ss:$8 sps:$4 sm:$0xff]   ;;  %v7038_v25 = vld [vmem:[%s11348_s3 + $0x30] ss:$8 sps:$4 sm:$0xff]   ;;  %v7043_v27 = vld [vmem:[%s11348_s3 + $0x44] ss:$8 sps:$4 sm:$0xff]  }
  0x16   : > { %5926 = vmatmul.mubr.msk.f32.vlgmr.msra.gmra.mrb[0].mxu1 %vm369_vm3, %v307_v16  ;;  %549 = vmatprep.mubr.f32.mxu0 %v7694_v11  ;;  %v7041_v28 = vld [vmem:[%s11348_s3 + $0x40] ss:$8 sps:$4 sm:$0xff]   ;;  %v7046_v30 = vld [vmem:[%s11348_s3 + $0x54] ss:$8 sps:$4 sm:$0xff]   ;;  %v7044_v31 = vld [vmem:[%s11348_s3 + $0x50] ss:$8 sps:$4 sm:$0xff]   ;;  %v349_v16 = vlaneseq }
  0x17   : > { %806 = vmatprep.mubr.f32.mxu1 %v7694_v11  ;;  %2225 = vmatpush1.bf16.msra.mxu0 %v7029_v15  ;;  %v313_v32 = vld [vmem:[%s7806_s9 + $0x30] sm:$0xff]  ;;  %v7047_v33 = vld [vmem:[%s11348_s3 + $0x60] ss:$8 sps:$4 sm:$0xff]   ;;  %v7049_v34 = vld [vmem:[%s11348_s3 + $0x64] ss:$8 sps:$4 sm:$0xff]  }
  0x18   : > { %2226 = vmatprep.subr.bf16.mxu0 %v7034_v17  ;;  %v314_v35 = vld [vmem:[%s7806_s9 + $0x38] sm:$0xff]  ;;  %v315_v38 = vld [vmem:[%s7806_s9 + $0x40] sm:$0xff]  ;;  %v316_v41 = vld [vmem:[%s7806_s9 + $0x48] sm:$0xff]  ;;  %v350_v17 = vshrl.u32 %v349_v16, 7 }
  0x19   : > { %5893 = vmatmul.mubr.msk.f32.gmra.mrb[2].mxu0 %vm369_vm3, %v308_v18  ;;  %v7052_v36 = vld [vmem:[%s11348_s3 + $0x74] ss:$8 sps:$4 sm:$0xff]   ;;  %v7050_v37 = vld [vmem:[%s11348_s3 + $0x70] ss:$8 sps:$4 sm:$0xff]   ;;  %v7055_v39 = vld [vmem:[%s11348_s3 + $0x84] ss:$8 sps:$4 sm:$0xff]  }
  0x1a   : > { %5927 = vmatmul.mubr.msk.f32.gmra.mrb[2].mxu1 %vm369_vm3, %v308_v18  ;;  %555 = vmatprep.mubr.f32.mxu0 %v7694_v11  ;;  %v7053_v40 = vld [vmem:[%s11348_s3 + $0x80] ss:$8 sps:$4 sm:$0xff]   ;;  %v7058_v42 = vld [vmem:[%s11348_s3 + $0x94] ss:$8 sps:$4 sm:$0xff]   ;;  %v7056_v43 = vld [vmem:[%s11348_s3 + $0x90] ss:$8 sps:$4 sm:$0xff]  }
  0x1b   : > { %812 = vmatprep.mubr.f32.mxu1 %v7694_v11  ;;  %2227 = vmatpush1.bf16.msra.mxu0 %v7032_v19  ;;  %v317_v44 = vld [vmem:[%s7806_s9 + $0x50] sm:$0xff]  ;;  %v7061_v45 = vld [vmem:[%s11348_s3 + $0xa4] ss:$8 sps:$4 sm:$0xff]   ;;  %v7059_v46 = vld [vmem:[%s11348_s3 + $0xa0] ss:$8 sps:$4 sm:$0xff]   ;;  %v8062_v18 = vsub.s32 0, %v350_v17 }
  0x1c   : > { %2228 = vmatprep.subr.bf16.mxu0 %v7037_v20  ;;  %v318_v47 = vld [vmem:[%s7806_s9 + $0x58] sm:$0xff]  ;;  %v319_v50 = vld [vmem:[%s7806_s9 + $0x60] sm:$0xff]  ;;  %v320_v51 = vld [vmem:[%s7806_s9 + $0x68] sm:$0xff]  ;;  %v359_v19 = vsub.s32 2, %v350_v17 }
  0x1d   : > { %5894 = vmatmul.mubr.msk.f32.gmra.mrb[4].mxu0 %vm369_vm3, %v309_v21  ;;  %v7064_v48 = vld [vmem:[%s11348_s3 + $0xb4] ss:$8 sps:$4 sm:$0xff]   ;;  %v7062_v49 = vld [vmem:[%s11348_s3 + $0xb0] ss:$8 sps:$4 sm:$0xff]   ;;  %v323_v54 = vld [vmem:[%s7806_s9 + $0x80] sm:$0xff]  ;;  %11416 = vst [vmem:[#allocation6_spill] sm:$0xff] %v8062_v18 }
  0x1e   : > { %5928 = vmatmul.mubr.msk.f32.gmra.mrb[4].mxu1 %vm369_vm3, %v309_v21  ;;  %561 = vmatprep.mubr.f32.mxu0 %v7694_v11  ;;  %v321_v52 = vld [vmem:[%s7806_s9 + $0x70] sm:$0xff]  ;;  %v322_v53 = vld [vmem:[%s7806_s9 + $0x78] sm:$0xff]  ;;  %v324_v55 = vld [vmem:[%s7806_s9 + $0x88] sm:$0xff]  ;;  %v363_v21 = vsub.s32 3, %v350_v17 }
  0x1f   : > { %818 = vmatprep.mubr.f32.mxu1 %v7694_v11  ;;  %2229 = vmatpush1.bf16.msra.mxu0 %v7035_v22  ;;  %v325_v56 = vld [vmem:[%s7806_s9 + $0x90] sm:$0xff]  ;;  %v326_v57 = vld [vmem:[%s7806_s9 + $0x98] sm:$0xff]  ;;  %v327_v58 = vld [vmem:[%s7806_s9 + $0xa0] sm:$0xff] }
  0x20   : > { %2230 = vmatprep.subr.bf16.mxu0 %v7040_v24  ;;  %v328_v59 = vld [vmem:[%s7806_s9 + $0xa8] sm:$0xff]  ;;  %v329_v60 = vld [vmem:[%s7806_s9 + $0xb0] sm:$0xff]  ;;  %v330_v61 = vld [vmem:[%s7806_s9 + $0xb8] sm:$0xff] }
  0x21   : > { %5895 = vmatmul.mubr.msk.f32.gmra.mrb[6].mxu0 %vm369_vm3, %v310_v23  ;;  %v331_v62 = vld [vmem:[%s7806_s9 + $0xc0] sm:$0xff]  ;;  %v332_v1 = vld [vmem:[%s7806_s9 + $0xc8] sm:$0xff]  ;;  %v7070_v2 = vld [vmem:[%s11348_s3 + $0xd4] ss:$8 sps:$4 sm:$0xff]  }
  0x22   : > { %5929 = vmatmul.mubr.msk.f32.gmra.mrb[6].mxu1 %vm369_vm3, %v310_v23  ;;  %567 = vmatprep.mubr.f32.mxu0 %v7694_v11  ;;  %v7067_v63 = vld [vmem:[%s11348_s3 + $0xc4] ss:$8 sps:$4 sm:$0xff]   ;;  %v7065_v0 = vld [vmem:[%s11348_s3 + $0xc0] ss:$8 sps:$4 sm:$0xff]   ;;  %v333_v3 = vld [vmem:[%s7806_s9 + $0xd0] sm:$0xff] }
  0x23   : > { %824 = vmatprep.mubr.f32.mxu1 %v7694_v11  ;;  %2231 = vmatpush1.bf16.msra.mxu0 %v7038_v25  ;;  %v7068_v4 = vld [vmem:[%s11348_s3 + $0xd0] ss:$8 sps:$4 sm:$0xff]   ;;  %v7073_v5 = vld [vmem:[%s11348_s3 + $0xe4] ss:$8 sps:$4 sm:$0xff]   ;;  %v7071_v7 = vld [vmem:[%s11348_s3 + $0xe0] ss:$8 sps:$4 sm:$0xff]  }
  0x24   : > { %2232 = vmatprep.subr.bf16.mxu0 %v7043_v27  ;;  %v334_v6 = vld [vmem:[%s7806_s9 + $0xd8] sm:$0xff]  ;;  %v335_v8 = vld [vmem:[%s7806_s9 + $0xe0] sm:$0xff]  ;;  %v336_v12 = vld [vmem:[%s7806_s9 + $0xe8] sm:$0xff] }
  0x25   : > { %5896 = vmatmul.mubr.msk.f32.gmra.mrb[8].mxu0 %vm369_vm3, %v311_v26  ;;  %v7076_v9 = vld [vmem:[%s11348_s3 + $0xf4] ss:$8 sps:$4 sm:$0xff]   ;;  %v7074_v10 = vld [vmem:[%s11348_s3 + $0xf0] ss:$8 sps:$4 sm:$0xff]   ;;  %v7079_v15 = vld [vmem:[%s11348_s3 + $0x104] ss:$8 sps:$4 sm:$0xff]  }
  0x26   : > { %5930 = vmatmul.mubr.msk.f32.gmra.mrb[8].mxu1 %vm369_vm3, %v311_v26  ;;  %573 = vmatprep.mubr.f32.mxu0 %v7694_v11  ;;  %v337_v13 = vld [vmem:[%s7806_s9 + $0xf0] sm:$0xff]  ;;  %v338_v14 = vld [vmem:[%s7806_s9 + $0xf8] sm:$0xff]  ;;  %v347_v20 = vld [vmem:[%s11347_s2] sm:$0xf] }
  0x27   : > { %830 = vmatprep.mubr.f32.mxu1 %v7694_v11  ;;  %2233 = vmatpush1.bf16.msra.mxu0 %v7041_v28  ;;  %v8070_v22 = vrot.slane %v347_v20, %v8062_v18  ;;  %v8072_v23 = vrot.slane %v347_v20, %v359_v19  ;;  %v8077_v25 = vrot.slane %v347_v20, %v363_v21 }
  0x28   : > { %2234 = vmatprep.subr.bf16.mxu0 %v7046_v30 }
  0x29   : > { %5897 = vmatmul.mubr.msk.f32.gmra.mrb[10].mxu0 %vm369_vm3, %v312_v29 }
  0x2a   : > { %5931 = vmatmul.mubr.msk.f32.gmra.mrb[10].mxu1 %vm369_vm3, %v312_v29  ;;  %579 = vmatprep.mubr.f32.mxu0 %v7694_v11 }
  0x2b   : > { %836 = vmatprep.mubr.f32.mxu1 %v7694_v11  ;;  %2235 = vmatpush1.bf16.msra.mxu0 %v7044_v31 }
  0x2c   : > { %2236 = vmatprep.subr.bf16.mxu0 %v7049_v34 }
  0x2d   : > { %5898 = vmatmul.mubr.msk.f32.gmra.mrb[12].mxu0 %vm369_vm3, %v313_v32 }
  0x2e   : > { %5932 = vmatmul.mubr.msk.f32.gmra.mrb[12].mxu1 %vm369_vm3, %v313_v32  ;;  %585 = vmatprep.mubr.f32.mxu0 %v7694_v11 }
  0x2f   : > { %842 = vmatprep.mubr.f32.mxu1 %v7694_v11  ;;  %2237 = vmatpush1.bf16.msra.mxu0 %v7047_v33 }
  0x30   : > { %2238 = vmatprep.subr.bf16.mxu0 %v7052_v36 }
  0x31   : > { %5899 = vmatmul.mubr.msk.f32.gmra.mrb[14].mxu0 %vm369_vm3, %v314_v35 }
  0x32   : > { %5933 = vmatmul.mubr.msk.f32.gmra.mrb[14].mxu1 %vm369_vm3, %v314_v35  ;;  %591 = vmatprep.mubr.f32.mxu0 %v7694_v11 }
  0x33   : > { %848 = vmatprep.mubr.f32.mxu1 %v7694_v11  ;;  %2239 = vmatpush1.bf16.msra.mxu0 %v7050_v37 }
  0x34   : > { %2240 = vmatprep.subr.bf16.mxu0 %v7055_v39 }
  0x35   : > { %5900 = vmatmul.mubr.msk.f32.gmra.mrb[16].mxu0 %vm369_vm3, %v315_v38 }
  0x36   : > { %5934 = vmatmul.mubr.msk.f32.gmra.mrb[16].mxu1 %vm369_vm3, %v315_v38  ;;  %597 = vmatprep.mubr.f32.mxu0 %v7694_v11 }
  0x37   : > { %854 = vmatprep.mubr.f32.mxu1 %v7694_v11  ;;  %2241 = vmatpush1.bf16.msra.mxu0 %v7053_v40 }
  0x38   : > { %2242 = vmatprep.subr.bf16.mxu0 %v7058_v42 }
  0x39   : > { %5901 = vmatmul.mubr.msk.f32.gmra.mrb[18].mxu0 %vm369_vm3, %v316_v41 }
  0x3a   : > { %5935 = vmatmul.mubr.msk.f32.gmra.mrb[18].mxu1 %vm369_vm3, %v316_v41  ;;  %603 = vmatprep.mubr.f32.mxu0 %v7694_v11 }
  0x3b   : > { %860 = vmatprep.mubr.f32.mxu1 %v7694_v11  ;;  %2243 = vmatpush1.bf16.msra.mxu0 %v7056_v43 }
  0x3c   : > { %2244 = vmatprep.subr.bf16.mxu0 %v7061_v45 }
  0x3d   : > { %5902 = vmatmul.mubr.msk.f32.gmra.mrb[20].mxu0 %vm369_vm3, %v317_v44 }
  0x3e   : > { %5936 = vmatmul.mubr.msk.f32.gmra.mrb[20].mxu1 %vm369_vm3, %v317_v44  ;;  %609 = vmatprep.mubr.f32.mxu0 %v7694_v11 }
  0x3f   : > { %866 = vmatprep.mubr.f32.mxu1 %v7694_v11  ;;  %2245 = vmatpush1.bf16.msra.mxu0 %v7059_v46 }
  0x40   : > { %2246 = vmatprep.subr.bf16.mxu0 %v7064_v48 }
  0x41   : > { %5903 = vmatmul.mubr.msk.f32.gmra.mrb[22].mxu0 %vm369_vm3, %v318_v47 }
  0x42   : > { %5937 = vmatmul.mubr.msk.f32.gmra.mrb[22].mxu1 %vm369_vm3, %v318_v47  ;;  %615 = vmatprep.mubr.f32.mxu0 %v7694_v11 }
  0x43   : > { %872 = vmatprep.mubr.f32.mxu1 %v7694_v11  ;;  %2247 = vmatpush1.bf16.msra.mxu0 %v7062_v49 }
  0x44   : > { %2248 = vmatprep.subr.bf16.mxu0 %v7067_v63 }
  0x45   : > { %5904 = vmatmul.mubr.msk.f32.gmra.mrb[24].mxu0 %vm369_vm3, %v319_v50 }
  0x46   : > { %5938 = vmatmul.mubr.msk.f32.gmra.mrb[24].mxu1 %vm369_vm3, %v319_v50  ;;  %621 = vmatprep.mubr.f32.mxu0 %v7694_v11 }
  0x47   : > { %878 = vmatprep.mubr.f32.mxu1 %v7694_v11  ;;  %2249 = vmatpush1.bf16.msra.mxu0 %v7065_v0 }
  0x48   : > { %2250 = vmatprep.subr.bf16.mxu0 %v7070_v2 }
  0x49   : > { %5905 = vmatmul.mubr.msk.f32.gmra.mrb[26].mxu0 %vm369_vm3, %v320_v51 }
  0x4a   : > { %5939 = vmatmul.mubr.msk.f32.gmra.mrb[26].mxu1 %vm369_vm3, %v320_v51  ;;  %627 = vmatprep.mubr.f32.mxu0 %v7694_v11 }
  0x4b   : > { %884 = vmatprep.mubr.f32.mxu1 %v7694_v11  ;;  %2251 = vmatpush1.bf16.msra.mxu0 %v7068_v4 }
  0x4c   : > { %2252 = vmatprep.subr.bf16.mxu0 %v7073_v5 }
  0x4d   : > { %5906 = vmatmul.mubr.msk.f32.gmra.mrb[28].mxu0 %vm369_vm3, %v321_v52 }
  0x4e   : > { %5940 = vmatmul.mubr.msk.f32.gmra.mrb[28].mxu1 %vm369_vm3, %v321_v52  ;;  %633 = vmatprep.mubr.f32.mxu0 %v7694_v11 }
  0x4f   : > { %890 = vmatprep.mubr.f32.mxu1 %v7694_v11  ;;  %2253 = vmatpush1.bf16.msra.mxu0 %v7071_v7 }
  0x50   : > { %2254 = vmatprep.subr.bf16.mxu0 %v7076_v9 }
  0x51   : > { %5907 = vmatmul.mubr.msk.f32.gmra.mrb[30].mxu0 %vm369_vm3, %v322_v53 }
  0x52   : > { %5941 = vmatmul.mubr.msk.f32.gmra.mrb[30].mxu1 %vm369_vm3, %v322_v53  ;;  %639 = vmatprep.mubr.f32.mxu0 %v7694_v11 }
  0x53   : > { %896 = vmatprep.mubr.f32.mxu1 %v7694_v11  ;;  %2255 = vmatpush1.bf16.msra.mxu0 %v7074_v10 }
  0x54   : > { %2417 = vmatprep.subr.bf16.mxu0 %v7079_v15 }
  0x55   : > { %5908 = vmatmul.mubr.msk.f32.gmra.mrb[32].mxu0 %vm369_vm3, %v323_v54 }
  0x56   : > { %5942 = vmatmul.mubr.msk.f32.gmra.mrb[32].mxu1 %vm369_vm3, %v323_v54  ;;  %645 = vmatprep.mubr.f32.mxu0 %v7694_v11 }
  0x57   : > { %902 = vmatprep.mubr.f32.mxu1 %v7694_v11 }
  0x59   : > { %5909 = vmatmul.mubr.msk.f32.gmra.mrb[34].mxu0 %vm369_vm3, %v324_v55 }
  0x5a   : > { %5943 = vmatmul.mubr.msk.f32.gmra.mrb[34].mxu1 %vm369_vm3, %v324_v55  ;;  %651 = vmatprep.mubr.f32.mxu0 %v7694_v11 }
  0x5b   : > { %908 = vmatprep.mubr.f32.mxu1 %v7694_v11 }
  0x5d   : > { %5910 = vmatmul.mubr.msk.f32.gmra.mrb[36].mxu0 %vm369_vm3, %v325_v56 }
  0x5e   : > { %5944 = vmatmul.mubr.msk.f32.gmra.mrb[36].mxu1 %vm369_vm3, %v325_v56  ;;  %657 = vmatprep.mubr.f32.mxu0 %v7694_v11 }
  0x5f   : > { %914 = vmatprep.mubr.f32.mxu1 %v7694_v11 }
  0x61   : > { %5911 = vmatmul.mubr.msk.f32.gmra.mrb[38].mxu0 %vm369_vm3, %v326_v57 }
  0x62   : > { %5945 = vmatmul.mubr.msk.f32.gmra.mrb[38].mxu1 %vm369_vm3, %v326_v57  ;;  %663 = vmatprep.mubr.f32.mxu0 %v7694_v11 }
  0x63   : > { %920 = vmatprep.mubr.f32.mxu1 %v7694_v11 }
  0x65   : > { %5912 = vmatmul.mubr.msk.f32.gmra.mrb[40].mxu0 %vm369_vm3, %v327_v58 }
  0x66   : > { %5946 = vmatmul.mubr.msk.f32.gmra.mrb[40].mxu1 %vm369_vm3, %v327_v58  ;;  %669 = vmatprep.mubr.f32.mxu0 %v7694_v11 }
  0x67   : > { %926 = vmatprep.mubr.f32.mxu1 %v7694_v11 }
  0x69   : > { %5913 = vmatmul.mubr.msk.f32.gmra.mrb[42].mxu0 %vm369_vm3, %v328_v59 }
  0x6a   : > { %5947 = vmatmul.mubr.msk.f32.gmra.mrb[42].mxu1 %vm369_vm3, %v328_v59  ;;  %675 = vmatprep.mubr.f32.mxu0 %v7694_v11 }
  0x6b   : > { %932 = vmatprep.mubr.f32.mxu1 %v7694_v11 }
  0x6d   : > { %5914 = vmatmul.mubr.msk.f32.gmra.mrb[44].mxu0 %vm369_vm3, %v329_v60 }
  0x6e   : > { %5948 = vmatmul.mubr.msk.f32.gmra.mrb[44].mxu1 %vm369_vm3, %v329_v60  ;;  %681 = vmatprep.mubr.f32.mxu0 %v7694_v11 }
  0x6f   : > { %938 = vmatprep.mubr.f32.mxu1 %v7694_v11 }
  0x71   : > { %5915 = vmatmul.mubr.msk.f32.gmra.mrb[46].mxu0 %vm369_vm3, %v330_v61 }
  0x72   : > { %5949 = vmatmul.mubr.msk.f32.gmra.mrb[46].mxu1 %vm369_vm3, %v330_v61  ;;  %687 = vmatprep.mubr.f32.mxu0 %v7694_v11 }
  0x73   : > { %944 = vmatprep.mubr.f32.mxu1 %v7694_v11 }
  0x75   : > { %5916 = vmatmul.mubr.msk.f32.gmra.mrb[48].mxu0 %vm369_vm3, %v331_v62 }
  0x76   : > { %5950 = vmatmul.mubr.msk.f32.gmra.mrb[48].mxu1 %vm369_vm3, %v331_v62  ;;  %693 = vmatprep.mubr.f32.mxu0 %v7694_v11 }
  0x77   : > { %950 = vmatprep.mubr.f32.mxu1 %v7694_v11 }
  0x79   : > { %5917 = vmatmul.mubr.msk.f32.gmra.mrb[50].mxu0 %vm369_vm3, %v332_v1 }
  0x7a   : > { %5951 = vmatmul.mubr.msk.f32.gmra.mrb[50].mxu1 %vm369_vm3, %v332_v1  ;;  %699 = vmatprep.mubr.f32.mxu0 %v7694_v11 }
  0x7b   : > { %956 = vmatprep.mubr.f32.mxu1 %v7694_v11 }
  0x7d   : > { %5918 = vmatmul.mubr.msk.f32.gmra.mrb[52].mxu0 %vm369_vm3, %v333_v3 }
  0x7e   : > { %5952 = vmatmul.mubr.msk.f32.gmra.mrb[52].mxu1 %vm369_vm3, %v333_v3  ;;  %705 = vmatprep.mubr.f32.mxu0 %v7694_v11 }
  0x7f   : > { %962 = vmatprep.mubr.f32.mxu1 %v7694_v11 }
  0x81   : > { %5919 = vmatmul.mubr.msk.f32.gmra.mrb[54].mxu0 %vm369_vm3, %v334_v6 }
  0x82   : > { %5953 = vmatmul.mubr.msk.f32.gmra.mrb[54].mxu1 %vm369_vm3, %v334_v6  ;;  %711 = vmatprep.mubr.f32.mxu0 %v7694_v11 }
  0x83   : > { %968 = vmatprep.mubr.f32.mxu1 %v7694_v11 }
  0x85   : > { %5920 = vmatmul.mubr.msk.f32.gmra.mrb[56].mxu0 %vm369_vm3, %v335_v8 }
  0x86   : > { %5954 = vmatmul.mubr.msk.f32.gmra.mrb[56].mxu1 %vm369_vm3, %v335_v8  ;;  %717 = vmatprep.mubr.f32.mxu0 %v7694_v11 }
  0x87   : > { %974 = vmatprep.mubr.f32.mxu1 %v7694_v11 }
  0x89   : > { %5921 = vmatmul.mubr.msk.f32.gmra.mrb[58].mxu0 %vm369_vm3, %v336_v12 }
  0x8a   : > { %5955 = vmatmul.mubr.msk.f32.gmra.mrb[58].mxu1 %vm369_vm3, %v336_v12  ;;  %723 = vmatprep.mubr.f32.mxu0 %v7694_v11 }
  0x8b   : > { %980 = vmatprep.mubr.f32.mxu1 %v7694_v11 }
  0x8d   : > { %5922 = vmatmul.mubr.msk.f32.gmra.mrb[60].mxu0 %vm369_vm3, %v337_v13 }
  0x8e   : > { %5956 = vmatmul.mubr.msk.f32.gmra.mrb[60].mxu1 %vm369_vm3, %v337_v13  ;;  %729 = vmatprep.mubr.f32.mxu0 %v7694_v11 }
  0x8f   : > { %986 = vmatprep.mubr.f32.mxu1 %v7694_v11  ;;  %v8067_v11 = vsub.s32 1, %v350_v17 }
  0x91   : > { %5923 = vmatmul.mubr.msk.f32.gmra.mrb[62].mxu0 %vm369_vm3, %v338_v14  ;;  %11417 = vst [vmem:[#allocation7_spill] sm:$0xff] %v8067_v11  ;;  %v8075_v24 = vrot.slane %v347_v20, %v8067_v11 }
  0x92   : > { %5957 = vmatmul.mubr.msk.f32.gmra.mrb[62].mxu1 %vm369_vm3, %v338_v14 }
  0xe8   : > { %v545_v26 = vpop.f32.mrb[0].mxu0 }
  0xe9   : > { %v802_v27 = vpop.f32.mrb[0].mxu1  ;;  %v546_v28 = vadd.f32 %v545_v26, %v8070_v22  ;;  %v547_v30 = vpop.f32.mrb[1].mxu0 }
  0xea   : > { %v803_v29 = vadd.f32 %v802_v27, %v8072_v23  ;;  %v804_v31 = vpop.f32.mrb[1].mxu1  ;;  %v548_v32 = vadd.f32 %v547_v30, %v8075_v24 }
  0xeb   : > { %v805_v33 = vadd.f32 %v804_v31, %v8077_v25 }
  0xec   : > { %v8083_v34 = vmax.f32 %v546_v28, %v548_v32  ;;  %v551_v36 = vpop.f32.mrb[2].mxu0 }
  0xed   : > { %v8085_v35 = vmax.f32 %v803_v29, %v805_v33  ;;  %v808_v37 = vpop.f32.mrb[2].mxu1  ;;  %v552_v38 = vadd.f32 %v551_v36, %v8070_v22  ;;  %v553_v40 = vpop.f32.mrb[3].mxu0 }
  0xee   : > { %v809_v39 = vadd.f32 %v808_v37, %v8072_v23  ;;  %v810_v41 = vpop.f32.mrb[3].mxu1  ;;  %v1057_v42 = vmul.f32 1.442695, %v8083_v34  ;;  %v554_v44 = vadd.f32 %v553_v40, %v8075_v24  ;;  %vm1025_vm4 = vcmp.gt.f32.partialorder %v8083_v34, 0.0 }
  0xef   : > { %v1281_v43 = vmul.f32 1.442695, %v8085_v35  ;;  %v811_v45 = vadd.f32 %v810_v41, %v8077_v25  ;;  %vm1249_vm5 = vcmp.gt.f32.partialorder %v8085_v35, 0.0 }
  0xf0   : > { %7237 = vpow2.f32 %v1057_v42  ;;  %v557_v46 = vpop.f32.mrb[4].mxu0  ;;  %v8093_v48 = vmax.f32 %v552_v38, %v554_v44 }
  0xf1   : > { %v814_v47 = vpop.f32.mrb[4].mxu1  ;;  %7239 = vpow2.f32 %v1281_v43  ;;  %v8095_v49 = vmax.f32 %v809_v39, %v811_v45  ;;  %v558_v50 = vadd.f32 %v557_v46, %v8070_v22  ;;  %v559_v51 = vpop.f32.mrb[5].mxu0 }
  0xf2   : > { %v816_v52 = vpop.f32.mrb[5].mxu1  ;;  %v815_v53 = vadd.f32 %v814_v47, %v8072_v23  ;;  %v560_v54 = vadd.f32 %v559_v51, %v8075_v24  ;;  %v1059_v56 = vmul.f32 1.442695, %v8093_v48  ;;  %vm1026_vm6 = vcmp.gt.f32.partialorder %v8093_v48, 0.0 }
  0xf3   : > { %v817_v55 = vadd.f32 %v816_v52, %v8077_v25  ;;  %v1283_v57 = vmul.f32 1.442695, %v8095_v49  ;;  %vm1250_vm7 = vcmp.gt.f32.partialorder %v8095_v49, 0.0 }
  0xf4   : > { %v8103_v58 = vmax.f32 %v558_v50, %v560_v54  ;;  %v563_v60 = vpop.f32.mrb[6].mxu0  ;;  %7241 = vpow2.f32 %v1059_v56 }
  0xf5   : > { %v8105_v59 = vmax.f32 %v815_v53, %v817_v55  ;;  %v820_v61 = vpop.f32.mrb[6].mxu1  ;;  %v564_v62 = vadd.f32 %v563_v60, %v8070_v22  ;;  %v565_v0 = vpop.f32.mrb[7].mxu0  ;;  %7243 = vpow2.f32 %v1283_v57 }
  0xf6   : > { %v821_v63 = vadd.f32 %v820_v61, %v8072_v23  ;;  %v822_v1 = vpop.f32.mrb[7].mxu1  ;;  %v1061_v2 = vmul.f32 1.442695, %v8103_v58  ;;  %v566_v4 = vadd.f32 %v565_v0, %v8075_v24  ;;  %vm1027_vm8 = vcmp.gt.f32.partialorder %v8103_v58, 0.0 }
  0xf7   : > { %v1285_v3 = vmul.f32 1.442695, %v8105_v59  ;;  %v823_v5 = vadd.f32 %v822_v1, %v8077_v25  ;;  %vm1251_vm9 = vcmp.gt.f32.partialorder %v8105_v59, 0.0 }
  0xf8   : > { %7245 = vpow2.f32 %v1061_v2  ;;  %v569_v6 = vpop.f32.mrb[8].mxu0  ;;  %v8113_v8 = vmax.f32 %v564_v62, %v566_v4 }
  0xf9   : > { %v826_v7 = vpop.f32.mrb[8].mxu1  ;;  %7247 = vpow2.f32 %v1285_v3  ;;  %v8115_v9 = vmax.f32 %v821_v63, %v823_v5  ;;  %v570_v10 = vadd.f32 %v569_v6, %v8070_v22  ;;  %v571_v12 = vpop.f32.mrb[9].mxu0 }
  0xfa   : > { %v828_v13 = vpop.f32.mrb[9].mxu1  ;;  %v7238_v14 = vpop.eup %7237  ;;  %v827_v15 = vadd.f32 %v826_v7, %v8072_v23  ;;  %v572_v16 = vadd.f32 %v571_v12, %v8075_v24  ;;  %v1063_v21 = vmul.f32 1.442695, %v8113_v8  ;;  %vm1028_vm10 = vcmp.gt.f32.partialorder %v8113_v8, 0.0 }
  0xfb   : > { %v829_v17 = vadd.f32 %v828_v13, %v8077_v25  ;;  %v7240_v19 = vpop.eup %7239  ;;  %v5958_v20 = vadd.f32 -1.0, %v7238_v14  ;;  %v1287_v27 = vmul.f32 1.442695, %v8115_v9  ;;  %vm1252_vm11 = vcmp.gt.f32.partialorder %v8115_v9, 0.0 }
  0xfc   : > { %v5990_v26 = vadd.f32 -1.0, %v7240_v19  ;;  %v8125_v28 = vmax.f32 %v570_v10, %v572_v16  ;;  %v575_v30 = vpop.f32.mrb[10].mxu0  ;;  %7249 = vpow2.f32 %v1063_v21 }
  0xfd   : > { %v8127_v29 = vmax.f32 %v827_v15, %v829_v17  ;;  %v832_v31 = vpop.f32.mrb[10].mxu1  ;;  %v8130_v32 = vsel %vm1025_vm4, %v8083_v34, %v5958_v20  ;;  %v576_v33 = vadd.f32 %v575_v30, %v8070_v22  ;;  %v577_v37 = vpop.f32.mrb[11].mxu0  ;;  %7251 = vpow2.f32 %v1287_v27 }
  0xfe   : > { %v833_v36 = vadd.f32 %v832_v31, %v8072_v23  ;;  %v834_v38 = vpop.f32.mrb[11].mxu1  ;;  %1185 = vst [vmem:[#allocation2] sm:$0xff] %v8130_v32  ;;  %v8136_v39 = vsel %vm1249_vm5, %v8085_v35, %v5990_v26  ;;  %v1065_v40 = vmul.f32 1.442695, %v8125_v28  ;;  %v7242_v41 = vpop.eup %7241  ;;  %v578_v42 = vadd.f32 %v577_v37, %v8075_v24 }
  0xff   : > { %1409 = vst [vmem:[#allocation2 + $0x8] sm:$0xff] %v8136_v39  ;;  %v1289_v34 = vmul.f32 1.442695, %v8127_v29  ;;  %v835_v43 = vadd.f32 %v834_v38, %v8077_v25  ;;  %v7244_v44 = vpop.eup %7243  ;;  %v5959_v45 = vadd.f32 -1.0, %v7242_v41  ;;  %vm1029_vm12 = vcmp.gt.f32.partialorder %v8125_v28, 0.0 }
 0x100   : > { %7253 = vpow2.f32 %v1065_v40  ;;  %v581_v35 = vpop.f32.mrb[12].mxu0  ;;  %v5991_v47 = vadd.f32 -1.0, %v7244_v44  ;;  %v8145_v50 = vmax.f32 %v576_v33, %v578_v42  ;;  %vm1253_vm13 = vcmp.gt.f32.partialorder %v8127_v29, 0.0 }
 0x101   : > { %v838_v46 = vpop.f32.mrb[12].mxu1  ;;  %7255 = vpow2.f32 %v1289_v34  ;;  %v8147_v51 = vmax.f32 %v833_v36, %v835_v43  ;;  %v583_v52 = vpop.f32.mrb[13].mxu0  ;;  %v8150_v55 = vsel %vm1026_vm6, %v8093_v48, %v5959_v45  ;;  %v582_v56 = vadd.f32 %v581_v35, %v8070_v22 }
 0x102   : > { %v840_v53 = vpop.f32.mrb[13].mxu1  ;;  %v7246_v54 = vpop.eup %7245  ;;  %v584_v57 = vadd.f32 %v583_v52, %v8075_v24  ;;  %v8158_v61 = vsel %vm1250_vm7, %v8095_v49, %v5991_v47  ;;  %v1067_v63 = vmul.f32 1.442695, %v8145_v50  ;;  %v839_v0 = vadd.f32 %v838_v46, %v8072_v23 }
 0x103   : > { %v7248_v60 = vpop.eup %7247  ;;  %v5960_v62 = vadd.f32 -1.0, %v7246_v54  ;;  %v1291_v1 = vmul.f32 1.442695, %v8147_v51  ;;  %v841_v49 = vadd.f32 %v840_v53, %v8077_v25  ;;  %v1765_v26 = vpack.c.bf16 %v8158_v61, %v8136_v39 }
 0x104   : > { %v5992_v48 = vadd.f32 -1.0, %v7248_v60  ;;  %v8164_v2 = vmax.f32 %v582_v56, %v584_v57  ;;  %v587_v3 = vpop.f32.mrb[14].mxu0  ;;  %7257 = vpow2.f32 %v1067_v63  ;;  %vm1030_vm14 = vcmp.gt.f32.partialorder %v8145_v50, 0.0 }
 0x105   : > { %v844_v4 = vpop.f32.mrb[14].mxu1  ;;  %v8167_v5 = vsel %vm1027_vm8, %v8103_v58, %v5960_v62  ;;  %v588_v6 = vadd.f32 %v587_v3, %v8070_v22  ;;  %v589_v7 = vpop.f32.mrb[15].mxu0  ;;  %7259 = vpow2.f32 %v1291_v1  ;;  %v8175_v15 = vmax.f32 %v839_v0, %v841_v49  ;;  %2256 = vmatprep.mubr.bf16.mxu0 %v1765_v26  ;;  %v7077_v0 = vld [vmem:[%s11348_s3 + $0x100] ss:$8 sps:$4 sm:$0xff]  }
 0x106   : > { %v846_v10 = vpop.f32.mrb[15].mxu1  ;;  %v8172_v12 = vsel %vm1251_vm9, %v8105_v59, %v5992_v48  ;;  %v1069_v13 = vmul.f32 1.442695, %v8164_v2  ;;  %v7250_v14 = vpop.eup %7249  ;;  %v845_v16 = vadd.f32 %v844_v4, %v8072_v23  ;;  %v590_v58 = vadd.f32 %v589_v7, %v8075_v24  ;;  %v7082_v7 = vld [vmem:[%s11348_s3 + $0x114] ss:$8 sps:$4 sm:$0xff]  }
 0x107   : > { %v847_v17 = vadd.f32 %v846_v10, %v8077_v25  ;;  %v7252_v19 = vpop.eup %7251  ;;  %v5961_v20 = vadd.f32 -1.0, %v7250_v14  ;;  %v1293_v30 = vmul.f32 1.442695, %v8175_v15  ;;  %vm1254_vm15 = vcmp.gt.f32.partialorder %v8147_v51, 0.0 }
 0x108   : > { %7261 = vpow2.f32 %v1069_v13  ;;  %v593_v21 = vpop.f32.mrb[16].mxu0  ;;  %v5993_v27 = vadd.f32 -1.0, %v7252_v19  ;;  %v8185_v31 = vmax.f32 %v588_v6, %v590_v58  ;;  %v1764_v4 = vpack.c.bf16 %v8150_v55, %v8130_v32 }
 0x109   : > { %v850_v59 = vpop.f32.mrb[16].mxu1  ;;  %v595_v33 = vpop.f32.mrb[17].mxu0  ;;  %v8188_v38 = vsel %vm1028_vm10, %v8113_v8, %v5961_v20  ;;  %v8191_v40 = vmax.f32 %v845_v16, %v847_v17  ;;  %v594_v41 = vadd.f32 %v593_v21, %v8070_v22  ;;  %7263 = vpow2.f32 %v1293_v30  ;;  %v7085_v30 = vld [vmem:[%s11348_s3 + $0x124] ss:$8 sps:$4 sm:$0xff]  }
 0x10a   : > { %v852_v36 = vpop.f32.mrb[17].mxu1  ;;  %v7254_v37 = vpop.eup %7253  ;;  %v8195_v34 = vsel %vm1252_vm11, %v8115_v9, %v5993_v27  ;;  %v851_v43 = vadd.f32 %v850_v59, %v8072_v23  ;;  %v1071_v8 = vmul.f32 1.442695, %v8185_v31  ;;  %v596_v46 = vadd.f32 %v595_v33, %v8075_v24  ;;  %2257 = vmatmul.mubr.bf16.vlgmr.msra.gmra.mrb[64].mxu0 %v1764_v4  ;;  %v7080_v27 = vld [vmem:[%s11348_s3 + $0x110] ss:$8 sps:$4 sm:$0xff]  }
 0x10b   : > { %v7256_v39 = vpop.eup %7255  ;;  %v5962_v42 = vadd.f32 -1.0, %v7254_v37  ;;  %v1295_v45 = vmul.f32 1.442695, %v8191_v40  ;;  %v853_v9 = vadd.f32 %v852_v36, %v8077_v25  ;;  %vm1031_vm0 = vcmp.gt.f32.partialorder %v8164_v2, 0.0  ;;  %2418 = vmatpush1.bf16.msra.mxu0 %v7077_v0  ;;  %v1505_v0 = vld [vmem:[#allocation2] sm:$0xfe] }
 0x10c   : > { %v5994_v44 = vadd.f32 -1.0, %v7256_v39  ;;  %v599_v47 = vpop.f32.mrb[18].mxu0  ;;  %7265 = vpow2.f32 %v1071_v8  ;;  %v8212_v62 = vmax.f32 %v594_v41, %v596_v46  ;;  %vm1255_vm2 = vcmp.gt.f32.partialorder %v8175_v15, 0.0  ;;  %2419 = vmatprep.subr.bf16.mxu0 %v7082_v7 }
 0x10d   : > { %v8202_v35 = vsel %vm1029_vm12, %v8125_v28, %v5962_v42  ;;  %v856_v52 = vpop.f32.mrb[18].mxu1  ;;  %v600_v54 = vadd.f32 %v599_v47, %v8070_v22  ;;  %v601_v57 = vpop.f32.mrb[19].mxu0  ;;  %7267 = vpow2.f32 %v1295_v45  ;;  %v8214_v63 = vmax.f32 %v851_v43, %v853_v9 }
 0x10e   : > { %v8208_v53 = vsel %vm1253_vm13, %v8127_v29, %v5994_v44  ;;  %v857_v56 = vadd.f32 %v856_v52, %v8072_v23  ;;  %v858_v60 = vpop.f32.mrb[19].mxu1  ;;  %v7258_v28 = vpop.eup %7257  ;;  %v602_v29 = vadd.f32 %v601_v57, %v8075_v24  ;;  %v1073_v13 = vmul.f32 1.442695, %v8212_v62  ;;  %v7083_v52 = vld [vmem:[%s11348_s3 + $0x120] ss:$8 sps:$4 sm:$0xff]  }
 0x10f   : > { %v7260_v48 = vpop.eup %7259  ;;  %v5963_v1 = vadd.f32 -1.0, %v7258_v28  ;;  %v859_v3 = vadd.f32 %v858_v60, %v8077_v25  ;;  %v1297_v32 = vmul.f32 1.442695, %v8214_v63  ;;  %vm1032_vm3 = vcmp.gt.f32.partialorder %v8185_v31, 0.0  ;;  %2420 = vmatpush1.bf16.msra.mxu0 %v7080_v27  ;;  %v7091_v27 = vld [vmem:[%s11348_s3 + $0x144] ss:$8 sps:$4 sm:$0xff]  }
 0x110   : > { %v605_v49 = vpop.f32.mrb[20].mxu0  ;;  %v5995_v10 = vadd.f32 -1.0, %v7260_v48  ;;  %v8236_v19 = vmax.f32 %v600_v54, %v602_v29  ;;  %7269 = vpow2.f32 %v1073_v13  ;;  %vm1256_vm4 = vcmp.gt.f32.partialorder %v8191_v40, 0.0  ;;  %2421 = vmatprep.subr.bf16.mxu0 %v7085_v30 }
 0x111   : > { %v862_v6 = vpop.f32.mrb[20].mxu1  ;;  %v607_v16 = vpop.f32.mrb[21].mxu0  ;;  %v8233_v17 = vsel %vm1030_vm14, %v8145_v50, %v5963_v1  ;;  %v8238_v20 = vmax.f32 %v857_v56, %v859_v3  ;;  %v606_v50 = vadd.f32 %v605_v49, %v8070_v22  ;;  %7271 = vpow2.f32 %v1297_v32  ;;  %v7088_v1 = vld [vmem:[%s11348_s3 + $0x134] ss:$8 sps:$4 sm:$0xff]  }
 0x112   : > { %v7262_v58 = vpop.eup %7261  ;;  %11418 = vst [vmem:[#allocation8_spill] sm:$0xff] %v8233_v17  ;;  %v864_v21 = vpop.f32.mrb[21].mxu1  ;;  %v8243_v59 = vsel %vm1254_vm15, %v8147_v51, %v5995_v10  ;;  %v1075_v51 = vmul.f32 1.442695, %v8236_v19  ;;  %v863_v42 = vadd.f32 %v862_v6, %v8072_v23  ;;  %v608_v43 = vadd.f32 %v607_v16, %v8075_v24 }
 0x113   : > { %v5964_v26 = vadd.f32 -1.0, %v7262_v58  ;;  %v7264_v37 = vpop.eup %7263  ;;  %v1299_v39 = vmul.f32 1.442695, %v8238_v20  ;;  %v865_v46 = vadd.f32 %v864_v21, %v8077_v25  ;;  %v1769_v60 = vpack.c.bf16 %v8195_v34, %v8172_v12  ;;  %2422 = vmatpush1.bf16.msra.mxu0 %v7083_v52  ;;  %v7089_v52 = vld [vmem:[%s11348_s3 + $0x140] ss:$8 sps:$4 sm:$0xff]  }
 0x114   : > { %v611_v33 = vpop.f32.mrb[22].mxu0  ;;  %v5996_v45 = vadd.f32 -1.0, %v7264_v37  ;;  %7273 = vpow2.f32 %v1075_v51  ;;  %v8266_v47 = vmax.f32 %v606_v50, %v608_v43  ;;  %v7086_v50 = vld [vmem:[%s11348_s3 + $0x130] ss:$8 sps:$4 sm:$0xff]   ;;  %vm1033_vm5 = vcmp.gt.f32.partialorder %v8212_v62, 0.0  ;;  %2423 = vmatprep.subr.bf16.mxu0 %v7088_v1 }
 0x115   : > { %v868_v36 = vpop.f32.mrb[22].mxu1  ;;  %v8258_v41 = vsel %vm1031_vm0, %v8164_v2, %v5964_v26  ;;  %v613_v44 = vpop.f32.mrb[23].mxu0  ;;  %v612_v9 = vadd.f32 %v611_v33, %v8070_v22  ;;  %7275 = vpow2.f32 %v1299_v39  ;;  %v8277_v57 = vmax.f32 %v863_v42, %v865_v46  ;;  %2266 = vmatprep.mubr.bf16.mxu0 %v1769_v60 }
 0x116   : > { %11419 = vst [vmem:[#allocation9_spill] sm:$0xff] %v8258_v41  ;;  %v870_v8 = vpop.f32.mrb[23].mxu1  ;;  %v869_v2 = vadd.f32 %v868_v36, %v8072_v23  ;;  %v7266_v54 = vpop.eup %7265  ;;  %v8275_v56 = vsel %vm1255_vm2, %v8175_v15, %v5996_v45  ;;  %v614_v28 = vadd.f32 %v613_v44, %v8075_v24  ;;  %v1575_v15 = vrot.slane %v8150_v55, 1 }
 0x117   : > { %v7268_v3 = vpop.eup %7267  ;;  %v5965_v4 = vadd.f32 -1.0, %v7266_v54  ;;  %v1077_v49 = vmul.f32 1.442695, %v8266_v47  ;;  %v871_v6 = vadd.f32 %v870_v8, %v8077_v25  ;;  %v1301_v16 = vmul.f32 1.442695, %v8277_v57  ;;  %2424 = vmatpush1.bf16.msra.mxu0 %v7086_v50 }
 0x118   : > { %v617_v29 = vpop.f32.mrb[24].mxu0  ;;  %v5997_v13 = vadd.f32 -1.0, %v7268_v3  ;;  %v8290_v32 = vmax.f32 %v612_v9, %v614_v28  ;;  %v1574_v26 = vrot.slane %v1505_v0, 1  ;;  %vm1257_vm6 = vcmp.gt.f32.partialorder %v8214_v63, 0.0  ;;  %2425 = vmatprep.subr.bf16.mxu0 %v7091_v27  ;;  %v7092_v27 = vld [vmem:[%s11348_s3 + $0x150] ss:$8 sps:$4 sm:$0xff]  }
 0x119   : > { %v874_v48 = vpop.f32.mrb[24].mxu1  ;;  %v619_v7 = vpop.f32.mrb[25].mxu0  ;;  %v8295_v21 = vsel %vm1032_vm3, %v8185_v31, %v5965_v4  ;;  %7277 = vpow2.f32 %v1077_v49  ;;  %v8297_v55 = vmax.f32 %v869_v2, %v871_v6  ;;  %v11354_v42 = vrot.slane %v8167_v5, 1  ;;  %v7094_v4 = vld [vmem:[%s11348_s3 + $0x154] ss:$8 sps:$4 sm:$0xff]  }
 0x11a   : > { %v876_v10 = vpop.f32.mrb[25].mxu1  ;;  %11420 = vst [vmem:[#allocation10_spill] sm:$0xff] %v8295_v21  ;;  %v8308_v30 = vsel %vm1256_vm4, %v8191_v40, %v5997_v13  ;;  %7279 = vpow2.f32 %v1301_v16  ;;  %v1079_v31 = vmul.f32 1.442695, %v8290_v32  ;;  %v7270_v36 = vpop.eup %7269  ;;  %v8315_v39 = vsel %vm1573_vm1, %v1574_v26, %v1575_v15 }
 0x11b   : > { %11421 = vst [vmem:[#allocation11_spill] sm:$0xff] %v8308_v30  ;;  %v1303_v37 = vmul.f32 1.442695, %v8297_v55  ;;  %11422 = vst [vmem:[#allocation12_spill] sm:$0xff] %v8315_v39  ;;  %v7272_v44 = vpop.eup %7271  ;;  %v5966_v8 = vadd.f32 -1.0, %v7270_v36  ;;  %vm1034_vm7 = vcmp.gt.f32.partialorder %v8236_v19, 0.0  ;;  %v1768_v45 = vpack.c.bf16 %v8188_v38, %v8167_v5  ;;  %2426 = vmatpush1.bf16.msra.mxu0 %v7089_v52 }
 0x11c   : > { %v623_v51 = vpop.f32.mrb[26].mxu0  ;;  %7281 = vpow2.f32 %v1079_v31  ;;  %v5998_v46 = vadd.f32 -1.0, %v7272_v44  ;;  %v8324_v9 = vsel %vm1573_vm1, %v1575_v15, %v11354_v42  ;;  %v618_v2 = vadd.f32 %v617_v29, %v8070_v22  ;;  %2427 = vmatprep.subr.bf16.mxu0 %v7094_v4 }
 0x11d   : > { %v880_v33 = vpop.f32.mrb[26].mxu1  ;;  %v625_v40 = vpop.f32.mrb[27].mxu0  ;;  %7283 = vpow2.f32 %v1303_v37  ;;  %11423 = vst [vmem:[#allocation13_spill] sm:$0xff] %v8324_v9  ;;  %v8333_v60 = vsel %vm1033_vm5, %v8212_v62, %v5966_v8  ;;  %2267 = vmatmul.mubr.bf16.gmra.mrb[68].mxu0 %v1768_v45  ;;  %v875_v0 = vadd.f32 %v874_v48, %v8072_v23  ;;  %v620_v1 = vadd.f32 %v619_v7, %v8075_v24 }
 0x11e   : > { %v882_v43 = vpop.f32.mrb[27].mxu1  ;;  %v7274_v54 = vpop.eup %7273  ;;  %11424 = vst [vmem:[#allocation14_spill] sm:$0xff] %v8333_v60  ;;  %v8347_v62 = vsel %vm1257_vm6, %v8214_v63, %v5998_v46  ;;  %vm1258_vm8 = vcmp.gt.f32.partialorder %v8238_v20, 0.0  ;;  %v877_v48 = vadd.f32 %v876_v10, %v8077_v25  ;;  %v624_v50 = vadd.f32 %v623_v51, %v8070_v22  ;;  %v7097_v51 = vld [vmem:[%s11348_s3 + $0x164] ss:$8 sps:$4 sm:$0xff]  }
 0x11f   : > { %v7276_v15 = vpop.eup %7275  ;;  %11425 = vst [vmem:[#allocation15_spill] sm:$0xff] %v8347_v62  ;;  %v5967_v49 = vadd.f32 -1.0, %v7274_v54  ;;  %v8352_v26 = vmax.f32 %v618_v2, %v620_v1  ;;  %v881_v36 = vadd.f32 %v880_v33, %v8072_v23  ;;  %v1773_v10 = vpack.c.bf16 %v8243_v59, %v8208_v53  ;;  %2428 = vmatpush1.bf16.msra.mxu0 %v7092_v27 }
 0x120   : > { %v629_v29 = vpop.f32.mrb[28].mxu0  ;;  %v5999_v13 = vadd.f32 -1.0, %v7276_v15  ;;  %v8360_v31 = vmax.f32 %v875_v0, %v877_v48  ;;  %vm1035_vm9 = vcmp.gt.f32.partialorder %v8266_v47, 0.0  ;;  %v626_v37 = vadd.f32 %v625_v40, %v8075_v24  ;;  %2429 = vmatprep.subr.bf16.mxu0 %v7097_v51 }
 0x121   : > { %v8339_v3 = vpop.f32.mrb[28].mxu1  ;;  %v631_v6 = vpop.f32.mrb[29].mxu0  ;;  %v8358_v63 = vsel %vm1034_vm7, %v8236_v19, %v5967_v49  ;;  %v1081_v33 = vmul.f32 1.442695, %v8352_v26  ;;  %vm1259_vm10 = vcmp.gt.f32.partialorder %v8277_v57, 0.0  ;;  %vm1036_vm11 = vcmp.gt.f32.partialorder %v8290_v32, 0.0  ;;  %2276 = vmatprep.mubr.bf16.mxu0 %v1773_v10 }
 0x122   : > { %v888_v7 = vpop.f32.mrb[29].mxu1  ;;  %11426 = vst [vmem:[#allocation16_spill] sm:$0xff] %v8358_v63  ;;  %v8374_v19 = vsel %vm1258_vm8, %v8238_v20, %v5999_v13  ;;  %v1305_v46 = vmul.f32 1.442695, %v8360_v31  ;;  %v883_v20 = vadd.f32 %v882_v43, %v8077_v25  ;;  %vm1260_vm12 = vcmp.gt.f32.partialorder %v8297_v55, 0.0 }
 0x123   : > { %11427 = vst [vmem:[#allocation17_spill] sm:$0xff] %v8374_v19  ;;  %v7278_v45 = vpop.eup %7277  ;;  %7285 = vpow2.f32 %v1081_v33  ;;  %v8384_v40 = vmax.f32 %v624_v50, %v626_v37  ;;  %v1772_v15 = vpack.c.bf16 %v8233_v17, %v8202_v35  ;;  %v7095_v43 = vld [vmem:[%s11348_s3 + $0x160] ss:$8 sps:$4 sm:$0xff]   ;;  %v7100_v49 = vld [vmem:[%s11348_s3 + $0x174] ss:$8 sps:$4 sm:$0xff]   ;;  %v630_v10 = vadd.f32 %v629_v29, %v8070_v22 }
 0x124   : > { %v635_v44 = vpop.f32.mrb[30].mxu0  ;;  %v7280_v54 = vpop.eup %7279  ;;  %v5968_v0 = vadd.f32 -1.0, %v7278_v45  ;;  %7287 = vpow2.f32 %v1305_v46  ;;  %v8386_v4 = vmax.f32 %v881_v36, %v883_v20  ;;  %v887_v29 = vadd.f32 %v8339_v3, %v8072_v23  ;;  %2430 = vmatpush1.bf16.msra.mxu0 %v7095_v43 }
 0x125   : > { %v892_v8 = vpop.f32.mrb[30].mxu1  ;;  %v637_v2 = vpop.f32.mrb[31].mxu0  ;;  %v6000_v1 = vadd.f32 -1.0, %v7280_v54  ;;  %v1083_v36 = vmul.f32 1.442695, %v8384_v40  ;;  %2277 = vmatmul.mubr.bf16.gmra.mrb[72].mxu0 %v1772_v15  ;;  %v632_v51 = vadd.f32 %v631_v6, %v8075_v24  ;;  %2431 = vmatprep.subr.bf16.mxu0 %v7100_v49  ;;  %vm1037_vm13 = vcmp.gt.f32.partialorder %v8352_v26, 0.0 }
 0x126   : > { %v894_v52 = vpop.f32.mrb[31].mxu1  ;;  %v7282_v48 = vpop.eup %7281  ;;  %v8399_v13 = vsel %vm1035_vm9, %v8266_v47, %v5968_v0  ;;  %v1307_v20 = vmul.f32 1.442695, %v8386_v4  ;;  %v7098_v15 = vld [vmem:[%s11348_s3 + $0x170] ss:$8 sps:$4 sm:$0xff]   ;;  %vm1261_vm14 = vcmp.gt.f32.partialorder %v8360_v31, 0.0  ;;  %v1781_v14 = vpack.c.bf16 %v8374_v19, %v8347_v62 }
 0x127   : > { %11428 = vst [vmem:[#allocation18_spill] sm:$0xff] %v8399_v13  ;;  %v7284_v37 = vpop.eup %7283  ;;  %v8409_v45 = vsel %vm1259_vm10, %v8277_v57, %v6000_v1  ;;  %v5969_v46 = vadd.f32 -1.0, %v7282_v48  ;;  %7289 = vpow2.f32 %v1083_v36  ;;  %v889_v1 = vadd.f32 %v888_v7, %v8077_v25 }
 0x128   : > { %v641_v27 = vpop.f32.mrb[32].mxu0  ;;  %11429 = vst [vmem:[#allocation19_spill] sm:$0xff] %v8409_v45  ;;  %v6001_v28 = vadd.f32 -1.0, %v7284_v37  ;;  %7291 = vpow2.f32 %v1307_v20  ;;  %v636_v48 = vadd.f32 %v635_v44, %v8070_v22  ;;  %v8432_v36 = vmax.f32 %v630_v10, %v632_v51  ;;  %v7103_v44 = vld [vmem:[%s11348_s3 + $0x184] ss:$8 sps:$4 sm:$0xff]   ;;  %2432 = vmatpush1.bf16.msra.mxu0 %v7098_v15 }
 0x129   : > { %v8404_v33 = vpop.f32.mrb[32].mxu1  ;;  %v643_v54 = vpop.f32.mrb[33].mxu0  ;;  %v8419_v57 = vsel %vm1036_vm11, %v8290_v32, %v5969_v46  ;;  %v893_v32 = vadd.f32 %v892_v8, %v8072_v23  ;;  %v8441_v43 = vmax.f32 %v887_v29, %v889_v1  ;;  %v895_v20 = vadd.f32 %v894_v52, %v8077_v25  ;;  %2433 = vmatprep.subr.bf16.mxu0 %v7103_v44 }
 0x12a   : > { %v900_v0 = vpop.f32.mrb[33].mxu1  ;;  %11430 = vst [vmem:[#allocation20_spill] sm:$0xff] %v8419_v57  ;;  %v8429_v3 = vsel %vm1260_vm12, %v8297_v55, %v6001_v28  ;;  %v1777_v55 = vpack.c.bf16 %v8308_v30, %v8275_v56  ;;  %v638_v28 = vadd.f32 %v637_v2, %v8075_v24  ;;  %v1085_v49 = vmul.f32 1.442695, %v8432_v36  ;;  %v7101_v2 = vld [vmem:[%s11348_s3 + $0x180] ss:$8 sps:$4 sm:$0xff]  }
 0x12b   : > { %11431 = vst [vmem:[#allocation21_spill] sm:$0xff] %v8429_v3  ;;  %vm1038_vm15 = vcmp.gt.f32.partialorder %v8384_v40, 0.0  ;;  %v1309_v51 = vmul.f32 1.442695, %v8441_v43  ;;  %vm1262_vm0 = vcmp.gt.f32.partialorder %v8386_v4, 0.0  ;;  %v8461_v8 = vmax.f32 %v893_v32, %v895_v20 }
 0x12c   : > { %v647_v37 = vpop.f32.mrb[34].mxu0  ;;  %2286 = vmatprep.mubr.bf16.mxu0 %v1777_v55  ;;  %v8455_v1 = vmax.f32 %v636_v48, %v638_v28  ;;  %7293 = vpow2.f32 %v1085_v49  ;;  %v1776_v52 = vpack.c.bf16 %v8295_v21, %v8258_v41  ;;  %v7106_v48 = vld [vmem:[%s11348_s3 + $0x194] ss:$8 sps:$4 sm:$0xff]   ;;  %v642_v32 = vadd.f32 %v641_v27, %v8070_v22  ;;  %2434 = vmatpush1.bf16.msra.mxu0 %v7101_v2 }
 0x12d   : > { %v8435_v7 = vpop.f32.mrb[34].mxu1  ;;  %v649_v10 = vpop.f32.mrb[35].mxu0  ;;  %7295 = vpow2.f32 %v1309_v51  ;;  %v1311_v44 = vmul.f32 1.442695, %v8461_v8  ;;  %v899_v16 = vadd.f32 %v8404_v33, %v8072_v23  ;;  %v644_v27 = vadd.f32 %v643_v54, %v8075_v24  ;;  %2435 = vmatprep.subr.bf16.mxu0 %v7106_v48 }
 0x12e   : > { %v8446_v46 = vpop.f32.mrb[35].mxu1  ;;  %v7286_v6 = vpop.eup %7285  ;;  %v1087_v28 = vmul.f32 1.442695, %v8455_v1  ;;  %2287 = vmatmul.mubr.bf16.gmra.mrb[76].mxu0 %v1776_v52  ;;  %v901_v51 = vadd.f32 %v900_v0, %v8077_v25  ;;  %v7109_v0 = vld [vmem:[%s11348_s3 + $0x1a4] ss:$8 sps:$4 sm:$0xff]   ;;  %vm1039_vm2 = vcmp.gt.f32.partialorder %v8432_v36, 0.0  ;;  %v905_v48 = vadd.f32 %v8435_v7, %v8072_v23 }
 0x12f   : > { %v7288_v15 = vpop.eup %7287  ;;  %v5970_v55 = vadd.f32 -1.0, %v7286_v6  ;;  %v650_v58 = vadd.f32 %v649_v10, %v8075_v24  ;;  %vm1263_vm3 = vcmp.gt.f32.partialorder %v8441_v43, 0.0  ;;  %2296 = vmatprep.mubr.bf16.mxu0 %v1781_v14  ;;  %vm1040_vm4 = vcmp.gt.f32.partialorder %v8455_v1, 0.0 }
 0x130   : > { %v8465_v29 = vpop.f32.mrb[36].mxu0  ;;  %v6002_v50 = vadd.f32 -1.0, %v7288_v15  ;;  %7297 = vpow2.f32 %v1087_v28  ;;  %v7104_v15 = vld [vmem:[%s11348_s3 + $0x190] ss:$8 sps:$4 sm:$0xff]   ;;  %v1780_v14 = vpack.c.bf16 %v8358_v63, %v8333_v60  ;;  %vm1264_vm5 = vcmp.gt.f32.partialorder %v8461_v8, 0.0 }
 0x131   : > { %v8467_v42 = vpop.f32.mrb[36].mxu1  ;;  %v8474_v49 = vpop.f32.mrb[37].mxu0  ;;  %v8485_v6 = vsel %vm1037_vm13, %v8352_v26, %v5970_v55  ;;  %7299 = vpow2.f32 %v1311_v44  ;;  %v648_v26 = vadd.f32 %v647_v37, %v8070_v22  ;;  %2436 = vmatpush1.bf16.msra.mxu0 %v7104_v15  ;;  %v7107_v15 = vld [vmem:[%s11348_s3 + $0x1a0] ss:$8 sps:$4 sm:$0xff]  }
 0x132   : > { %v8476_v20 = vpop.f32.mrb[37].mxu1  ;;  %11432 = vst [vmem:[#allocation22_spill] sm:$0xff] %v8485_v6  ;;  %v7290_v47 = vpop.eup %7289  ;;  %v8495_v33 = vsel %vm1261_vm14, %v8360_v31, %v6002_v50  ;;  %v8507_v31 = vmax.f32 %v642_v32, %v644_v27  ;;  %v8509_v50 = vmax.f32 %v899_v16, %v901_v51  ;;  %2437 = vmatprep.subr.bf16.mxu0 %v7109_v0 }
 0x133   : > { %11433 = vst [vmem:[#allocation23_spill] sm:$0xff] %v8495_v33  ;;  %v7292_v2 = vpop.eup %7291  ;;  %v5971_v28 = vadd.f32 -1.0, %v7290_v47  ;;  %v8534_v10 = vmax.f32 %v648_v26, %v650_v58  ;;  %v654_v16 = vadd.f32 %v8465_v29, %v8070_v22  ;;  %v911_v11 = vadd.f32 %v8467_v42, %v8072_v23 }
 0x134   : > { %v8499_v55 = vpop.f32.mrb[38].mxu0  ;;  %v6003_v52 = vadd.f32 -1.0, %v7292_v2  ;;  %v1089_v32 = vmul.f32 1.442695, %v8507_v31  ;;  %v1313_v27 = vmul.f32 1.442695, %v8509_v50  ;;  %v656_v18 = vadd.f32 %v8474_v49, %v8075_v24 }
 0x135   : > { %v8501_v54 = vpop.f32.mrb[38].mxu1  ;;  %v8511_v44 = vpop.f32.mrb[39].mxu0  ;;  %v8523_v47 = vsel %vm1038_vm15, %v8384_v40, %v5971_v28  ;;  %v907_v40 = vadd.f32 %v8446_v46, %v8077_v25  ;;  %v1091_v0 = vmul.f32 1.442695, %v8534_v10  ;;  %2438 = vmatpush1.bf16.msra.mxu0 %v7107_v15  ;;  %v7115_v15 = vld [vmem:[%s11348_s3 + $0x1c4] ss:$8 sps:$4 sm:$0xff]  }
 0x136   : > { %v8513_v37 = vpop.f32.mrb[39].mxu1  ;;  %11434 = vst [vmem:[#allocation24_spill] sm:$0xff] %v8523_v47  ;;  %v8531_v7 = vsel %vm1262_vm0, %v8386_v4, %v6003_v52  ;;  %7301 = vpow2.f32 %v1089_v32  ;;  %v7112_v52 = vld [vmem:[%s11348_s3 + $0x1b4] ss:$8 sps:$4 sm:$0xff]   ;;  %v7294_v26 = vpop.eup %7293  ;;  %2297 = vmatmul.mubr.bf16.gmra.mrb[80].mxu0 %v1780_v14  ;;  %v8581_v9 = vmax.f32 %v654_v16, %v656_v18  ;;  %vm1041_vm6 = vcmp.gt.f32.partialorder %v8507_v31, 0.0 }
 0x137   : > { %11435 = vst [vmem:[#allocation25_spill] sm:$0xff] %v8531_v7  ;;  %7303 = vpow2.f32 %v1313_v27  ;;  %v8558_v28 = vmax.f32 %v905_v48, %v907_v40  ;;  %v7296_v32 = vpop.eup %7295  ;;  %v5972_v4 = vadd.f32 -1.0, %v7294_v26  ;;  %v7110_v27 = vld [vmem:[%s11348_s3 + $0x1b0] ss:$8 sps:$4 sm:$0xff]   ;;  %2439 = vmatprep.subr.bf16.mxu0 %v7112_v52  ;;  %vm1265_vm7 = vcmp.gt.f32.partialorder %v8509_v50, 0.0 }
 0x138   : > { %v8538_v51 = vpop.f32.mrb[40].mxu0  ;;  %v6004_v39 = vadd.f32 -1.0, %v7296_v32  ;;  %7305 = vpow2.f32 %v1091_v0  ;;  %v913_v0 = vadd.f32 %v8476_v20, %v8077_v25  ;;  %v1093_v16 = vmul.f32 1.442695, %v8581_v9 }
 0x139   : > { %v8540_v2 = vpop.f32.mrb[40].mxu1  ;;  %v8549_v58 = vpop.f32.mrb[41].mxu0  ;;  %v1315_v40 = vmul.f32 1.442695, %v8558_v28  ;;  %v8578_v42 = vsel %vm1039_vm2, %v8432_v36, %v5972_v4  ;;  %2440 = vmatpush1.bf16.msra.mxu0 %v7110_v27  ;;  %vm1042_vm8 = vcmp.gt.f32.partialorder %v8534_v10, 0.0  ;;  %v662_v19 = vadd.f32 %v8511_v44, %v8075_v24 }
 0x13a   : > { %v8551_v46 = vpop.f32.mrb[41].mxu1  ;;  %v7298_v29 = vpop.eup %7297  ;;  %11436 = vst [vmem:[#allocation26_spill] sm:$0xff] %v8578_v42  ;;  %v8595_v36 = vsel %vm1263_vm3, %v8441_v43, %v6004_v39  ;;  %v8600_v4 = vmax.f32 %v911_v11, %v913_v0  ;;  %v660_v39 = vadd.f32 %v8499_v55, %v8070_v22  ;;  %v917_v43 = vadd.f32 %v8501_v54, %v8072_v23  ;;  %v7113_v11 = vld [vmem:[%s11348_s3 + $0x1c0] ss:$8 sps:$4 sm:$0xff]  }
 0x13b   : > { %v7300_v21 = vpop.eup %7299  ;;  %11437 = vst [vmem:[#allocation27_spill] sm:$0xff] %v8595_v36  ;;  %v5973_v18 = vadd.f32 -1.0, %v7298_v29  ;;  %7307 = vpow2.f32 %v1315_v40  ;;  %2441 = vmatprep.subr.bf16.mxu0 %v7115_v15  ;;  %v666_v54 = vadd.f32 %v8538_v51, %v8070_v22  ;;  %v923_v15 = vadd.f32 %v8540_v2, %v8072_v23  ;;  %v7121_v51 = vld [vmem:[%s11348_s3 + $0x1e4] ss:$8 sps:$4 sm:$0xff]  }
 0x13c   : > { %v8571_v14 = vpop.f32.mrb[42].mxu0  ;;  %v6005_v20 = vadd.f32 -1.0, %v7300_v21  ;;  %v1785_v21 = vpack.c.bf16 %v8429_v3, %v8409_v45  ;;  %7309 = vpow2.f32 %v1093_v16  ;;  %v1317_v0 = vmul.f32 1.442695, %v8600_v4 }
 0x13d   : > { %v8573_v26 = vpop.f32.mrb[42].mxu1  ;;  %v8585_v32 = vpop.f32.mrb[43].mxu0  ;;  %v8605_v52 = vsel %vm1040_vm4, %v8455_v1, %v5973_v18  ;;  %v7118_v1 = vld [vmem:[%s11348_s3 + $0x1d4] ss:$8 sps:$4 sm:$0xff]   ;;  %v1784_v16 = vpack.c.bf16 %v8419_v57, %v8399_v13  ;;  %v8649_v63 = vmax.f32 %v660_v39, %v662_v19  ;;  %2442 = vmatpush1.bf16.msra.mxu0 %v7113_v11  ;;  %vm1266_vm9 = vcmp.gt.f32.partialorder %v8558_v28, 0.0 }
 0x13e   : > { %v8587_v48 = vpop.f32.mrb[43].mxu1  ;;  %11438 = vst [vmem:[#allocation28_spill] sm:$0xff] %v8605_v52  ;;  %v8626_v55 = vsel %vm1264_vm5, %v8461_v8, %v6005_v20  ;;  %2306 = vmatprep.mubr.bf16.mxu0 %v1785_v21  ;;  %v919_v8 = vadd.f32 %v8513_v37, %v8077_v25  ;;  %7311 = vpow2.f32 %v1317_v0  ;;  %v7116_v21 = vld [vmem:[%s11348_s3 + $0x1d0] ss:$8 sps:$4 sm:$0xff]   ;;  %v668_v0 = vadd.f32 %v8549_v58, %v8075_v24 }
 0x13f   : > { %11439 = vst [vmem:[#allocation29_spill] sm:$0xff] %v8626_v55  ;;  %vm1043_vm10 = vcmp.gt.f32.partialorder %v8581_v9, 0.0  ;;  %2307 = vmatmul.mubr.bf16.gmra.mrb[84].mxu0 %v1784_v16  ;;  %v925_v19 = vadd.f32 %v8551_v46, %v8077_v25  ;;  %2443 = vmatprep.subr.bf16.mxu0 %v7118_v1  ;;  %vm1267_vm11 = vcmp.gt.f32.partialorder %v8600_v4, 0.0  ;;  %vm1044_vm12 = vcmp.gt.f32.partialorder %v8649_v63, 0.0 }
 0x140   : > { %v8613_v40 = vpop.f32.mrb[44].mxu0  ;;  %v7302_v20 = vpop.eup %7301  ;;  %v8651_v37 = vmax.f32 %v917_v43, %v919_v8  ;;  %v8684_v30 = vmax.f32 %v666_v54, %v668_v0  ;;  %v1788_v3 = vpack.c.bf16 %v8523_v47, %v8485_v6 }
 0x141   : > { %v8615_v29 = vpop.f32.mrb[44].mxu1  ;;  %v8630_v18 = vpop.f32.mrb[45].mxu0  ;;  %v5974_v44 = vadd.f32 -1.0, %v7302_v20  ;;  %v1095_v20 = vmul.f32 1.442695, %v8649_v63  ;;  %2444 = vmatpush1.bf16.msra.mxu0 %v7116_v21 }
 0x142   : > { %v8632_v27 = vpop.f32.mrb[45].mxu1  ;;  %v7304_v49 = vpop.eup %7303  ;;  %v1319_v1 = vmul.f32 1.442695, %v8651_v37  ;;  %2445 = vmatprep.subr.bf16.mxu0 %v7121_v51  ;;  %v7124_v21 = vld [vmem:[%s11348_s3 + $0x1f4] ss:$8 sps:$4 sm:$0xff]   ;;  %vm1268_vm13 = vcmp.gt.f32.partialorder %v8651_v37, 0.0 }
 0x143   : > { %v6006_v2 = vadd.f32 -1.0, %v7304_v49  ;;  %v7306_v43 = vpop.eup %7305  ;;  %v8673_v11 = vsel %vm1041_vm6, %v8507_v31, %v5974_v44  ;;  %7313 = vpow2.f32 %v1095_v20  ;;  %v8687_v31 = vmax.f32 %v923_v15, %v925_v19 }
 0x144   : > { %v8655_v60 = vpop.f32.mrb[46].mxu0  ;;  %v5975_v16 = vadd.f32 -1.0, %v7306_v43  ;;  %v672_v44 = vadd.f32 %v8571_v14, %v8070_v22  ;;  %7315 = vpow2.f32 %v1319_v1  ;;  %v929_v15 = vadd.f32 %v8573_v26, %v8072_v23 }
 0x145   : > { %v8657_v62 = vpop.f32.mrb[46].mxu1  ;;  %v8666_v39 = vpop.f32.mrb[47].mxu0  ;;  %v8681_v46 = vsel %vm1265_vm7, %v8509_v50, %v6006_v2  ;;  %v7119_v50 = vld [vmem:[%s11348_s3 + $0x1e0] ss:$8 sps:$4 sm:$0xff]   ;;  %v1097_v43 = vmul.f32 1.442695, %v8684_v30  ;;  %v931_v1 = vadd.f32 %v8587_v48, %v8077_v25 }
 0x146   : > { %v8668_v58 = vpop.f32.mrb[47].mxu1  ;;  %11440 = vst [vmem:[#allocation30_spill] sm:$0xff] %v8681_v46  ;;  %v7308_v41 = vpop.eup %7307  ;;  %v8701_v54 = vsel %vm1042_vm8, %v8534_v10, %v5975_v16  ;;  %v1321_v10 = vmul.f32 1.442695, %v8687_v31  ;;  %v674_v16 = vadd.f32 %v8585_v32, %v8075_v24  ;;  %2446 = vmatpush1.bf16.msra.mxu0 %v7119_v50  ;;  %v7122_v32 = vld [vmem:[%s11348_s3 + $0x1f0] ss:$8 sps:$4 sm:$0xff]  }
 0x147   : > { %v6007_v0 = vadd.f32 -1.0, %v7308_v41  ;;  %v1789_v41 = vpack.c.bf16 %v8531_v7, %v8495_v33  ;;  %v7310_v20 = vpop.eup %7309  ;;  %7317 = vpow2.f32 %v1097_v43  ;;  %v678_v43 = vadd.f32 %v8613_v40, %v8070_v22  ;;  %2447 = vmatprep.subr.bf16.mxu0 %v7124_v21 }
 0x148   : > { %v8691_v8 = vpop.f32.mrb[48].mxu0  ;;  %v5976_v19 = vadd.f32 -1.0, %v7310_v20  ;;  %7319 = vpow2.f32 %v1321_v10  ;;  %v8737_v48 = vmax.f32 %v672_v44, %v674_v16  ;;  %v8739_v20 = vmax.f32 %v929_v15, %v931_v1 }
 0x149   : > { %v8693_v49 = vpop.f32.mrb[48].mxu1  ;;  %v8705_v14 = vpop.f32.mrb[49].mxu0  ;;  %v8720_v26 = vsel %vm1266_vm9, %v8558_v28, %v6007_v0  ;;  %2316 = vmatprep.mubr.bf16.mxu0 %v1789_v41  ;;  %v935_v44 = vadd.f32 %v8615_v29, %v8072_v23  ;;  %v680_v15 = vadd.f32 %v8630_v18, %v8075_v24  ;;  %v937_v29 = vadd.f32 %v8632_v27, %v8077_v25 }
 0x14a   : > { %v8707_v2 = vpop.f32.mrb[49].mxu1  ;;  %11441 = vst [vmem:[#allocation31_spill] sm:$0xff] %v8720_v26  ;;  %v7312_v0 = vpop.eup %7311  ;;  %v8750_v50 = vsel %vm1043_vm10, %v8581_v9, %v5976_v19  ;;  %2317 = vmatmul.mubr.bf16.gmra.mrb[88].mxu0 %v1788_v3  ;;  %v1099_v10 = vmul.f32 1.442695, %v8737_v48  ;;  %v1323_v21 = vmul.f32 1.442695, %v8739_v20  ;;  %v684_v1 = vadd.f32 %v8655_v60, %v8070_v22 }
 0x14b   : > { %v6008_v57 = vadd.f32 -1.0, %v7312_v0  ;;  %v8766_v19 = vmax.f32 %v678_v43, %v680_v15  ;;  %2448 = vmatpush1.bf16.msra.mxu0 %v7122_v32  ;;  %vm1045_vm14 = vcmp.gt.f32.partialorder %v8684_v30, 0.0  ;;  %vm1269_vm15 = vcmp.gt.f32.partialorder %v8687_v31, 0.0 }
 0x14c   : > { %v8730_v13 = vpop.f32.mrb[50].mxu0  ;;  %7321 = vpow2.f32 %v1099_v10  ;;  %v8785_v32 = vmax.f32 %v935_v44, %v937_v29  ;;  %v1793_v60 = vpack.c.bf16 %v8626_v55, %v8595_v36  ;;  %v943_v3 = vadd.f32 %v8668_v58, %v8077_v25 }
 0x14d   : > { %v8732_v28 = vpop.f32.mrb[50].mxu1  ;;  %v8743_v41 = vpop.f32.mrb[51].mxu0  ;;  %v8763_v9 = vsel %vm1267_vm11, %v8600_v4, %v6008_v57  ;;  %v941_v57 = vadd.f32 %v8657_v62, %v8072_v23  ;;  %7323 = vpow2.f32 %v1323_v21  ;;  %v1101_v27 = vmul.f32 1.442695, %v8766_v19 }
 0x14e   : > { %v8745_v51 = vpop.f32.mrb[51].mxu1  ;;  %v7314_v43 = vpop.eup %7313  ;;  %v686_v62 = vadd.f32 %v8666_v39, %v8075_v24  ;;  %v1325_v21 = vmul.f32 1.442695, %v8785_v32  ;;  %2326 = vmatprep.mubr.bf16.mxu0 %v1793_v60  ;;  %vm1046_vm0 = vcmp.gt.f32.partialorder %v8737_v48, 0.0  ;;  %vm1270_vm2 = vcmp.gt.f32.partialorder %v8739_v20, 0.0 }
 0x14f   : > { %v7316_v15 = vpop.eup %7315  ;;  %v5977_v10 = vadd.f32 -1.0, %v7314_v43  ;;  %7325 = vpow2.f32 %v1101_v27  ;;  %v8807_v58 = vmax.f32 %v941_v57, %v943_v3  ;;  %vm1047_vm3 = vcmp.gt.f32.partialorder %v8766_v19, 0.0 }
 0x150   : > { %v8770_v18 = vpop.f32.mrb[52].mxu0  ;;  %v6009_v40 = vadd.f32 -1.0, %v7316_v15  ;;  %v8805_v43 = vmax.f32 %v684_v1, %v686_v62  ;;  %7327 = vpow2.f32 %v1325_v21  ;;  %vm1271_vm4 = vcmp.gt.f32.partialorder %v8785_v32, 0.0 }
 0x151   : > { %v8772_v16 = vpop.f32.mrb[52].mxu1  ;;  %v8779_v4 = vpop.f32.mrb[53].mxu0  ;;  %v8802_v29 = vsel %vm1044_vm12, %v8649_v63, %v5977_v10  ;;  %v1792_v63 = vpack.c.bf16 %v8605_v52, %v8578_v42  ;;  %v1327_v62 = vmul.f32 1.442695, %v8807_v58  ;;  %vm1272_vm6 = vcmp.gt.f32.partialorder %v8807_v58, 0.0 }
 0x152   : > { %v8781_v0 = vpop.f32.mrb[53].mxu1  ;;  %v7318_v7 = vpop.eup %7317  ;;  %v8816_v6 = vsel %vm1268_vm13, %v8651_v37, %v6009_v40  ;;  %v1103_v57 = vmul.f32 1.442695, %v8805_v43  ;;  %v690_v37 = vadd.f32 %v8691_v8, %v8070_v22  ;;  %v947_v40 = vadd.f32 %v8693_v49, %v8072_v23 }
 0x153   : > { %v7320_v1 = vpop.eup %7319  ;;  %v5978_v10 = vadd.f32 -1.0, %v7318_v7  ;;  %2327 = vmatmul.mubr.bf16.gmra.mrb[92].mxu0 %v1792_v63  ;;  %v949_v63 = vadd.f32 %v8707_v2, %v8077_v25  ;;  %vm1048_vm5 = vcmp.gt.f32.partialorder %v8805_v43, 0.0  ;;  %v704_v17 = vadd.f32 %v8779_v4, %v8075_v24 }
 0x154   : > { %v8795_v33 = vpop.f32.mrb[54].mxu0  ;;  %v6010_v60 = vadd.f32 -1.0, %v7320_v1  ;;  %7329 = vpow2.f32 %v1103_v57  ;;  %v692_v1 = vadd.f32 %v8705_v14, %v8075_v24 }
 0x155   : > { %v8797_v44 = vpop.f32.mrb[54].mxu1  ;;  %v8809_v15 = vpop.f32.mrb[55].mxu0  ;;  %v8836_v7 = vsel %vm1045_vm14, %v8684_v30, %v5978_v10  ;;  %7331 = vpow2.f32 %v1327_v62  ;;  %v696_v30 = vadd.f32 %v8730_v13, %v8070_v22  ;;  %v953_v10 = vadd.f32 %v8732_v28, %v8072_v23 }
 0x156   : > { %v8811_v27 = vpop.f32.mrb[55].mxu1  ;;  %v8849_v49 = vsel %vm1269_vm15, %v8687_v31, %v6010_v60  ;;  %v7322_v14 = vpop.eup %7321  ;;  %v8857_v57 = vmax.f32 %v690_v37, %v692_v1  ;;  %v8859_v47 = vmax.f32 %v947_v40, %v949_v63  ;;  %v1797_v31 = vpack.c.bf16 %v8720_v26, %v8681_v46 }
 0x157   : > { %v7324_v36 = vpop.eup %7323  ;;  %v5979_v45 = vadd.f32 -1.0, %v7322_v14  ;;  %v698_v13 = vadd.f32 %v8743_v41, %v8075_v24  ;;  %v955_v28 = vadd.f32 %v8745_v51, %v8077_v25  ;;  %v965_v46 = vadd.f32 %v8797_v44, %v8072_v23 }
 0x158   : > { %v8829_v21 = vpop.f32.mrb[56].mxu0  ;;  %v6011_v2 = vadd.f32 -1.0, %v7324_v36  ;;  %v1105_v40 = vmul.f32 1.442695, %v8857_v57  ;;  %v1329_v51 = vmul.f32 1.442695, %v8859_v47  ;;  %2336 = vmatprep.mubr.bf16.mxu0 %v1797_v31  ;;  %v1801_v44 = vpack.c.bf16 %v8816_v6, %v8763_v9 }
 0x159   : > { %v8831_v39 = vpop.f32.mrb[56].mxu1  ;;  %v8842_v8 = vpop.f32.mrb[57].mxu0  ;;  %v8879_v41 = vsel %vm1046_vm0, %v8737_v48, %v5979_v45  ;;  %v8882_v14 = vmax.f32 %v696_v30, %v698_v13  ;;  %v8884_v36 = vmax.f32 %v953_v10, %v955_v28  ;;  %vm1049_vm7 = vcmp.gt.f32.partialorder %v8857_v57, 0.0 }
 0x15a   : > { %v8844_v3 = vpop.f32.mrb[57].mxu1  ;;  %v7326_v63 = vpop.eup %7325  ;;  %v8891_v37 = vsel %vm1270_vm2, %v8739_v20, %v6011_v2  ;;  %7333 = vpow2.f32 %v1105_v40  ;;  %vm1273_vm8 = vcmp.gt.f32.partialorder %v8859_v47, 0.0 }
 0x15b   : > { %v5980_v42 = vadd.f32 -1.0, %v7326_v63  ;;  %v7328_v45 = vpop.eup %7327  ;;  %7335 = vpow2.f32 %v1329_v51  ;;  %v1107_v48 = vmul.f32 1.442695, %v8882_v14  ;;  %v1331_v13 = vmul.f32 1.442695, %v8884_v36 }
 0x15c   : > { %v8867_v60 = vpop.f32.mrb[58].mxu0  ;;  %v6012_v2 = vadd.f32 -1.0, %v7328_v45  ;;  %v1796_v63 = vpack.c.bf16 %v8701_v54, %v8673_v11  ;;  %v702_v51 = vadd.f32 %v8770_v18, %v8070_v22  ;;  %vm1050_vm9 = vcmp.gt.f32.partialorder %v8882_v14, 0.0 }
 0x15d   : > { %v8869_v62 = vpop.f32.mrb[58].mxu1  ;;  %v8874_v1 = vpop.f32.mrb[59].mxu0  ;;  %v8904_v20 = vsel %vm1047_vm3, %v8766_v19, %v5980_v42  ;;  %7337 = vpow2.f32 %v1107_v48  ;;  %v959_v42 = vadd.f32 %v8772_v16, %v8072_v23  ;;  %v961_v48 = vadd.f32 %v8781_v0, %v8077_v25 }
 0x15e   : > { %v8886_v55 = vpop.f32.mrb[59].mxu1  ;;  %v7330_v19 = vpop.eup %7329  ;;  %v8921_v45 = vsel %vm1271_vm4, %v8785_v32, %v6012_v2  ;;  %7339 = vpow2.f32 %v1331_v13  ;;  %2337 = vmatmul.mubr.bf16.gmra.mrb[96].mxu0 %v1796_v63  ;;  %v708_v16 = vadd.f32 %v8795_v33, %v8070_v22  ;;  %v8937_v4 = vmax.f32 %v702_v51, %v704_v17 }
 0x15f   : > { %v7332_v31 = vpop.eup %7331  ;;  %v5981_v52 = vadd.f32 -1.0, %v7330_v19  ;;  %v8939_v0 = vmax.f32 %v959_v42, %v961_v48  ;;  %v967_v17 = vadd.f32 %v8811_v27, %v8077_v25  ;;  %2346 = vmatprep.mubr.bf16.mxu0 %v1801_v44  ;;  %vm1274_vm10 = vcmp.gt.f32.partialorder %v8884_v36, 0.0 }
 0x160   : > { %v8897_v30 = vpop.f32.mrb[60].mxu0  ;;  %v6013_v13 = vadd.f32 -1.0, %v7332_v31  ;;  %v710_v31 = vadd.f32 %v8809_v15, %v8075_v24  ;;  %vm1051_vm11 = vcmp.gt.f32.partialorder %v8937_v4, 0.0 }
 0x161   : > { %v8899_v10 = vpop.f32.mrb[60].mxu1  ;;  %v8908_v28 = vpop.f32.mrb[61].mxu0  ;;  %v8948_v33 = vsel %vm1048_vm5, %v8805_v43, %v5981_v52  ;;  %v1109_v52 = vmul.f32 1.442695, %v8937_v4  ;;  %v1333_v43 = vmul.f32 1.442695, %v8939_v0  ;;  %v8968_v48 = vmax.f32 %v965_v46, %v967_v17 }
 0x162   : > { %v8910_v40 = vpop.f32.mrb[61].mxu1  ;;  %v8959_v51 = vsel %vm1272_vm6, %v8807_v58, %v6013_v13  ;;  %v8966_v15 = vmax.f32 %v708_v16, %v710_v31  ;;  %v1800_v13 = vpack.c.bf16 %v8802_v29, %v8750_v50  ;;  %v714_v16 = vadd.f32 %v8829_v21, %v8070_v22 }
 0x163   : > { %7341 = vpow2.f32 %v1109_v52  ;;  %v1335_v31 = vmul.f32 1.442695, %v8968_v48  ;;  %v971_v17 = vadd.f32 %v8831_v39, %v8072_v23  ;;  %v973_v21 = vadd.f32 %v8844_v3, %v8077_v25 }
 0x164   : > { %v8932_v32 = vpop.f32.mrb[62].mxu0  ;;  %v7334_v27 = vpop.eup %7333  ;;  %7343 = vpow2.f32 %v1333_v43  ;;  %v1111_v26 = vmul.f32 1.442695, %v8966_v15  ;;  %v716_v43 = vadd.f32 %v8842_v8, %v8075_v24  ;;  %v977_v8 = vadd.f32 %v8869_v62, %v8072_v23 }
 0x165   : > { %v8934_v2 = vpop.f32.mrb[62].mxu1  ;;  %v8941_v19 = vpop.f32.mrb[63].mxu0  ;;  %v5982_v42 = vadd.f32 -1.0, %v7334_v27  ;;  %vm1275_vm12 = vcmp.gt.f32.partialorder %v8939_v0, 0.0  ;;  %v722_v62 = vadd.f32 %v8874_v1, %v8075_v24  ;;  %vm1052_vm13 = vcmp.gt.f32.partialorder %v8966_v15, 0.0 }
 0x166   : > { %v8943_v63 = vpop.f32.mrb[63].mxu1  ;;  %v7336_v18 = vpop.eup %7335  ;;  %7345 = vpow2.f32 %v1111_v26  ;;  %2347 = vmatmul.mubr.bf16.gmra.mrb[100].mxu0 %v1800_v13  ;;  %v8997_v26 = vmax.f32 %v714_v16, %v716_v43  ;;  %v1805_v13 = vpack.c.bf16 %v8891_v37, %v8849_v49  ;;  %v983_v1 = vadd.f32 %v8899_v10, %v8072_v23 }
 0x167   : > { %v6014_v44 = vadd.f32 -1.0, %v7336_v18  ;;  %v7338_v52 = vpop.eup %7337  ;;  %v8984_v58 = vsel %vm1049_vm7, %v8857_v57, %v5982_v42  ;;  %7347 = vpow2.f32 %v1335_v31  ;;  %v8999_v42 = vmax.f32 %v971_v17, %v973_v21 }
 0x168   : > { %v7340_v18 = vpop.eup %7339  ;;  %v5983_v39 = vadd.f32 -1.0, %v7338_v52  ;;  %2356 = vmatprep.mubr.bf16.mxu0 %v1805_v13  ;;  %v979_v17 = vadd.f32 %v8886_v55, %v8077_v25  ;;  %v726_v52 = vadd.f32 %v8897_v30, %v8070_v22  ;;  %vm1276_vm14 = vcmp.gt.f32.partialorder %v8968_v48, 0.0 }
 0x169   : > { %v8993_v27 = vsel %vm1273_vm8, %v8859_v47, %v6014_v44  ;;  %v6015_v57 = vadd.f32 -1.0, %v7340_v18  ;;  %v720_v47 = vadd.f32 %v8867_v60, %v8070_v22  ;;  %v1337_v60 = vmul.f32 1.442695, %v8999_v42 }
 0x16a   : > { %v9004_v3 = vsel %vm1050_vm9, %v8882_v14, %v5983_v39  ;;  %v1113_v14 = vmul.f32 1.442695, %v8997_v26  ;;  %v9033_v18 = vmax.f32 %v977_v8, %v979_v17  ;;  %v985_v30 = vadd.f32 %v8910_v40, %v8077_v25 }
 0x16b   : > { %v9015_v16 = vsel %vm1274_vm10, %v8884_v36, %v6015_v57  ;;  %v1804_v36 = vpack.c.bf16 %v8879_v41, %v8836_v7  ;;  %v9031_v21 = vmax.f32 %v720_v47, %v722_v62  ;;  %v728_v57 = vadd.f32 %v8908_v28, %v8075_v24 }
 0x16c   : > { %7349 = vpow2.f32 %v1113_v14  ;;  %vm1053_vm15 = vcmp.gt.f32.partialorder %v8997_v26, 0.0  ;;  %v1339_v28 = vmul.f32 1.442695, %v9033_v18  ;;  %v9054_v40 = vmax.f32 %v983_v1, %v985_v30 }
 0x16d   : > { %v7342_v43 = vpop.eup %7341  ;;  %7351 = vpow2.f32 %v1337_v60  ;;  %v1115_v14 = vmul.f32 1.442695, %v9031_v21  ;;  %v9052_v62 = vmax.f32 %v726_v52, %v728_v57  ;;  %vm1277_vm0 = vcmp.gt.f32.partialorder %v8999_v42, 0.0 }
 0x16e   : > { %v7344_v39 = vpop.eup %7343  ;;  %v5984_v55 = vadd.f32 -1.0, %v7342_v43  ;;  %2357 = vmatmul.mubr.bf16.gmra.mrb[104].mxu0 %v1804_v36  ;;  %v1341_v1 = vmul.f32 1.442695, %v9054_v40  ;;  %v989_v57 = vadd.f32 %v8934_v2, %v8072_v23  ;;  %vm1054_vm2 = vcmp.gt.f32.partialorder %v9031_v21, 0.0 }
 0x16f   : > { %v6016_v13 = vadd.f32 -1.0, %v7344_v39  ;;  %7353 = vpow2.f32 %v1115_v14  ;;  %v991_v23 = vadd.f32 %v8943_v63, %v8077_v25  ;;  %vm1278_vm3 = vcmp.gt.f32.partialorder %v9033_v18, 0.0 }
 0x170   : > { %v7346_v60 = vpop.eup %7345  ;;  %v9048_v10 = vsel %vm1051_vm11, %v8937_v4, %v5984_v55  ;;  %7355 = vpow2.f32 %v1339_v28  ;;  %v1117_v55 = vmul.f32 1.442695, %v9052_v62  ;;  %v1808_v28 = vpack.c.bf16 %v8948_v33, %v8904_v20 }
 0x171   : > { %v7348_v17 = vpop.eup %7347  ;;  %v9059_v36 = vsel %vm1275_vm12, %v8939_v0, %v6016_v13  ;;  %v5985_v43 = vadd.f32 -1.0, %v7346_v60  ;;  %v732_v0 = vadd.f32 %v8932_v32, %v8070_v22  ;;  %v734_v22 = vadd.f32 %v8941_v19, %v8075_v24  ;;  %v11469_v13 = vld [vmem:[#allocation10_spill] sm:$0xff] }
 0x172   : > { %v6017_v4 = vadd.f32 -1.0, %v7348_v17  ;;  %7357 = vpow2.f32 %v1117_v55  ;;  %v9096_v24 = vmax.f32 %v989_v57, %v991_v23  ;;  %v1813_v25 = vpack.c.bf16 %v9015_v16, %v8993_v27 }
 0x173   : > { %v9067_v52 = vsel %vm1052_vm13, %v8966_v15, %v5985_v43  ;;  %v1809_v15 = vpack.c.bf16 %v8959_v51, %v8921_v45  ;;  %7359 = vpow2.f32 %v1341_v1  ;;  %vm1055_vm4 = vcmp.gt.f32.partialorder %v9052_v62, 0.0 }
 0x174   : > { %v9077_v30 = vsel %vm1276_vm14, %v8968_v48, %v6017_v4  ;;  %v9094_v4 = vmax.f32 %v732_v0, %v734_v22  ;;  %v1812_v1 = vpack.c.bf16 %v9004_v3, %v8984_v58  ;;  %vm1279_vm5 = vcmp.gt.f32.partialorder %v9054_v40, 0.0 }
 0x175   : > { %2366 = vmatprep.mubr.bf16.mxu0 %v1809_v15  ;;  %v11443_v2 = vrot.slane %v8158_v61, 1  ;;  %v11449_v48 = vrot.slane %v8167_v5, 1  ;;  %vm1280_vm7 = vcmp.gt.f32.partialorder %v9096_v24, 0.0 }
 0x176   : > { %v7350_v32 = vpop.eup %7349  ;;  %2367 = vmatmul.mubr.bf16.gmra.mrb[108].mxu0 %v1808_v28  ;;  %v1119_v57 = vmul.f32 1.442695, %v9094_v4  ;;  %vm1056_vm6 = vcmp.gt.f32.partialorder %v9094_v4, 0.0 }
 0x177   : > { %v7352_v17 = vpop.eup %7351  ;;  %v5986_v43 = vadd.f32 -1.0, %v7350_v32  ;;  %2376 = vmatprep.mubr.bf16.mxu0 %v1813_v25  ;;  %v1343_v32 = vmul.f32 1.442695, %v9096_v24  ;;  %v1817_v25 = vpack.c.bf16 %v9077_v30, %v9059_v36 }
 0x178   : > { %v6018_v19 = vadd.f32 -1.0, %v7352_v17  ;;  %v1506_v17 = vld [vmem:[#allocation2 + $0x8] sm:$0xfe]  ;;  %7361 = vpow2.f32 %v1119_v57  ;;  %v11442_v57 = vrot.slane %v8172_v12, 1 }
 0x179   : > { %v9108_v0 = vsel %vm1053_vm15, %v8997_v26, %v5986_v43  ;;  %v7354_v43 = vpop.eup %7353  ;;  %7363 = vpow2.f32 %v1343_v32  ;;  %v1577_v63 = vrot.slane %v1506_v17, 1  ;;  %v11446_v17 = vrot.slane %v8208_v53, 1  ;;  %v11460_v53 = vld [vmem:[#allocation9_spill] sm:$0xff] }
 0x17a   : > { %v9117_v23 = vsel %vm1277_vm0, %v8999_v42, %v6018_v19  ;;  %v7356_v15 = vpop.eup %7355  ;;  %v5987_v60 = vadd.f32 -1.0, %v7354_v43  ;;  %v1816_v42 = vpack.c.bf16 %v9067_v52, %v9048_v10  ;;  %v9135_v55 = vsel %vm1573_vm1, %v11443_v2, %v11442_v57 }
 0x17b   : > { %v6019_v28 = vadd.f32 -1.0, %v7356_v15  ;;  %v11444_v43 = vrot.slane %v8195_v34, 1  ;;  %v11445_v15 = vmov %v11442_v57  ;;  %v11448_v57 = vrot.slane %v8188_v38, 1 }
 0x17c   : > { %v7358_v22 = vpop.eup %7357  ;;  %v9140_v32 = vsel %vm1054_vm2, %v9031_v21, %v5987_v60  ;;  %v11461_v34 = vrot.slane %v11460_v53, 1  ;;  %v11471_v14 = vrot.slane %v11460_v53, 1  ;;  %v11479_v53 = vld [vmem:[#allocation19_spill] sm:$0xff] }
 0x17d   : > { %v9147_v26 = vsel %vm1573_vm1, %v11445_v15, %v11444_v43  ;;  %v11447_v19 = vmov %v11444_v43  ;;  %v9161_v21 = vsel %vm1573_vm1, %v11449_v48, %v11448_v57  ;;  %v7360_v60 = vpop.eup %7359  ;;  %v9166_v12 = vsel %vm1278_vm3, %v9033_v18, %v6019_v28 }
 0x17e   : > { %v9154_v2 = vsel %vm1573_vm1, %v11447_v19, %v11446_v17  ;;  %v5988_v43 = vadd.f32 -1.0, %v7358_v22  ;;  %v6020_v15 = vadd.f32 -1.0, %v7360_v60  ;;  %2377 = vmatmul.mubr.bf16.gmra.mrb[112].mxu0 %v1812_v1  ;;  %v1821_v48 = vpack.c.bf16 %v9166_v12, %v9117_v23 }
 0x17f   : > { %v11450_v18 = vrot.slane %v8158_v61, 1  ;;  %2386 = vmatprep.mubr.bf16.mxu0 %v1817_v25  ;;  %v11451_v57 = vrot.slane %v8202_v35, 1  ;;  %v11452_v60 = vrot.slane %v8188_v38, 1  ;;  %v11459_v25 = vrot.slane %v8202_v35, 1 }
 0x180   : > { %v9184_v28 = vsel %vm1055_vm4, %v9052_v62, %v5988_v43  ;;  %v11453_v43 = vrot.slane %v8243_v59, 1 }
 0x181   : > { %v9179_v22 = vsel %vm1573_vm1, %v1577_v63, %v11450_v18  ;;  %v9195_v61 = vsel %vm1573_vm1, %v11452_v60, %v11451_v57  ;;  %v9200_v63 = vsel %vm1279_vm5, %v9054_v40, %v6020_v15  ;;  %v11454_v18 = vmov %v11446_v17  ;;  %v11457_v15 = vld [vmem:[#allocation8_spill] sm:$0xff] }
 0x182   : > { %v9210_v1 = vsel %vm1573_vm1, %v11454_v18, %v11453_v43  ;;  %v11455_v57 = vrot.slane %v8275_v56, 1  ;;  %v11456_v60 = vmov %v11453_v43  ;;  %v11458_v17 = vrot.slane %v11457_v15, 1 }
 0x184   : > { %v9218_v40 = vsel %vm1573_vm1, %v11456_v60, %v11455_v57  ;;  %v9225_v62 = vsel %vm1573_vm1, %v11459_v25, %v11458_v17  ;;  %v11462_v43 = vmov %v11458_v17  ;;  %v11463_v60 = vld [vmem:[#allocation11_spill] sm:$0xff]  ;;  %v11465_v35 = vmov %v11455_v57 }
 0x185   : > { %v9232_v18 = vsel %vm1573_vm1, %v11462_v43, %v11461_v34  ;;  %v11464_v38 = vrot.slane %v11463_v60, 1  ;;  %v11466_v25 = vld [vmem:[#allocation15_spill] sm:$0xff]  ;;  %v7362_v43 = vpop.eup %7361  ;;  %v11470_v57 = vrot.slane %v11469_v13, 1 }
 0x186   : > { %v11467_v5 = vrot.slane %v11466_v25, 1  ;;  %v11478_v8 = vrot.slane %v11466_v25, 1  ;;  %v7364_v39 = vpop.eup %7363  ;;  %v5989_v31 = vadd.f32 -1.0, %v7362_v43  ;;  %2387 = vmatmul.mubr.bf16.gmra.mrb[116].mxu0 %v1816_v42  ;;  %v11494_v43 = vld [vmem:[#allocation20_spill] sm:$0xff]  ;;  %v11498_v42 = vld [vmem:[#allocation22_spill] sm:$0xff] }
 0x187   : > { %v9243_v17 = vsel %vm1573_vm1, %v11465_v35, %v11464_v38  ;;  %v11468_v15 = vmov %v11464_v38  ;;  %v9259_v56 = vsel %vm1573_vm1, %v11471_v14, %v11470_v57  ;;  %v11473_v38 = vld [vmem:[#allocation14_spill] sm:$0xff]  ;;  %v11475_v19 = vmov %v11470_v57  ;;  %2396 = vmatprep.mubr.bf16.mxu0 %v1821_v48  ;;  %v11506_v48 = vld [vmem:[#allocation27_spill] sm:$0xff] }
 0x188   : > { %v9250_v34 = vsel %vm1573_vm1, %v11468_v15, %v11467_v5  ;;  %11472 = vst [vmem:[#allocation8_spill] sm:$0xff] %v9259_v56  ;;  %v11474_v35 = vrot.slane %v11473_v38, 1  ;;  %v11476_v5 = vld [vmem:[#allocation17_spill] sm:$0xff]  ;;  %v11480_v57 = vrot.slane %v11479_v53, 1  ;;  %v11484_v46 = vrot.slane %v11473_v38, 1 }
 0x189   : > { %v11477_v15 = vrot.slane %v11476_v5, 1  ;;  %v11490_v56 = vrot.slane %v11479_v53, 1  ;;  %v11495_v53 = vrot.slane %v11494_v43, 1 }
 0x18a   : > { %v9266_v60 = vsel %vm1573_vm1, %v11475_v19, %v11474_v35  ;;  %v11482_v19 = vld [vmem:[#allocation16_spill] sm:$0xff] }
 0x18b   : > { %v9273_v59 = vsel %vm1573_vm1, %v11478_v8, %v11477_v15  ;;  %v11481_v47 = vmov %v11477_v15  ;;  %v11483_v35 = vrot.slane %v11482_v19, 1  ;;  %v6021_v8 = vadd.f32 -1.0, %v7364_v39  ;;  %v11485_v15 = vld [vmem:[#allocation18_spill] sm:$0xff] }
 0x18c   : > { %v9282_v13 = vsel %vm1573_vm1, %v11481_v47, %v11480_v57  ;;  %v11486_v14 = vrot.slane %v11485_v15, 1  ;;  %v11488_v47 = vld [vmem:[#allocation21_spill] sm:$0xff] }
 0x18d   : > { %v9289_v25 = vsel %vm1573_vm1, %v11484_v46, %v11483_v35  ;;  %v11487_v44 = vmov %v11483_v35  ;;  %v11489_v57 = vrot.slane %v11488_v47, 1  ;;  %v1184_v46 = vsel %vm1056_vm6, %v9094_v4, %v5989_v31  ;;  %v11491_v35 = vld [vmem:[#allocation23_spill] sm:$0xff] }
 0x18e   : > { %v9298_v5 = vsel %vm1573_vm1, %v11487_v44, %v11486_v14  ;;  %v11492_v19 = vrot.slane %v11491_v35, 1  ;;  %1216 = vst [vmem:[#allocation2 + $0x1f0] sm:$0xff] %v1184_v46  ;;  %v1408_v31 = vsel %vm1280_vm7, %v9096_v24, %v6021_v8  ;;  %v11499_v47 = vrot.slane %v11498_v42, 1 }
 0x18f   : > { %v9305_v38 = vsel %vm1573_vm1, %v11490_v56, %v11489_v57  ;;  %v11493_v44 = vmov %v11489_v57  ;;  %v11496_v56 = vrot.slane %v11485_v15, 1  ;;  %v11502_v15 = vld [vmem:[#allocation25_spill] sm:$0xff]  ;;  %1440 = vst [vmem:[#allocation2 + $0x1f8] sm:$0xff] %v1408_v31  ;;  %v11507_v8 = vrot.slane %v11506_v48, 1 }
 0x190   : > { %v9317_v14 = vsel %vm1573_vm1, %v11493_v44, %v11492_v19  ;;  %v11500_v19 = vmov %v11495_v53  ;;  %v11503_v39 = vrot.slane %v11502_v15, 1  ;;  %v11511_v4 = vrot.slane %v11498_v42, 1  ;;  %v11523_v15 = vld [vmem:[#allocation28_spill] sm:$0xff] }
 0x191   : > { %v9324_v57 = vsel %vm1573_vm1, %v11496_v56, %v11495_v53  ;;  %v9336_v44 = vsel %vm1573_vm1, %v11500_v19, %v11499_v47  ;;  %v11504_v53 = vrot.slane %v11491_v35, 1  ;;  %v11509_v47 = vld [vmem:[#allocation24_spill] sm:$0xff]  ;;  %v11518_v42 = vmov %v11507_v8 }
 0x192   : > { %11497 = vst [vmem:[#allocation9_spill] sm:$0xff] %v9324_v57  ;;  %11501 = vst [vmem:[#allocation11_spill] sm:$0xff] %v9336_v44  ;;  %v11508_v56 = vmov %v11503_v39  ;;  %v11510_v19 = vrot.slane %v11509_v47, 1 }
 0x193   : > { %v9343_v46 = vsel %vm1573_vm1, %v11504_v53, %v11503_v39  ;;  %v9352_v43 = vsel %vm1573_vm1, %v11508_v56, %v11507_v8  ;;  %v11513_v39 = vld [vmem:[#allocation26_spill] sm:$0xff]  ;;  %v11516_v56 = vld [vmem:[#allocation29_spill] sm:$0xff] }
 0x194   : > { %11505 = vst [vmem:[#allocation15_spill] sm:$0xff] %v9343_v46  ;;  %v9359_v35 = vsel %vm1573_vm1, %v11511_v4, %v11510_v19  ;;  %v11514_v53 = vrot.slane %v11513_v39, 1  ;;  %v11515_v31 = vmov %v11510_v19  ;;  %v11517_v57 = vrot.slane %v11516_v56, 1  ;;  %v11520_v19 = vld [vmem:[#allocation30_spill] sm:$0xff]  ;;  %v11528_v56 = vld [vmem:[#allocation31_spill] sm:$0xff] }
 0x195   : > { %11512 = vst [vmem:[#allocation10_spill] sm:$0xff] %v9359_v35  ;;  %v11521_v44 = vrot.slane %v11520_v19, 1  ;;  %v11524_v46 = vrot.slane %v11523_v15, 1  ;;  %v11525_v8 = vrot.slane %v11513_v39, 1  ;;  %v11533_v15 = vrot.slane %v8701_v54, 1 }
 0x196   : > { %v9366_v24 = vsel %vm1573_vm1, %v11515_v31, %v11514_v53  ;;  %v9377_v4 = vsel %vm1573_vm1, %v11518_v42, %v11517_v57  ;;  %v11522_v47 = vmov %v11517_v57  ;;  %v11526_v57 = vrot.slane %v8673_v11, 1 }
 0x197   : > { %11519 = vst [vmem:[#allocation14_spill] sm:$0xff] %v9377_v4  ;;  %v9384_v53 = vsel %vm1573_vm1, %v11522_v47, %v11521_v44  ;;  %v9393_v35 = vsel %vm1573_vm1, %v11525_v8, %v11524_v46  ;;  %v11527_v48 = vmov %v11524_v46  ;;  %v11529_v44 = vrot.slane %v11528_v56, 1 }
 0x198   : > { %v9400_v42 = vsel %vm1573_vm1, %v11527_v48, %v11526_v57  ;;  %v11530_v47 = vrot.slane %v11520_v19, 1  ;;  %v11531_v46 = vrot.slane %v8763_v9, 1  ;;  %v9423_v48 = vsel %vm1573_vm1, %v11526_v57, %v11533_v15 }
 0x199   : > { %v11532_v8 = vmov %v11529_v44  ;;  %v11534_v19 = vrot.slane %v8750_v50, 1  ;;  %v11538_v57 = vrot.slane %v8849_v49, 1  ;;  %v11540_v56 = vrot.slane %v8802_v29, 1 }
 0x19a   : > { %v9407_v31 = vsel %vm1573_vm1, %v11530_v47, %v11529_v44  ;;  %v9416_v4 = vsel %vm1573_vm1, %v11532_v8, %v11531_v46  ;;  %v11535_v44 = vmov %v11533_v15  ;;  %v11536_v8 = vrot.slane %v8816_v6, 1 }
 0x19b   : > { %v9430_v47 = vsel %vm1573_vm1, %v11535_v44, %v11534_v19  ;;  %v11537_v11 = vmov %v11531_v46  ;;  %v11541_v46 = vrot.slane %v8750_v50, 1  ;;  %v11543_v9 = vrot.slane %v8836_v7, 1 }
 0x19c   : > { %v9441_v15 = vsel %vm1573_vm1, %v11537_v11, %v11536_v8  ;;  %v11539_v54 = vmov %v11536_v8  ;;  %v11544_v8 = vmov %v11540_v56  ;;  %v11545_v6 = vrot.slane %v8891_v37, 1 }
 0x19d   : > { %v9448_v19 = vsel %vm1573_vm1, %v11539_v54, %v11538_v57  ;;  %v9457_v39 = vsel %vm1573_vm1, %v11541_v46, %v11540_v56  ;;  %v9464_v11 = vsel %vm1573_vm1, %v11544_v8, %v11543_v9  ;;  %v11546_v50 = vpack.c.bf16 %v9140_v32, %v9108_v0  ;;  %v1503_v56 = vld [vmem:[#allocation2 + $0x1f0] sm:$0x3f] }
 0x19e   : > { %11542 = vst [vmem:[#allocation17_spill] sm:$0xff] %v9457_v39  ;;  %v9471_v54 = vsel %vm1573_vm1, %v11538_v57, %v11545_v6  ;;  %v11547_v29 = vrot.slane %v8921_v45, 1  ;;  %v11548_v9 = vmov %v11545_v6  ;;  %v11549_v49 = vrot.slane %v8879_v41, 1  ;;  %v1504_v39 = vld [vmem:[#allocation2 + $0x1f8] sm:$0x3f] }
 0x19f   : > { %2397 = vmatmul.mubr.bf16.gmra.mrb[120].mxu0 %v11546_v50  ;;  %v11550_v6 = vrot.slane %v8836_v7, 1  ;;  %v11552_v50 = vrot.slane %v8904_v20, 1  ;;  %v1824_v37 = vpack.c.bf16 %v1503_v56, %v9184_v28  ;;  %v11554_v7 = vrot.slane %v8959_v51, 1 }
 0x1a0   : > { %v9483_v8 = vsel %vm1573_vm1, %v11548_v9, %v11547_v29  ;;  %v11553_v44 = vmov %v11549_v49  ;;  %v1825_v41 = vpack.c.bf16 %v1504_v39, %v9200_v63  ;;  %v11559_v9 = vrot.slane %v8904_v20, 1 }
 0x1a1   : > { %v9490_v57 = vsel %vm1573_vm1, %v11550_v6, %v11549_v49  ;;  %v9497_v46 = vsel %vm1573_vm1, %v11553_v44, %v11552_v50  ;;  %v11555_v49 = vmov %v11547_v29  ;;  %v11556_v44 = vrot.slane %v8993_v27, 1 }
 0x1a2   : > { %11551 = vst [vmem:[#allocation19_spill] sm:$0xff] %v9490_v57  ;;  %v9509_v6 = vsel %vm1573_vm1, %v11555_v49, %v11554_v7  ;;  %v11557_v50 = vmov %v11554_v7  ;;  %v11558_v29 = vrot.slane %v8948_v33, 1  ;;  %v11560_v45 = vrot.slane %v8984_v58, 1  ;;  %2406 = vmatprep.mubr.bf16.mxu0 %v1825_v41 }
 0x1a3   : > { %v9517_v56 = vsel %vm1573_vm1, %v11557_v50, %v11556_v44  ;;  %v11562_v44 = vrot.slane %v9015_v16, 1  ;;  %v11563_v20 = vrot.slane %v8993_v27, 1  ;;  %v11571_v41 = vrot.slane %v9059_v36, 1 }
 0x1a4   : > { %v9524_v57 = vsel %vm1573_vm1, %v11559_v9, %v11558_v29  ;;  %v11561_v7 = vmov %v11558_v29  ;;  %v11564_v9 = vrot.slane %v9059_v36, 1  ;;  %v11567_v49 = vmov %v11560_v45 }
 0x1a5   : > { %v9531_v39 = vsel %vm1573_vm1, %v11561_v7, %v11560_v45  ;;  %v9542_v29 = vsel %vm1573_vm1, %v11563_v20, %v11562_v44  ;;  %v11565_v33 = vmov %v11562_v44  ;;  %v11566_v7 = vrot.slane %v9004_v3, 1 }
 0x1a6   : > { %v9549_v50 = vsel %vm1573_vm1, %v11565_v33, %v11564_v9  ;;  %v11568_v44 = vrot.slane %v9048_v10, 1  ;;  %v11570_v9 = vrot.slane %v9077_v30, 1  ;;  %v11574_v3 = vrot.slane %v9067_v52, 1 }
 0x1a7   : > { %v9558_v27 = vsel %vm1573_vm1, %v11567_v49, %v11566_v7  ;;  %v11569_v20 = vmov %v11566_v7  ;;  %v11572_v49 = vrot.slane %v9117_v23, 1  ;;  %v11575_v36 = vrot.slane %v9108_v0, 1  ;;  %2407 = vmatmul.mubr.bf16.gmra.mrb[124].mxu0 %v1824_v37  ;;  %v7126_v0 = vld [vmem:[%s11349_s4] sm:$0xff]   ;;  %v7128_v37 = vld [vmem:[%s11349_s4 + $0x8] sm:$0xff]  }
 0x1a8   : > { %v9565_v16 = vsel %vm1573_vm1, %v11569_v20, %v11568_v44  ;;  %v9572_v33 = vsel %vm1573_vm1, %v11571_v41, %v11570_v9  ;;  %v11573_v7 = vmov %v11570_v9  ;;  %v9586_v20 = vsel %vm1573_vm1, %v11568_v44, %v11574_v3 }
 0x1a9   : > { %v1814_v58 = vpack.c.bf16 %v9565_v16, %v9558_v27  ;;  %v1687_v45 = vsel %vm1573_vm1, %v11573_v7, %v11572_v49  ;;  %v11576_v9 = vmov %v11574_v3  ;;  %v11577_v30 = vrot.slane %v9166_v12, 1 }
 0x1aa   : > { %v1685_v41 = vsel %vm1573_vm1, %v11576_v9, %v11575_v36  ;;  %v1819_v27 = vpack.c.bf16 %v1687_v45, %v9572_v33  ;;  %v11578_v10 = vrot.slane %v9200_v63, 1  ;;  %v11580_v52 = vrot.slane %v9140_v32, 1  ;;  %v7125_v9 = vld [vmem:[%s11349_s4 + $0x40] sm:$0xff]  }
 0x1ab   : > { %v1818_v16 = vpack.c.bf16 %v1685_v41, %v9586_v20  ;;  %v1691_v7 = vsel %vm1573_vm1, %v11572_v49, %v11577_v30  ;;  %v11579_v3 = vmov %v11577_v30  ;;  %v11581_v33 = vrot.slane %v9184_v28, 1  ;;  %v7127_v41 = vld [vmem:[%s11349_s4 + $0x48] sm:$0xff]   ;;  %6398 = vmatprep.subr.bf16.mxu1 %v7125_v9  ;;  %v7129_v30 = vld [vmem:[%s11349_s4 + $0x50] sm:$0xff]   ;;  %v11598_v9 = vld [vmem:[#allocation9_spill] sm:$0xff] }
 0x1ac   : > { %v1695_v44 = vsel %vm1573_vm1, %v11579_v3, %v11578_v10  ;;  %v9610_v45 = vsel %vm1573_vm1, %v11575_v36, %v11580_v52  ;;  %v11582_v23 = vmov %v11580_v52  ;;  %v11583_v32 = vpack.c.bf16 %v9135_v55, %v9179_v22  ;;  %6399 = vmatpush3.bf16.msra.mxu1 %v7126_v0  ;;  %v7130_v49 = vld [vmem:[%s11349_s4 + $0x10] sm:$0xff]   ;;  %v7131_v22 = vld [vmem:[%s11349_s4 + $0x58] sm:$0xff]   ;;  %v7133_v52 = vld [vmem:[%s11349_s4 + $0x60] sm:$0xff]  }
 0x1ad   : > { %v1823_v51 = vpack.c.bf16 %v1695_v44, %v1691_v7  ;;  %v9617_v20 = vsel %vm1573_vm1, %v11582_v23, %v11581_v33  ;;  %6400 = vmatprep.subr.bf16.mxu1 %v7127_v41  ;;  %v11584_v7 = vld [vmem:[#allocation13_spill] sm:$0xff]  ;;  %v11585_v10 = vld [vmem:[#allocation12_spill] sm:$0xff]  ;;  %v11587_v3 = vpack.c.bf16 %v9154_v2, %v9147_v26  ;;  %v7134_v36 = vld [vmem:[%s11349_s4 + $0x20] sm:$0xff]   ;;  %v11589_v2 = vpack.c.bf16 %v9218_v40, %v9210_v1 }
 0x1ae   : > { %v1822_v12 = vpack.c.bf16 %v9617_v20, %v9610_v45  ;;  %2449 = vmatprep.mubr.bf16.mxu0 %v11583_v32  ;;  %v11586_v55 = vpack.c.bf16 %v11584_v7, %v11585_v10  ;;  %v7132_v44 = vld [vmem:[%s11349_s4 + $0x18] sm:$0xff]   ;;  %v11588_v45 = vpack.c.bf16 %v9195_v61, %v9161_v21  ;;  %v7135_v26 = vld [vmem:[%s11349_s4 + $0x68] sm:$0xff]   ;;  %v11590_v21 = vpack.c.bf16 %v9232_v18, %v9225_v62  ;;  %v11592_v23 = vld [vmem:[#allocation8_spill] sm:$0xff] }
 0x1af   : > { %v7136_v33 = vld [vmem:[%s11349_s4 + $0x28] sm:$0xff]   ;;  %v11591_v61 = vpack.c.bf16 %v9250_v34, %v9243_v17  ;;  %v11593_v20 = vpack.c.bf16 %v9266_v60, %v11592_v23  ;;  %v11594_v1 = vpack.c.bf16 %v9282_v13, %v9273_v59  ;;  %v11595_v40 = vpack.c.bf16 %v9298_v5, %v9289_v25  ;;  %v11602_v0 = vld [vmem:[#allocation10_spill] sm:$0xff] }
 0x1b0   : > { %6401 = vmatpush3.bf16.msra.mxu1 %v7128_v37  ;;  %2450 = vmatmul.mubr.bf16.vlgmr.msra.gmra.mrb[64].mxu0 %v11586_v55  ;;  %v11596_v62 = vpack.c.bf16 %v9317_v14, %v9305_v38  ;;  %v11597_v18 = vld [vmem:[#allocation11_spill] sm:$0xff]  ;;  %v11603_v59 = vpack.c.bf16 %v9366_v24, %v11602_v0  ;;  %v11604_v13 = vld [vmem:[#allocation14_spill] sm:$0xff]  ;;  %v11606_v5 = vpack.c.bf16 %v9400_v42, %v9393_v35 }
 0x1b1   : > { %6402 = vmatprep.subr.bf16.mxu1 %v7129_v30  ;;  %2459 = vmatprep.mubr.bf16.mxu0 %v11587_v3  ;;  %v11599_v17 = vpack.c.bf16 %v11597_v18, %v11598_v9  ;;  %v11600_v34 = vld [vmem:[#allocation15_spill] sm:$0xff]  ;;  %v11605_v25 = vpack.c.bf16 %v9384_v53, %v11604_v13  ;;  %v11607_v38 = vpack.c.bf16 %v9416_v4, %v9407_v31 }
 0x1b2   : > { %v11601_v60 = vpack.c.bf16 %v9352_v43, %v11600_v34  ;;  %v11608_v14 = vpack.c.bf16 %v9430_v47, %v9423_v48  ;;  %v11609_v24 = vpack.c.bf16 %v9448_v19, %v9441_v15  ;;  %v11610_v43 = vld [vmem:[#allocation17_spill] sm:$0xff]  ;;  %v11612_v35 = vpack.c.bf16 %v9483_v8, %v9471_v54  ;;  %v11613_v42 = vld [vmem:[#allocation19_spill] sm:$0xff]  ;;  %v1507_v8 = vld [vmem:[#allocation2 + $0x1f0] sm:$0x7f] }
 0x1b3   : > { %v11611_v53 = vpack.c.bf16 %v9464_v11, %v11610_v43  ;;  %v11614_v4 = vpack.c.bf16 %v9497_v46, %v11613_v42  ;;  %v11615_v31 = vpack.c.bf16 %v9517_v56, %v9509_v6  ;;  %v11616_v48 = vpack.c.bf16 %v9531_v39, %v9524_v57  ;;  %v1508_v15 = vld [vmem:[#allocation2 + $0x1f8] sm:$0x7f]  ;;  %v7137_v11 = vld [vmem:[%s11349_s4 + $0x70] sm:$0xff]  }
 0x1b4   : > { %6403 = vmatpush3.bf16.msra.mxu1 %v7130_v49  ;;  %v11617_v47 = vpack.c.bf16 %v9549_v50, %v9542_v29  ;;  %v1698_v19 = vrot.slane %v1508_v15, 1  ;;  %v11618_v54 = vrot.slane %v9200_v63, 1  ;;  %v1696_v6 = vrot.slane %v1507_v8, 1  ;;  %v7138_v56 = vld [vmem:[%s11349_s4 + $0x30] sm:$0xff]   ;;  %v7139_v63 = vld [vmem:[%s11349_s4 + $0x78] sm:$0xff]  }
 0x1b5   : > { %6404 = vmatprep.subr.bf16.mxu1 %v7131_v22  ;;  %v11619_v39 = vrot.slane %v9184_v28, 1  ;;  %v7140_v50 = vld [vmem:[%s11349_s4 + $0x38] sm:$0xff]   ;;  %v1892_v28 = vld [vmem:[%s11352_s7] ss:$4 sm:$0x3] }
 0x1b6   : > { %v1699_v46 = vsel %vm1573_vm1, %v11618_v54, %v1698_v19 }
 0x1b7   : > { %v1827_v57 = vpack.c.bf16 %v1698_v19, %v1699_v46 }
 0x1b8   : > { %6405 = vmatpush3.bf16.msra.mxu1 %v7132_v44  ;;  %2460 = vmatmul.mubr.bf16.gmra.mrb[68].mxu0 %v11588_v45 }
 0x1b9   : > { %6406 = vmatprep.subr.bf16.mxu1 %v7133_v52  ;;  %2469 = vmatprep.mubr.bf16.mxu0 %v11589_v2 }
 0x1bc   : > { %6407 = vmatpush3.bf16.msra.mxu1 %v7134_v36 }
 0x1bd   : > { %6408 = vmatprep.subr.bf16.mxu1 %v7135_v26 }
 0x1c0   : > { %6409 = vmatpush3.bf16.msra.mxu1 %v7136_v33  ;;  %2470 = vmatmul.mubr.bf16.gmra.mrb[72].mxu0 %v11590_v21 }
 0x1c1   : > { %2479 = vmatprep.mubr.bf16.mxu0 %v11591_v61  ;;  %6410 = vmatprep.subr.bf16.mxu1 %v7137_v11 }
 0x1c4   : > { %6411 = vmatpush3.bf16.msra.mxu1 %v7138_v56 }
 0x1c5   : > { %6412 = vmatprep.subr.bf16.mxu1 %v7139_v63 }
 0x1c8   : > { %2480 = vmatmul.mubr.bf16.gmra.mrb[76].mxu0 %v11593_v20  ;;  %6413 = vmatpush3.bf16.msra.mxu1 %v7140_v50 }
 0x1c9   : > { %2489 = vmatprep.mubr.bf16.mxu0 %v11594_v1 }
 0x1d0   : > { %2490 = vmatmul.mubr.bf16.gmra.mrb[80].mxu0 %v11595_v40 }
 0x1d1   : > { %2499 = vmatprep.mubr.bf16.mxu0 %v11596_v62 }
 0x1d8   : > { %2500 = vmatmul.mubr.bf16.gmra.mrb[84].mxu0 %v11599_v17 }
 0x1d9   : > { %2509 = vmatprep.mubr.bf16.mxu0 %v11601_v60 }
 0x1e0   : > { %2510 = vmatmul.mubr.bf16.gmra.mrb[88].mxu0 %v11603_v59 }
 0x1e1   : > { %2519 = vmatprep.mubr.bf16.mxu0 %v11605_v25 }
 0x1e8   : > { %2520 = vmatmul.mubr.bf16.gmra.mrb[92].mxu0 %v11606_v5 }
 0x1e9   : > { %2529 = vmatprep.mubr.bf16.mxu0 %v11607_v38 }
 0x1f0   : > { %2530 = vmatmul.mubr.bf16.gmra.mrb[96].mxu0 %v11608_v14 }
 0x1f1   : > { %2539 = vmatprep.mubr.bf16.mxu0 %v11609_v24 }
 0x1f8   : > { %2540 = vmatmul.mubr.bf16.gmra.mrb[100].mxu0 %v11611_v53 }
 0x1f9   : > { %2549 = vmatprep.mubr.bf16.mxu0 %v11612_v35 }
 0x200   : > { %2550 = vmatmul.mubr.bf16.gmra.mrb[104].mxu0 %v11614_v4 }
 0x201   : > { %2559 = vmatprep.mubr.bf16.mxu0 %v11615_v31 }
 0x208   : > { %2560 = vmatmul.mubr.bf16.gmra.mrb[108].mxu0 %v11616_v48 }
 0x209   : > { %2569 = vmatprep.mubr.bf16.mxu0 %v11617_v47 }
 0x210   : > { %2570 = vmatmul.mubr.bf16.gmra.mrb[112].mxu0 %v1814_v58  ;;  %v9753_v58 = vld [vmem:[%s11349_s4 + $0x80] sm:$0xff]  }
 0x211   : > { %2579 = vmatprep.mubr.bf16.mxu0 %v1819_v27  ;;  %6782 = vmatprep.subr.bf16.mxu1 %v9753_v58  ;;  %v11620_v27 = vld [vmem:[#allocation6_spill] sm:$0xff] }
 0x218   : > { %2580 = vmatmul.mubr.bf16.gmra.mrb[116].mxu0 %v1818_v16  ;;  %v9760_v16 = vrot.slane %v1892_v28, %v11620_v27 }
 0x219   : > { %2589 = vmatprep.mubr.bf16.mxu0 %v1823_v51  ;;  %v1697_v51 = vsel %vm1573_vm1, %v11619_v39, %v1696_v6 }
 0x21a   : > { %v1826_v29 = vpack.c.bf16 %v1696_v6, %v1697_v51 }
 0x220   : > { %2590 = vmatmul.mubr.bf16.gmra.mrb[120].mxu0 %v1822_v12  ;;  %v11621_v12 = vld [vmem:[#allocation7_spill] sm:$0xff] }
 0x221   : > { %2599 = vmatprep.mubr.bf16.mxu0 %v1827_v57  ;;  %v9763_v41 = vrot.slane %v1892_v28, %v11621_v12 }
 0x228   : > { %2600 = vmatmul.mubr.bf16.gmra.mrb[124].mxu0 %v1826_v29 }
 0x283   : > { %v2451_v32 = vpop.f32.mrb[64].mxu0 }
 0x284   : > { %v6890_v37 = vadd.f32 %v2451_v32, %v9760_v16  ;;  %v2453_v30 = vpop.f32.mrb[65].mxu0 }
 0x285   : > { %v6891_v49 = vadd.f32 %v2453_v30, %v9763_v41  ;;  %v2455_v7 = vpop.f32.mrb[66].mxu0 }
 0x286   : > { %v6892_v10 = vadd.f32 %v2455_v7, %v9760_v16  ;;  %v2457_v55 = vpop.f32.mrb[67].mxu0 }
 0x287   : > { %v2610_v22 = vmax.f32 %v6890_v37, %v6891_v49  ;;  %v6893_v3 = vadd.f32 %v2457_v55, %v9763_v41 }
 0x289   : > { %v2674_v44 = vmul.f32 1.442695, %v2610_v22  ;;  %v2611_v52 = vmax.f32 %v6892_v10, %v6893_v3  ;;  %vm2642_vm8 = vcmp.gt.f32.partialorder %v2610_v22, 0.0 }
 0x28b   : > { %7365 = vpow2.f32 %v2674_v44  ;;  %v2676_v36 = vmul.f32 1.442695, %v2611_v52  ;;  %v2461_v45 = vpop.f32.mrb[68].mxu0  ;;  %vm2643_vm9 = vcmp.gt.f32.partialorder %v2611_v52, 0.0 }
 0x28c   : > { %v6894_v26 = vadd.f32 %v2461_v45, %v9760_v16  ;;  %v2463_v2 = vpop.f32.mrb[69].mxu0 }
 0x28d   : > { %7367 = vpow2.f32 %v2676_v36  ;;  %v6895_v33 = vadd.f32 %v2463_v2, %v9763_v41  ;;  %v2465_v21 = vpop.f32.mrb[70].mxu0 }
 0x28e   : > { %v6896_v61 = vadd.f32 %v2465_v21, %v9760_v16  ;;  %v2467_v23 = vpop.f32.mrb[71].mxu0 }
 0x28f   : > { %v2612_v20 = vmax.f32 %v6894_v26, %v6895_v33  ;;  %v6897_v1 = vadd.f32 %v2467_v23, %v9763_v41 }
 0x291   : > { %v2678_v40 = vmul.f32 1.442695, %v2612_v20  ;;  %v2613_v62 = vmax.f32 %v6896_v61, %v6897_v1  ;;  %vm2644_vm10 = vcmp.gt.f32.partialorder %v2612_v20, 0.0 }
 0x293   : > { %7369 = vpow2.f32 %v2678_v40  ;;  %v2680_v18 = vmul.f32 1.442695, %v2613_v62  ;;  %v2471_v9 = vpop.f32.mrb[72].mxu0  ;;  %vm2645_vm11 = vcmp.gt.f32.partialorder %v2613_v62, 0.0 }
 0x294   : > { %v6898_v17 = vadd.f32 %v2471_v9, %v9760_v16  ;;  %v2473_v34 = vpop.f32.mrb[73].mxu0 }
 0x295   : > { %v7366_v60 = vpop.eup %7365  ;;  %7371 = vpow2.f32 %v2680_v18  ;;  %v6899_v0 = vadd.f32 %v2473_v34, %v9763_v41  ;;  %v2475_v59 = vpop.f32.mrb[74].mxu0  ;;  %v7142_v18 = vld [vmem:[%s11349_s4 + $0x88] sm:$0xff]  }
 0x296   : > { %v6086_v13 = vadd.f32 -1.0, %v7366_v60  ;;  %v6900_v25 = vadd.f32 %v2475_v59, %v9760_v16  ;;  %v2477_v5 = vpop.f32.mrb[75].mxu0 }
 0x297   : > { %v7368_v38 = vpop.eup %7367  ;;  %v2614_v14 = vmax.f32 %v6898_v17, %v6899_v0  ;;  %v6901_v24 = vadd.f32 %v2477_v5, %v9763_v41 }
 0x298   : > { %v9777_v43 = vsel %vm2642_vm8, %v2610_v22, %v6086_v13  ;;  %v6087_v53 = vadd.f32 -1.0, %v7368_v38 }
 0x299   : > { %2802 = vst [vmem:[#allocation3] sm:$0xff] %v9777_v43  ;;  %v2682_v35 = vmul.f32 1.442695, %v2614_v14  ;;  %v2615_v42 = vmax.f32 %v6900_v25, %v6901_v24  ;;  %vm2646_vm12 = vcmp.gt.f32.partialorder %v2614_v14, 0.0  ;;  %v7143_v24 = vld [vmem:[%s11349_s4 + $0x90] sm:$0xff]  }
 0x29a   : > { %v9780_v4 = vsel %vm2643_vm9, %v2611_v52, %v6087_v53 }
 0x29b   : > { %2803 = vst [vmem:[#allocation3 + $0x8] sm:$0xff] %v9780_v4  ;;  %7373 = vpow2.f32 %v2682_v35  ;;  %v2684_v31 = vmul.f32 1.442695, %v2615_v42  ;;  %v2481_v48 = vpop.f32.mrb[76].mxu0  ;;  %v2930_v47 = vpack.c.bf16 %v9780_v4, %v9777_v43  ;;  %vm2647_vm13 = vcmp.gt.f32.partialorder %v2615_v42, 0.0 }
 0x29c   : > { %v6902_v15 = vadd.f32 %v2481_v48, %v9760_v16  ;;  %v2483_v19 = vpop.f32.mrb[77].mxu0 }
 0x29d   : > { %v7370_v11 = vpop.eup %7369  ;;  %7375 = vpow2.f32 %v2684_v31  ;;  %v6903_v54 = vadd.f32 %v2483_v19, %v9763_v41  ;;  %v2485_v46 = vpop.f32.mrb[78].mxu0 }
 0x29e   : > { %v6088_v8 = vadd.f32 -1.0, %v7370_v11  ;;  %v6904_v57 = vadd.f32 %v2485_v46, %v9760_v16  ;;  %v2487_v6 = vpop.f32.mrb[79].mxu0  ;;  %v7144_v11 = vld [vmem:[%s11349_s4 + $0x98] sm:$0xff]  }
 0x29f   : > { %v7372_v56 = vpop.eup %7371  ;;  %v2616_v39 = vmax.f32 %v6902_v15, %v6903_v54  ;;  %v6905_v51 = vadd.f32 %v2487_v6, %v9763_v41 }
 0x2a0   : > { %v9789_v29 = vsel %vm2644_vm10, %v2612_v20, %v6088_v8  ;;  %v6089_v63 = vadd.f32 -1.0, %v7372_v56 }
 0x2a1   : > { %2804 = vst [vmem:[#allocation3 + $0x10] sm:$0xff] %v9789_v29  ;;  %v2686_v50 = vmul.f32 1.442695, %v2616_v39  ;;  %v9792_v28 = vmax.f32 %v6904_v57, %v6905_v51  ;;  %vm2648_vm14 = vcmp.gt.f32.partialorder %v2616_v39, 0.0 }
 0x2a2   : > { %v9794_v32 = vsel %vm2645_vm11, %v2613_v62, %v6089_v63  ;;  %v2866_v61 = vld [vmem:[#allocation3 + $0x1] sm:$0xff] }
 0x2a3   : > { %2805 = vst [vmem:[#allocation3 + $0x18] sm:$0xff] %v9794_v32  ;;  %7377 = vpow2.f32 %v2686_v50  ;;  %v2688_v37 = vmul.f32 1.442695, %v9792_v28  ;;  %v2491_v30 = vpop.f32.mrb[80].mxu0  ;;  %v2933_v49 = vpack.c.bf16 %v9794_v32, %v9789_v29  ;;  %vm2649_vm15 = vcmp.gt.f32.partialorder %v9792_v28, 0.0 }
 0x2a4   : > { %v6906_v7 = vadd.f32 %v2491_v30, %v9760_v16  ;;  %v2493_v10 = vpop.f32.mrb[81].mxu0 }
 0x2a5   : > { %v7374_v55 = vpop.eup %7373  ;;  %7379 = vpow2.f32 %v2688_v37  ;;  %v6907_v22 = vadd.f32 %v2493_v10, %v9763_v41  ;;  %v2495_v3 = vpop.f32.mrb[82].mxu0  ;;  %v7145_v37 = vld [vmem:[%s11349_s4 + $0xa0] sm:$0xff]  }
 0x2a6   : > { %v6090_v44 = vadd.f32 -1.0, %v7374_v55  ;;  %v6908_v52 = vadd.f32 %v2495_v3, %v9760_v16  ;;  %v2497_v36 = vpop.f32.mrb[83].mxu0 }
 0x2a7   : > { %v7376_v45 = vpop.eup %7375  ;;  %v9803_v26 = vmax.f32 %v6906_v7, %v6907_v22  ;;  %v6909_v2 = vadd.f32 %v2497_v36, %v9763_v41  ;;  %v7146_v36 = vld [vmem:[%s11349_s4 + $0xa8] sm:$0xff]  }
 0x2a8   : > { %v9806_v33 = vsel %vm2646_vm12, %v2614_v14, %v6090_v44  ;;  %v6091_v21 = vadd.f32 -1.0, %v7376_v45  ;;  %v2867_v23 = vld [vmem:[#allocation3 + $0x9] sm:$0xff] }
 0x2a9   : > { %2806 = vst [vmem:[#allocation3 + $0x20] sm:$0xff] %v9806_v33  ;;  %v2690_v20 = vmul.f32 1.442695, %v9803_v26  ;;  %v9810_v1 = vmax.f32 %v6908_v52, %v6909_v2  ;;  %v2931_v40 = vpack.c.bf16 %v2867_v23, %v2866_v61  ;;  %vm2650_vm0 = vcmp.gt.f32.partialorder %v9803_v26, 0.0 }
 0x2aa   : > { %v9812_v62 = vsel %vm2647_vm13, %v2615_v42, %v6091_v21 }
 0x2ab   : > { %2807 = vst [vmem:[#allocation3 + $0x28] sm:$0xff] %v9812_v62  ;;  %7381 = vpow2.f32 %v2690_v20  ;;  %v2692_v9 = vmul.f32 1.442695, %v9810_v1  ;;  %v2501_v17 = vpop.f32.mrb[84].mxu0  ;;  %3207 = vmatprep.mubr.bf16.mxu1 %v2931_v40  ;;  %v2936_v34 = vpack.c.bf16 %v9812_v62, %v9806_v33  ;;  %vm2651_vm2 = vcmp.gt.f32.partialorder %v9810_v1, 0.0 }
 0x2ac   : > { %v6910_v60 = vadd.f32 %v2501_v17, %v9760_v16  ;;  %v2503_v0 = vpop.f32.mrb[85].mxu0  ;;  %3208 = vmatmul.mubr.bf16.vlgmr.msra.gmra.mrb[64].mxu1 %v2930_v47  ;;  %v7147_v17 = vld [vmem:[%s11349_s4 + $0xb0] sm:$0xff]  }
 0x2ad   : > { %v7378_v59 = vpop.eup %7377  ;;  %7383 = vpow2.f32 %v2692_v9  ;;  %v6911_v13 = vadd.f32 %v2503_v0, %v9763_v41  ;;  %6783 = vmatpush3.bf16.msra.mxu1 %v9753_v58  ;;  %v2505_v25 = vpop.f32.mrb[86].mxu0  ;;  %v2868_v58 = vld [vmem:[#allocation3 + $0x11] sm:$0xff] }
 0x2ae   : > { %v6092_v5 = vadd.f32 -1.0, %v7378_v59  ;;  %v6912_v38 = vadd.f32 %v2505_v25, %v9760_v16  ;;  %v2507_v14 = vpop.f32.mrb[87].mxu0  ;;  %6784 = vmatprep.subr.bf16.mxu1 %v7142_v18 }
 0x2af   : > { %v7380_v43 = vpop.eup %7379  ;;  %v9828_v53 = vmax.f32 %v6910_v60, %v6911_v13  ;;  %v6913_v35 = vadd.f32 %v2507_v14, %v9763_v41 }
 0x2b0   : > { %v9831_v42 = vsel %vm2648_vm14, %v2616_v39, %v6092_v5  ;;  %v6093_v4 = vadd.f32 -1.0, %v7380_v43  ;;  %v2869_v31 = vld [vmem:[#allocation3 + $0x19] sm:$0xff] }
 0x2b1   : > { %2808 = vst [vmem:[#allocation3 + $0x30] sm:$0xff] %v9831_v42  ;;  %v2694_v48 = vmul.f32 1.442695, %v9828_v53  ;;  %v9836_v47 = vmax.f32 %v6912_v38, %v6913_v35  ;;  %v2934_v15 = vpack.c.bf16 %v2869_v31, %v2868_v58  ;;  %6785 = vmatpush3.bf16.msra.mxu1 %v7142_v18  ;;  %vm2652_vm3 = vcmp.gt.f32.partialorder %v9828_v53, 0.0 }
 0x2b2   : > { %v9839_v19 = vsel %vm2649_vm15, %v9792_v28, %v6093_v4  ;;  %6786 = vmatprep.subr.bf16.mxu1 %v7143_v24  ;;  %v2870_v10 = vld [vmem:[#allocation3 + $0x21] sm:$0xff] }
 0x2b3   : > { %2809 = vst [vmem:[#allocation3 + $0x38] sm:$0xff] %v9839_v19  ;;  %7385 = vpow2.f32 %v2694_v48  ;;  %v2696_v54 = vmul.f32 1.442695, %v9836_v47  ;;  %v2511_v46 = vpop.f32.mrb[88].mxu0  ;;  %3215 = vmatprep.mubr.bf16.mxu1 %v2934_v15  ;;  %v2939_v8 = vpack.c.bf16 %v9839_v19, %v9831_v42  ;;  %vm2653_vm4 = vcmp.gt.f32.partialorder %v9836_v47, 0.0 }
 0x2b4   : > { %v6914_v57 = vadd.f32 %v2511_v46, %v9760_v16  ;;  %v2513_v6 = vpop.f32.mrb[89].mxu0  ;;  %3216 = vmatmul.mubr.bf16.gmra.mrb[68].mxu1 %v2933_v49 }
 0x2b5   : > { %v7382_v56 = vpop.eup %7381  ;;  %7387 = vpow2.f32 %v2696_v54  ;;  %v6915_v39 = vadd.f32 %v2513_v6, %v9763_v41  ;;  %v2515_v51 = vpop.f32.mrb[90].mxu0  ;;  %6787 = vmatpush3.bf16.msra.mxu1 %v7143_v24  ;;  %v7148_v24 = vld [vmem:[%s11349_s4 + $0xb8] sm:$0xff]  }
 0x2b6   : > { %v6094_v63 = vadd.f32 -1.0, %v7382_v56  ;;  %v6916_v50 = vadd.f32 %v2515_v51, %v9760_v16  ;;  %v2517_v28 = vpop.f32.mrb[91].mxu0  ;;  %6788 = vmatprep.subr.bf16.mxu1 %v7144_v11 }
 0x2b7   : > { %v7384_v30 = vpop.eup %7383  ;;  %v9858_v29 = vmax.f32 %v6914_v57, %v6915_v39  ;;  %v6917_v32 = vadd.f32 %v2517_v28, %v9763_v41 }
 0x2b8   : > { %v9862_v49 = vsel %vm2650_vm0, %v9803_v26, %v6094_v63  ;;  %v6095_v7 = vadd.f32 -1.0, %v7384_v30  ;;  %v2871_v55 = vld [vmem:[#allocation3 + $0x29] sm:$0xff] }
 0x2b9   : > { %2810 = vst [vmem:[#allocation3 + $0x40] sm:$0xff] %v9862_v49  ;;  %v2698_v22 = vmul.f32 1.442695, %v9858_v29  ;;  %v9867_v3 = vmax.f32 %v6916_v50, %v6917_v32  ;;  %v2937_v44 = vpack.c.bf16 %v2871_v55, %v2870_v10  ;;  %6789 = vmatpush3.bf16.msra.mxu1 %v7144_v11  ;;  %vm2654_vm5 = vcmp.gt.f32.partialorder %v9858_v29, 0.0 }
 0x2ba   : > { %v9870_v52 = vsel %vm2651_vm2, %v9810_v1, %v6095_v7  ;;  %6790 = vmatprep.subr.bf16.mxu1 %v7145_v37  ;;  %v2872_v59 = vld [vmem:[#allocation3 + $0x31] sm:$0xff] }
 0x2bb   : > { %2811 = vst [vmem:[#allocation3 + $0x48] sm:$0xff] %v9870_v52  ;;  %7389 = vpow2.f32 %v2698_v22  ;;  %v2700_v45 = vmul.f32 1.442695, %v9867_v3  ;;  %v2521_v26 = vpop.f32.mrb[92].mxu0  ;;  %3223 = vmatprep.mubr.bf16.mxu1 %v2937_v44  ;;  %v2942_v2 = vpack.c.bf16 %v9870_v52, %v9862_v49  ;;  %vm2655_vm6 = vcmp.gt.f32.partialorder %v9867_v3, 0.0 }
 0x2bc   : > { %v6918_v21 = vadd.f32 %v2521_v26, %v9760_v16  ;;  %v2523_v61 = vpop.f32.mrb[93].mxu0  ;;  %3224 = vmatmul.mubr.bf16.gmra.mrb[72].mxu1 %v2936_v34 }
 0x2bd   : > { %v7386_v23 = vpop.eup %7385  ;;  %7391 = vpow2.f32 %v2700_v45  ;;  %v6919_v20 = vadd.f32 %v2523_v61, %v9763_v41  ;;  %v2525_v1 = vpop.f32.mrb[94].mxu0  ;;  %6791 = vmatpush3.bf16.msra.mxu1 %v7145_v37 }
 0x2be   : > { %v6096_v40 = vadd.f32 -1.0, %v7386_v23  ;;  %v6920_v18 = vadd.f32 %v2525_v1, %v9760_v16  ;;  %v2527_v9 = vpop.f32.mrb[95].mxu0  ;;  %6792 = vmatprep.subr.bf16.mxu1 %v7146_v36 }
 0x2bf   : > { %v7388_v60 = vpop.eup %7387  ;;  %v9889_v33 = vmax.f32 %v6918_v21, %v6919_v20  ;;  %v6921_v62 = vadd.f32 %v2527_v9, %v9763_v41 }
 0x2c0   : > { %v9893_v34 = vsel %vm2652_vm3, %v9828_v53, %v6096_v40  ;;  %v6097_v0 = vadd.f32 -1.0, %v7388_v60  ;;  %v2873_v13 = vld [vmem:[#allocation3 + $0x39] sm:$0xff] }
 0x2c1   : > { %2812 = vst [vmem:[#allocation3 + $0x50] sm:$0xff] %v9893_v34  ;;  %v2702_v25 = vmul.f32 1.442695, %v9889_v33  ;;  %v9898_v5 = vmax.f32 %v6920_v18, %v6921_v62  ;;  %v2940_v38 = vpack.c.bf16 %v2873_v13, %v2872_v59  ;;  %6793 = vmatpush3.bf16.msra.mxu1 %v7146_v36  ;;  %vm2656_vm7 = vcmp.gt.f32.partialorder %v9889_v33, 0.0 }
 0x2c2   : > { %v9901_v14 = vsel %vm2653_vm4, %v9836_v47, %v6097_v0  ;;  %6794 = vmatprep.subr.bf16.mxu1 %v7147_v17 }
 0x2c3   : > { %2813 = vst [vmem:[#allocation3 + $0x58] sm:$0xff] %v9901_v14  ;;  %7393 = vpow2.f32 %v2702_v25  ;;  %v2704_v43 = vmul.f32 1.442695, %v9898_v5  ;;  %v2531_v53 = vpop.f32.mrb[96].mxu0  ;;  %3231 = vmatprep.mubr.bf16.mxu1 %v2940_v38  ;;  %v2945_v35 = vpack.c.bf16 %v9901_v14, %v9893_v34  ;;  %vm2657_vm8 = vcmp.gt.f32.partialorder %v9898_v5, 0.0 }
 0x2c4   : > { %v6922_v4 = vadd.f32 %v2531_v53, %v9760_v16  ;;  %v2533_v58 = vpop.f32.mrb[97].mxu0  ;;  %3232 = vmatmul.mubr.bf16.gmra.mrb[76].mxu1 %v2939_v8  ;;  %v2874_v8 = vld [vmem:[#allocation3 + $0x41] sm:$0xff] }
 0x2c5   : > { %v7390_v31 = vpop.eup %7389  ;;  %7395 = vpow2.f32 %v2704_v43  ;;  %v6923_v48 = vadd.f32 %v2533_v58, %v9763_v41  ;;  %v2535_v47 = vpop.f32.mrb[98].mxu0  ;;  %6795 = vmatpush3.bf16.msra.mxu1 %v7147_v17 }
 0x2c6   : > { %v6098_v15 = vadd.f32 -1.0, %v7390_v31  ;;  %v6924_v11 = vadd.f32 %v2535_v47, %v9760_v16  ;;  %v2537_v54 = vpop.f32.mrb[99].mxu0  ;;  %6796 = vmatprep.subr.bf16.mxu1 %v7148_v24 }
 0x2c7   : > { %v7392_v46 = vpop.eup %7391  ;;  %v9917_v57 = vmax.f32 %v6922_v4, %v6923_v48  ;;  %v6925_v6 = vadd.f32 %v2537_v54, %v9763_v41 }
 0x2c8   : > { %v9921_v42 = vsel %vm2654_vm5, %v9858_v29, %v6098_v15  ;;  %v6099_v19 = vadd.f32 -1.0, %v7392_v46  ;;  %v2875_v56 = vld [vmem:[#allocation3 + $0x49] sm:$0xff] }
 0x2c9   : > { %2814 = vst [vmem:[#allocation3 + $0x60] sm:$0xff] %v9921_v42  ;;  %v2706_v39 = vmul.f32 1.442695, %v9917_v57  ;;  %v9926_v51 = vmax.f32 %v6924_v11, %v6925_v6  ;;  %v2943_v63 = vpack.c.bf16 %v2875_v56, %v2874_v8  ;;  %6797 = vmatpush3.bf16.msra.mxu1 %v7148_v24  ;;  %vm2658_vm9 = vcmp.gt.f32.partialorder %v9917_v57, 0.0 }
 0x2ca   : > { %v9929_v50 = vsel %vm2655_vm6, %v9867_v3, %v6099_v19  ;;  %v2876_v52 = vld [vmem:[#allocation3 + $0x51] sm:$0xff] }
 0x2cb   : > { %2815 = vst [vmem:[#allocation3 + $0x68] sm:$0xff] %v9929_v50  ;;  %7397 = vpow2.f32 %v2706_v39  ;;  %v2708_v28 = vmul.f32 1.442695, %v9926_v51  ;;  %v2541_v37 = vpop.f32.mrb[100].mxu0  ;;  %3239 = vmatprep.mubr.bf16.mxu1 %v2943_v63  ;;  %v2948_v30 = vpack.c.bf16 %v9929_v50, %v9921_v42  ;;  %vm2659_vm10 = vcmp.gt.f32.partialorder %v9926_v51, 0.0 }
 0x2cc   : > { %v6926_v29 = vadd.f32 %v2541_v37, %v9760_v16  ;;  %v2543_v32 = vpop.f32.mrb[101].mxu0  ;;  %3240 = vmatmul.mubr.bf16.gmra.mrb[80].mxu1 %v2942_v2 }
 0x2cd   : > { %v7394_v7 = vpop.eup %7393  ;;  %7399 = vpow2.f32 %v2708_v28  ;;  %v6927_v10 = vadd.f32 %v2543_v32, %v9763_v41  ;;  %v2545_v55 = vpop.f32.mrb[102].mxu0 }
 0x2ce   : > { %v6100_v22 = vadd.f32 -1.0, %v7394_v7  ;;  %v6928_v3 = vadd.f32 %v2545_v55, %v9760_v16  ;;  %v2547_v44 = vpop.f32.mrb[103].mxu0 }
 0x2cf   : > { %v7396_v36 = vpop.eup %7395  ;;  %v9942_v45 = vmax.f32 %v6926_v29, %v6927_v10  ;;  %v6929_v26 = vadd.f32 %v2547_v44, %v9763_v41 }
 0x2d0   : > { %v9946_v21 = vsel %vm2656_vm7, %v9889_v33, %v6100_v22  ;;  %v6101_v49 = vadd.f32 -1.0, %v7396_v36  ;;  %v2877_v2 = vld [vmem:[#allocation3 + $0x59] sm:$0xff] }
 0x2d1   : > { %2816 = vst [vmem:[#allocation3 + $0x70] sm:$0xff] %v9946_v21  ;;  %v2710_v61 = vmul.f32 1.442695, %v9942_v45  ;;  %v9951_v23 = vmax.f32 %v6928_v3, %v6929_v26  ;;  %v2946_v20 = vpack.c.bf16 %v2877_v2, %v2876_v52  ;;  %vm2660_vm11 = vcmp.gt.f32.partialorder %v9942_v45, 0.0 }
 0x2d2   : > { %v9954_v1 = vsel %vm2657_vm8, %v9898_v5, %v6101_v49  ;;  %v2878_v14 = vld [vmem:[#allocation3 + $0x61] sm:$0xff] }
 0x2d3   : > { %2817 = vst [vmem:[#allocation3 + $0x78] sm:$0xff] %v9954_v1  ;;  %7401 = vpow2.f32 %v2710_v61  ;;  %v2712_v40 = vmul.f32 1.442695, %v9951_v23  ;;  %v2551_v18 = vpop.f32.mrb[104].mxu0  ;;  %3247 = vmatprep.mubr.bf16.mxu1 %v2946_v20  ;;  %v2951_v9 = vpack.c.bf16 %v9954_v1, %v9946_v21  ;;  %vm2661_vm12 = vcmp.gt.f32.partialorder %v9951_v23, 0.0 }
 0x2d4   : > { %v6930_v17 = vadd.f32 %v2551_v18, %v9760_v16  ;;  %v2553_v60 = vpop.f32.mrb[105].mxu0  ;;  %3248 = vmatmul.mubr.bf16.gmra.mrb[84].mxu1 %v2945_v35 }
 0x2d5   : > { %v7398_v33 = vpop.eup %7397  ;;  %7403 = vpow2.f32 %v2712_v40  ;;  %v6931_v62 = vadd.f32 %v2553_v60, %v9763_v41  ;;  %v2555_v0 = vpop.f32.mrb[106].mxu0 }
 0x2d6   : > { %v6102_v59 = vadd.f32 -1.0, %v7398_v33  ;;  %v6932_v13 = vadd.f32 %v2555_v0, %v9760_v16  ;;  %v2557_v25 = vpop.f32.mrb[107].mxu0 }
 0x2d7   : > { %v7400_v5 = vpop.eup %7399  ;;  %v9967_v38 = vmax.f32 %v6930_v17, %v6931_v62  ;;  %v6933_v24 = vadd.f32 %v2557_v25, %v9763_v41 }
 0x2d8   : > { %v9971_v43 = vsel %vm2658_vm9, %v9917_v57, %v6102_v59  ;;  %v6103_v34 = vadd.f32 -1.0, %v7400_v5  ;;  %v2879_v53 = vld [vmem:[#allocation3 + $0x69] sm:$0xff] }
 0x2d9   : > { %2818 = vst [vmem:[#allocation3 + $0x80] sm:$0xff] %v9971_v43  ;;  %v2714_v35 = vmul.f32 1.442695, %v9967_v38  ;;  %v9976_v4 = vmax.f32 %v6932_v13, %v6933_v24  ;;  %v2949_v58 = vpack.c.bf16 %v2879_v53, %v2878_v14  ;;  %vm2662_vm13 = vcmp.gt.f32.partialorder %v9967_v38, 0.0 }
 0x2da   : > { %v9979_v31 = vsel %vm2659_vm10, %v9926_v51, %v6103_v34  ;;  %v2880_v28 = vld [vmem:[#allocation3 + $0x71] sm:$0xff] }
 0x2db   : > { %2819 = vst [vmem:[#allocation3 + $0x88] sm:$0xff] %v9979_v31  ;;  %7405 = vpow2.f32 %v2714_v35  ;;  %v2716_v48 = vmul.f32 1.442695, %v9976_v4  ;;  %v2561_v47 = vpop.f32.mrb[108].mxu0  ;;  %3255 = vmatprep.mubr.bf16.mxu1 %v2949_v58  ;;  %v2954_v15 = vpack.c.bf16 %v9979_v31, %v9971_v43  ;;  %vm2663_vm14 = vcmp.gt.f32.partialorder %v9976_v4, 0.0 }
 0x2dc   : > { %v6934_v11 = vadd.f32 %v2561_v47, %v9760_v16  ;;  %v2563_v54 = vpop.f32.mrb[109].mxu0  ;;  %3256 = vmatmul.mubr.bf16.gmra.mrb[88].mxu1 %v2948_v30 }
 0x2dd   : > { %v7402_v46 = vpop.eup %7401  ;;  %7407 = vpow2.f32 %v2716_v48  ;;  %v6935_v57 = vadd.f32 %v2563_v54, %v9763_v41  ;;  %v2565_v6 = vpop.f32.mrb[110].mxu0 }
 0x2de   : > { %v6104_v42 = vadd.f32 -1.0, %v7402_v46  ;;  %v6936_v19 = vadd.f32 %v2565_v6, %v9760_v16  ;;  %v2567_v8 = vpop.f32.mrb[111].mxu0 }
 0x2df   : > { %v7404_v56 = vpop.eup %7403  ;;  %v9989_v39 = vmax.f32 %v6934_v11, %v6935_v57  ;;  %v6937_v51 = vadd.f32 %v2567_v8, %v9763_v41 }
 0x2e0   : > { %v9993_v63 = vsel %vm2660_vm11, %v9942_v45, %v6104_v42  ;;  %v6105_v50 = vadd.f32 -1.0, %v7404_v56  ;;  %v2881_v37 = vld [vmem:[#allocation3 + $0x79] sm:$0xff] }
 0x2e1   : > { %2820 = vst [vmem:[#allocation3 + $0x90] sm:$0xff] %v9993_v63  ;;  %v2718_v30 = vmul.f32 1.442695, %v9989_v39  ;;  %v9998_v29 = vmax.f32 %v6936_v19, %v6937_v51  ;;  %v2952_v32 = vpack.c.bf16 %v2881_v37, %v2880_v28  ;;  %vm2664_vm15 = vcmp.gt.f32.partialorder %v9989_v39, 0.0 }
 0x2e2   : > { %v10001_v7 = vsel %vm2661_vm12, %v9951_v23, %v6105_v50  ;;  %v2882_v40 = vld [vmem:[#allocation3 + $0x81] sm:$0xff] }
 0x2e3   : > { %2821 = vst [vmem:[#allocation3 + $0x98] sm:$0xff] %v10001_v7  ;;  %7409 = vpow2.f32 %v2718_v30  ;;  %v2720_v10 = vmul.f32 1.442695, %v9998_v29  ;;  %v2571_v55 = vpop.f32.mrb[112].mxu0  ;;  %3263 = vmatprep.mubr.bf16.mxu1 %v2952_v32  ;;  %v2957_v22 = vpack.c.bf16 %v10001_v7, %v9993_v63  ;;  %vm2665_vm0 = vcmp.gt.f32.partialorder %v9998_v29, 0.0 }
 0x2e4   : > { %v6938_v3 = vadd.f32 %v2571_v55, %v9760_v16  ;;  %v2573_v44 = vpop.f32.mrb[113].mxu0  ;;  %3264 = vmatmul.mubr.bf16.gmra.mrb[92].mxu1 %v2951_v9 }
 0x2e5   : > { %v7406_v36 = vpop.eup %7405  ;;  %7411 = vpow2.f32 %v2720_v10  ;;  %v6939_v45 = vadd.f32 %v2573_v44, %v9763_v41  ;;  %v2575_v26 = vpop.f32.mrb[114].mxu0 }
 0x2e6   : > { %v6106_v21 = vadd.f32 -1.0, %v7406_v36  ;;  %v6940_v49 = vadd.f32 %v2575_v26, %v9760_v16  ;;  %v2577_v52 = vpop.f32.mrb[115].mxu0 }
 0x2e7   : > { %v7408_v2 = vpop.eup %7407  ;;  %v10011_v61 = vmax.f32 %v6938_v3, %v6939_v45  ;;  %v6941_v23 = vadd.f32 %v2577_v52, %v9763_v41 }
 0x2e8   : > { %v10015_v20 = vsel %vm2662_vm13, %v9967_v38, %v6106_v21  ;;  %v6107_v1 = vadd.f32 -1.0, %v7408_v2  ;;  %v2883_v18 = vld [vmem:[#allocation3 + $0x89] sm:$0xff] }
 0x2e9   : > { %2822 = vst [vmem:[#allocation3 + $0xa0] sm:$0xff] %v10015_v20  ;;  %v2722_v9 = vmul.f32 1.442695, %v10011_v61  ;;  %v10020_v17 = vmax.f32 %v6940_v49, %v6941_v23  ;;  %v2955_v60 = vpack.c.bf16 %v2883_v18, %v2882_v40  ;;  %vm2666_vm2 = vcmp.gt.f32.partialorder %v10011_v61, 0.0 }
 0x2ea   : > { %v10023_v33 = vsel %vm2663_vm14, %v9976_v4, %v6107_v1  ;;  %v2884_v48 = vld [vmem:[#allocation3 + $0x91] sm:$0xff] }
 0x2eb   : > { %2823 = vst [vmem:[#allocation3 + $0xa8] sm:$0xff] %v10023_v33  ;;  %7413 = vpow2.f32 %v2722_v9  ;;  %v2724_v62 = vmul.f32 1.442695, %v10020_v17  ;;  %v2581_v0 = vpop.f32.mrb[116].mxu0  ;;  %3271 = vmatprep.mubr.bf16.mxu1 %v2955_v60  ;;  %v2960_v59 = vpack.c.bf16 %v10023_v33, %v10015_v20  ;;  %vm2667_vm3 = vcmp.gt.f32.partialorder %v10020_v17, 0.0 }
 0x2ec   : > { %v6942_v13 = vadd.f32 %v2581_v0, %v9760_v16  ;;  %v2583_v25 = vpop.f32.mrb[117].mxu0  ;;  %3272 = vmatmul.mubr.bf16.gmra.mrb[96].mxu1 %v2954_v15 }
 0x2ed   : > { %v7410_v5 = vpop.eup %7409  ;;  %7415 = vpow2.f32 %v2724_v62  ;;  %v6943_v38 = vadd.f32 %v2583_v25, %v9763_v41  ;;  %v2585_v24 = vpop.f32.mrb[118].mxu0 }
 0x2ee   : > { %v6108_v43 = vadd.f32 -1.0, %v7410_v5  ;;  %v6944_v34 = vadd.f32 %v2585_v24, %v9760_v16  ;;  %v2587_v14 = vpop.f32.mrb[119].mxu0 }
 0x2ef   : > { %v7412_v53 = vpop.eup %7411  ;;  %v10033_v35 = vmax.f32 %v6942_v13, %v6943_v38  ;;  %v6945_v4 = vadd.f32 %v2587_v14, %v9763_v41 }
 0x2f0   : > { %v10037_v58 = vsel %vm2664_vm15, %v9989_v39, %v6108_v43  ;;  %v6109_v31 = vadd.f32 -1.0, %v7412_v53  ;;  %v2885_v47 = vld [vmem:[#allocation3 + $0x99] sm:$0xff] }
 0x2f1   : > { %2824 = vst [vmem:[#allocation3 + $0xb0] sm:$0xff] %v10037_v58  ;;  %v2726_v15 = vmul.f32 1.442695, %v10033_v35  ;;  %v10042_v11 = vmax.f32 %v6944_v34, %v6945_v4  ;;  %v2958_v54 = vpack.c.bf16 %v2885_v47, %v2884_v48  ;;  %vm2668_vm4 = vcmp.gt.f32.partialorder %v10033_v35, 0.0 }
 0x2f2   : > { %v10045_v46 = vsel %vm2665_vm0, %v9998_v29, %v6109_v31  ;;  %v2886_v10 = vld [vmem:[#allocation3 + $0xa1] sm:$0xff] }
 0x2f3   : > { %2825 = vst [vmem:[#allocation3 + $0xb8] sm:$0xff] %v10045_v46  ;;  %7417 = vpow2.f32 %v2726_v15  ;;  %v2728_v57 = vmul.f32 1.442695, %v10042_v11  ;;  %v2591_v6 = vpop.f32.mrb[120].mxu0  ;;  %3279 = vmatprep.mubr.bf16.mxu1 %v2958_v54  ;;  %v2963_v42 = vpack.c.bf16 %v10045_v46, %v10037_v58  ;;  %vm2669_vm5 = vcmp.gt.f32.partialorder %v10042_v11, 0.0 }
 0x2f4   : > { %v6946_v19 = vadd.f32 %v2591_v6, %v9760_v16  ;;  %v2593_v8 = vpop.f32.mrb[121].mxu0  ;;  %3280 = vmatmul.mubr.bf16.gmra.mrb[100].mxu1 %v2957_v22 }
 0x2f5   : > { %v7414_v56 = vpop.eup %7413  ;;  %7419 = vpow2.f32 %v2728_v57  ;;  %v6947_v39 = vadd.f32 %v2593_v8, %v9763_v41  ;;  %v2595_v51 = vpop.f32.mrb[122].mxu0 }
 0x2f6   : > { %v6110_v63 = vadd.f32 -1.0, %v7414_v56  ;;  %v6948_v50 = vadd.f32 %v2595_v51, %v9760_v16  ;;  %v2597_v28 = vpop.f32.mrb[123].mxu0 }
 0x2f7   : > { %v7416_v37 = vpop.eup %7415  ;;  %v2638_v30 = vmax.f32 %v6946_v19, %v6947_v39  ;;  %v6949_v29 = vadd.f32 %v2597_v28, %v9763_v41  ;;  %v2899_v28 = vld [vmem:[#allocation3 + $0xa] sm:$0xff] }
 0x2f8   : > { %v2794_v32 = vsel %vm2666_vm2, %v10011_v61, %v6110_v63  ;;  %v6111_v7 = vadd.f32 -1.0, %v7416_v37  ;;  %v2887_v55 = vld [vmem:[#allocation3 + $0xa9] sm:$0xff] }
 0x2f9   : > { %2826 = vst [vmem:[#allocation3 + $0xc0] sm:$0xff] %v2794_v32  ;;  %v2730_v22 = vmul.f32 1.442695, %v2638_v30  ;;  %v2639_v3 = vmax.f32 %v6948_v50, %v6949_v29  ;;  %v2961_v44 = vpack.c.bf16 %v2887_v55, %v2886_v10  ;;  %vm2670_vm6 = vcmp.gt.f32.partialorder %v2638_v30, 0.0  ;;  %v2903_v10 = vld [vmem:[#allocation3 + $0x2a] sm:$0xff]  ;;  %v2900_v55 = vld [vmem:[#allocation3 + $0x12] sm:$0xff] }
 0x2fa   : > { %v2795_v36 = vsel %vm2667_vm3, %v10020_v17, %v6111_v7  ;;  %v2888_v62 = vld [vmem:[#allocation3 + $0xb1] sm:$0xff]  ;;  %v2901_v7 = vld [vmem:[#allocation3 + $0x1a] sm:$0xff] }
 0x2fb   : > { %2827 = vst [vmem:[#allocation3 + $0xc8] sm:$0xff] %v2795_v36  ;;  %7421 = vpow2.f32 %v2730_v22  ;;  %v2732_v45 = vmul.f32 1.442695, %v2639_v3  ;;  %v2601_v26 = vpop.f32.mrb[124].mxu0  ;;  %3287 = vmatprep.mubr.bf16.mxu1 %v2961_v44  ;;  %v2966_v21 = vpack.c.bf16 %v2795_v36, %v2794_v32  ;;  %vm2671_vm7 = vcmp.gt.f32.partialorder %v2639_v3, 0.0  ;;  %v7149_v32 = vld [vmem:[%s11349_s4 + $0x140] sm:$0xff]  }
 0x2fc   : > { %v6950_v49 = vadd.f32 %v2601_v26, %v9760_v16  ;;  %v2603_v52 = vpop.f32.mrb[125].mxu0  ;;  %3288 = vmatmul.mubr.bf16.gmra.mrb[104].mxu1 %v2960_v59  ;;  %6830 = vmatprep.subr.bf16.mxu0 %v7149_v32  ;;  %v2935_v22 = vpack.c.bf16 %v2901_v7, %v2900_v55  ;;  %v2905_v36 = vld [vmem:[#allocation3 + $0x3a] sm:$0xff]  ;;  %v2904_v26 = vld [vmem:[#allocation3 + $0x32] sm:$0xff] }
 0x2fd   : > { %v7418_v2 = vpop.eup %7417  ;;  %7423 = vpow2.f32 %v2732_v45  ;;  %v6951_v61 = vadd.f32 %v2603_v52, %v9763_v41  ;;  %v2605_v23 = vpop.f32.mrb[126].mxu0  ;;  %6831 = vmatpush3.bf16.msra.mxu0 %v7149_v32  ;;  %v2907_v45 = vld [vmem:[#allocation3 + $0x4a] sm:$0xff] }
 0x2fe   : > { %v6112_v20 = vadd.f32 -1.0, %v7418_v2  ;;  %v6952_v1 = vadd.f32 %v2605_v23, %v9760_v16  ;;  %v2607_v40 = vpop.f32.mrb[127].mxu0  ;;  %v7150_v2 = vld [vmem:[%s11349_s4 + $0x148] sm:$0xff]  }
 0x2ff   : > { %v7420_v18 = vpop.eup %7419  ;;  %v2640_v9 = vmax.f32 %v6950_v49, %v6951_v61  ;;  %v6953_v17 = vadd.f32 %v2607_v40, %v9763_v41  ;;  %v2906_v49 = vld [vmem:[#allocation3 + $0x42] sm:$0xff]  ;;  %6832 = vmatprep.subr.bf16.mxu0 %v7150_v2  ;;  %v2909_v61 = vld [vmem:[#allocation3 + $0x5a] sm:$0xff]  ;;  %v2911_v23 = vld [vmem:[#allocation3 + $0x6a] sm:$0xff] }
 0x300   : > { %v2796_v60 = vsel %vm2668_vm4, %v10033_v35, %v6112_v20  ;;  %v6113_v33 = vadd.f32 -1.0, %v7420_v18  ;;  %v2889_v0 = vld [vmem:[#allocation3 + $0xb9] sm:$0xff]  ;;  %v2944_v52 = vpack.c.bf16 %v2907_v45, %v2906_v49  ;;  %v2910_v40 = vld [vmem:[#allocation3 + $0x62] sm:$0xff] }
 0x301   : > { %2828 = vst [vmem:[#allocation3 + $0xd0] sm:$0xff] %v2796_v60  ;;  %v2734_v59 = vmul.f32 1.442695, %v2640_v9  ;;  %v2641_v13 = vmax.f32 %v6952_v1, %v6953_v17  ;;  %v2964_v25 = vpack.c.bf16 %v2889_v0, %v2888_v62  ;;  %vm2672_vm8 = vcmp.gt.f32.partialorder %v2640_v9, 0.0  ;;  %6833 = vmatpush3.bf16.msra.mxu0 %v7150_v2  ;;  %v2908_v20 = vld [vmem:[#allocation3 + $0x52] sm:$0xff]  ;;  %v2915_v17 = vld [vmem:[#allocation3 + $0x8a] sm:$0xff] }
 0x302   : > { %v2797_v16 = vsel %vm2669_vm5, %v10042_v11, %v6113_v33  ;;  %v2890_v53 = vld [vmem:[#allocation3 + $0xc1] sm:$0xff]  ;;  %v2947_v1 = vpack.c.bf16 %v2909_v61, %v2908_v20  ;;  %v2950_v18 = vpack.c.bf16 %v2911_v23, %v2910_v40 }
 0x303   : > { %2829 = vst [vmem:[#allocation3 + $0xd8] sm:$0xff] %v2797_v16  ;;  %7425 = vpow2.f32 %v2734_v59  ;;  %v2736_v5 = vmul.f32 1.442695, %v2641_v13  ;;  %3295 = vmatprep.mubr.bf16.mxu1 %v2964_v25  ;;  %v2969_v38 = vpack.c.bf16 %v2797_v16, %v2796_v60  ;;  %vm2673_vm9 = vcmp.gt.f32.partialorder %v2641_v13, 0.0  ;;  %v2912_v60 = vld [vmem:[#allocation3 + $0x72] sm:$0xff]  ;;  %v2914_v62 = vld [vmem:[#allocation3 + $0x82] sm:$0xff] }
 0x304   : > { %3296 = vmatmul.mubr.bf16.gmra.mrb[108].mxu1 %v2963_v42  ;;  %v2956_v0 = vpack.c.bf16 %v2915_v17, %v2914_v62  ;;  %v7151_v59 = vld [vmem:[%s11349_s4 + $0x150] sm:$0xff]   ;;  %v7163_v61 = vld [vmem:[%s11349_s4 + $0x120] sm:$0xff]  }
 0x305   : > { %v7422_v41 = vpop.eup %7421  ;;  %7427 = vpow2.f32 %v2736_v5  ;;  %6834 = vmatprep.subr.bf16.mxu0 %v7151_v59  ;;  %v2919_v25 = vld [vmem:[#allocation3 + $0xaa] sm:$0xff]  ;;  %v2916_v16 = vld [vmem:[#allocation3 + $0x92] sm:$0xff]  ;;  %v7164_v20 = vld [vmem:[%s11349_s4 + $0xe0] sm:$0xff]  }
 0x306   : > { %v6114_v24 = vadd.f32 -1.0, %v7422_v41  ;;  %6835 = vmatpush3.bf16.msra.mxu0 %v7151_v59 }
 0x307   : > { %v7424_v43 = vpop.eup %7423 }
 0x308   : > { %v2798_v34 = vsel %vm2670_vm6, %v2638_v30, %v6114_v24  ;;  %v6115_v14 = vadd.f32 -1.0, %v7424_v43  ;;  %v2891_v35 = vld [vmem:[#allocation3 + $0xc9] sm:$0xff]  ;;  %v2921_v24 = vld [vmem:[#allocation3 + $0xba] sm:$0xff] }
 0x309   : > { %2830 = vst [vmem:[#allocation3 + $0xe0] sm:$0xff] %v2798_v34  ;;  %v2967_v4 = vpack.c.bf16 %v2891_v35, %v2890_v53  ;;  %v2898_v30 = vld [vmem:[#allocation3 + $0x2] sm:$0xff]  ;;  %v2923_v43 = vld [vmem:[#allocation3 + $0xca] sm:$0xff] }
 0x30a   : > { %v2799_v58 = vsel %vm2671_vm7, %v2639_v3, %v6115_v14  ;;  %v2892_v46 = vld [vmem:[#allocation3 + $0xd1] sm:$0xff]  ;;  %v2932_v29 = vpack.c.bf16 %v2899_v28, %v2898_v30  ;;  %v2902_v3 = vld [vmem:[#allocation3 + $0x22] sm:$0xff] }
 0x30b   : > { %2831 = vst [vmem:[#allocation3 + $0xe8] sm:$0xff] %v2799_v58  ;;  %3303 = vmatprep.mubr.bf16.mxu1 %v2967_v4  ;;  %v2972_v31 = vpack.c.bf16 %v2799_v58, %v2798_v34  ;;  %v2938_v44 = vpack.c.bf16 %v2903_v10, %v2902_v3  ;;  %v2920_v34 = vld [vmem:[#allocation3 + $0xb2] sm:$0xff]  ;;  %v2922_v53 = vld [vmem:[#allocation3 + $0xc2] sm:$0xff] }
 0x30c   : > { %3304 = vmatmul.mubr.bf16.gmra.mrb[112].mxu1 %v2966_v21  ;;  %v2941_v21 = vpack.c.bf16 %v2905_v36, %v2904_v26  ;;  %v2965_v14 = vpack.c.bf16 %v2921_v24, %v2920_v34  ;;  %v2968_v35 = vpack.c.bf16 %v2923_v43, %v2922_v53  ;;  %v7152_v4 = vld [vmem:[%s11349_s4 + $0x158] sm:$0xff]   ;;  %v7169_v24 = vld [vmem:[%s11349_s4 + $0xf0] sm:$0xff]  }
 0x30d   : > { %v7426_v48 = vpop.eup %7425  ;;  %6836 = vmatprep.subr.bf16.mxu0 %v7152_v4  ;;  %v7162_v28 = vld [vmem:[%s11349_s4 + $0xd8] sm:$0xff]  }
 0x30e   : > { %v6116_v47 = vadd.f32 -1.0, %v7426_v48  ;;  %6837 = vmatpush3.bf16.msra.mxu0 %v7152_v4  ;;  %v2924_v48 = vld [vmem:[#allocation3 + $0xd2] sm:$0xff] }
 0x30f   : > { %v7428_v15 = vpop.eup %7427  ;;  %v7170_v43 = vld [vmem:[%s11349_s4 + $0x178] sm:$0xff]  }
 0x310   : > { %v2800_v11 = vsel %vm2672_vm8, %v2640_v9, %v6116_v47  ;;  %v6117_v54 = vadd.f32 -1.0, %v7428_v15  ;;  %v2893_v57 = vld [vmem:[#allocation3 + $0xd9] sm:$0xff] }
 0x311   : > { %2832 = vst [vmem:[#allocation3 + $0xf0] sm:$0xff] %v2800_v11  ;;  %v2970_v6 = vpack.c.bf16 %v2893_v57, %v2892_v46  ;;  %v2913_v9 = vld [vmem:[#allocation3 + $0x7a] sm:$0xff] }
 0x312   : > { %v2801_v42 = vsel %vm2673_vm9, %v2641_v13, %v6117_v54  ;;  %v2894_v19 = vld [vmem:[#allocation3 + $0xe1] sm:$0xff]  ;;  %v2953_v33 = vpack.c.bf16 %v2913_v9, %v2912_v60 }
 0x313   : > { %2833 = vst [vmem:[#allocation3 + $0xf8] sm:$0x3f] %v2801_v42  ;;  %3311 = vmatprep.mubr.bf16.mxu1 %v2970_v6  ;;  %v2917_v13 = vld [vmem:[#allocation3 + $0x9a] sm:$0xff]  ;;  %v2926_v15 = vld [vmem:[#allocation3 + $0xe2] sm:$0xff] }
 0x314   : > { %3312 = vmatmul.mubr.bf16.gmra.mrb[116].mxu1 %v2969_v38  ;;  %v2959_v5 = vpack.c.bf16 %v2917_v13, %v2916_v16  ;;  %v2918_v38 = vld [vmem:[#allocation3 + $0xa2] sm:$0xff]  ;;  %v2925_v58 = vld [vmem:[#allocation3 + $0xda] sm:$0xff] }
 0x315   : > { %v2962_v41 = vpack.c.bf16 %v2919_v25, %v2918_v38  ;;  %v2971_v47 = vpack.c.bf16 %v2925_v58, %v2924_v48  ;;  %v7153_v57 = vld [vmem:[%s11349_s4 + $0x100] sm:$0xff]   ;;  %v7168_v38 = vld [vmem:[%s11349_s4 + $0x130] sm:$0xff]   ;;  %v7171_v58 = vld [vmem:[%s11349_s4 + $0x138] sm:$0xff]  }
 0x316   : > { %6534 = vmatprep.subr.bf16.mxu1 %v7153_v57  ;;  %v7154_v6 = vld [vmem:[%s11349_s4 + $0xc0] sm:$0xff]   ;;  %v7172_v48 = vld [vmem:[%s11349_s4 + $0xf8] sm:$0xff]  }
 0x318   : > { %v2895_v8 = vld [vmem:[#allocation3 + $0xe9] sm:$0xff] }
 0x319   : > { %v2973_v56 = vpack.c.bf16 %v2895_v8, %v2894_v19  ;;  %v7155_v19 = vld [vmem:[%s11349_s4 + $0x160] sm:$0xff]   ;;  %v7156_v8 = vld [vmem:[%s11349_s4 + $0x108] sm:$0xff]  }
 0x31a   : > { %v2896_v39 = vld [vmem:[#allocation3 + $0xf1] sm:$0xff]  ;;  %v2897_v51 = vld [vmem:[#allocation3 + $0xf9] sm:$0xf]  ;;  %6838 = vmatprep.subr.bf16.mxu0 %v7155_v19 }
 0x31b   : > { %3319 = vmatprep.mubr.bf16.mxu1 %v2973_v56  ;;  %v2976_v63 = vpack.c.bf16 %v2897_v51, %v2896_v39  ;;  %v2865_v50 = vld [vmem:[#allocation3 + $0xf8] sm:$0xf]  ;;  %6839 = vmatpush3.bf16.msra.mxu0 %v7155_v19  ;;  %v7157_v56 = vld [vmem:[%s11349_s4 + $0xc8] sm:$0xff]   ;;  %v7158_v39 = vld [vmem:[%s11349_s4 + $0x110] sm:$0xff]  }
 0x31c   : > { %3320 = vmatmul.mubr.bf16.gmra.mrb[120].mxu1 %v2972_v31  ;;  %v2975_v37 = vpack.c.bf16 %v2865_v50, %v2800_v11  ;;  %v2927_v31 = vld [vmem:[#allocation3 + $0xea] sm:$0xff]  ;;  %v2928_v54 = vld [vmem:[#allocation3 + $0xf2] sm:$0xff]  ;;  %v2929_v46 = vld [vmem:[#allocation3 + $0xfa] sm:$0xf] }
 0x31d   : > { %3327 = vmatprep.mubr.bf16.mxu1 %v2976_v63  ;;  %v2974_v11 = vpack.c.bf16 %v2927_v31, %v2926_v15  ;;  %v2977_v42 = vpack.c.bf16 %v2929_v46, %v2928_v54  ;;  %v7159_v51 = vld [vmem:[%s11349_s4 + $0xd0] sm:$0xff]   ;;  %v7160_v63 = vld [vmem:[%s11349_s4 + $0x168] sm:$0xff]   ;;  %v7161_v50 = vld [vmem:[%s11349_s4 + $0x118] sm:$0xff]  }
 0x31e   : > { %6840 = vmatprep.subr.bf16.mxu0 %v7160_v63 }
 0x31f   : > { %6841 = vmatpush3.bf16.msra.mxu0 %v7160_v63 }
 0x324   : > { %3328 = vmatmul.mubr.bf16.gmra.mrb[124].mxu1 %v2975_v37 }
 0x325   : > { %6798 = vmatprep.mubr.bf16.mxu1 %v2932_v29 }
 0x32c   : > { %6799 = vmatmul.mubr.bf16.vlgmr.msra.gmra.mrb[128].mxu1 %v2935_v22 }
 0x32d   : > { %6802 = vmatprep.mubr.bf16.mxu1 %v2938_v44  ;;  %6535 = vmatpush3.bf16.msra.mxu1 %v7154_v6 }
 0x32e   : > { %6536 = vmatprep.subr.bf16.mxu1 %v7156_v8 }
 0x331   : > { %6537 = vmatpush3.bf16.msra.mxu1 %v7157_v56 }
 0x332   : > { %6538 = vmatprep.subr.bf16.mxu1 %v7158_v39 }
 0x334   : > { %6803 = vmatmul.mubr.bf16.gmra.mrb[132].mxu1 %v2941_v21 }
 0x335   : > { %6806 = vmatprep.mubr.bf16.mxu1 %v2944_v52  ;;  %6539 = vmatpush3.bf16.msra.mxu1 %v7159_v51 }
 0x336   : > { %6540 = vmatprep.subr.bf16.mxu1 %v7161_v50 }
 0x339   : > { %6541 = vmatpush3.bf16.msra.mxu1 %v7162_v28 }
 0x33a   : > { %6542 = vmatprep.subr.bf16.mxu1 %v7163_v61 }
 0x33c   : > { %6807 = vmatmul.mubr.bf16.gmra.mrb[136].mxu1 %v2947_v1  ;;  %v7165_v1 = vld [vmem:[%s11349_s4 + $0x170] sm:$0xff]  }
 0x33d   : > { %6810 = vmatprep.mubr.bf16.mxu1 %v2950_v18  ;;  %6543 = vmatpush3.bf16.msra.mxu1 %v7164_v20 }
 0x33e   : > { %6842 = vmatprep.subr.bf16.mxu0 %v7165_v1 }
 0x33f   : > { %6843 = vmatpush3.bf16.msra.mxu0 %v7165_v1 }
 0x340   : > { %6844 = vmatprep.subr.bf16.mxu0 %v7170_v43 }
 0x343   : > { %6845 = vmatpush3.bf16.msra.mxu0 %v7170_v43 }
 0x344   : > { %6811 = vmatmul.mubr.bf16.gmra.mrb[140].mxu1 %v2953_v33  ;;  %v7166_v33 = vld [vmem:[%s11349_s4 + $0x128] sm:$0xff]  }
 0x345   : > { %6814 = vmatprep.mubr.bf16.mxu1 %v2956_v0  ;;  %v7167_v0 = vld [vmem:[%s11349_s4 + $0xe8] sm:$0xff]   ;;  %6544 = vmatprep.subr.bf16.mxu1 %v7166_v33 }
 0x346   : > { %6545 = vmatpush3.bf16.msra.mxu1 %v7167_v0 }
 0x347   : > { %6546 = vmatprep.subr.bf16.mxu1 %v7168_v38 }
 0x34a   : > { %6547 = vmatpush3.bf16.msra.mxu1 %v7169_v24 }
 0x34b   : > { %6548 = vmatprep.subr.bf16.mxu1 %v7171_v58 }
 0x34c   : > { %6815 = vmatmul.mubr.bf16.gmra.mrb[144].mxu1 %v2959_v5 }
 0x34d   : > { %6818 = vmatprep.mubr.bf16.mxu1 %v2962_v41 }
 0x34e   : > { %6549 = vmatpush3.bf16.msra.mxu1 %v7172_v48 }
 0x354   : > { %6819 = vmatmul.mubr.bf16.gmra.mrb[148].mxu1 %v2965_v14 }
 0x355   : > { %6822 = vmatprep.mubr.bf16.mxu1 %v2968_v35 }
 0x35c   : > { %6823 = vmatmul.mubr.bf16.gmra.mrb[152].mxu1 %v2971_v47 }
 0x35d   : > { %6826 = vmatprep.mubr.bf16.mxu1 %v2974_v11 }
 0x364   : > { %6827 = vmatmul.mubr.bf16.gmra.mrb[156].mxu1 %v2977_v42 }
 0x37f   : > { %v6414_v37 = vpop.f32.mrb[64].mxu1 }
 0x380   : > { %v6415_v30 = vpop.f32.mrb[65].mxu1 }
 0x381   : > { %v10109_v29 = vadd.f32 %v6415_v30, %v6414_v37  ;;  %v6417_v32 = vpop.f32.mrb[66].mxu1 }
 0x382   : > { %v6418_v7 = vpop.f32.mrb[67].mxu1 }
 0x383   : > { %v10111_v10 = vadd.f32 %v6418_v7, %v6417_v32 }
 0x387   : > { %v6420_v55 = vpop.f32.mrb[68].mxu1 }
 0x388   : > { %v6421_v22 = vpop.f32.mrb[69].mxu1 }
 0x389   : > { %v10113_v3 = vadd.f32 %v6421_v22, %v6420_v55  ;;  %v6423_v44 = vpop.f32.mrb[70].mxu1 }
 0x38a   : > { %v6424_v36 = vpop.f32.mrb[71].mxu1 }
 0x38b   : > { %v10115_v45 = vadd.f32 %v6424_v36, %v6423_v44 }
 0x38f   : > { %v6426_v26 = vpop.f32.mrb[72].mxu1 }
 0x390   : > { %v6427_v21 = vpop.f32.mrb[73].mxu1 }
 0x391   : > { %v10117_v49 = vadd.f32 %v6427_v21, %v6426_v26  ;;  %v6429_v52 = vpop.f32.mrb[74].mxu1 }
 0x392   : > { %v6430_v2 = vpop.f32.mrb[75].mxu1 }
 0x393   : > { %v10122_v23 = vadd.f32 %v6430_v2, %v6429_v52 }
 0x397   : > { %v6432_v40 = vpop.f32.mrb[76].mxu1 }
 0x398   : > { %v6433_v18 = vpop.f32.mrb[77].mxu1 }
 0x399   : > { %v10130_v9 = vadd.f32 %v6433_v18, %v6432_v40  ;;  %v6435_v17 = vpop.f32.mrb[78].mxu1 }
 0x39a   : > { %v6436_v60 = vpop.f32.mrb[79].mxu1 }
 0x39b   : > { %v10135_v62 = vadd.f32 %v6436_v60, %v6435_v17 }
 0x39f   : > { %v6438_v59 = vpop.f32.mrb[80].mxu1 }
 0x3a0   : > { %v6439_v13 = vpop.f32.mrb[81].mxu1 }
 0x3a1   : > { %v10140_v25 = vadd.f32 %v6439_v13, %v6438_v59  ;;  %v6441_v16 = vpop.f32.mrb[82].mxu1 }
 0x3a2   : > { %v6442_v5 = vpop.f32.mrb[83].mxu1 }
 0x3a3   : > { %v10145_v41 = vadd.f32 %v6442_v5, %v6441_v16 }
 0x3a7   : > { %v6444_v34 = vpop.f32.mrb[84].mxu1 }
 0x3a8   : > { %v6445_v14 = vpop.f32.mrb[85].mxu1 }
 0x3a9   : > { %v10153_v53 = vadd.f32 %v6445_v14, %v6444_v34  ;;  %v6447_v35 = vpop.f32.mrb[86].mxu1 }
 0x3aa   : > { %v6448_v4 = vpop.f32.mrb[87].mxu1 }
 0x3ab   : > { %v10158_v31 = vadd.f32 %v6448_v4, %v6447_v35 }
 0x3af   : > { %v6450_v47 = vpop.f32.mrb[88].mxu1 }
 0x3b0   : > { %v6451_v15 = vpop.f32.mrb[89].mxu1 }
 0x3b1   : > { %v10163_v11 = vadd.f32 %v6451_v15, %v6450_v47  ;;  %v6453_v54 = vpop.f32.mrb[90].mxu1 }
 0x3b2   : > { %v6454_v46 = vpop.f32.mrb[91].mxu1 }
 0x3b3   : > { %v10165_v57 = vadd.f32 %v6454_v46, %v6453_v54 }
 0x3b7   : > { %v6456_v6 = vpop.f32.mrb[92].mxu1 }
 0x3b8   : > { %v6457_v42 = vpop.f32.mrb[93].mxu1 }
 0x3b9   : > { %v10167_v19 = vadd.f32 %v6457_v42, %v6456_v6  ;;  %v6459_v8 = vpop.f32.mrb[94].mxu1 }
 0x3ba   : > { %v6460_v56 = vpop.f32.mrb[95].mxu1 }
 0x3bb   : > { %v10169_v39 = vadd.f32 %v6460_v56, %v6459_v8 }
 0x3bf   : > { %v6462_v51 = vpop.f32.mrb[96].mxu1 }
 0x3c0   : > { %v6463_v63 = vpop.f32.mrb[97].mxu1 }
 0x3c1   : > { %v10171_v50 = vadd.f32 %v6463_v63, %v6462_v51  ;;  %v6465_v28 = vpop.f32.mrb[98].mxu1 }
 0x3c2   : > { %v6466_v37 = vpop.f32.mrb[99].mxu1 }
 0x3c3   : > { %v10173_v30 = vadd.f32 %v6466_v37, %v6465_v28  ;;  %v10206_v28 = vld [vmem:[%s11352_s7 + $0x1] ss:$0 sm:$0xff] }
 0x3c4   : > { %v3218_v37 = vadd.f32 %v10113_v3, %v10206_v28 }
 0x3c7   : > { %v6468_v32 = vpop.f32.mrb[100].mxu1 }
 0x3c8   : > { %v6469_v7 = vpop.f32.mrb[101].mxu1 }
 0x3c9   : > { %v10175_v55 = vadd.f32 %v6469_v7, %v6468_v32  ;;  %v6471_v22 = vpop.f32.mrb[102].mxu1  ;;  %v3210_v7 = vadd.f32 %v10109_v29, %v10206_v28  ;;  %v3234_v29 = vadd.f32 %v10130_v9, %v10206_v28 }
 0x3ca   : > { %v6472_v44 = vpop.f32.mrb[103].mxu1 }
 0x3cb   : > { %v10177_v36 = vadd.f32 %v6472_v44, %v6471_v22 }
 0x3cf   : > { %v6474_v26 = vpop.f32.mrb[104].mxu1 }
 0x3d0   : > { %v6475_v21 = vpop.f32.mrb[105].mxu1 }
 0x3d1   : > { %v10179_v52 = vadd.f32 %v6475_v21, %v6474_v26  ;;  %v6477_v2 = vpop.f32.mrb[106].mxu1  ;;  %v3221_v26 = vadd.f32 %v10115_v45, %v10206_v28 }
 0x3d2   : > { %v6478_v61 = vpop.f32.mrb[107].mxu1 }
 0x3d3   : > { %v10181_v20 = vadd.f32 %v6478_v61, %v6477_v2  ;;  %v3213_v61 = vadd.f32 %v10111_v10, %v10206_v28 }
 0x3d7   : > { %v6480_v1 = vpop.f32.mrb[108].mxu1 }
 0x3d8   : > { %v6481_v40 = vpop.f32.mrb[109].mxu1 }
 0x3d9   : > { %v10183_v18 = vadd.f32 %v6481_v40, %v6480_v1  ;;  %v6483_v17 = vpop.f32.mrb[110].mxu1 }
 0x3da   : > { %v6484_v60 = vpop.f32.mrb[111].mxu1 }
 0x3db   : > { %v10185_v33 = vadd.f32 %v6484_v60, %v6483_v17 }
 0x3df   : > { %v6486_v0 = vpop.f32.mrb[112].mxu1 }
 0x3e0   : > { %v6487_v59 = vpop.f32.mrb[113].mxu1 }
 0x3e1   : > { %v10187_v13 = vadd.f32 %v6487_v59, %v6486_v0  ;;  %v6489_v16 = vpop.f32.mrb[114].mxu1 }
 0x3e2   : > { %v6490_v5 = vpop.f32.mrb[115].mxu1 }
 0x3e3   : > { %v10189_v38 = vadd.f32 %v6490_v5, %v6489_v16  ;;  %v3226_v16 = vadd.f32 %v10117_v49, %v10206_v28 }
 0x3e7   : > { %v6492_v24 = vpop.f32.mrb[116].mxu1 }
 0x3e8   : > { %v6493_v43 = vpop.f32.mrb[117].mxu1 }
 0x3e9   : > { %v10191_v34 = vadd.f32 %v6493_v43, %v6492_v24  ;;  %v6495_v14 = vpop.f32.mrb[118].mxu1  ;;  %v3237_v24 = vadd.f32 %v10135_v62, %v10206_v28 }
 0x3ea   : > { %v6496_v35 = vpop.f32.mrb[119].mxu1 }
 0x3eb   : > { %v10193_v4 = vadd.f32 %v6496_v35, %v6495_v14  ;;  %v3229_v35 = vadd.f32 %v10122_v23, %v10206_v28  ;;  %v3250_v23 = vadd.f32 %v10153_v53, %v10206_v28 }
 0x3ef   : > { %v6498_v58 = vpop.f32.mrb[120].mxu1 }
 0x3f0   : > { %v6499_v48 = vpop.f32.mrb[121].mxu1 }
 0x3f1   : > { %v10195_v47 = vadd.f32 %v6499_v48, %v6498_v58  ;;  %v6501_v15 = vpop.f32.mrb[122].mxu1 }
 0x3f2   : > { %v6502_v54 = vpop.f32.mrb[123].mxu1 }
 0x3f3   : > { %v10197_v46 = vadd.f32 %v6502_v54, %v6501_v15 }
 0x3f7   : > { %v6504_v6 = vpop.f32.mrb[124].mxu1 }
 0x3f8   : > { %v6505_v42 = vpop.f32.mrb[125].mxu1 }
 0x3f9   : > { %v10199_v8 = vadd.f32 %v6505_v42, %v6504_v6  ;;  %v6507_v56 = vpop.f32.mrb[126].mxu1 }
 0x3fa   : > { %v6508_v51 = vpop.f32.mrb[127].mxu1 }
 0x3fb   : > { %v10201_v63 = vadd.f32 %v6508_v51, %v6507_v56 }
 0x3ff   : > { %v6800_v32 = vpop.f32.mrb[128].mxu1 }
 0x400   : > { %v3379_v22 = vadd.f32 %v6800_v32, %v3218_v37  ;;  %v3370_v44 = vpop.f32.mrb[129].mxu1  ;;  %v3242_v37 = vadd.f32 %v10140_v25, %v10206_v28  ;;  %v3245_v32 = vadd.f32 %v10145_v41, %v10206_v28 }
 0x401   : > { %v3371_v21 = vadd.f32 %v3370_v44, %v3210_v7  ;;  %v6801_v2 = vpop.f32.mrb[130].mxu1 }
 0x402   : > { %v3535_v1 = vmul.f32 1.442695, %v3379_v22  ;;  %v3382_v40 = vadd.f32 %v6801_v2, %v3221_v26  ;;  %v3373_v17 = vpop.f32.mrb[131].mxu1  ;;  %vm3501_vm10 = vcmp.gt.f32.partialorder %v3379_v22, 0.0 }
 0x403   : > { %v3531_v60 = vmul.f32 1.442695, %v3371_v21  ;;  %v3374_v0 = vadd.f32 %v3373_v17, %v3213_v61  ;;  %v3253_v61 = vadd.f32 %v10158_v31, %v10206_v28  ;;  %vm3499_vm11 = vcmp.gt.f32.partialorder %v3371_v21, 0.0 }
 0x404   : > { %7429 = vpow2.f32 %v3535_v1  ;;  %v3537_v3 = vmul.f32 1.442695, %v3382_v40  ;;  %vm3502_vm12 = vcmp.gt.f32.partialorder %v3382_v40, 0.0 }
 0x405   : > { %7431 = vpow2.f32 %v3531_v60  ;;  %v3533_v59 = vmul.f32 1.442695, %v3374_v0  ;;  %vm3500_vm13 = vcmp.gt.f32.partialorder %v3374_v0, 0.0 }
 0x406   : > { %7433 = vpow2.f32 %v3537_v3 }
 0x407   : > { %7435 = vpow2.f32 %v3533_v59  ;;  %v6804_v45 = vpop.f32.mrb[132].mxu1 }
 0x408   : > { %v10220_v5 = vadd.f32 %v6804_v45, %v3234_v29  ;;  %v3386_v10 = vpop.f32.mrb[133].mxu1 }
 0x409   : > { %v10224_v43 = vadd.f32 %v3386_v10, %v3226_v16  ;;  %v6805_v14 = vpop.f32.mrb[134].mxu1 }
 0x40a   : > { %v3543_v58 = vmul.f32 1.442695, %v10220_v5  ;;  %v10229_v9 = vadd.f32 %v6805_v14, %v3237_v24  ;;  %v3389_v48 = vpop.f32.mrb[135].mxu1  ;;  %vm3505_vm14 = vcmp.gt.f32.partialorder %v10220_v5, 0.0 }
 0x40b   : > { %v3539_v15 = vmul.f32 1.442695, %v10224_v43  ;;  %v10232_v49 = vadd.f32 %v3389_v48, %v3229_v35  ;;  %v3258_v48 = vadd.f32 %v10163_v11, %v10206_v28  ;;  %vm3503_vm15 = vcmp.gt.f32.partialorder %v10224_v43, 0.0 }
 0x40c   : > { %7437 = vpow2.f32 %v3543_v58  ;;  %v3545_v54 = vmul.f32 1.442695, %v10229_v9  ;;  %v3269_v11 = vadd.f32 %v10169_v39, %v10206_v28  ;;  %vm3506_vm0 = vcmp.gt.f32.partialorder %v10229_v9, 0.0 }
 0x40d   : > { %7439 = vpow2.f32 %v3539_v15  ;;  %v3541_v62 = vmul.f32 1.442695, %v10232_v49  ;;  %vm3504_vm2 = vcmp.gt.f32.partialorder %v10232_v49, 0.0 }
 0x40e   : > { %v7430_v6 = vpop.eup %7429  ;;  %7441 = vpow2.f32 %v3545_v54 }
 0x40f   : > { %v7432_v42 = vpop.eup %7431  ;;  %v6145_v56 = vadd.f32 -1.0, %v7430_v6  ;;  %7443 = vpow2.f32 %v3541_v62  ;;  %v6808_v51 = vpop.f32.mrb[136].mxu1 }
 0x410   : > { %v7434_v7 = vpop.eup %7433  ;;  %v6143_v44 = vadd.f32 -1.0, %v7432_v42  ;;  %v10242_v26 = vadd.f32 %v6808_v51, %v3250_v23  ;;  %v3402_v2 = vpop.f32.mrb[137].mxu1 }
 0x411   : > { %v7436_v53 = vpop.eup %7435  ;;  %v3629_v1 = vsel %vm3501_vm10, %v3379_v22, %v6145_v56  ;;  %v6146_v17 = vadd.f32 -1.0, %v7434_v7  ;;  %v10246_v60 = vadd.f32 %v3402_v2, %v3242_v37  ;;  %v6809_v3 = vpop.f32.mrb[138].mxu1  ;;  %v7175_v56 = vld [vmem:[%s11350_s5 + $0x4] ss:$8 sps:$4 sm:$0xff]  }
 0x412   : > { %3661 = vst [vmem:[#allocation4 + $0x12] sm:$0xff] %v3629_v1  ;;  %v3627_v25 = vsel %vm3499_vm11, %v3371_v21, %v6143_v44  ;;  %v6144_v41 = vadd.f32 -1.0, %v7436_v53  ;;  %v3551_v59 = vmul.f32 1.442695, %v10242_v26  ;;  %v3405_v29 = vpop.f32.mrb[139].mxu1  ;;  %v10250_v31 = vadd.f32 %v6809_v3, %v3253_v61  ;;  %4850 = vmatprep.subr.bf16.mxu0 %v7175_v56 }
 0x413   : > { %3659 = vst [vmem:[#allocation4 + $0x2] sm:$0xff] %v3627_v25  ;;  %v3630_v45 = vsel %vm3502_vm12, %v3382_v40, %v6146_v17  ;;  %v3547_v16 = vmul.f32 1.442695, %v10246_v60  ;;  %v10252_v10 = vadd.f32 %v3405_v29, %v3245_v32  ;;  %v3266_v40 = vadd.f32 %v10167_v19, %v10206_v28  ;;  %v7178_v44 = vld [vmem:[%s11350_s5 + $0x14] ss:$8 sps:$4 sm:$0xff]  }
 0x414   : > { %3662 = vst [vmem:[#allocation4 + $0x1a] sm:$0xff] %v3630_v45  ;;  %v3628_v22 = vsel %vm3500_vm13, %v3374_v0, %v6144_v41  ;;  %7445 = vpow2.f32 %v3551_v59  ;;  %v3792_v24 = vpack.c.bf16 %v3630_v45, %v3629_v1  ;;  %v3553_v21 = vmul.f32 1.442695, %v10250_v31 }
 0x415   : > { %3660 = vst [vmem:[#allocation4 + $0xa] sm:$0xff] %v3628_v22  ;;  %7447 = vpow2.f32 %v3547_v16  ;;  %v3789_v14 = vpack.c.bf16 %v3628_v22, %v3627_v25  ;;  %v3549_v58 = vmul.f32 1.442695, %v10252_v10  ;;  %v3261_v0 = vadd.f32 %v10165_v57, %v10206_v28  ;;  %v7173_v57 = vld [vmem:[%s11350_s5] ss:$8 sps:$4 sm:$0xff]  }
 0x416   : > { %v7438_v35 = vpop.eup %7437  ;;  %7449 = vpow2.f32 %v3553_v21  ;;  %vm3509_vm3 = vcmp.gt.f32.partialorder %v10242_v26, 0.0  ;;  %vm3507_vm4 = vcmp.gt.f32.partialorder %v10246_v60, 0.0  ;;  %vm3510_vm5 = vcmp.gt.f32.partialorder %v10250_v31, 0.0 }
 0x417   : > { %v7440_v15 = vpop.eup %7439  ;;  %v6149_v54 = vadd.f32 -1.0, %v7438_v35  ;;  %v6812_v62 = vpop.f32.mrb[140].mxu1  ;;  %6846 = vmatprep.mubr.bf16.mxu0 %v3789_v14  ;;  %7451 = vpow2.f32 %v3549_v58  ;;  %v3274_v14 = vadd.f32 %v10171_v50, %v10206_v28  ;;  %vm3508_vm6 = vcmp.gt.f32.partialorder %v10252_v10, 0.0 }
 0x418   : > { %v7442_v6 = vpop.eup %7441  ;;  %v6147_v23 = vadd.f32 -1.0, %v7440_v15  ;;  %v10264_v42 = vadd.f32 %v6812_v62, %v3266_v40  ;;  %v3418_v19 = vpop.f32.mrb[141].mxu1  ;;  %6847 = vmatmul.mubr.bf16.vlgmr.msra.gmra.mrb[128].mxu0 %v3792_v24  ;;  %v3282_v40 = vadd.f32 %v10175_v55, %v10206_v28  ;;  %v7181_v15 = vld [vmem:[%s11350_s5 + $0x24] ss:$8 sps:$4 sm:$0xff]   ;;  %v7179_v55 = vld [vmem:[%s11350_s5 + $0x20] ss:$8 sps:$4 sm:$0xff]  }
 0x419   : > { %v7444_v51 = vpop.eup %7443  ;;  %v10277_v37 = vsel %vm3505_vm14, %v10220_v5, %v6149_v54  ;;  %v6150_v32 = vadd.f32 -1.0, %v7442_v6  ;;  %v10280_v7 = vadd.f32 %v3418_v19, %v3258_v48  ;;  %v6813_v39 = vpop.f32.mrb[142].mxu1  ;;  %4851 = vmatpush1.bf16.msra.mxu0 %v7173_v57  ;;  %v7184_v57 = vld [vmem:[%s11350_s5 + $0x34] ss:$8 sps:$4 sm:$0xff]  }
 0x41a   : > { %3665 = vst [vmem:[#allocation4 + $0x32] sm:$0xff] %v10277_v37  ;;  %v3631_v2 = vsel %vm3503_vm15, %v10224_v43, %v6147_v23  ;;  %v6148_v5 = vadd.f32 -1.0, %v7444_v51  ;;  %v3559_v61 = vmul.f32 1.442695, %v10264_v42  ;;  %v3421_v53 = vpop.f32.mrb[143].mxu1  ;;  %v10293_v3 = vadd.f32 %v6813_v39, %v3269_v11  ;;  %v3723_v25 = vld [vmem:[#allocation4 + $0x1] sm:$0xff]  ;;  %4852 = vmatprep.subr.bf16.mxu0 %v7178_v44 }
 0x41b   : > { %3663 = vst [vmem:[#allocation4 + $0x22] sm:$0xff] %v3631_v2  ;;  %v3634_v1 = vsel %vm3506_vm0, %v10229_v9, %v6150_v32  ;;  %v3555_v17 = vmul.f32 1.442695, %v10280_v7  ;;  %v3726_v41 = vld [vmem:[#allocation4 + $0x19] sm:$0xff]  ;;  %v10299_v29 = vadd.f32 %v3421_v53, %v3261_v0  ;;  %v3277_v0 = vadd.f32 %v10173_v30, %v10206_v28 }
 0x41c   : > { %v7176_v43 = vld [vmem:[%s11350_s5 + $0x10] ss:$8 sps:$4 sm:$0xff]   ;;  %3666 = vst [vmem:[#allocation4 + $0x3a] sm:$0xff] %v3634_v1  ;;  %v3632_v59 = vsel %vm3504_vm2, %v10232_v49, %v6148_v5  ;;  %7453 = vpow2.f32 %v3559_v61  ;;  %v3692_v16 = vld [vmem:[#allocation4 + $0x8] sm:$0xff]  ;;  %v3798_v22 = vpack.c.bf16 %v3634_v1, %v10277_v37  ;;  %v3561_v24 = vmul.f32 1.442695, %v10293_v3 }
 0x41d   : > { %v3724_v45 = vld [vmem:[#allocation4 + $0x9] sm:$0xff]  ;;  %v3725_v9 = vld [vmem:[#allocation4 + $0x11] sm:$0xff]  ;;  %3664 = vst [vmem:[#allocation4 + $0x2a] sm:$0xff] %v3632_v59  ;;  %7455 = vpow2.f32 %v3555_v17  ;;  %v3691_v35 = vld [vmem:[#allocation4] sm:$0xff]  ;;  %v3557_v49 = vmul.f32 1.442695, %v10299_v29  ;;  %v3795_v23 = vpack.c.bf16 %v3632_v59, %v3631_v2  ;;  %4853 = vmatpush1.bf16.msra.mxu0 %v7176_v43  ;;  %v3285_v32 = vadd.f32 %v10177_v36, %v10206_v28 }
 0x41e   : > { %v3788_v21 = vpack.c.bf16 %v3724_v45, %v3723_v25  ;;  %v7446_v58 = vpop.eup %7445  ;;  %v3787_v48 = vpack.c.bf16 %v3692_v16, %v3691_v35  ;;  %7457 = vpow2.f32 %v3561_v24  ;;  %v3791_v50 = vpack.c.bf16 %v3726_v41, %v3725_v9  ;;  %4854 = vmatprep.subr.bf16.mxu0 %v7181_v15  ;;  %v3694_v53 = vld [vmem:[#allocation4 + $0x18] sm:$0xff]  ;;  %v3693_v41 = vld [vmem:[#allocation4 + $0x10] sm:$0xff] }
 0x41f   : > { %v7448_v54 = vpop.eup %7447  ;;  %v6153_v62 = vadd.f32 -1.0, %v7446_v58  ;;  %v6816_v6 = vpop.f32.mrb[144].mxu1  ;;  %7459 = vpow2.f32 %v3557_v49  ;;  %6850 = vmatprep.mubr.bf16.mxu0 %v3795_v23  ;;  %v3290_v25 = vadd.f32 %v10179_v52, %v10206_v28  ;;  %v3293_v9 = vadd.f32 %v10181_v20, %v10206_v28 }
 0x420   : > { %4065 = vmatprep.mubr.bf16.mxu1 %v3788_v21  ;;  %v6151_v19 = vadd.f32 -1.0, %v7448_v54  ;;  %v10317_v30 = vadd.f32 %v6816_v6, %v3282_v40  ;;  %v3434_v11 = vpop.f32.mrb[145].mxu1  ;;  %v7450_v56 = vpop.eup %7449  ;;  %6851 = vmatmul.mubr.bf16.gmra.mrb[132].mxu0 %v3798_v22  ;;  %v3298_v21 = vadd.f32 %v10183_v18, %v10206_v28  ;;  %vm3513_vm7 = vcmp.gt.f32.partialorder %v10264_v42, 0.0 }
 0x421   : > { %4066 = vmatmul.mubr.bf16.vlgmr.msra.gmra.mrb[160].mxu1 %v3787_v48  ;;  %v10323_v51 = vsel %vm3509_vm3, %v10242_v26, %v6153_v62  ;;  %v10326_v37 = vadd.f32 %v3434_v11, %v3274_v14  ;;  %v6817_v39 = vpop.f32.mrb[146].mxu1  ;;  %v7452_v44 = vpop.eup %7451  ;;  %v6154_v5 = vadd.f32 -1.0, %v7450_v56  ;;  %4855 = vmatpush1.bf16.msra.mxu0 %v7179_v55  ;;  %v3790_v14 = vpack.c.bf16 %v3694_v53, %v3693_v41  ;;  %v7190_v62 = vld [vmem:[%s11350_s5 + $0x54] ss:$8 sps:$4 sm:$0xff]  }
 0x422   : > { %4073 = vmatprep.mubr.bf16.mxu1 %v3791_v50  ;;  %3669 = vst [vmem:[#allocation4 + $0x52] sm:$0xff] %v10323_v51  ;;  %v3635_v2 = vsel %vm3507_vm4, %v10246_v60, %v6151_v19  ;;  %v3567_v26 = vmul.f32 1.442695, %v10317_v30  ;;  %v3437_v61 = vpop.f32.mrb[147].mxu1  ;;  %v6152_v1 = vadd.f32 -1.0, %v7452_v44  ;;  %v10335_v17 = vadd.f32 %v6817_v39, %v3285_v32  ;;  %4856 = vmatprep.subr.bf16.mxu0 %v7184_v57  ;;  %v3727_v35 = vld [vmem:[#allocation4 + $0x21] sm:$0xff] }
 0x423   : > { %3667 = vst [vmem:[#allocation4 + $0x42] sm:$0xff] %v3635_v2  ;;  %v3563_v36 = vmul.f32 1.442695, %v10326_v37  ;;  %v7182_v60 = vld [vmem:[%s11350_s5 + $0x30] ss:$8 sps:$4 sm:$0xff]   ;;  %v3638_v43 = vsel %vm3510_vm5, %v10250_v31, %v6154_v5  ;;  %v10344_v59 = vadd.f32 %v3437_v61, %v3277_v0  ;;  %vm3511_vm8 = vcmp.gt.f32.partialorder %v10280_v7, 0.0 }
 0x424   : > { %7461 = vpow2.f32 %v3567_v26  ;;  %v3728_v45 = vld [vmem:[#allocation4 + $0x29] sm:$0xff]  ;;  %3670 = vst [vmem:[#allocation4 + $0x5a] sm:$0xff] %v3638_v43  ;;  %v3636_v16 = vsel %vm3508_vm6, %v10252_v10, %v6152_v1  ;;  %v3569_v52 = vmul.f32 1.442695, %v10335_v17  ;;  %v3804_v20 = vpack.c.bf16 %v3638_v43, %v10323_v51  ;;  %v3729_v26 = vld [vmem:[#allocation4 + $0x31] sm:$0xff]  ;;  %v3730_v61 = vld [vmem:[#allocation4 + $0x39] sm:$0xff] }
 0x425   : > { %7463 = vpow2.f32 %v3563_v36  ;;  %v7187_v31 = vld [vmem:[%s11350_s5 + $0x44] ss:$8 sps:$4 sm:$0xff]   ;;  %3668 = vst [vmem:[#allocation4 + $0x4a] sm:$0xff] %v3636_v16  ;;  %v3565_v24 = vmul.f32 1.442695, %v10344_v59  ;;  %v3801_v10 = vpack.c.bf16 %v3636_v16, %v3635_v2  ;;  %v3794_v48 = vpack.c.bf16 %v3728_v45, %v3727_v35  ;;  %4857 = vmatpush1.bf16.msra.mxu0 %v7182_v60 }
 0x426   : > { %v7454_v22 = vpop.eup %7453  ;;  %7465 = vpow2.f32 %v3569_v52  ;;  %v7185_v0 = vld [vmem:[%s11350_s5 + $0x40] ss:$8 sps:$4 sm:$0xff]   ;;  %v3301_v55 = vadd.f32 %v10185_v33, %v10206_v28  ;;  %4858 = vmatprep.subr.bf16.mxu0 %v7187_v31  ;;  %vm3514_vm9 = vcmp.gt.f32.partialorder %v10293_v3, 0.0  ;;  %v7188_v2 = vld [vmem:[%s11350_s5 + $0x50] ss:$8 sps:$4 sm:$0xff]   ;;  %vm3512_vm10 = vcmp.gt.f32.partialorder %v10299_v29, 0.0 }
 0x427   : > { %v7456_v58 = vpop.eup %7455  ;;  %v6157_v49 = vadd.f32 -1.0, %v7454_v22  ;;  %v6820_v40 = vpop.f32.mrb[148].mxu1  ;;  %7467 = vpow2.f32 %v3565_v24  ;;  %6854 = vmatprep.mubr.bf16.mxu0 %v3801_v10  ;;  %v3696_v44 = vld [vmem:[#allocation4 + $0x28] sm:$0xff]  ;;  %v3314_v36 = vadd.f32 %v10191_v34, %v10206_v28  ;;  %v3306_v34 = vadd.f32 %v10187_v13, %v10206_v28 }
 0x428   : > { %v6155_v15 = vadd.f32 -1.0, %v7456_v58  ;;  %v10361_v18 = vadd.f32 %v6820_v40, %v3298_v21  ;;  %v3450_v54 = vpop.f32.mrb[149].mxu1  ;;  %v7458_v6 = vpop.eup %7457  ;;  %6855 = vmatmul.mubr.bf16.gmra.mrb[136].mxu0 %v3804_v20  ;;  %v3797_v31 = vpack.c.bf16 %v3730_v61, %v3729_v26  ;;  %v7191_v22 = vld [vmem:[%s11350_s5 + $0x60] ss:$8 sps:$4 sm:$0xff]   ;;  %vm3517_vm11 = vcmp.gt.f32.partialorder %v10317_v30, 0.0 }
 0x429   : > { %4074 = vmatmul.mubr.bf16.gmra.mrb[164].mxu1 %v3790_v14  ;;  %v10367_v50 = vsel %vm3513_vm7, %v10264_v42, %v6157_v49  ;;  %v10370_v23 = vadd.f32 %v3450_v54, %v3290_v25  ;;  %v6821_v19 = vpop.f32.mrb[150].mxu1  ;;  %v7460_v11 = vpop.eup %7459  ;;  %v6158_v56 = vadd.f32 -1.0, %v7458_v6  ;;  %4859 = vmatpush1.bf16.msra.mxu0 %v7185_v0  ;;  %v3695_v25 = vld [vmem:[#allocation4 + $0x20] sm:$0xff]  ;;  %vm3515_vm12 = vcmp.gt.f32.partialorder %v10326_v37, 0.0  ;;  %v3697_v6 = vld [vmem:[#allocation4 + $0x30] sm:$0xff] }
 0x42a   : > { %4081 = vmatprep.mubr.bf16.mxu1 %v3794_v48  ;;  %3673 = vst [vmem:[#allocation4 + $0x72] sm:$0xff] %v10367_v50  ;;  %v3639_v57 = vsel %vm3511_vm8, %v10280_v7, %v6155_v15  ;;  %v3575_v42 = vmul.f32 1.442695, %v10361_v18  ;;  %v3453_v51 = vpop.f32.mrb[151].mxu1  ;;  %v6156_v32 = vadd.f32 -1.0, %v7460_v11  ;;  %v10379_v33 = vadd.f32 %v6821_v19, %v3301_v55  ;;  %4860 = vmatprep.subr.bf16.mxu0 %v7190_v62 }
 0x42b   : > { %3671 = vst [vmem:[#allocation4 + $0x62] sm:$0xff] %v3639_v57  ;;  %v3571_v39 = vmul.f32 1.442695, %v10370_v23  ;;  %v3642_v7 = vsel %vm3514_vm9, %v10293_v3, %v6158_v56  ;;  %v10386_v5 = vadd.f32 %v3453_v51, %v3293_v9  ;;  %v7193_v3 = vld [vmem:[%s11350_s5 + $0x64] ss:$8 sps:$4 sm:$0xff]   ;;  %v3793_v43 = vpack.c.bf16 %v3696_v44, %v3695_v25 }
 0x42c   : > { %7469 = vpow2.f32 %v3575_v42  ;;  %3674 = vst [vmem:[#allocation4 + $0x7a] sm:$0xff] %v3642_v7  ;;  %v3640_v53 = vsel %vm3512_vm10, %v10299_v29, %v6156_v32  ;;  %v3577_v1 = vmul.f32 1.442695, %v10379_v33  ;;  %v3810_v16 = vpack.c.bf16 %v3642_v7, %v10367_v50  ;;  %v3698_v50 = vld [vmem:[#allocation4 + $0x38] sm:$0xff]  ;;  %v3731_v51 = vld [vmem:[#allocation4 + $0x41] sm:$0xff] }
 0x42d   : > { %7471 = vpow2.f32 %v3571_v39  ;;  %3672 = vst [vmem:[#allocation4 + $0x6a] sm:$0xff] %v3640_v53  ;;  %v3573_v60 = vmul.f32 1.442695, %v10386_v5  ;;  %v3807_v45 = vpack.c.bf16 %v3640_v53, %v3639_v57  ;;  %4861 = vmatpush1.bf16.msra.mxu0 %v7188_v2  ;;  %v3317_v58 = vadd.f32 %v10193_v4, %v10206_v28 }
 0x42e   : > { %v7462_v41 = vpop.eup %7461  ;;  %7473 = vpow2.f32 %v3577_v1  ;;  %4862 = vmatprep.subr.bf16.mxu0 %v7193_v3  ;;  %vm3518_vm13 = vcmp.gt.f32.partialorder %v10335_v17, 0.0  ;;  %vm3516_vm14 = vcmp.gt.f32.partialorder %v10344_v59, 0.0  ;;  %v3330_v57 = vadd.f32 %v10199_v8, %v10206_v28 }
 0x42f   : > { %v7464_v29 = vpop.eup %7463  ;;  %v6161_v52 = vadd.f32 -1.0, %v7462_v41  ;;  %v6824_v9 = vpop.f32.mrb[152].mxu1  ;;  %7475 = vpow2.f32 %v3573_v60  ;;  %6858 = vmatprep.mubr.bf16.mxu0 %v3807_v45  ;;  %vm3521_vm15 = vcmp.gt.f32.partialorder %v10361_v18, 0.0  ;;  %vm3519_vm0 = vcmp.gt.f32.partialorder %v10370_v23, 0.0 }
 0x430   : > { %v6159_v24 = vadd.f32 -1.0, %v7464_v29  ;;  %v10403_v21 = vadd.f32 %v6824_v9, %v3314_v36  ;;  %v3466_v14 = vpop.f32.mrb[153].mxu1  ;;  %v7466_v35 = vpop.eup %7465  ;;  %6859 = vmatmul.mubr.bf16.gmra.mrb[140].mxu0 %v3810_v16  ;;  %v3325_v16 = vadd.f32 %v10197_v46, %v10206_v28  ;;  %vm3522_vm2 = vcmp.gt.f32.partialorder %v10379_v33, 0.0  ;;  %v3700_v9 = vld [vmem:[#allocation4 + $0x48] sm:$0xff]  ;;  %v3734_v46 = vld [vmem:[#allocation4 + $0x59] sm:$0xff] }
 0x431   : > { %4082 = vmatmul.mubr.bf16.gmra.mrb[168].mxu1 %v3793_v43  ;;  %v10406_v10 = vsel %vm3517_vm11, %v10317_v30, %v6161_v52  ;;  %v10409_v13 = vadd.f32 %v3466_v14, %v3306_v34  ;;  %v6825_v49 = vpop.f32.mrb[154].mxu1  ;;  %v7468_v40 = vpop.eup %7467  ;;  %v6162_v20 = vadd.f32 -1.0, %v7466_v35  ;;  %v3309_v30 = vadd.f32 %v10189_v38, %v10206_v28  ;;  %4863 = vmatpush1.bf16.msra.mxu0 %v7191_v22  ;;  %v3732_v38 = vld [vmem:[#allocation4 + $0x49] sm:$0xff] }
 0x432   : > { %4089 = vmatprep.mubr.bf16.mxu1 %v3797_v31  ;;  %3677 = vst [vmem:[#allocation4 + $0x92] sm:$0xff] %v10406_v10  ;;  %v3643_v48 = vsel %vm3515_vm12, %v10326_v37, %v6159_v24  ;;  %v3583_v0 = vmul.f32 1.442695, %v10403_v21  ;;  %v3469_v15 = vpop.f32.mrb[155].mxu1  ;;  %v6160_v4 = vadd.f32 -1.0, %v7468_v40  ;;  %v10420_v62 = vadd.f32 %v6825_v49, %v3317_v58  ;;  %v3733_v31 = vld [vmem:[#allocation4 + $0x51] sm:$0xff] }
 0x433   : > { %3675 = vst [vmem:[#allocation4 + $0x82] sm:$0xff] %v3643_v48  ;;  %v3579_v54 = vmul.f32 1.442695, %v10409_v13  ;;  %v3646_v37 = vsel %vm3518_vm13, %v10335_v17, %v6162_v20  ;;  %v10424_v55 = vadd.f32 %v3469_v15, %v3309_v30  ;;  %v3796_v17 = vpack.c.bf16 %v3698_v50, %v3697_v6  ;;  %v3699_v24 = vld [vmem:[#allocation4 + $0x40] sm:$0xff]  ;;  %v3701_v6 = vld [vmem:[#allocation4 + $0x50] sm:$0xff]  ;;  %v3702_v50 = vld [vmem:[#allocation4 + $0x58] sm:$0xff] }
 0x434   : > { %7477 = vpow2.f32 %v3583_v0  ;;  %3678 = vst [vmem:[#allocation4 + $0x9a] sm:$0xff] %v3646_v37  ;;  %v3644_v19 = vsel %vm3516_vm14, %v10344_v59, %v6160_v4  ;;  %v3585_v11 = vmul.f32 1.442695, %v10420_v62  ;;  %v3816_v39 = vpack.c.bf16 %v3646_v37, %v10406_v10 }
 0x435   : > { %7479 = vpow2.f32 %v3579_v54  ;;  %3676 = vst [vmem:[#allocation4 + $0x8a] sm:$0xff] %v3644_v19  ;;  %v3581_v42 = vmul.f32 1.442695, %v10424_v55  ;;  %v3813_v32 = vpack.c.bf16 %v3644_v19, %v3643_v48  ;;  %v3322_v59 = vadd.f32 %v10195_v47, %v10206_v28 }
 0x436   : > { %v7470_v56 = vpop.eup %7469  ;;  %7481 = vpow2.f32 %v3585_v11  ;;  %v3800_v26 = vpack.c.bf16 %v3732_v38, %v3731_v51  ;;  %v3333_v47 = vadd.f32 %v10201_v63, %v10206_v28  ;;  %vm3520_vm3 = vcmp.gt.f32.partialorder %v10386_v5, 0.0 }
 0x437   : > { %v7472_v44 = vpop.eup %7471  ;;  %v6165_v2 = vadd.f32 -1.0, %v7470_v56  ;;  %v6828_v7 = vpop.f32.mrb[156].mxu1  ;;  %7483 = vpow2.f32 %v3581_v42  ;;  %6862 = vmatprep.mubr.bf16.mxu0 %v3813_v32  ;;  %v3799_v10 = vpack.c.bf16 %v3700_v9, %v3699_v24  ;;  %v3803_v48 = vpack.c.bf16 %v3734_v46, %v3733_v31 }
 0x438   : > { %v6163_v8 = vadd.f32 -1.0, %v7472_v44  ;;  %v10435_v61 = vadd.f32 %v6828_v7, %v3330_v57  ;;  %v3482_v53 = vpop.f32.mrb[157].mxu1  ;;  %v7474_v1 = vpop.eup %7473  ;;  %6863 = vmatmul.mubr.bf16.gmra.mrb[144].mxu0 %v3816_v39  ;;  %vm3525_vm4 = vcmp.gt.f32.partialorder %v10403_v21, 0.0  ;;  %vm3523_vm5 = vcmp.gt.f32.partialorder %v10409_v13, 0.0  ;;  %v3735_v57 = vld [vmem:[#allocation4 + $0x61] sm:$0xff] }
 0x439   : > { %4090 = vmatmul.mubr.bf16.gmra.mrb[172].mxu1 %v3796_v17  ;;  %v3649_v36 = vsel %vm3521_vm15, %v10361_v18, %v6165_v2  ;;  %v10439_v25 = vadd.f32 %v3482_v53, %v3322_v59  ;;  %v6829_v3 = vpop.f32.mrb[158].mxu1  ;;  %v7476_v41 = vpop.eup %7475  ;;  %v6166_v43 = vadd.f32 -1.0, %v7474_v1  ;;  %vm3526_vm6 = vcmp.gt.f32.partialorder %v10420_v62, 0.0  ;;  %v3704_v59 = vld [vmem:[#allocation4 + $0x68] sm:$0xff]  ;;  %v3703_v1 = vld [vmem:[#allocation4 + $0x60] sm:$0xff] }
 0x43a   : > { %4097 = vmatprep.mubr.bf16.mxu1 %v3800_v26  ;;  %3681 = vst [vmem:[#allocation4 + $0xb2] sm:$0xff] %v3649_v36  ;;  %v3647_v60 = vsel %vm3519_vm0, %v10370_v23, %v6163_v8  ;;  %v3591_v45 = vmul.f32 1.442695, %v10435_v61  ;;  %v3485_v18 = vpop.f32.mrb[159].mxu1  ;;  %v6164_v29 = vadd.f32 -1.0, %v7476_v41  ;;  %v10449_v52 = vadd.f32 %v6829_v3, %v3333_v47  ;;  %v3737_v8 = vld [vmem:[#allocation4 + $0x71] sm:$0xff] }
 0x43b   : > { %3679 = vst [vmem:[#allocation4 + $0xa2] sm:$0xff] %v3647_v60  ;;  %v3587_v63 = vmul.f32 1.442695, %v10439_v25  ;;  %v3650_v34 = vsel %vm3522_vm2, %v10379_v33, %v6166_v43  ;;  %v10453_v23 = vadd.f32 %v3485_v18, %v3325_v16  ;;  %vm3524_vm7 = vcmp.gt.f32.partialorder %v10424_v55, 0.0  ;;  %v3705_v3 = vld [vmem:[#allocation4 + $0x70] sm:$0xff]  ;;  %v3706_v41 = vld [vmem:[#allocation4 + $0x78] sm:$0xff] }
 0x43c   : > { %7485 = vpow2.f32 %v3591_v45  ;;  %3682 = vst [vmem:[#allocation4 + $0xba] sm:$0xff] %v3650_v34  ;;  %v3648_v28 = vsel %vm3520_vm3, %v10386_v5, %v6164_v29  ;;  %v3593_v22 = vmul.f32 1.442695, %v10449_v52  ;;  %v3822_v58 = vpack.c.bf16 %v3650_v34, %v3649_v36  ;;  %v3740_v43 = vld [vmem:[#allocation4 + $0x89] sm:$0xff]  ;;  %v3739_v18 = vld [vmem:[#allocation4 + $0x81] sm:$0xff]  ;;  %v3742_v9 = vld [vmem:[#allocation4 + $0x99] sm:$0xff] }
 0x43d   : > { %7487 = vpow2.f32 %v3587_v63  ;;  %3680 = vst [vmem:[#allocation4 + $0xaa] sm:$0xff] %v3648_v28  ;;  %v3589_v35 = vmul.f32 1.442695, %v10453_v23  ;;  %v3819_v33 = vpack.c.bf16 %v3648_v28, %v3647_v60  ;;  %vm3529_vm8 = vcmp.gt.f32.partialorder %v10435_v61, 0.0  ;;  %v3708_v63 = vld [vmem:[#allocation4 + $0x88] sm:$0xff]  ;;  %v3707_v34 = vld [vmem:[#allocation4 + $0x80] sm:$0xff] }
 0x43e   : > { %v7478_v14 = vpop.eup %7477  ;;  %7489 = vpow2.f32 %v3593_v22  ;;  %vm3527_vm9 = vcmp.gt.f32.partialorder %v10439_v25, 0.0  ;;  %vm3530_vm10 = vcmp.gt.f32.partialorder %v10449_v52, 0.0  ;;  %vm3528_vm11 = vcmp.gt.f32.partialorder %v10453_v23, 0.0  ;;  %v3709_v46 = vld [vmem:[#allocation4 + $0x90] sm:$0xff]  ;;  %v3710_v28 = vld [vmem:[#allocation4 + $0x98] sm:$0xff] }
 0x43f   : > { %v7480_v49 = vpop.eup %7479  ;;  %v6169_v40 = vadd.f32 -1.0, %v7478_v14  ;;  %7491 = vpow2.f32 %v3589_v35  ;;  %6866 = vmatprep.mubr.bf16.mxu0 %v3819_v33  ;;  %v3805_v36 = vpack.c.bf16 %v3704_v59, %v3703_v1  ;;  %v3808_v16 = vpack.c.bf16 %v3706_v41, %v3705_v3  ;;  %v7202_v59 = vld [vmem:[%s11350_s5 + $0x94] ss:$8 sps:$4 sm:$0xff]   ;;  %v7203_v1 = vld [vmem:[%s11350_s5 + $0xa0] ss:$8 sps:$4 sm:$0xff]  }
 0x440   : > { %v6167_v20 = vadd.f32 -1.0, %v7480_v49  ;;  %v7482_v5 = vpop.eup %7481  ;;  %6867 = vmatmul.mubr.bf16.gmra.mrb[148].mxu0 %v3822_v58  ;;  %v3812_v29 = vpack.c.bf16 %v3740_v43, %v3739_v18  ;;  %v3814_v24 = vpack.c.bf16 %v3710_v28, %v3709_v46  ;;  %v7206_v3 = vld [vmem:[%s11350_s5 + $0xb0] ss:$8 sps:$4 sm:$0xff]   ;;  %v7209_v41 = vld [vmem:[%s11350_s5 + $0xc0] ss:$8 sps:$4 sm:$0xff]  }
 0x441   : > { %4098 = vmatmul.mubr.bf16.gmra.mrb[176].mxu1 %v3799_v10  ;;  %v3653_v0 = vsel %vm3525_vm4, %v10403_v21, %v6169_v40  ;;  %v7484_v30 = vpop.eup %7483  ;;  %v6170_v4 = vadd.f32 -1.0, %v7482_v5  ;;  %v3736_v21 = vld [vmem:[#allocation4 + $0x69] sm:$0xff]  ;;  %v7214_v43 = vld [vmem:[%s11350_s5 + $0xd4] ss:$8 sps:$4 sm:$0xff]   ;;  %v10531_v28 = vld [vmem:[%s11352_s7 + $0x5] ss:$0 sm:$0xff] }
 0x442   : > { %4105 = vmatprep.mubr.bf16.mxu1 %v3803_v48  ;;  %3685 = vst [vmem:[#allocation4 + $0xd2] sm:$0xff] %v3653_v0  ;;  %v3651_v15 = vsel %vm3523_vm5, %v10409_v13, %v6167_v20  ;;  %v6168_v54 = vadd.f32 -1.0, %v7484_v30  ;;  %v3802_v13 = vpack.c.bf16 %v3702_v50, %v3701_v6  ;;  %v3806_v51 = vpack.c.bf16 %v3736_v21, %v3735_v57  ;;  %v3743_v14 = vld [vmem:[#allocation4 + $0xa1] sm:$0xff]  ;;  %v7196_v30 = vld [vmem:[%s11350_s5 + $0x74] ss:$8 sps:$4 sm:$0xff]  }
 0x443   : > { %3683 = vst [vmem:[#allocation4 + $0xc2] sm:$0xff] %v3651_v15  ;;  %v3654_v37 = vsel %vm3526_vm6, %v10420_v62, %v6170_v4  ;;  %v3746_v58 = vld [vmem:[#allocation4 + $0xb9] sm:$0xff]  ;;  %4864 = vmatprep.subr.bf16.mxu0 %v7196_v30  ;;  %v7217_v18 = vld [vmem:[%s11350_s5 + $0xe4] ss:$8 sps:$4 sm:$0xff]  }
 0x444   : > { %3686 = vst [vmem:[#allocation4 + $0xda] sm:$0xff] %v3654_v37  ;;  %v3652_v38 = vsel %vm3524_vm7, %v10424_v55, %v6168_v54  ;;  %v3828_v19 = vpack.c.bf16 %v3654_v37, %v3653_v0  ;;  %v3744_v22 = vld [vmem:[#allocation4 + $0xa9] sm:$0xff]  ;;  %v3745_v33 = vld [vmem:[#allocation4 + $0xb1] sm:$0xff]  ;;  %v3711_v49 = vld [vmem:[#allocation4 + $0xa0] sm:$0xff] }
 0x445   : > { %3684 = vst [vmem:[#allocation4 + $0xca] sm:$0xff] %v3652_v38  ;;  %v3825_v56 = vpack.c.bf16 %v3652_v38, %v3651_v15  ;;  %v3818_v35 = vpack.c.bf16 %v3744_v22, %v3743_v14  ;;  %v3712_v10 = vld [vmem:[#allocation4 + $0xa8] sm:$0xff]  ;;  %v3821_v48 = vpack.c.bf16 %v3746_v58, %v3745_v33  ;;  %v3714_v20 = vld [vmem:[#allocation4 + $0xb8] sm:$0xff]  ;;  %v3713_v5 = vld [vmem:[#allocation4 + $0xb0] sm:$0xff] }
 0x446   : > { %v7486_v11 = vpop.eup %7485  ;;  %v3817_v40 = vpack.c.bf16 %v3712_v10, %v3711_v49  ;;  %v7194_v0 = vld [vmem:[%s11350_s5 + $0x70] ss:$8 sps:$4 sm:$0xff]   ;;  %v3820_v4 = vpack.c.bf16 %v3714_v20, %v3713_v5 }
 0x447   : > { %v7488_v42 = vpop.eup %7487  ;;  %v6173_v17 = vadd.f32 -1.0, %v7486_v11  ;;  %6870 = vmatprep.mubr.bf16.mxu0 %v3825_v56  ;;  %4865 = vmatpush1.bf16.msra.mxu0 %v7194_v0 }
 0x448   : > { %v6171_v32 = vadd.f32 -1.0, %v7488_v42  ;;  %v7490_v62 = vpop.eup %7489  ;;  %6871 = vmatmul.mubr.bf16.gmra.mrb[152].mxu0 %v3828_v19 }
 0x449   : > { %4106 = vmatmul.mubr.bf16.gmra.mrb[180].mxu1 %v3802_v13  ;;  %v3657_v39 = vsel %vm3529_vm8, %v10435_v61, %v6173_v17  ;;  %v7492_v55 = vpop.eup %7491  ;;  %v6174_v2 = vadd.f32 -1.0, %v7490_v62  ;;  %v3738_v61 = vld [vmem:[#allocation4 + $0x79] sm:$0xff] }
 0x44a   : > { %4113 = vmatprep.mubr.bf16.mxu1 %v3806_v51  ;;  %3689 = vst [vmem:[#allocation4 + $0xf2] sm:$0xff] %v3657_v39  ;;  %v3655_v44 = vsel %vm3527_vm9, %v10439_v25, %v6171_v32  ;;  %v6172_v7 = vadd.f32 -1.0, %v7492_v55  ;;  %v3809_v47 = vpack.c.bf16 %v3738_v61, %v3737_v8  ;;  %v3747_v54 = vld [vmem:[#allocation4 + $0xc1] sm:$0xff]  ;;  %v7200_v8 = vld [vmem:[%s11350_s5 + $0x90] ss:$8 sps:$4 sm:$0xff]  }
 0x44b   : > { %3687 = vst [vmem:[#allocation4 + $0xe2] sm:$0xff] %v3655_v44  ;;  %v3658_v26 = vsel %vm3530_vm10, %v10449_v52, %v6174_v2  ;;  %v3741_v52 = vld [vmem:[#allocation4 + $0x91] sm:$0xff]  ;;  %v3750_v21 = vld [vmem:[#allocation4 + $0xd9] sm:$0xff]  ;;  %v7199_v2 = vld [vmem:[%s11350_s5 + $0x84] ss:$8 sps:$4 sm:$0xff]  }
 0x44c   : > { %3690 = vst [vmem:[#allocation4 + $0xfa] sm:$0xf] %v3658_v26  ;;  %v3656_v53 = vsel %vm3528_vm11, %v10453_v23, %v6172_v7  ;;  %v3811_v23 = vpack.c.bf16 %v3708_v63, %v3707_v34  ;;  %v3815_v31 = vpack.c.bf16 %v3742_v9, %v3741_v52  ;;  %v3748_v15 = vld [vmem:[#allocation4 + $0xc9] sm:$0xff]  ;;  %v3749_v37 = vld [vmem:[#allocation4 + $0xd1] sm:$0xff]  ;;  %v3715_v38 = vld [vmem:[#allocation4 + $0xc0] sm:$0xff]  ;;  %4866 = vmatprep.subr.bf16.mxu0 %v7199_v2 }
 0x44d   : > { %3688 = vst [vmem:[#allocation4 + $0xea] sm:$0xff] %v3656_v53  ;;  %v3831_v25 = vpack.c.bf16 %v3656_v53, %v3655_v44  ;;  %v3824_v6 = vpack.c.bf16 %v3748_v15, %v3747_v54  ;;  %v3716_v50 = vld [vmem:[#allocation4 + $0xc8] sm:$0xff]  ;;  %v3827_v11 = vpack.c.bf16 %v3750_v21, %v3749_v37  ;;  %v3717_v13 = vld [vmem:[#allocation4 + $0xd0] sm:$0xff]  ;;  %v3718_v57 = vld [vmem:[#allocation4 + $0xd8] sm:$0xff] }
 0x44e   : > { %v3823_v19 = vpack.c.bf16 %v3716_v50, %v3715_v38  ;;  %v3826_v42 = vpack.c.bf16 %v3718_v57, %v3717_v13  ;;  %v7197_v44 = vld [vmem:[%s11350_s5 + $0x80] ss:$8 sps:$4 sm:$0xff]   ;;  %v7218_v63 = vld [vmem:[%s11350_s5 + $0xf0] ss:$8 sps:$4 sm:$0xff]  }
 0x44f   : > { %6874 = vmatprep.mubr.bf16.mxu0 %v3831_v25  ;;  %4867 = vmatpush1.bf16.msra.mxu0 %v7197_v44  ;;  %v7221_v2 = vld [vmem:[%s11351_s6 + $0x40] sm:$0xff]  }
 0x450   : > { %4868 = vmatprep.subr.bf16.mxu0 %v7202_v59  ;;  %6670 = vmatprep.subr.bf16.mxu1 %v7221_v2 }
 0x451   : > { %4114 = vmatmul.mubr.bf16.gmra.mrb[184].mxu1 %v3805_v36  ;;  %v7205_v36 = vld [vmem:[%s11350_s5 + $0xa4] ss:$8 sps:$4 sm:$0xff]  }
 0x452   : > { %4121 = vmatprep.mubr.bf16.mxu1 %v3809_v47  ;;  %v3751_v17 = vld [vmem:[#allocation4 + $0xe1] sm:$0xff]  ;;  %v7208_v47 = vld [vmem:[%s11350_s5 + $0xb4] ss:$8 sps:$4 sm:$0xff]  }
 0x453   : > { %v3786_v60 = vld [vmem:[#allocation4 + $0xfa] sm:$0x3f]  ;;  %v3719_v55 = vld [vmem:[#allocation4 + $0xe0] sm:$0xff]  ;;  %4869 = vmatpush1.bf16.msra.mxu0 %v7200_v8 }
 0x454   : > { %v3834_v45 = vpack.c.bf16 %v3786_v60, %v3657_v39  ;;  %v3752_v56 = vld [vmem:[#allocation4 + $0xe9] sm:$0xff]  ;;  %v3753_v62 = vld [vmem:[#allocation4 + $0xf1] sm:$0xff]  ;;  %v3754_v39 = vld [vmem:[#allocation4 + $0xf9] sm:$0x3f]  ;;  %4870 = vmatprep.subr.bf16.mxu0 %v7205_v36 }
 0x455   : > { %v3830_v51 = vpack.c.bf16 %v3752_v56, %v3751_v17  ;;  %v3720_v32 = vld [vmem:[#allocation4 + $0xe8] sm:$0xff]  ;;  %v3833_v26 = vpack.c.bf16 %v3754_v39, %v3753_v62  ;;  %v3721_v61 = vld [vmem:[#allocation4 + $0xf0] sm:$0xff]  ;;  %v3722_v53 = vld [vmem:[#allocation4 + $0xf8] sm:$0x3f] }
 0x456   : > { %6875 = vmatmul.mubr.bf16.gmra.mrb[156].mxu0 %v3834_v45  ;;  %v3829_v7 = vpack.c.bf16 %v3720_v32, %v3719_v55  ;;  %v3832_v25 = vpack.c.bf16 %v3722_v53, %v3721_v61  ;;  %v7211_v60 = vld [vmem:[%s11350_s5 + $0xc4] ss:$8 sps:$4 sm:$0xff]   ;;  %v7212_v45 = vld [vmem:[%s11350_s5 + $0xd0] ss:$8 sps:$4 sm:$0xff]  }
 0x457   : > { %4871 = vmatpush1.bf16.msra.mxu0 %v7203_v1 }
 0x458   : > { %4872 = vmatprep.subr.bf16.mxu0 %v7208_v47 }
 0x459   : > { %4122 = vmatmul.mubr.bf16.gmra.mrb[188].mxu1 %v3808_v16  ;;  %v7215_v16 = vld [vmem:[%s11350_s5 + $0xe0] ss:$8 sps:$4 sm:$0xff]  }
 0x45a   : > { %4129 = vmatprep.mubr.bf16.mxu1 %v3812_v29  ;;  %v7220_v29 = vld [vmem:[%s11350_s5 + $0xf4] ss:$8 sps:$4 sm:$0xff]  }
 0x45b   : > { %4873 = vmatpush1.bf16.msra.mxu0 %v7206_v3 }
 0x45c   : > { %4874 = vmatprep.subr.bf16.mxu0 %v7211_v60 }
 0x45f   : > { %4875 = vmatpush1.bf16.msra.mxu0 %v7209_v41 }
 0x460   : > { %4876 = vmatprep.subr.bf16.mxu0 %v7214_v43 }
 0x461   : > { %4130 = vmatmul.mubr.bf16.gmra.mrb[192].mxu1 %v3811_v23 }
 0x462   : > { %4137 = vmatprep.mubr.bf16.mxu1 %v3815_v31 }
 0x463   : > { %4877 = vmatpush1.bf16.msra.mxu0 %v7212_v45 }
 0x464   : > { %4878 = vmatprep.subr.bf16.mxu0 %v7217_v18 }
 0x467   : > { %4879 = vmatpush1.bf16.msra.mxu0 %v7215_v16 }
 0x468   : > { %4880 = vmatprep.subr.bf16.mxu0 %v7220_v29 }
 0x469   : > { %4138 = vmatmul.mubr.bf16.gmra.mrb[196].mxu1 %v3814_v24 }
 0x46a   : > { %4145 = vmatprep.mubr.bf16.mxu1 %v3818_v35 }
 0x46b   : > { %4881 = vmatpush1.bf16.msra.mxu0 %v7218_v63 }
 0x471   : > { %4146 = vmatmul.mubr.bf16.gmra.mrb[200].mxu1 %v3817_v40 }
 0x472   : > { %4153 = vmatprep.mubr.bf16.mxu1 %v3821_v48 }
 0x479   : > { %4154 = vmatmul.mubr.bf16.gmra.mrb[204].mxu1 %v3820_v4 }
 0x47a   : > { %4161 = vmatprep.mubr.bf16.mxu1 %v3824_v6 }
 0x481   : > { %4162 = vmatmul.mubr.bf16.gmra.mrb[208].mxu1 %v3823_v19 }
 0x482   : > { %4169 = vmatprep.mubr.bf16.mxu1 %v3827_v11 }
 0x489   : > { %4170 = vmatmul.mubr.bf16.gmra.mrb[212].mxu1 %v3826_v42 }
 0x48a   : > { %4177 = vmatprep.mubr.bf16.mxu1 %v3830_v51 }
 0x491   : > { %4178 = vmatmul.mubr.bf16.gmra.mrb[216].mxu1 %v3829_v7 }
 0x492   : > { %4185 = vmatprep.mubr.bf16.mxu1 %v3833_v26  ;;  %v7222_v26 = vld [vmem:[%s11351_s6] sm:$0xff]  }
 0x493   : > { %6671 = vmatpush3.bf16.msra.mxu1 %v7222_v26 }
 0x499   : > { %4186 = vmatmul.mubr.bf16.gmra.mrb[220].mxu1 %v3832_v25 }
 0x4eb   : > { %v6848_v52 = vpop.f32.mrb[128].mxu0 }
 0x4ec   : > { %v4228_v9 = vpop.f32.mrb[129].mxu0 }
 0x4ed   : > { %v6849_v34 = vpop.f32.mrb[130].mxu0 }
 0x4ee   : > { %v4231_v23 = vpop.f32.mrb[131].mxu0 }
 0x4f3   : > { %v10533_v14 = vpop.f32.mrb[132].mxu0 }
 0x4f4   : > { %v6550_v31 = vpop.f32.mrb[160].mxu1  ;;  %v4244_v10 = vpop.f32.mrb[133].mxu0 }
 0x4f5   : > { %v6551_v46 = vpop.f32.mrb[161].mxu1  ;;  %v10536_v49 = vpop.f32.mrb[134].mxu0 }
 0x4f6   : > { %v6552_v22 = vadd.f32 %v6551_v46, %v6550_v31  ;;  %v6553_v24 = vpop.f32.mrb[162].mxu1  ;;  %v4247_v40 = vpop.f32.mrb[135].mxu0 }
 0x4f7   : > { %v6554_v35 = vpop.f32.mrb[163].mxu1 }
 0x4f8   : > { %v4068_v33 = vadd.f32 %v6552_v22, %v10531_v28  ;;  %v6555_v58 = vadd.f32 %v6554_v35, %v6553_v24 }
 0x4fa   : > { %v4229_v48 = vadd.f32 %v4228_v9, %v4068_v33  ;;  %v4071_v20 = vadd.f32 %v6555_v58, %v10531_v28 }
 0x4fb   : > { %v10539_v50 = vpop.f32.mrb[136].mxu0 }
 0x4fc   : > { %v4389_v5 = vmul.f32 1.442695, %v4229_v48  ;;  %v4232_v0 = vadd.f32 %v4231_v23, %v4071_v20  ;;  %v6556_v30 = vpop.f32.mrb[164].mxu1  ;;  %v10541_v21 = vpop.f32.mrb[137].mxu0  ;;  %vm4357_vm12 = vcmp.gt.f32.partialorder %v4229_v48, 0.0  ;;  %v7224_v20 = vld [vmem:[%s11351_s6 + $0x8] sm:$0xff]  }
 0x4fd   : > { %v6557_v15 = vpop.f32.mrb[165].mxu1  ;;  %v10544_v11 = vpop.f32.mrb[138].mxu0 }
 0x4fe   : > { %7493 = vpow2.f32 %v4389_v5  ;;  %v4391_v4 = vmul.f32 1.442695, %v4232_v0  ;;  %v6558_v54 = vadd.f32 %v6557_v15, %v6556_v30  ;;  %v6559_v6 = vpop.f32.mrb[166].mxu1  ;;  %v10546_v13 = vpop.f32.mrb[139].mxu0  ;;  %vm4358_vm13 = vcmp.gt.f32.partialorder %v4232_v0, 0.0  ;;  %v7225_v5 = vld [vmem:[%s11351_s6 + $0x50] sm:$0xff]  }
 0x4ff   : > { %v6560_v37 = vpop.f32.mrb[167].mxu1 }
 0x500   : > { %7495 = vpow2.f32 %v4391_v4  ;;  %v4076_v38 = vadd.f32 %v6558_v54, %v10531_v28  ;;  %v6561_v19 = vadd.f32 %v6560_v37, %v6559_v6 }
 0x502   : > { %v4237_v57 = vadd.f32 %v6848_v52, %v4076_v38  ;;  %v4079_v56 = vadd.f32 %v6561_v19, %v10531_v28 }
 0x503   : > { %v10552_v44 = vpop.f32.mrb[140].mxu0 }
 0x504   : > { %v4393_v42 = vmul.f32 1.442695, %v4237_v57  ;;  %v10549_v17 = vadd.f32 %v6849_v34, %v4079_v56  ;;  %v6562_v51 = vpop.f32.mrb[168].mxu1  ;;  %v10557_v59 = vpop.f32.mrb[141].mxu0  ;;  %vm4359_vm14 = vcmp.gt.f32.partialorder %v4237_v57, 0.0 }
 0x505   : > { %v6563_v32 = vpop.f32.mrb[169].mxu1  ;;  %v10563_v1 = vpop.f32.mrb[142].mxu0 }
 0x506   : > { %7497 = vpow2.f32 %v4393_v42  ;;  %v4395_v62 = vmul.f32 1.442695, %v10549_v17  ;;  %v6564_v39 = vadd.f32 %v6563_v32, %v6562_v51  ;;  %v6565_v55 = vpop.f32.mrb[170].mxu1  ;;  %v10565_v25 = vpop.f32.mrb[143].mxu0  ;;  %vm4360_vm15 = vcmp.gt.f32.partialorder %v10549_v17, 0.0  ;;  %v7227_v42 = vld [vmem:[%s11351_s6 + $0x58] sm:$0xff]  }
 0x507   : > { %v6566_v7 = vpop.f32.mrb[171].mxu1 }
 0x508   : > { %v7494_v8 = vpop.eup %7493  ;;  %7499 = vpow2.f32 %v4395_v62  ;;  %v4084_v61 = vadd.f32 %v6564_v39, %v10531_v28  ;;  %v6567_v53 = vadd.f32 %v6566_v7, %v6565_v55 }
 0x509   : > { %v6248_v36 = vadd.f32 -1.0, %v7494_v8 }
 0x50a   : > { %v7496_v47 = vpop.eup %7495  ;;  %v10567_v3 = vadd.f32 %v4244_v10, %v4084_v61  ;;  %v4087_v41 = vadd.f32 %v6567_v53, %v10531_v28 }
 0x50b   : > { %v4485_v60 = vsel %vm4357_vm12, %v4229_v48, %v6248_v36  ;;  %v6249_v43 = vadd.f32 -1.0, %v7496_v47  ;;  %v10574_v23 = vpop.f32.mrb[144].mxu0  ;;  %v7223_v48 = vld [vmem:[%s11351_s6 + $0x48] sm:$0xff]   ;;  %v7228_v36 = vld [vmem:[%s11351_s6 + $0x18] sm:$0xff]  }
 0x50c   : > { %4517 = vst [vmem:[#allocation5 + $0x1] sm:$0xff] %v4485_v60  ;;  %v4397_v45 = vmul.f32 1.442695, %v10567_v3  ;;  %v10571_v16 = vadd.f32 %v4247_v40, %v4087_v41  ;;  %v6568_v18 = vpop.f32.mrb[172].mxu1  ;;  %v10576_v46 = vpop.f32.mrb[145].mxu0  ;;  %6672 = vmatprep.subr.bf16.mxu1 %v7223_v48  ;;  %vm4361_vm0 = vcmp.gt.f32.partialorder %v10567_v3, 0.0 }
 0x50d   : > { %v4486_v29 = vsel %vm4358_vm13, %v4232_v0, %v6249_v43  ;;  %v6569_v63 = vpop.f32.mrb[173].mxu1  ;;  %v10579_v33 = vpop.f32.mrb[146].mxu0  ;;  %6673 = vmatpush3.bf16.msra.mxu1 %v7224_v20 }
 0x50e   : > { %4518 = vst [vmem:[#allocation5 + $0x9] sm:$0xff] %v4486_v29  ;;  %7501 = vpow2.f32 %v4397_v45  ;;  %v4399_v52 = vmul.f32 1.442695, %v10571_v16  ;;  %v6570_v9 = vadd.f32 %v6569_v63, %v6568_v18  ;;  %v6571_v34 = vpop.f32.mrb[174].mxu1  ;;  %v4614_v22 = vpack.c.bf16 %v4486_v29, %v4485_v60  ;;  %v10581_v40 = vpop.f32.mrb[147].mxu0  ;;  %6674 = vmatprep.subr.bf16.mxu1 %v7225_v5  ;;  %v7229_v60 = vld [vmem:[%s11351_s6 + $0x60] sm:$0xff]  }
 0x50f   : > { %v6572_v31 = vpop.f32.mrb[175].mxu1  ;;  %vm4362_vm2 = vcmp.gt.f32.partialorder %v10571_v16, 0.0 }
 0x510   : > { %v7498_v24 = vpop.eup %7497  ;;  %7503 = vpow2.f32 %v4399_v52  ;;  %v4092_v35 = vadd.f32 %v6570_v9, %v10531_v28  ;;  %v6573_v10 = vadd.f32 %v6572_v31, %v6571_v34  ;;  %4882 = vmatprep.mubr.bf16.mxu0 %v4614_v22 }
 0x511   : > { %v6250_v58 = vadd.f32 -1.0, %v7498_v24 }
 0x512   : > { %v7500_v0 = vpop.eup %7499  ;;  %v10593_v30 = vadd.f32 %v10533_v14, %v4092_v35  ;;  %v4095_v15 = vadd.f32 %v6573_v10, %v10531_v28  ;;  %v7226_v14 = vld [vmem:[%s11351_s6 + $0x10] sm:$0xff]  }
 0x513   : > { %v4487_v4 = vsel %vm4359_vm14, %v4237_v57, %v6250_v58  ;;  %v6251_v54 = vadd.f32 -1.0, %v7500_v0  ;;  %v4549_v62 = vld [vmem:[#allocation5] sm:$0xff]  ;;  %v10609_v39 = vpop.f32.mrb[148].mxu0  ;;  %6675 = vmatpush3.bf16.msra.mxu1 %v7226_v14 }
 0x514   : > { %4519 = vst [vmem:[#allocation5 + $0x11] sm:$0xff] %v4487_v4  ;;  %v4401_v6 = vmul.f32 1.442695, %v10593_v30  ;;  %v10599_v37 = vadd.f32 %v10536_v49, %v4095_v15  ;;  %v6574_v38 = vpop.f32.mrb[176].mxu1  ;;  %v10611_v7 = vpop.f32.mrb[149].mxu0  ;;  %6676 = vmatprep.subr.bf16.mxu1 %v7227_v42  ;;  %vm4363_vm3 = vcmp.gt.f32.partialorder %v10593_v30, 0.0 }
 0x515   : > { %v4488_v19 = vsel %vm4360_vm15, %v10549_v17, %v6251_v54  ;;  %v6575_v56 = vpop.f32.mrb[177].mxu1  ;;  %v4550_v57 = vld [vmem:[#allocation5 + $0x8] sm:$0xff]  ;;  %v10614_v53 = vpop.f32.mrb[150].mxu0 }
 0x516   : > { %4520 = vst [vmem:[#allocation5 + $0x19] sm:$0xff] %v4488_v19  ;;  %7505 = vpow2.f32 %v4401_v6  ;;  %v4403_v49 = vmul.f32 1.442695, %v10599_v37  ;;  %v6576_v51 = vadd.f32 %v6575_v56, %v6574_v38  ;;  %v6577_v32 = vpop.f32.mrb[178].mxu1  ;;  %v4613_v2 = vpack.c.bf16 %v4550_v57, %v4549_v62  ;;  %v10619_v41 = vpop.f32.mrb[151].mxu0  ;;  %v7232_v38 = vld [vmem:[%s11351_s6 + $0x28] sm:$0xff]  }
 0x517   : > { %v6578_v55 = vpop.f32.mrb[179].mxu1  ;;  %v4616_v17 = vpack.c.bf16 %v4488_v19, %v4487_v4  ;;  %6677 = vmatpush3.bf16.msra.mxu1 %v7228_v36  ;;  %v7233_v56 = vld [vmem:[%s11351_s6 + $0x70] sm:$0xff]   ;;  %vm4364_vm4 = vcmp.gt.f32.partialorder %v10599_v37, 0.0 }
 0x518   : > { %v7502_v26 = vpop.eup %7501  ;;  %7507 = vpow2.f32 %v4403_v49  ;;  %v4100_v8 = vadd.f32 %v6576_v51, %v10531_v28  ;;  %v6579_v61 = vadd.f32 %v6578_v55, %v6577_v32  ;;  %4883 = vmatmul.mubr.bf16.vlgmr.msra.gmra.mrb[160].mxu0 %v4613_v2  ;;  %6678 = vmatprep.subr.bf16.mxu1 %v7229_v60 }
 0x519   : > { %v6252_v47 = vadd.f32 -1.0, %v7502_v26  ;;  %4892 = vmatprep.mubr.bf16.mxu0 %v4616_v17 }
 0x51a   : > { %v7504_v43 = vpop.eup %7503  ;;  %v10626_v45 = vadd.f32 %v10541_v21, %v4100_v8  ;;  %v4103_v18 = vadd.f32 %v6579_v61, %v10531_v28  ;;  %v7230_v21 = vld [vmem:[%s11351_s6 + $0x20] sm:$0xff]  }
 0x51b   : > { %v4489_v29 = vsel %vm4361_vm0, %v10567_v3, %v6252_v47  ;;  %v6253_v63 = vadd.f32 -1.0, %v7504_v43  ;;  %v7231_v3 = vld [vmem:[%s11351_s6 + $0x68] sm:$0xff]   ;;  %v4551_v58 = vld [vmem:[#allocation5 + $0x10] sm:$0xff]  ;;  %v10643_v48 = vpop.f32.mrb[152].mxu0  ;;  %6679 = vmatpush3.bf16.msra.mxu1 %v7230_v21 }
 0x51c   : > { %4521 = vst [vmem:[#allocation5 + $0x21] sm:$0xff] %v4489_v29  ;;  %v4405_v52 = vmul.f32 1.442695, %v10626_v45  ;;  %v10633_v9 = vadd.f32 %v10546_v13, %v4103_v18  ;;  %v6580_v34 = vpop.f32.mrb[180].mxu1  ;;  %v10645_v0 = vpop.f32.mrb[153].mxu0  ;;  %6680 = vmatprep.subr.bf16.mxu1 %v7231_v3  ;;  %vm4365_vm5 = vcmp.gt.f32.partialorder %v10626_v45, 0.0 }
 0x51d   : > { %v4490_v31 = vsel %vm4362_vm2, %v10571_v16, %v6253_v63  ;;  %v6581_v22 = vpop.f32.mrb[181].mxu1  ;;  %v4552_v24 = vld [vmem:[#allocation5 + $0x18] sm:$0xff]  ;;  %v10648_v6 = vpop.f32.mrb[154].mxu0 }
 0x51e   : > { %4522 = vst [vmem:[#allocation5 + $0x29] sm:$0xff] %v4490_v31  ;;  %7509 = vpow2.f32 %v4405_v52  ;;  %v4407_v13 = vmul.f32 1.442695, %v10633_v9  ;;  %v6582_v35 = vadd.f32 %v6581_v22, %v6580_v34  ;;  %v6583_v10 = vpop.f32.mrb[182].mxu1  ;;  %v4615_v5 = vpack.c.bf16 %v4552_v24, %v4551_v58  ;;  %v10653_v19 = vpop.f32.mrb[155].mxu0 }
 0x51f   : > { %v6584_v20 = vpop.f32.mrb[183].mxu1  ;;  %v4618_v16 = vpack.c.bf16 %v4490_v31, %v4489_v29  ;;  %6681 = vmatpush3.bf16.msra.mxu1 %v7232_v38  ;;  %vm4366_vm6 = vcmp.gt.f32.partialorder %v10633_v9, 0.0 }
 0x520   : > { %v7506_v15 = vpop.eup %7505  ;;  %7511 = vpow2.f32 %v4407_v13  ;;  %v4108_v4 = vadd.f32 %v6582_v35, %v10531_v28  ;;  %v6585_v54 = vadd.f32 %v6584_v20, %v6583_v10  ;;  %4893 = vmatmul.mubr.bf16.gmra.mrb[164].mxu0 %v4615_v5  ;;  %6682 = vmatprep.subr.bf16.mxu1 %v7233_v56 }
 0x521   : > { %v6254_v14 = vadd.f32 -1.0, %v7506_v15  ;;  %4902 = vmatprep.mubr.bf16.mxu0 %v4618_v16 }
 0x522   : > { %v7508_v57 = vpop.eup %7507  ;;  %v10660_v42 = vadd.f32 %v10539_v50, %v4108_v4  ;;  %v4111_v49 = vadd.f32 %v6585_v54, %v10531_v28  ;;  %v7234_v50 = vld [vmem:[%s11351_s6 + $0x30] sm:$0xff]  }
 0x523   : > { %v4491_v51 = vsel %vm4363_vm3, %v10593_v30, %v6254_v14  ;;  %v6255_v32 = vadd.f32 -1.0, %v7508_v57  ;;  %v4553_v47 = vld [vmem:[#allocation5 + $0x20] sm:$0xff]  ;;  %6683 = vmatpush3.bf16.msra.mxu1 %v7234_v50 }
 0x524   : > { %4523 = vst [vmem:[#allocation5 + $0x31] sm:$0xff] %v4491_v51  ;;  %v4409_v62 = vmul.f32 1.442695, %v10660_v42  ;;  %v10667_v55 = vadd.f32 %v10544_v11, %v4111_v49  ;;  %v6586_v2 = vpop.f32.mrb[184].mxu1  ;;  %vm4367_vm7 = vcmp.gt.f32.partialorder %v10660_v42, 0.0 }
 0x525   : > { %v4492_v17 = vsel %vm4364_vm4, %v10599_v37, %v6255_v32  ;;  %v6587_v26 = vpop.f32.mrb[185].mxu1  ;;  %v4554_v8 = vld [vmem:[#allocation5 + $0x28] sm:$0xff] }
 0x526   : > { %4524 = vst [vmem:[#allocation5 + $0x39] sm:$0xff] %v4492_v17  ;;  %7513 = vpow2.f32 %v4409_v62  ;;  %v4411_v30 = vmul.f32 1.442695, %v10667_v55  ;;  %v6588_v61 = vadd.f32 %v6587_v26, %v6586_v2  ;;  %v6589_v36 = vpop.f32.mrb[186].mxu1  ;;  %v4617_v60 = vpack.c.bf16 %v4554_v8, %v4553_v47 }
 0x527   : > { %v6590_v11 = vpop.f32.mrb[187].mxu1  ;;  %v4620_v43 = vpack.c.bf16 %v4492_v17, %v4491_v51  ;;  %vm4368_vm8 = vcmp.gt.f32.partialorder %v10667_v55, 0.0 }
 0x528   : > { %v7510_v18 = vpop.eup %7509  ;;  %7515 = vpow2.f32 %v4411_v30  ;;  %v4116_v29 = vadd.f32 %v6588_v61, %v10531_v28  ;;  %v6591_v63 = vadd.f32 %v6590_v11, %v6589_v36  ;;  %4903 = vmatmul.mubr.bf16.gmra.mrb[168].mxu0 %v4617_v60 }
 0x529   : > { %v6256_v37 = vadd.f32 -1.0, %v7510_v18  ;;  %4912 = vmatprep.mubr.bf16.mxu0 %v4620_v43  ;;  %v10681_v24 = vpop.f32.mrb[156].mxu0 }
 0x52a   : > { %v7512_v52 = vpop.eup %7511  ;;  %v10677_v34 = vadd.f32 %v10557_v59, %v4116_v29  ;;  %v4119_v21 = vadd.f32 %v6591_v63, %v10531_v28  ;;  %v10688_v10 = vpop.f32.mrb[157].mxu0 }
 0x52b   : > { %v4493_v31 = vsel %vm4365_vm5, %v10626_v45, %v6256_v37  ;;  %v6257_v22 = vadd.f32 -1.0, %v7512_v52  ;;  %v10691_v20 = vpop.f32.mrb[158].mxu0  ;;  %v4555_v54 = vld [vmem:[#allocation5 + $0x30] sm:$0xff] }
 0x52c   : > { %4525 = vst [vmem:[#allocation5 + $0x41] sm:$0xff] %v4493_v31  ;;  %v4413_v3 = vmul.f32 1.442695, %v10677_v34  ;;  %v10686_v13 = vadd.f32 %v10565_v25, %v4119_v21  ;;  %v6592_v35 = vpop.f32.mrb[188].mxu1  ;;  %v10694_v4 = vpop.f32.mrb[159].mxu0  ;;  %vm4369_vm9 = vcmp.gt.f32.partialorder %v10677_v34, 0.0 }
 0x52d   : > { %v4494_v59 = vsel %vm4366_vm6, %v10633_v9, %v6257_v22  ;;  %v6593_v58 = vpop.f32.mrb[189].mxu1  ;;  %v4556_v45 = vld [vmem:[#allocation5 + $0x38] sm:$0xff] }
 0x52e   : > { %4526 = vst [vmem:[#allocation5 + $0x49] sm:$0xff] %v4494_v59  ;;  %7517 = vpow2.f32 %v4413_v3  ;;  %v4415_v5 = vmul.f32 1.442695, %v10686_v13  ;;  %v6594_v16 = vadd.f32 %v6593_v58, %v6592_v35  ;;  %v6595_v15 = vpop.f32.mrb[190].mxu1  ;;  %v4619_v38 = vpack.c.bf16 %v4556_v45, %v4555_v54 }
 0x52f   : > { %v6596_v25 = vpop.f32.mrb[191].mxu1  ;;  %v4622_v14 = vpack.c.bf16 %v4494_v59, %v4493_v31  ;;  %vm4370_vm10 = vcmp.gt.f32.partialorder %v10686_v13, 0.0 }
 0x530   : > { %v7514_v56 = vpop.eup %7513  ;;  %7519 = vpow2.f32 %v4415_v5  ;;  %v4124_v9 = vadd.f32 %v6594_v16, %v10531_v28  ;;  %v6597_v57 = vadd.f32 %v6596_v25, %v6595_v15  ;;  %4913 = vmatmul.mubr.bf16.gmra.mrb[172].mxu0 %v4619_v38 }
 0x531   : > { %v6258_v49 = vadd.f32 -1.0, %v7514_v56  ;;  %4922 = vmatprep.mubr.bf16.mxu0 %v4622_v14 }
 0x532   : > { %v7516_v51 = vpop.eup %7515  ;;  %v10699_v32 = vadd.f32 %v10552_v44, %v4124_v9  ;;  %v4127_v62 = vadd.f32 %v6597_v57, %v10531_v28 }
 0x533   : > { %v4495_v2 = vsel %vm4367_vm7, %v10660_v42, %v6258_v49  ;;  %v6259_v50 = vadd.f32 -1.0, %v7516_v51  ;;  %v4557_v11 = vld [vmem:[#allocation5 + $0x40] sm:$0xff] }
 0x534   : > { %4527 = vst [vmem:[#allocation5 + $0x51] sm:$0xff] %v4495_v2  ;;  %v4417_v17 = vmul.f32 1.442695, %v10699_v32  ;;  %v10706_v26 = vadd.f32 %v10563_v1, %v4127_v62  ;;  %v6598_v8 = vpop.f32.mrb[192].mxu1  ;;  %vm4371_vm11 = vcmp.gt.f32.partialorder %v10699_v32, 0.0 }
 0x535   : > { %v4496_v30 = vsel %vm4368_vm8, %v10667_v55, %v6259_v50  ;;  %v6599_v61 = vpop.f32.mrb[193].mxu1  ;;  %v4558_v44 = vld [vmem:[#allocation5 + $0x48] sm:$0xff] }
 0x536   : > { %4528 = vst [vmem:[#allocation5 + $0x59] sm:$0xff] %v4496_v30  ;;  %7521 = vpow2.f32 %v4417_v17  ;;  %v4419_v36 = vmul.f32 1.442695, %v10706_v26  ;;  %v6600_v47 = vadd.f32 %v6599_v61, %v6598_v8  ;;  %v6601_v42 = vpop.f32.mrb[194].mxu1  ;;  %v4621_v43 = vpack.c.bf16 %v4558_v44, %v4557_v11 }
 0x537   : > { %v6602_v60 = vpop.f32.mrb[195].mxu1  ;;  %v4624_v18 = vpack.c.bf16 %v4496_v30, %v4495_v2  ;;  %vm4372_vm12 = vcmp.gt.f32.partialorder %v10706_v26, 0.0 }
 0x538   : > { %v7518_v29 = vpop.eup %7517  ;;  %7523 = vpow2.f32 %v4419_v36  ;;  %v4132_v1 = vadd.f32 %v6600_v47, %v10531_v28  ;;  %v6603_v63 = vadd.f32 %v6602_v60, %v6601_v42  ;;  %4923 = vmatmul.mubr.bf16.gmra.mrb[176].mxu0 %v4621_v43 }
 0x539   : > { %v6260_v37 = vadd.f32 -1.0, %v7518_v29  ;;  %4932 = vmatprep.mubr.bf16.mxu0 %v4624_v18 }
 0x53a   : > { %v7520_v55 = vpop.eup %7519  ;;  %v10713_v52 = vadd.f32 %v10576_v46, %v4132_v1  ;;  %v4135_v21 = vadd.f32 %v6603_v63, %v10531_v28 }
 0x53b   : > { %v4497_v31 = vsel %vm4369_vm9, %v10677_v34, %v6260_v37  ;;  %v6261_v22 = vadd.f32 -1.0, %v7520_v55  ;;  %v4559_v15 = vld [vmem:[#allocation5 + $0x50] sm:$0xff] }
 0x53c   : > { %4529 = vst [vmem:[#allocation5 + $0x61] sm:$0xff] %v4497_v31  ;;  %v4421_v3 = vmul.f32 1.442695, %v10713_v52  ;;  %v10720_v35 = vadd.f32 %v10581_v40, %v4135_v21  ;;  %v6604_v59 = vpop.f32.mrb[196].mxu1  ;;  %vm4373_vm13 = vcmp.gt.f32.partialorder %v10713_v52, 0.0 }
 0x53d   : > { %v4498_v58 = vsel %vm4370_vm10, %v10686_v13, %v6261_v22  ;;  %v6605_v45 = vpop.f32.mrb[197].mxu1  ;;  %v4560_v46 = vld [vmem:[#allocation5 + $0x58] sm:$0xff] }
 0x53e   : > { %4530 = vst [vmem:[#allocation5 + $0x69] sm:$0xff] %v4498_v58  ;;  %7525 = vpow2.f32 %v4421_v3  ;;  %v4423_v5 = vmul.f32 1.442695, %v10720_v35  ;;  %v6606_v16 = vadd.f32 %v6605_v45, %v6604_v59  ;;  %v6607_v34 = vpop.f32.mrb[198].mxu1  ;;  %v4623_v25 = vpack.c.bf16 %v4560_v46, %v4559_v15 }
 0x53f   : > { %v6608_v54 = vpop.f32.mrb[199].mxu1  ;;  %v4626_v38 = vpack.c.bf16 %v4498_v58, %v4497_v31  ;;  %vm4374_vm14 = vcmp.gt.f32.partialorder %v10720_v35, 0.0 }
 0x540   : > { %v7522_v14 = vpop.eup %7521  ;;  %7527 = vpow2.f32 %v4423_v5  ;;  %v4140_v40 = vadd.f32 %v6606_v16, %v10531_v28  ;;  %v6609_v56 = vadd.f32 %v6608_v54, %v6607_v34  ;;  %4933 = vmatmul.mubr.bf16.gmra.mrb[180].mxu0 %v4623_v25 }
 0x541   : > { %v6262_v9 = vadd.f32 -1.0, %v7522_v14  ;;  %4942 = vmatprep.mubr.bf16.mxu0 %v4626_v38 }
 0x542   : > { %v7524_v13 = vpop.eup %7523  ;;  %v10727_v57 = vadd.f32 %v10574_v23, %v4140_v40  ;;  %v4143_v49 = vadd.f32 %v6609_v56, %v10531_v28 }
 0x543   : > { %v4499_v51 = vsel %vm4371_vm11, %v10699_v32, %v6262_v9  ;;  %v6263_v62 = vadd.f32 -1.0, %v7524_v13  ;;  %v4561_v36 = vld [vmem:[#allocation5 + $0x60] sm:$0xff] }
 0x544   : > { %4531 = vst [vmem:[#allocation5 + $0x71] sm:$0xff] %v4499_v51  ;;  %v4425_v2 = vmul.f32 1.442695, %v10727_v57  ;;  %v10734_v50 = vadd.f32 %v10579_v33, %v4143_v49  ;;  %v6610_v17 = vpop.f32.mrb[200].mxu1  ;;  %vm4375_vm15 = vcmp.gt.f32.partialorder %v10727_v57, 0.0 }
 0x545   : > { %v4500_v8 = vsel %vm4372_vm12, %v10706_v26, %v6263_v62  ;;  %v6611_v30 = vpop.f32.mrb[201].mxu1  ;;  %v4562_v23 = vld [vmem:[#allocation5 + $0x68] sm:$0xff] }
 0x546   : > { %4532 = vst [vmem:[#allocation5 + $0x79] sm:$0xff] %v4500_v8  ;;  %7529 = vpow2.f32 %v4425_v2  ;;  %v4427_v61 = vmul.f32 1.442695, %v10734_v50  ;;  %v6612_v44 = vadd.f32 %v6611_v30, %v6610_v17  ;;  %v6613_v32 = vpop.f32.mrb[202].mxu1  ;;  %v4625_v42 = vpack.c.bf16 %v4562_v23, %v4561_v36 }
 0x547   : > { %v6614_v47 = vpop.f32.mrb[203].mxu1  ;;  %v4628_v11 = vpack.c.bf16 %v4500_v8, %v4499_v51  ;;  %vm4376_vm0 = vcmp.gt.f32.partialorder %v10734_v50, 0.0 }
 0x548   : > { %v7526_v60 = vpop.eup %7525  ;;  %7531 = vpow2.f32 %v4427_v61  ;;  %v4148_v33 = vadd.f32 %v6612_v44, %v10531_v28  ;;  %v6615_v43 = vadd.f32 %v6614_v47, %v6613_v32  ;;  %4943 = vmatmul.mubr.bf16.gmra.mrb[184].mxu0 %v4625_v42 }
 0x549   : > { %v6264_v18 = vadd.f32 -1.0, %v7526_v60  ;;  %4952 = vmatprep.mubr.bf16.mxu0 %v4628_v11 }
 0x54a   : > { %v7528_v26 = vpop.eup %7527  ;;  %v10741_v29 = vadd.f32 %v10611_v7, %v4148_v33  ;;  %v4151_v1 = vadd.f32 %v6615_v43, %v10531_v28 }
 0x54b   : > { %v4501_v63 = vsel %vm4373_vm13, %v10713_v52, %v6264_v18  ;;  %v6265_v37 = vadd.f32 -1.0, %v7528_v26  ;;  %v4563_v45 = vld [vmem:[#allocation5 + $0x70] sm:$0xff] }
 0x54c   : > { %4533 = vst [vmem:[#allocation5 + $0x81] sm:$0xff] %v4501_v63  ;;  %v4429_v55 = vmul.f32 1.442695, %v10741_v29  ;;  %v10748_v21 = vadd.f32 %v10619_v41, %v4151_v1  ;;  %v6616_v31 = vpop.f32.mrb[204].mxu1  ;;  %vm4377_vm2 = vcmp.gt.f32.partialorder %v10741_v29, 0.0 }
 0x54d   : > { %v4502_v22 = vsel %vm4374_vm14, %v10720_v35, %v6265_v37  ;;  %v6617_v3 = vpop.f32.mrb[205].mxu1  ;;  %v4564_v7 = vld [vmem:[#allocation5 + $0x78] sm:$0xff] }
 0x54e   : > { %4534 = vst [vmem:[#allocation5 + $0x89] sm:$0xff] %v4502_v22  ;;  %7533 = vpow2.f32 %v4429_v55  ;;  %v4431_v59 = vmul.f32 1.442695, %v10748_v21  ;;  %v6618_v58 = vadd.f32 %v6617_v3, %v6616_v31  ;;  %v6619_v52 = vpop.f32.mrb[206].mxu1  ;;  %v4627_v5 = vpack.c.bf16 %v4564_v7, %v4563_v45 }
 0x54f   : > { %v6620_v46 = vpop.f32.mrb[207].mxu1  ;;  %v4630_v16 = vpack.c.bf16 %v4502_v22, %v4501_v63  ;;  %vm4378_vm3 = vcmp.gt.f32.partialorder %v10748_v21, 0.0 }
 0x550   : > { %v7530_v34 = vpop.eup %7529  ;;  %7535 = vpow2.f32 %v4431_v59  ;;  %v4156_v41 = vadd.f32 %v6618_v58, %v10531_v28  ;;  %v6621_v15 = vadd.f32 %v6620_v46, %v6619_v52  ;;  %4953 = vmatmul.mubr.bf16.gmra.mrb[188].mxu0 %v4627_v5 }
 0x551   : > { %v6266_v54 = vadd.f32 -1.0, %v7530_v34  ;;  %4962 = vmatprep.mubr.bf16.mxu0 %v4630_v16 }
 0x552   : > { %v7532_v35 = vpop.eup %7531  ;;  %v10755_v25 = vadd.f32 %v10609_v39, %v4156_v41  ;;  %v4159_v38 = vadd.f32 %v6621_v15, %v10531_v28 }
 0x553   : > { %v4503_v14 = vsel %vm4375_vm15, %v10727_v57, %v6266_v54  ;;  %v6267_v40 = vadd.f32 -1.0, %v7532_v35  ;;  %v4565_v17 = vld [vmem:[#allocation5 + $0x80] sm:$0xff] }
 0x554   : > { %4535 = vst [vmem:[#allocation5 + $0x91] sm:$0xff] %v4503_v14  ;;  %v4433_v56 = vmul.f32 1.442695, %v10755_v25  ;;  %v10762_v9 = vadd.f32 %v10614_v53, %v4159_v38  ;;  %v6622_v13 = vpop.f32.mrb[208].mxu1  ;;  %vm4379_vm4 = vcmp.gt.f32.partialorder %v10755_v25, 0.0 }
 0x555   : > { %v4504_v49 = vsel %vm4376_vm0, %v10734_v50, %v6267_v40  ;;  %v6623_v51 = vpop.f32.mrb[209].mxu1  ;;  %v4566_v39 = vld [vmem:[#allocation5 + $0x88] sm:$0xff] }
 0x556   : > { %4536 = vst [vmem:[#allocation5 + $0x99] sm:$0xff] %v4504_v49  ;;  %7537 = vpow2.f32 %v4433_v56  ;;  %v4435_v62 = vmul.f32 1.442695, %v10762_v9  ;;  %v6624_v2 = vadd.f32 %v6623_v51, %v6622_v13  ;;  %v6625_v57 = vpop.f32.mrb[210].mxu1  ;;  %v4629_v30 = vpack.c.bf16 %v4566_v39, %v4565_v17 }
 0x557   : > { %v6626_v8 = vpop.f32.mrb[211].mxu1  ;;  %v4632_v23 = vpack.c.bf16 %v4504_v49, %v4503_v14  ;;  %vm4380_vm5 = vcmp.gt.f32.partialorder %v10762_v9, 0.0 }
 0x558   : > { %v7534_v61 = vpop.eup %7533  ;;  %7539 = vpow2.f32 %v4435_v62  ;;  %v4164_v53 = vadd.f32 %v6624_v2, %v10531_v28  ;;  %v6627_v44 = vadd.f32 %v6626_v8, %v6625_v57  ;;  %4963 = vmatmul.mubr.bf16.gmra.mrb[192].mxu0 %v4629_v30 }
 0x559   : > { %v6268_v32 = vadd.f32 -1.0, %v7534_v61  ;;  %4972 = vmatprep.mubr.bf16.mxu0 %v4632_v23 }
 0x55a   : > { %v7536_v50 = vpop.eup %7535  ;;  %v10769_v36 = vadd.f32 %v10645_v0, %v4164_v53  ;;  %v4167_v47 = vadd.f32 %v6627_v44, %v10531_v28 }
 0x55b   : > { %v4505_v42 = vsel %vm4377_vm2, %v10741_v29, %v6268_v32  ;;  %v6269_v11 = vadd.f32 -1.0, %v7536_v50  ;;  %v4567_v37 = vld [vmem:[#allocation5 + $0x90] sm:$0xff] }
 0x55c   : > { %4537 = vst [vmem:[#allocation5 + $0xa1] sm:$0xff] %v4505_v42  ;;  %v4437_v60 = vmul.f32 1.442695, %v10769_v36  ;;  %v10776_v33 = vadd.f32 %v10653_v19, %v4167_v47  ;;  %v6628_v43 = vpop.f32.mrb[212].mxu1  ;;  %vm4381_vm6 = vcmp.gt.f32.partialorder %v10769_v36, 0.0 }
 0x55d   : > { %v4506_v18 = vsel %vm4378_vm3, %v10748_v21, %v6269_v11  ;;  %v6629_v26 = vpop.f32.mrb[213].mxu1  ;;  %v4568_v0 = vld [vmem:[#allocation5 + $0x98] sm:$0xff] }
 0x55e   : > { %4538 = vst [vmem:[#allocation5 + $0xa9] sm:$0xff] %v4506_v18  ;;  %7541 = vpow2.f32 %v4437_v60  ;;  %v4439_v1 = vmul.f32 1.442695, %v10776_v33  ;;  %v6630_v63 = vadd.f32 %v6629_v26, %v6628_v43  ;;  %v6631_v29 = vpop.f32.mrb[214].mxu1  ;;  %v4631_v31 = vpack.c.bf16 %v4568_v0, %v4567_v37 }
 0x55f   : > { %v6632_v55 = vpop.f32.mrb[215].mxu1  ;;  %v4634_v22 = vpack.c.bf16 %v4506_v18, %v4505_v42  ;;  %vm4382_vm7 = vcmp.gt.f32.partialorder %v10776_v33, 0.0 }
 0x560   : > { %v7538_v3 = vpop.eup %7537  ;;  %7543 = vpow2.f32 %v4439_v1  ;;  %v4172_v19 = vadd.f32 %v6630_v63, %v10531_v28  ;;  %v6633_v7 = vadd.f32 %v6632_v55, %v6631_v29  ;;  %4973 = vmatmul.mubr.bf16.gmra.mrb[196].mxu0 %v4631_v31 }
 0x561   : > { %v6270_v59 = vadd.f32 -1.0, %v7538_v3  ;;  %4982 = vmatprep.mubr.bf16.mxu0 %v4634_v22 }
 0x562   : > { %v7540_v21 = vpop.eup %7539  ;;  %v10783_v58 = vadd.f32 %v10643_v48, %v4172_v19  ;;  %v4175_v52 = vadd.f32 %v6633_v7, %v10531_v28 }
 0x563   : > { %v4507_v45 = vsel %vm4379_vm4, %v10755_v25, %v6270_v59  ;;  %v6271_v46 = vadd.f32 -1.0, %v7540_v21  ;;  %v4569_v14 = vld [vmem:[#allocation5 + $0xa0] sm:$0xff] }
 0x564   : > { %4539 = vst [vmem:[#allocation5 + $0xb1] sm:$0xff] %v4507_v45  ;;  %v4441_v5 = vmul.f32 1.442695, %v10783_v58  ;;  %v4336_v16 = vadd.f32 %v10648_v6, %v4175_v52  ;;  %v6634_v34 = vpop.f32.mrb[216].mxu1  ;;  %vm4383_vm8 = vcmp.gt.f32.partialorder %v10783_v58, 0.0 }
 0x565   : > { %v4508_v41 = vsel %vm4380_vm5, %v10762_v9, %v6271_v46  ;;  %v6635_v15 = vpop.f32.mrb[217].mxu1  ;;  %v4570_v54 = vld [vmem:[#allocation5 + $0xa8] sm:$0xff] }
 0x566   : > { %4540 = vst [vmem:[#allocation5 + $0xb9] sm:$0xff] %v4508_v41  ;;  %7545 = vpow2.f32 %v4441_v5  ;;  %v4443_v48 = vmul.f32 1.442695, %v4336_v16  ;;  %v6636_v35 = vadd.f32 %v6635_v15, %v6634_v34  ;;  %v6637_v38 = vpop.f32.mrb[218].mxu1  ;;  %v4633_v40 = vpack.c.bf16 %v4570_v54, %v4569_v14  ;;  %v7235_v54 = vld [vmem:[%s11351_s6 + $0x78] sm:$0xff]  }
 0x567   : > { %v6638_v25 = vpop.f32.mrb[219].mxu1  ;;  %v4636_v56 = vpack.c.bf16 %v4508_v41, %v4507_v45  ;;  %vm4384_vm9 = vcmp.gt.f32.partialorder %v4336_v16, 0.0  ;;  %v7236_v14 = vld [vmem:[%s11351_s6 + $0x38] sm:$0xff]   ;;  %6684 = vmatprep.subr.bf16.mxu1 %v7235_v54 }
 0x568   : > { %v7542_v13 = vpop.eup %7541  ;;  %7547 = vpow2.f32 %v4443_v48  ;;  %v4180_v49 = vadd.f32 %v6636_v35, %v10531_v28  ;;  %v6639_v51 = vadd.f32 %v6638_v25, %v6637_v38  ;;  %4983 = vmatmul.mubr.bf16.gmra.mrb[200].mxu0 %v4633_v40  ;;  %6685 = vmatpush3.bf16.msra.mxu1 %v7236_v14 }
 0x569   : > { %v6272_v6 = vadd.f32 -1.0, %v7542_v13  ;;  %4992 = vmatprep.mubr.bf16.mxu0 %v4636_v56 }
 0x56a   : > { %v7544_v39 = vpop.eup %7543  ;;  %v4341_v9 = vadd.f32 %v10688_v10, %v4180_v49  ;;  %v4183_v62 = vadd.f32 %v6639_v51, %v10531_v28 }
 0x56b   : > { %v4509_v2 = vsel %vm4381_vm6, %v10769_v36, %v6272_v6  ;;  %v6273_v57 = vadd.f32 -1.0, %v7544_v39  ;;  %v4571_v50 = vld [vmem:[#allocation5 + $0xb0] sm:$0xff]  ;;  %v6280_v6 = vld [vmem:[%s11352_s7 + $0x2] ss:$4 sm:$0x3] }
 0x56c   : > { %4541 = vst [vmem:[#allocation5 + $0xc1] sm:$0xff] %v4509_v2  ;;  %v4445_v17 = vmul.f32 1.442695, %v4341_v9  ;;  %v4344_v8 = vadd.f32 %v10694_v4, %v4183_v62  ;;  %v6640_v30 = vpop.f32.mrb[220].mxu1  ;;  %vm4385_vm10 = vcmp.gt.f32.partialorder %v4341_v9, 0.0  ;;  %v10815_v39 = vrot.slane %v6280_v6, %v11620_v27 }
 0x56d   : > { %v4510_v23 = vsel %vm4382_vm7, %v10776_v33, %v6273_v57  ;;  %v6641_v61 = vpop.f32.mrb[221].mxu1  ;;  %v4572_v53 = vld [vmem:[#allocation5 + $0xb8] sm:$0xff] }
 0x56e   : > { %4542 = vst [vmem:[#allocation5 + $0xc9] sm:$0xff] %v4510_v23  ;;  %7549 = vpow2.f32 %v4445_v17  ;;  %v4447_v10 = vmul.f32 1.442695, %v4344_v8  ;;  %v6642_v44 = vadd.f32 %v6641_v61, %v6640_v30  ;;  %v6643_v32 = vpop.f32.mrb[222].mxu1  ;;  %v4635_v36 = vpack.c.bf16 %v4572_v53, %v4571_v50 }
 0x56f   : > { %v6644_v47 = vpop.f32.mrb[223].mxu1  ;;  %v4638_v42 = vpack.c.bf16 %v4510_v23, %v4509_v2  ;;  %vm4386_vm11 = vcmp.gt.f32.partialorder %v4344_v8, 0.0 }
 0x570   : > { %v7546_v11 = vpop.eup %7545  ;;  %7551 = vpow2.f32 %v4447_v10  ;;  %v4188_v60 = vadd.f32 %v6642_v44, %v10531_v28  ;;  %v6645_v43 = vadd.f32 %v6644_v47, %v6643_v32  ;;  %4993 = vmatmul.mubr.bf16.gmra.mrb[204].mxu0 %v4635_v36 }
 0x571   : > { %v6274_v4 = vadd.f32 -1.0, %v7546_v11  ;;  %5002 = vmatprep.mubr.bf16.mxu0 %v4638_v42 }
 0x572   : > { %v7548_v18 = vpop.eup %7547  ;;  %v4349_v33 = vadd.f32 %v10681_v24, %v4188_v60  ;;  %v4191_v26 = vadd.f32 %v6645_v43, %v10531_v28 }
 0x573   : > { %v4511_v0 = vsel %vm4383_vm8, %v10783_v58, %v6274_v4  ;;  %v6275_v1 = vadd.f32 -1.0, %v7548_v18  ;;  %v4573_v55 = vld [vmem:[#allocation5 + $0xc0] sm:$0xff] }
 0x574   : > { %4543 = vst [vmem:[#allocation5 + $0xd1] sm:$0xff] %v4511_v0  ;;  %v4449_v63 = vmul.f32 1.442695, %v4349_v33  ;;  %v4352_v29 = vadd.f32 %v10691_v20, %v4191_v26  ;;  %vm4387_vm12 = vcmp.gt.f32.partialorder %v4349_v33, 0.0 }
 0x575   : > { %v4512_v37 = vsel %vm4384_vm9, %v4336_v16, %v6275_v1  ;;  %v4574_v31 = vld [vmem:[#allocation5 + $0xc8] sm:$0xff] }
 0x576   : > { %4544 = vst [vmem:[#allocation5 + $0xd9] sm:$0xff] %v4512_v37  ;;  %7553 = vpow2.f32 %v4449_v63  ;;  %v4451_v22 = vmul.f32 1.442695, %v4352_v29  ;;  %v4637_v3 = vpack.c.bf16 %v4574_v31, %v4573_v55  ;;  %v4640_v19 = vpack.c.bf16 %v4512_v37, %v4511_v0 }
 0x577   : > { %vm4388_vm13 = vcmp.gt.f32.partialorder %v4352_v29, 0.0 }
 0x578   : > { %v7550_v24 = vpop.eup %7549  ;;  %7555 = vpow2.f32 %v4451_v22  ;;  %5003 = vmatmul.mubr.bf16.gmra.mrb[208].mxu0 %v4637_v3 }
 0x579   : > { %v6276_v28 = vadd.f32 -1.0, %v7550_v24  ;;  %5012 = vmatprep.mubr.bf16.mxu0 %v4640_v19 }
 0x57a   : > { %v7552_v7 = vpop.eup %7551 }
 0x57b   : > { %v4513_v59 = vsel %vm4385_vm10, %v4341_v9, %v6276_v28  ;;  %v6277_v21 = vadd.f32 -1.0, %v7552_v7  ;;  %v4575_v58 = vld [vmem:[#allocation5 + $0xd0] sm:$0xff]  ;;  %v10818_v9 = vrot.slane %v6280_v6, %v11621_v12 }
 0x57c   : > { %4545 = vst [vmem:[#allocation5 + $0xe1] sm:$0xff] %v4513_v59 }
 0x57d   : > { %v4514_v20 = vsel %vm4386_vm11, %v4344_v8, %v6277_v21  ;;  %v4576_v52 = vld [vmem:[#allocation5 + $0xd8] sm:$0xff] }
 0x57e   : > { %4546 = vst [vmem:[#allocation5 + $0xe9] sm:$0xff] %v4514_v20  ;;  %v4639_v45 = vpack.c.bf16 %v4576_v52, %v4575_v58  ;;  %v4642_v46 = vpack.c.bf16 %v4514_v20, %v4513_v59 }
 0x580   : > { %v7554_v5 = vpop.eup %7553  ;;  %5013 = vmatmul.mubr.bf16.gmra.mrb[212].mxu0 %v4639_v45 }
 0x581   : > { %v6278_v16 = vadd.f32 -1.0, %v7554_v5  ;;  %5022 = vmatprep.mubr.bf16.mxu0 %v4642_v46 }
 0x582   : > { %v7556_v34 = vpop.eup %7555 }
 0x583   : > { %v4515_v41 = vsel %vm4387_vm12, %v4349_v33, %v6278_v16  ;;  %v6279_v15 = vadd.f32 -1.0, %v7556_v34  ;;  %v4577_v35 = vld [vmem:[#allocation5 + $0xe0] sm:$0xff] }
 0x584   : > { %4547 = vst [vmem:[#allocation5 + $0xf1] sm:$0xff] %v4515_v41 }
 0x585   : > { %v4516_v48 = vsel %vm4388_vm13, %v4352_v29, %v6279_v15  ;;  %v4578_v38 = vld [vmem:[#allocation5 + $0xe8] sm:$0xff] }
 0x586   : > { %4548 = vst [vmem:[#allocation5 + $0xf9] sm:$0x3f] %v4516_v48  ;;  %v4641_v25 = vpack.c.bf16 %v4578_v38, %v4577_v35 }
 0x588   : > { %5023 = vmatmul.mubr.bf16.gmra.mrb[216].mxu0 %v4641_v25 }
 0x58b   : > { %v4579_v56 = vld [vmem:[#allocation5 + $0xf0] sm:$0xff] }
 0x58d   : > { %v4612_v40 = vld [vmem:[#allocation5 + $0xf9] sm:$0x7f] }
 0x58e   : > { %v4580_v13 = vld [vmem:[#allocation5 + $0xf8] sm:$0x7f]  ;;  %v4644_v49 = vpack.c.bf16 %v4612_v40, %v4515_v41 }
 0x58f   : > { %v4643_v51 = vpack.c.bf16 %v4580_v13, %v4579_v56 }
 0x590   : > { %5032 = vmatprep.mubr.bf16.mxu0 %v4644_v49 }
 0x591   : > { %5033 = vmatmul.mubr.bf16.gmra.mrb[220].mxu0 %v4643_v51 }
 0x5eb   : > { %v4884_v62 = vpop.f32.mrb[160].mxu0 }
 0x5ec   : > { %v4885_v2 = vadd.f32 %v4884_v62, %v10815_v39  ;;  %v4886_v57 = vpop.f32.mrb[161].mxu0 }
 0x5ed   : > { %v4887_v17 = vadd.f32 %v4886_v57, %v10818_v9  ;;  %v4888_v8 = vpop.f32.mrb[162].mxu0 }
 0x5ee   : > { %v5107_v30 = vmul.f32 1.442695, %v4885_v2  ;;  %v4889_v23 = vadd.f32 %v4888_v8, %v10815_v39  ;;  %v4890_v61 = vpop.f32.mrb[163].mxu0  ;;  %vm5043_vm14 = vcmp.gt.f32.partialorder %v4885_v2, 0.0 }
 0x5ef   : > { %v5109_v53 = vmul.f32 1.442695, %v4887_v17  ;;  %v4891_v10 = vadd.f32 %v4890_v61, %v10818_v9  ;;  %vm5044_vm0 = vcmp.gt.f32.partialorder %v4887_v17, 0.0 }
 0x5f0   : > { %7557 = vpow2.f32 %v5107_v30  ;;  %v5111_v27 = vmul.f32 1.442695, %v4889_v23  ;;  %vm5045_vm15 = vcmp.gt.f32.partialorder %v4889_v23, 0.0 }
 0x5f1   : > { %7559 = vpow2.f32 %v5109_v53  ;;  %v5113_v44 = vmul.f32 1.442695, %v4891_v10  ;;  %vm5046_vm2 = vcmp.gt.f32.partialorder %v4891_v10, 0.0 }
 0x5f2   : > { %7561 = vpow2.f32 %v5111_v27 }
 0x5f3   : > { %7563 = vpow2.f32 %v5113_v44  ;;  %v4894_v12 = vpop.f32.mrb[164].mxu0 }
 0x5f4   : > { %v10825_v32 = vadd.f32 %v4894_v12, %v10815_v39  ;;  %v4896_v50 = vpop.f32.mrb[165].mxu0 }
 0x5f5   : > { %v10828_v47 = vadd.f32 %v4896_v50, %v10818_v9  ;;  %v4898_v36 = vpop.f32.mrb[166].mxu0 }
 0x5f6   : > { %v5115_v42 = vmul.f32 1.442695, %v10825_v32  ;;  %v10832_v11 = vadd.f32 %v4898_v36, %v10815_v39  ;;  %v4900_v60 = vpop.f32.mrb[167].mxu0  ;;  %vm5047_vm3 = vcmp.gt.f32.partialorder %v10825_v32, 0.0 }
 0x5f7   : > { %v5117_v43 = vmul.f32 1.442695, %v10828_v47  ;;  %v10836_v4 = vadd.f32 %v4900_v60, %v10818_v9  ;;  %vm5048_vm4 = vcmp.gt.f32.partialorder %v10828_v47, 0.0 }
 0x5f8   : > { %7565 = vpow2.f32 %v5115_v42  ;;  %v5119_v18 = vmul.f32 1.442695, %v10832_v11  ;;  %vm5049_vm6 = vcmp.gt.f32.partialorder %v10832_v11, 0.0 }
 0x5f9   : > { %7567 = vpow2.f32 %v5117_v43  ;;  %v5121_v33 = vmul.f32 1.442695, %v10836_v4  ;;  %vm5050_vm5 = vcmp.gt.f32.partialorder %v10836_v4, 0.0 }
 0x5fa   : > { %v7558_v26 = vpop.eup %7557  ;;  %7569 = vpow2.f32 %v5119_v18 }
 0x5fb   : > { %v7560_v0 = vpop.eup %7559  ;;  %v6313_v1 = vadd.f32 -1.0, %v7558_v26  ;;  %7571 = vpow2.f32 %v5121_v33  ;;  %v4904_v63 = vpop.f32.mrb[168].mxu0 }
 0x5fc   : > { %v7562_v29 = vpop.eup %7561  ;;  %v10841_v37 = vadd.f32 %v4904_v63, %v10815_v39  ;;  %v4906_v55 = vpop.f32.mrb[169].mxu0  ;;  %v6314_v24 = vadd.f32 -1.0, %v7560_v0 }
 0x5fd   : > { %v7564_v31 = vpop.eup %7563  ;;  %v6315_v22 = vadd.f32 -1.0, %v7562_v29  ;;  %v10844_v3 = vadd.f32 %v4906_v55, %v10818_v9  ;;  %v4908_v19 = vpop.f32.mrb[170].mxu0  ;;  %v5299_v20 = vsel %vm5043_vm14, %v4885_v2, %v6313_v1 }
 0x5fe   : > { %v6316_v28 = vadd.f32 -1.0, %v7564_v31  ;;  %v5123_v7 = vmul.f32 1.442695, %v10841_v37  ;;  %v10848_v59 = vadd.f32 %v4908_v19, %v10815_v39  ;;  %v4910_v21 = vpop.f32.mrb[171].mxu0  ;;  %v5300_v41 = vsel %vm5044_vm0, %v4887_v17, %v6314_v24 }
 0x5ff   : > { %v5301_v58 = vsel %vm5045_vm15, %v4889_v23, %v6315_v22  ;;  %v5125_v52 = vmul.f32 1.442695, %v10844_v3  ;;  %v10852_v45 = vadd.f32 %v4910_v21, %v10818_v9  ;;  %vm5051_vm7 = vcmp.gt.f32.partialorder %v10841_v37, 0.0 }
 0x600   : > { %v5363_v46 = vpack.c.bf16 %v5301_v58, %v5299_v20  ;;  %7573 = vpow2.f32 %v5123_v7  ;;  %v5127_v5 = vmul.f32 1.442695, %v10848_v59  ;;  %v5302_v15 = vsel %vm5046_vm2, %v4891_v10, %v6316_v28 }
 0x601   : > { %7575 = vpow2.f32 %v5125_v52  ;;  %v5129_v16 = vmul.f32 1.442695, %v10852_v45  ;;  %v5364_v35 = vpack.c.bf16 %v5302_v15, %v5300_v41  ;;  %vm5052_vm8 = vcmp.gt.f32.partialorder %v10844_v3, 0.0 }
 0x602   : > { %v7566_v34 = vpop.eup %7565  ;;  %7577 = vpow2.f32 %v5127_v5  ;;  %vm5054_vm9 = vcmp.gt.f32.partialorder %v10852_v45, 0.0  ;;  %vm5053_vm10 = vcmp.gt.f32.partialorder %v10848_v59, 0.0 }
 0x603   : > { %v7568_v54 = vpop.eup %7567  ;;  %7579 = vpow2.f32 %v5129_v16  ;;  %v4914_v48 = vpop.f32.mrb[172].mxu0  ;;  %v6317_v13 = vadd.f32 -1.0, %v7566_v34  ;;  %5555 = vmatprep.mubr.bf16.mxu1 %v5364_v35 }
 0x604   : > { %v7570_v38 = vpop.eup %7569  ;;  %v6318_v14 = vadd.f32 -1.0, %v7568_v54  ;;  %v10857_v25 = vadd.f32 %v4914_v48, %v10815_v39  ;;  %v4916_v40 = vpop.f32.mrb[173].mxu0  ;;  %5556 = vmatmul.mubr.bf16.vlgmr.msra.gmra.mrb[224].mxu1 %v5363_v46 }
 0x605   : > { %v7572_v56 = vpop.eup %7571  ;;  %v10861_v49 = vadd.f32 %v4916_v40, %v10818_v9  ;;  %v4918_v51 = vpop.f32.mrb[174].mxu0  ;;  %v6319_v6 = vadd.f32 -1.0, %v7570_v38  ;;  %v5303_v12 = vsel %vm5047_vm3, %v10825_v32, %v6317_v13 }
 0x606   : > { %v6320_v62 = vadd.f32 -1.0, %v7572_v56  ;;  %v5131_v2 = vmul.f32 1.442695, %v10857_v25  ;;  %v10865_v57 = vadd.f32 %v4918_v51, %v10815_v39  ;;  %v4920_v17 = vpop.f32.mrb[175].mxu0  ;;  %v5304_v61 = vsel %vm5048_vm4, %v10828_v47, %v6318_v14 }
 0x607   : > { %v5133_v8 = vmul.f32 1.442695, %v10861_v49  ;;  %v10871_v30 = vadd.f32 %v4920_v17, %v10818_v9  ;;  %v5305_v50 = vsel %vm5049_vm6, %v10832_v11, %v6319_v6  ;;  %vm5055_vm11 = vcmp.gt.f32.partialorder %v10857_v25, 0.0 }
 0x608   : > { %7581 = vpow2.f32 %v5131_v2  ;;  %v5135_v23 = vmul.f32 1.442695, %v10865_v57  ;;  %v5306_v53 = vsel %vm5050_vm5, %v10836_v4, %v6320_v62  ;;  %v5365_v47 = vpack.c.bf16 %v5305_v50, %v5303_v12 }
 0x609   : > { %7583 = vpow2.f32 %v5133_v8  ;;  %v5137_v10 = vmul.f32 1.442695, %v10871_v30  ;;  %v5366_v27 = vpack.c.bf16 %v5306_v53, %v5304_v61  ;;  %vm5056_vm12 = vcmp.gt.f32.partialorder %v10861_v49, 0.0 }
 0x60a   : > { %v7574_v44 = vpop.eup %7573  ;;  %7585 = vpow2.f32 %v5135_v23  ;;  %vm5058_vm13 = vcmp.gt.f32.partialorder %v10871_v30, 0.0  ;;  %vm5057_vm14 = vcmp.gt.f32.partialorder %v10865_v57, 0.0 }
 0x60b   : > { %v7576_v36 = vpop.eup %7575  ;;  %7587 = vpow2.f32 %v5137_v10  ;;  %v4924_v42 = vpop.f32.mrb[176].mxu0  ;;  %5561 = vmatprep.mubr.bf16.mxu1 %v5366_v27  ;;  %v6321_v26 = vadd.f32 -1.0, %v7574_v44 }
 0x60c   : > { %v7578_v60 = vpop.eup %7577  ;;  %v6322_v43 = vadd.f32 -1.0, %v7576_v36  ;;  %v10883_v4 = vadd.f32 %v4924_v42, %v10815_v39  ;;  %v4926_v18 = vpop.f32.mrb[177].mxu0  ;;  %5562 = vmatmul.mubr.bf16.gmra.mrb[228].mxu1 %v5365_v47 }
 0x60d   : > { %v7580_v33 = vpop.eup %7579  ;;  %v10887_v0 = vadd.f32 %v4926_v18, %v10818_v9  ;;  %v4928_v32 = vpop.f32.mrb[178].mxu0  ;;  %v6323_v11 = vadd.f32 -1.0, %v7578_v60  ;;  %v5307_v58 = vsel %vm5051_vm7, %v10841_v37, %v6321_v26 }
 0x60e   : > { %v6324_v1 = vadd.f32 -1.0, %v7580_v33  ;;  %v5139_v63 = vmul.f32 1.442695, %v10883_v4  ;;  %v10891_v29 = vadd.f32 %v4928_v32, %v10815_v39  ;;  %v4930_v55 = vpop.f32.mrb[179].mxu0  ;;  %v5308_v24 = vsel %vm5052_vm8, %v10844_v3, %v6322_v43 }
 0x60f   : > { %v5141_v31 = vmul.f32 1.442695, %v10887_v0  ;;  %v10897_v22 = vadd.f32 %v4930_v55, %v10818_v9  ;;  %v5309_v52 = vsel %vm5053_vm10, %v10848_v59, %v6323_v11  ;;  %vm5059_vm15 = vcmp.gt.f32.partialorder %v10883_v4, 0.0 }
 0x610   : > { %7589 = vpow2.f32 %v5139_v63  ;;  %v5143_v19 = vmul.f32 1.442695, %v10891_v29  ;;  %v5310_v28 = vsel %vm5054_vm9, %v10852_v45, %v6324_v1  ;;  %v5367_v3 = vpack.c.bf16 %v5309_v52, %v5307_v58 }
 0x611   : > { %7591 = vpow2.f32 %v5141_v31  ;;  %v5145_v7 = vmul.f32 1.442695, %v10897_v22  ;;  %v5368_v21 = vpack.c.bf16 %v5310_v28, %v5308_v24  ;;  %vm5060_vm0 = vcmp.gt.f32.partialorder %v10887_v0, 0.0 }
 0x612   : > { %v7582_v20 = vpop.eup %7581  ;;  %7593 = vpow2.f32 %v5143_v19  ;;  %vm5062_vm2 = vcmp.gt.f32.partialorder %v10897_v22, 0.0  ;;  %vm5061_vm3 = vcmp.gt.f32.partialorder %v10891_v29, 0.0 }
 0x613   : > { %v7584_v46 = vpop.eup %7583  ;;  %7595 = vpow2.f32 %v5145_v7  ;;  %v4934_v5 = vpop.f32.mrb[180].mxu0  ;;  %5567 = vmatprep.mubr.bf16.mxu1 %v5368_v21  ;;  %v6325_v54 = vadd.f32 -1.0, %v7582_v20 }
 0x614   : > { %v7586_v45 = vpop.eup %7585  ;;  %v6326_v16 = vadd.f32 -1.0, %v7584_v46  ;;  %v10909_v34 = vadd.f32 %v4934_v5, %v10815_v39  ;;  %v4936_v41 = vpop.f32.mrb[181].mxu0  ;;  %5568 = vmatmul.mubr.bf16.gmra.mrb[232].mxu1 %v5367_v3 }
 0x615   : > { %v7588_v15 = vpop.eup %7587  ;;  %v10913_v48 = vadd.f32 %v4936_v41, %v10818_v9  ;;  %v4938_v37 = vpop.f32.mrb[182].mxu0  ;;  %v6327_v59 = vadd.f32 -1.0, %v7586_v45  ;;  %v5311_v23 = vsel %vm5055_vm11, %v10857_v25, %v6325_v54 }
 0x616   : > { %v6328_v35 = vadd.f32 -1.0, %v7588_v15  ;;  %v5147_v38 = vmul.f32 1.442695, %v10909_v34  ;;  %v10917_v14 = vadd.f32 %v4938_v37, %v10815_v39  ;;  %v4940_v40 = vpop.f32.mrb[183].mxu0  ;;  %v5312_v6 = vsel %vm5056_vm12, %v10861_v49, %v6326_v16 }
 0x617   : > { %v5149_v56 = vmul.f32 1.442695, %v10913_v48  ;;  %v10923_v13 = vadd.f32 %v4940_v40, %v10818_v9  ;;  %v5313_v61 = vsel %vm5057_vm14, %v10865_v57, %v6327_v59  ;;  %vm5063_vm4 = vcmp.gt.f32.partialorder %v10909_v34, 0.0 }
 0x618   : > { %7597 = vpow2.f32 %v5147_v38  ;;  %v5151_v51 = vmul.f32 1.442695, %v10917_v14  ;;  %v5314_v62 = vsel %vm5058_vm13, %v10871_v30, %v6328_v35  ;;  %v5369_v49 = vpack.c.bf16 %v5313_v61, %v5311_v23 }
 0x619   : > { %7599 = vpow2.f32 %v5149_v56  ;;  %v5153_v2 = vmul.f32 1.442695, %v10923_v13  ;;  %v5370_v17 = vpack.c.bf16 %v5314_v62, %v5312_v6  ;;  %vm5064_vm5 = vcmp.gt.f32.partialorder %v10913_v48, 0.0 }
 0x61a   : > { %v7590_v8 = vpop.eup %7589  ;;  %7601 = vpow2.f32 %v5151_v51  ;;  %vm5066_vm6 = vcmp.gt.f32.partialorder %v10923_v13, 0.0  ;;  %vm5065_vm7 = vcmp.gt.f32.partialorder %v10917_v14, 0.0 }
 0x61b   : > { %v7592_v53 = vpop.eup %7591  ;;  %7603 = vpow2.f32 %v5153_v2  ;;  %v4944_v10 = vpop.f32.mrb[184].mxu0  ;;  %5573 = vmatprep.mubr.bf16.mxu1 %v5370_v17  ;;  %v6329_v36 = vadd.f32 -1.0, %v7590_v8 }
 0x61c   : > { %v7594_v30 = vpop.eup %7593  ;;  %v6330_v27 = vadd.f32 -1.0, %v7592_v53  ;;  %v10935_v44 = vadd.f32 %v4944_v10, %v10815_v39  ;;  %v4946_v12 = vpop.f32.mrb[185].mxu0  ;;  %5574 = vmatmul.mubr.bf16.gmra.mrb[236].mxu1 %v5369_v49 }
 0x61d   : > { %v7596_v50 = vpop.eup %7595  ;;  %v10939_v42 = vadd.f32 %v4946_v12, %v10818_v9  ;;  %v4948_v25 = vpop.f32.mrb[186].mxu0  ;;  %v6331_v57 = vadd.f32 -1.0, %v7594_v30  ;;  %v5315_v19 = vsel %vm5059_vm15, %v10883_v4, %v6329_v36 }
 0x61e   : > { %v6332_v47 = vadd.f32 -1.0, %v7596_v50  ;;  %v5155_v60 = vmul.f32 1.442695, %v10935_v44  ;;  %v10943_v43 = vadd.f32 %v4948_v25, %v10815_v39  ;;  %v4950_v18 = vpop.f32.mrb[187].mxu0  ;;  %v5316_v11 = vsel %vm5060_vm0, %v10887_v0, %v6330_v27 }
 0x61f   : > { %v5157_v33 = vmul.f32 1.442695, %v10939_v42  ;;  %v10949_v26 = vadd.f32 %v4950_v18, %v10818_v9  ;;  %v5317_v24 = vsel %vm5061_vm3, %v10891_v29, %v6331_v57  ;;  %vm5067_vm8 = vcmp.gt.f32.partialorder %v10935_v44, 0.0 }
 0x620   : > { %7605 = vpow2.f32 %v5155_v60  ;;  %v5159_v32 = vmul.f32 1.442695, %v10943_v43  ;;  %v5318_v1 = vsel %vm5062_vm2, %v10897_v22, %v6332_v47  ;;  %v5371_v0 = vpack.c.bf16 %v5317_v24, %v5315_v19 }
 0x621   : > { %7607 = vpow2.f32 %v5157_v33  ;;  %v5161_v63 = vmul.f32 1.442695, %v10949_v26  ;;  %v5372_v55 = vpack.c.bf16 %v5318_v1, %v5316_v11  ;;  %vm5068_vm9 = vcmp.gt.f32.partialorder %v10939_v42, 0.0 }
 0x622   : > { %v7598_v31 = vpop.eup %7597  ;;  %7609 = vpow2.f32 %v5159_v32  ;;  %vm5070_vm10 = vcmp.gt.f32.partialorder %v10949_v26, 0.0  ;;  %vm5069_vm11 = vcmp.gt.f32.partialorder %v10943_v43, 0.0 }
 0x623   : > { %v7600_v28 = vpop.eup %7599  ;;  %7611 = vpow2.f32 %v5161_v63  ;;  %v4954_v7 = vpop.f32.mrb[188].mxu0  ;;  %5580 = vmatprep.mubr.bf16.mxu1 %v5372_v55  ;;  %v6333_v46 = vadd.f32 -1.0, %v7598_v31 }
 0x624   : > { %v7602_v22 = vpop.eup %7601  ;;  %v6334_v21 = vadd.f32 -1.0, %v7600_v28  ;;  %v10961_v20 = vadd.f32 %v4954_v7, %v10815_v39  ;;  %v4956_v58 = vpop.f32.mrb[189].mxu0  ;;  %5581 = vmatmul.mubr.bf16.gmra.mrb[240].mxu1 %v5371_v0 }
 0x625   : > { %v7604_v52 = vpop.eup %7603  ;;  %v10965_v5 = vadd.f32 %v4956_v58, %v10818_v9  ;;  %v4958_v4 = vpop.f32.mrb[190].mxu0  ;;  %v6335_v29 = vadd.f32 -1.0, %v7602_v22  ;;  %v5319_v51 = vsel %vm5063_vm4, %v10909_v34, %v6333_v46 }
 0x626   : > { %v6336_v3 = vadd.f32 -1.0, %v7604_v52  ;;  %v5163_v45 = vmul.f32 1.442695, %v10961_v20  ;;  %v10969_v16 = vadd.f32 %v4958_v4, %v10815_v39  ;;  %v4960_v41 = vpop.f32.mrb[191].mxu0  ;;  %v5320_v59 = vsel %vm5064_vm5, %v10913_v48, %v6334_v21 }
 0x627   : > { %v5165_v15 = vmul.f32 1.442695, %v10965_v5  ;;  %v10975_v54 = vadd.f32 %v4960_v41, %v10818_v9  ;;  %v5321_v6 = vsel %vm5065_vm7, %v10917_v14, %v6335_v29  ;;  %vm5071_vm12 = vcmp.gt.f32.partialorder %v10961_v20, 0.0 }
 0x628   : > { %7613 = vpow2.f32 %v5163_v45  ;;  %v5167_v37 = vmul.f32 1.442695, %v10969_v16  ;;  %v5322_v35 = vsel %vm5066_vm6, %v10923_v13, %v6336_v3  ;;  %v5373_v48 = vpack.c.bf16 %v5321_v6, %v5319_v51 }
 0x629   : > { %7615 = vpow2.f32 %v5165_v15  ;;  %v5169_v38 = vmul.f32 1.442695, %v10975_v54  ;;  %v5374_v40 = vpack.c.bf16 %v5322_v35, %v5320_v59  ;;  %vm5072_vm13 = vcmp.gt.f32.partialorder %v10965_v5, 0.0 }
 0x62a   : > { %v7606_v56 = vpop.eup %7605  ;;  %7617 = vpow2.f32 %v5167_v37  ;;  %vm5074_vm14 = vcmp.gt.f32.partialorder %v10975_v54, 0.0  ;;  %vm5073_vm15 = vcmp.gt.f32.partialorder %v10969_v16, 0.0 }
 0x62b   : > { %v7608_v62 = vpop.eup %7607  ;;  %7619 = vpow2.f32 %v5169_v38  ;;  %v4964_v2 = vpop.f32.mrb[192].mxu0  ;;  %5588 = vmatprep.mubr.bf16.mxu1 %v5374_v40  ;;  %v6337_v53 = vadd.f32 -1.0, %v7606_v56 }
 0x62c   : > { %v7610_v13 = vpop.eup %7609  ;;  %v6338_v17 = vadd.f32 -1.0, %v7608_v62  ;;  %v10987_v8 = vadd.f32 %v4964_v2, %v10815_v39  ;;  %v4966_v23 = vpop.f32.mrb[193].mxu0  ;;  %5589 = vmatmul.mubr.bf16.gmra.mrb[244].mxu1 %v5373_v48 }
 0x62d   : > { %v7612_v61 = vpop.eup %7611  ;;  %v10991_v10 = vadd.f32 %v4966_v23, %v10818_v9  ;;  %v4968_v34 = vpop.f32.mrb[194].mxu0  ;;  %v6339_v14 = vadd.f32 -1.0, %v7610_v13  ;;  %v5323_v32 = vsel %vm5067_vm8, %v10935_v44, %v6337_v53 }
 0x62e   : > { %v6340_v49 = vadd.f32 -1.0, %v7612_v61  ;;  %v5171_v30 = vmul.f32 1.442695, %v10987_v8  ;;  %v10995_v27 = vadd.f32 %v4968_v34, %v10815_v39  ;;  %v4970_v12 = vpop.f32.mrb[195].mxu0  ;;  %v5324_v57 = vsel %vm5068_vm9, %v10939_v42, %v6338_v17 }
 0x62f   : > { %v5173_v50 = vmul.f32 1.442695, %v10991_v10  ;;  %v11001_v36 = vadd.f32 %v4970_v12, %v10818_v9  ;;  %v5325_v11 = vsel %vm5069_vm11, %v10943_v43, %v6339_v14  ;;  %vm5075_vm0 = vcmp.gt.f32.partialorder %v10987_v8, 0.0 }
 0x630   : > { %7621 = vpow2.f32 %v5171_v30  ;;  %v5175_v25 = vmul.f32 1.442695, %v10995_v27  ;;  %v5326_v47 = vsel %vm5070_vm10, %v10949_v26, %v6340_v49  ;;  %v5375_v42 = vpack.c.bf16 %v5325_v11, %v5323_v32 }
 0x631   : > { %7623 = vpow2.f32 %v5173_v50  ;;  %v5177_v60 = vmul.f32 1.442695, %v11001_v36  ;;  %v5376_v18 = vpack.c.bf16 %v5326_v47, %v5324_v57  ;;  %vm5077_vm2 = vcmp.gt.f32.partialorder %v10995_v27, 0.0 }
 0x632   : > { %v7614_v33 = vpop.eup %7613  ;;  %7625 = vpow2.f32 %v5175_v25  ;;  %vm5076_vm3 = vcmp.gt.f32.partialorder %v10991_v10, 0.0  ;;  %vm5078_vm4 = vcmp.gt.f32.partialorder %v11001_v36, 0.0 }
 0x633   : > { %v7616_v1 = vpop.eup %7615  ;;  %7627 = vpow2.f32 %v5177_v60  ;;  %v4974_v63 = vpop.f32.mrb[196].mxu0  ;;  %5596 = vmatprep.mubr.bf16.mxu1 %v5376_v18  ;;  %v6341_v28 = vadd.f32 -1.0, %v7614_v33 }
 0x634   : > { %v7618_v26 = vpop.eup %7617  ;;  %v6342_v55 = vadd.f32 -1.0, %v7616_v1  ;;  %v11013_v31 = vadd.f32 %v4974_v63, %v10815_v39  ;;  %v4976_v19 = vpop.f32.mrb[197].mxu0  ;;  %5597 = vmatmul.mubr.bf16.gmra.mrb[248].mxu1 %v5375_v42 }
 0x635   : > { %v7620_v24 = vpop.eup %7619  ;;  %v11017_v7 = vadd.f32 %v4976_v19, %v10818_v9  ;;  %v4978_v44 = vpop.f32.mrb[198].mxu0  ;;  %v6343_v43 = vadd.f32 -1.0, %v7618_v26  ;;  %v5327_v37 = vsel %vm5071_vm12, %v10961_v20, %v6341_v28 }
 0x636   : > { %v6344_v0 = vadd.f32 -1.0, %v7620_v24  ;;  %v5179_v22 = vmul.f32 1.442695, %v11013_v31  ;;  %v11021_v21 = vadd.f32 %v4978_v44, %v10815_v39  ;;  %v4980_v58 = vpop.f32.mrb[199].mxu0  ;;  %v5328_v29 = vsel %vm5072_vm13, %v10965_v5, %v6342_v55 }
 0x637   : > { %v5181_v52 = vmul.f32 1.442695, %v11017_v7  ;;  %v11027_v46 = vadd.f32 %v4980_v58, %v10818_v9  ;;  %v5329_v59 = vsel %vm5073_vm15, %v10969_v16, %v6343_v43  ;;  %vm5079_vm5 = vcmp.gt.f32.partialorder %v11013_v31, 0.0 }
 0x638   : > { %7629 = vpow2.f32 %v5179_v22  ;;  %v5183_v4 = vmul.f32 1.442695, %v11021_v21  ;;  %v5330_v3 = vsel %vm5074_vm14, %v10975_v54, %v6344_v0  ;;  %v5377_v54 = vpack.c.bf16 %v5329_v59, %v5327_v37 }
 0x639   : > { %7631 = vpow2.f32 %v5181_v52  ;;  %v5185_v45 = vmul.f32 1.442695, %v11027_v46  ;;  %v5378_v41 = vpack.c.bf16 %v5330_v3, %v5328_v29  ;;  %vm5081_vm6 = vcmp.gt.f32.partialorder %v11021_v21, 0.0 }
 0x63a   : > { %v7622_v15 = vpop.eup %7621  ;;  %7633 = vpow2.f32 %v5183_v4  ;;  %vm5080_vm7 = vcmp.gt.f32.partialorder %v11017_v7, 0.0  ;;  %vm5082_vm8 = vcmp.gt.f32.partialorder %v11027_v46, 0.0 }
 0x63b   : > { %v7624_v35 = vpop.eup %7623  ;;  %v6345_v38 = vadd.f32 -1.0, %v7622_v15  ;;  %7635 = vpow2.f32 %v5185_v45  ;;  %v4984_v5 = vpop.f32.mrb[200].mxu0  ;;  %5604 = vmatprep.mubr.bf16.mxu1 %v5378_v41 }
 0x63c   : > { %v7626_v40 = vpop.eup %7625  ;;  %v11039_v56 = vadd.f32 %v4984_v5, %v10815_v39  ;;  %v4986_v51 = vpop.f32.mrb[201].mxu0  ;;  %v6346_v2 = vadd.f32 -1.0, %v7624_v35  ;;  %5605 = vmatmul.mubr.bf16.gmra.mrb[252].mxu1 %v5377_v54 }
 0x63d   : > { %v7628_v6 = vpop.eup %7627  ;;  %v6347_v62 = vadd.f32 -1.0, %v7626_v40  ;;  %v11044_v20 = vadd.f32 %v4986_v51, %v10818_v9  ;;  %v4988_v16 = vpop.f32.mrb[202].mxu0  ;;  %v5331_v61 = vsel %vm5075_vm0, %v10987_v8, %v6345_v38 }
 0x63e   : > { %v6348_v48 = vadd.f32 -1.0, %v7628_v6  ;;  %v5187_v13 = vmul.f32 1.442695, %v11039_v56  ;;  %v11048_v17 = vadd.f32 %v4988_v16, %v10815_v39  ;;  %v4990_v23 = vpop.f32.mrb[203].mxu0  ;;  %v5332_v8 = vsel %vm5076_vm3, %v10991_v10, %v6346_v2 }
 0x63f   : > { %v5333_v53 = vsel %vm5077_vm2, %v10995_v27, %v6347_v62  ;;  %v5189_v34 = vmul.f32 1.442695, %v11044_v20  ;;  %v11054_v14 = vadd.f32 %v4990_v23, %v10818_v9  ;;  %vm5083_vm9 = vcmp.gt.f32.partialorder %v11039_v56, 0.0 }
 0x640   : > { %v5379_v49 = vpack.c.bf16 %v5333_v53, %v5331_v61  ;;  %7637 = vpow2.f32 %v5187_v13  ;;  %v5191_v30 = vmul.f32 1.442695, %v11048_v17  ;;  %v5334_v27 = vsel %vm5078_vm4, %v11001_v36, %v6348_v48 }
 0x641   : > { %7639 = vpow2.f32 %v5189_v34  ;;  %v5193_v12 = vmul.f32 1.442695, %v11054_v14  ;;  %v5380_v60 = vpack.c.bf16 %v5334_v27, %v5332_v8  ;;  %vm5085_vm10 = vcmp.gt.f32.partialorder %v11048_v17, 0.0 }
 0x642   : > { %v7630_v50 = vpop.eup %7629  ;;  %7641 = vpow2.f32 %v5191_v30  ;;  %vm5084_vm11 = vcmp.gt.f32.partialorder %v11044_v20, 0.0  ;;  %vm5086_vm12 = vcmp.gt.f32.partialorder %v11054_v14, 0.0 }
 0x643   : > { %v7632_v25 = vpop.eup %7631  ;;  %v6349_v57 = vadd.f32 -1.0, %v7630_v50  ;;  %7643 = vpow2.f32 %v5193_v12  ;;  %v4994_v47 = vpop.f32.mrb[204].mxu0  ;;  %5612 = vmatprep.mubr.bf16.mxu1 %v5380_v60 }
 0x644   : > { %v7634_v18 = vpop.eup %7633  ;;  %v11063_v33 = vadd.f32 %v4994_v47, %v10815_v39  ;;  %v4996_v32 = vpop.f32.mrb[205].mxu0  ;;  %v6350_v63 = vadd.f32 -1.0, %v7632_v25  ;;  %5613 = vmatmul.mubr.bf16.gmra.mrb[0].mxu1 %v5379_v49 }
 0x645   : > { %v7636_v11 = vpop.eup %7635  ;;  %v6351_v1 = vadd.f32 -1.0, %v7634_v18  ;;  %v11068_v10 = vadd.f32 %v4996_v32, %v10818_v9  ;;  %v4998_v36 = vpop.f32.mrb[206].mxu0  ;;  %v5335_v24 = vsel %vm5079_vm5, %v11013_v31, %v6349_v57 }
 0x646   : > { %v6352_v42 = vadd.f32 -1.0, %v7636_v11  ;;  %v5195_v26 = vmul.f32 1.442695, %v11063_v33  ;;  %v11072_v55 = vadd.f32 %v4998_v36, %v10815_v39  ;;  %v5000_v19 = vpop.f32.mrb[207].mxu0  ;;  %v5336_v31 = vsel %vm5080_vm7, %v11017_v7, %v6350_v63 }
 0x647   : > { %v5337_v28 = vsel %vm5081_vm6, %v11021_v21, %v6351_v1  ;;  %v5197_v44 = vmul.f32 1.442695, %v11068_v10  ;;  %v11078_v43 = vadd.f32 %v5000_v19, %v10818_v9  ;;  %vm5087_vm13 = vcmp.gt.f32.partialorder %v11063_v33, 0.0 }
 0x648   : > { %v5381_v0 = vpack.c.bf16 %v5337_v28, %v5335_v24  ;;  %7645 = vpow2.f32 %v5195_v26  ;;  %v5199_v22 = vmul.f32 1.442695, %v11072_v55  ;;  %v5338_v21 = vsel %vm5082_vm8, %v11027_v46, %v6352_v42 }
 0x649   : > { %7647 = vpow2.f32 %v5197_v44  ;;  %v5201_v58 = vmul.f32 1.442695, %v11078_v43  ;;  %v5382_v45 = vpack.c.bf16 %v5338_v21, %v5336_v31  ;;  %vm5089_vm14 = vcmp.gt.f32.partialorder %v11072_v55, 0.0 }
 0x64a   : > { %v7638_v52 = vpop.eup %7637  ;;  %7649 = vpow2.f32 %v5199_v22  ;;  %vm5088_vm15 = vcmp.gt.f32.partialorder %v11068_v10, 0.0  ;;  %vm5090_vm0 = vcmp.gt.f32.partialorder %v11078_v43, 0.0 }
 0x64b   : > { %v7640_v4 = vpop.eup %7639  ;;  %v6353_v29 = vadd.f32 -1.0, %v7638_v52  ;;  %7651 = vpow2.f32 %v5201_v58  ;;  %v5004_v3 = vpop.f32.mrb[208].mxu0  ;;  %5620 = vmatprep.mubr.bf16.mxu1 %v5382_v45 }
 0x64c   : > { %v7642_v41 = vpop.eup %7641  ;;  %v11087_v15 = vadd.f32 %v5004_v3, %v10815_v39  ;;  %v5006_v37 = vpop.f32.mrb[209].mxu0  ;;  %v6354_v38 = vadd.f32 -1.0, %v7640_v4  ;;  %5621 = vmatmul.mubr.bf16.gmra.mrb[4].mxu1 %v5381_v0 }
 0x64d   : > { %v7644_v59 = vpop.eup %7643  ;;  %v6355_v35 = vadd.f32 -1.0, %v7642_v41  ;;  %v11092_v7 = vadd.f32 %v5006_v37, %v10818_v9  ;;  %v5008_v46 = vpop.f32.mrb[210].mxu0  ;;  %v5339_v6 = vsel %vm5083_vm9, %v11039_v56, %v6353_v29 }
 0x64e   : > { %v6356_v5 = vadd.f32 -1.0, %v7644_v59  ;;  %v5203_v54 = vmul.f32 1.442695, %v11087_v15  ;;  %v11096_v40 = vadd.f32 %v5008_v46, %v10815_v39  ;;  %v5010_v51 = vpop.f32.mrb[211].mxu0  ;;  %v5340_v56 = vsel %vm5084_vm11, %v11044_v20, %v6354_v38 }
 0x64f   : > { %v5341_v62 = vsel %vm5085_vm10, %v11048_v17, %v6355_v35  ;;  %v5205_v16 = vmul.f32 1.442695, %v11092_v7  ;;  %v11102_v2 = vadd.f32 %v5010_v51, %v10818_v9  ;;  %vm5091_vm2 = vcmp.gt.f32.partialorder %v11087_v15, 0.0 }
 0x650   : > { %v5383_v48 = vpack.c.bf16 %v5341_v62, %v5339_v6  ;;  %7653 = vpow2.f32 %v5203_v54  ;;  %v5207_v13 = vmul.f32 1.442695, %v11096_v40  ;;  %v5342_v17 = vsel %vm5086_vm12, %v11054_v14, %v6356_v5 }
 0x651   : > { %7655 = vpow2.f32 %v5205_v16  ;;  %v5209_v23 = vmul.f32 1.442695, %v11102_v2  ;;  %v5384_v30 = vpack.c.bf16 %v5342_v17, %v5340_v56  ;;  %vm5093_vm3 = vcmp.gt.f32.partialorder %v11096_v40, 0.0 }
 0x652   : > { %v7646_v61 = vpop.eup %7645  ;;  %7657 = vpow2.f32 %v5207_v13  ;;  %vm5092_vm4 = vcmp.gt.f32.partialorder %v11092_v7, 0.0  ;;  %vm5094_vm5 = vcmp.gt.f32.partialorder %v11102_v2, 0.0 }
 0x653   : > { %v7648_v53 = vpop.eup %7647  ;;  %v6357_v34 = vadd.f32 -1.0, %v7646_v61  ;;  %7659 = vpow2.f32 %v5209_v23  ;;  %v5014_v49 = vpop.f32.mrb[212].mxu0  ;;  %5628 = vmatprep.mubr.bf16.mxu1 %v5384_v30 }
 0x654   : > { %v7650_v12 = vpop.eup %7649  ;;  %v11111_v50 = vadd.f32 %v5014_v49, %v10815_v39  ;;  %v5016_v8 = vpop.f32.mrb[213].mxu0  ;;  %v6358_v57 = vadd.f32 -1.0, %v7648_v53  ;;  %5629 = vmatmul.mubr.bf16.gmra.mrb[8].mxu1 %v5383_v48 }
 0x655   : > { %v7652_v27 = vpop.eup %7651  ;;  %v6359_v25 = vadd.f32 -1.0, %v7650_v12  ;;  %v11116_v20 = vadd.f32 %v5016_v8, %v10818_v9  ;;  %v5018_v14 = vpop.f32.mrb[214].mxu0  ;;  %v5343_v11 = vsel %vm5087_vm13, %v11063_v33, %v6357_v34 }
 0x656   : > { %v6360_v47 = vadd.f32 -1.0, %v7652_v27  ;;  %v5211_v60 = vmul.f32 1.442695, %v11111_v50  ;;  %v11120_v18 = vadd.f32 %v5018_v14, %v10815_v39  ;;  %v5020_v32 = vpop.f32.mrb[215].mxu0  ;;  %v5344_v33 = vsel %vm5088_vm15, %v11068_v10, %v6358_v57 }
 0x657   : > { %v5345_v1 = vsel %vm5089_vm14, %v11072_v55, %v6359_v25  ;;  %v5213_v36 = vmul.f32 1.442695, %v11116_v20  ;;  %v11126_v63 = vadd.f32 %v5020_v32, %v10818_v9  ;;  %vm5095_vm6 = vcmp.gt.f32.partialorder %v11111_v50, 0.0 }
 0x658   : > { %v5385_v42 = vpack.c.bf16 %v5345_v1, %v5343_v11  ;;  %7661 = vpow2.f32 %v5211_v60  ;;  %v5215_v26 = vmul.f32 1.442695, %v11120_v18  ;;  %v5346_v55 = vsel %vm5090_vm0, %v11078_v43, %v6360_v47 }
 0x659   : > { %7663 = vpow2.f32 %v5213_v36  ;;  %v5217_v19 = vmul.f32 1.442695, %v11126_v63  ;;  %v5386_v22 = vpack.c.bf16 %v5346_v55, %v5344_v33  ;;  %vm5097_vm7 = vcmp.gt.f32.partialorder %v11120_v18, 0.0 }
 0x65a   : > { %v7654_v24 = vpop.eup %7653  ;;  %7665 = vpow2.f32 %v5215_v26  ;;  %vm5096_vm8 = vcmp.gt.f32.partialorder %v11116_v20, 0.0  ;;  %vm5098_vm9 = vcmp.gt.f32.partialorder %v11126_v63, 0.0 }
 0x65b   : > { %v7656_v28 = vpop.eup %7655  ;;  %v6361_v44 = vadd.f32 -1.0, %v7654_v24  ;;  %7667 = vpow2.f32 %v5217_v19  ;;  %v5024_v0 = vpop.f32.mrb[216].mxu0  ;;  %5636 = vmatprep.mubr.bf16.mxu1 %v5386_v22 }
 0x65c   : > { %v7658_v58 = vpop.eup %7657  ;;  %v11135_v52 = vadd.f32 %v5024_v0, %v10815_v39  ;;  %v5026_v31 = vpop.f32.mrb[217].mxu0  ;;  %v6362_v29 = vadd.f32 -1.0, %v7656_v28  ;;  %5637 = vmatmul.mubr.bf16.gmra.mrb[12].mxu1 %v5385_v42 }
 0x65d   : > { %v7660_v21 = vpop.eup %7659  ;;  %v6363_v4 = vadd.f32 -1.0, %v7658_v58  ;;  %v11140_v10 = vadd.f32 %v5026_v31, %v10818_v9  ;;  %v5028_v43 = vpop.f32.mrb[218].mxu0  ;;  %v5347_v59 = vsel %vm5091_vm2, %v11087_v15, %v6361_v44 }
 0x65e   : > { %v6364_v3 = vadd.f32 -1.0, %v7660_v21  ;;  %v5219_v45 = vmul.f32 1.442695, %v11135_v52  ;;  %v11144_v41 = vadd.f32 %v5028_v43, %v10815_v39  ;;  %v5030_v37 = vpop.f32.mrb[219].mxu0  ;;  %v5348_v15 = vsel %vm5092_vm4, %v11092_v7, %v6362_v29 }
 0x65f   : > { %v5349_v35 = vsel %vm5093_vm3, %v11096_v40, %v6363_v4  ;;  %v5221_v46 = vmul.f32 1.442695, %v11140_v10  ;;  %v11150_v38 = vadd.f32 %v5030_v37, %v10818_v9  ;;  %vm5099_vm10 = vcmp.gt.f32.partialorder %v11135_v52, 0.0 }
 0x660   : > { %v5387_v5 = vpack.c.bf16 %v5349_v35, %v5347_v59  ;;  %7669 = vpow2.f32 %v5219_v45  ;;  %v5223_v54 = vmul.f32 1.442695, %v11144_v41  ;;  %v5350_v40 = vsel %vm5094_vm5, %v11102_v2, %v6364_v3 }
 0x661   : > { %7671 = vpow2.f32 %v5221_v46  ;;  %v5225_v51 = vmul.f32 1.442695, %v11150_v38  ;;  %v5388_v13 = vpack.c.bf16 %v5350_v40, %v5348_v15  ;;  %vm5101_vm11 = vcmp.gt.f32.partialorder %v11144_v41, 0.0 }
 0x662   : > { %v7662_v6 = vpop.eup %7661  ;;  %7673 = vpow2.f32 %v5223_v54  ;;  %vm5100_vm12 = vcmp.gt.f32.partialorder %v11140_v10, 0.0  ;;  %vm5102_vm13 = vcmp.gt.f32.partialorder %v11150_v38, 0.0  ;;  %vm5808_vm3 = vcmask 31744  }
 0x663   : > { %v7664_v62 = vpop.eup %7663  ;;  %v6365_v16 = vadd.f32 -1.0, %v7662_v6  ;;  %7675 = vpow2.f32 %v5225_v51  ;;  %5644 = vmatprep.mubr.bf16.mxu1 %v5388_v13  ;;  %vm5824_vm4 = vcmask 30720  }
 0x664   : > { %v5034_v48 = vpop.f32.mrb[220].mxu0  ;;  %v7666_v23 = vpop.eup %7665  ;;  %v6366_v34 = vadd.f32 -1.0, %v7664_v62  ;;  %5645 = vmatmul.mubr.bf16.gmra.mrb[16].mxu1 %v5387_v5 }
 0x665   : > { %v11159_v61 = vadd.f32 %v5034_v48, %v10815_v39  ;;  %v5036_v56 = vpop.f32.mrb[221].mxu0  ;;  %v7668_v17 = vpop.eup %7667  ;;  %v6367_v53 = vadd.f32 -1.0, %v7666_v23  ;;  %v5351_v27 = vsel %vm5095_vm6, %v11111_v50, %v6365_v16 }
 0x666   : > { %v5037_v7 = vadd.f32 %v5036_v56, %v10818_v9  ;;  %v5038_v2 = vpop.f32.mrb[222].mxu0  ;;  %v6368_v49 = vadd.f32 -1.0, %v7668_v17 }
 0x667   : > { %v5227_v30 = vmul.f32 1.442695, %v11159_v61  ;;  %v5039_v12 = vadd.f32 %v5038_v2, %v10815_v39  ;;  %v5040_v8 = vpop.f32.mrb[223].mxu0  ;;  %v5353_v25 = vsel %vm5097_vm7, %v11120_v18, %v6367_v53  ;;  %v5352_v39 = vsel %vm5096_vm8, %v11116_v20, %v6366_v34 }
 0x668   : > { %v5229_v14 = vmul.f32 1.442695, %v5037_v7  ;;  %v5041_v57 = vadd.f32 %v5040_v8, %v10818_v9  ;;  %v5389_v47 = vpack.c.bf16 %v5353_v25, %v5351_v27  ;;  %v5354_v50 = vsel %vm5098_vm9, %v11126_v63, %v6368_v49 }
 0x669   : > { %7677 = vpow2.f32 %v5227_v30  ;;  %v5231_v60 = vmul.f32 1.442695, %v5039_v12  ;;  %v5390_v36 = vpack.c.bf16 %v5354_v50, %v5352_v39  ;;  %vm5103_vm14 = vcmp.gt.f32.partialorder %v11159_v61, 0.0 }
 0x66a   : > { %7679 = vpow2.f32 %v5229_v14  ;;  %v5233_v32 = vmul.f32 1.442695, %v5041_v57  ;;  %v7670_v11 = vpop.eup %7669  ;;  %vm5105_vm15 = vcmp.gt.f32.partialorder %v5039_v12, 0.0  ;;  %vm5104_vm0 = vcmp.gt.f32.partialorder %v5037_v7, 0.0 }
 0x66b   : > { %7681 = vpow2.f32 %v5231_v60  ;;  %v7672_v1 = vpop.eup %7671  ;;  %v6369_v18 = vadd.f32 -1.0, %v7670_v11  ;;  %5650 = vmatprep.mubr.bf16.mxu1 %v5390_v36  ;;  %vm5106_vm2 = vcmp.gt.f32.partialorder %v5041_v57, 0.0 }
 0x66c   : > { %7683 = vpow2.f32 %v5233_v32  ;;  %v7674_v9 = vpop.eup %7673  ;;  %v6370_v42 = vadd.f32 -1.0, %v7672_v1  ;;  %5651 = vmatmul.mubr.bf16.gmra.mrb[20].mxu1 %v5389_v47 }
 0x66d   : > { %v7676_v26 = vpop.eup %7675  ;;  %v6371_v19 = vadd.f32 -1.0, %v7674_v9  ;;  %v5355_v33 = vsel %vm5099_vm10, %v11135_v52, %v6369_v18 }
 0x66e   : > { %v6372_v24 = vadd.f32 -1.0, %v7676_v26  ;;  %v5356_v55 = vsel %vm5100_vm12, %v11140_v10, %v6370_v42 }
 0x66f   : > { %v5357_v20 = vsel %vm5101_vm11, %v11144_v41, %v6371_v19 }
 0x670   : > { %v5391_v63 = vpack.c.bf16 %v5357_v20, %v5355_v33  ;;  %v5358_v28 = vsel %vm5102_vm13, %v11150_v38, %v6372_v24 }
 0x671   : > { %v5392_v44 = vpack.c.bf16 %v5358_v28, %v5356_v55 }
 0x673   : > { %v7678_v0 = vpop.eup %7677  ;;  %5656 = vmatprep.mubr.bf16.mxu1 %v5392_v44 }
 0x674   : > { %v7680_v22 = vpop.eup %7679  ;;  %v6373_v58 = vadd.f32 -1.0, %v7678_v0  ;;  %5657 = vmatmul.mubr.bf16.gmra.mrb[24].mxu1 %v5391_v63 }
 0x675   : > { %v7682_v31 = vpop.eup %7681  ;;  %v6374_v21 = vadd.f32 -1.0, %v7680_v22 }
 0x676   : > { %v7684_v4 = vpop.eup %7683  ;;  %v6375_v52 = vadd.f32 -1.0, %v7682_v31  ;;  %v5359_v29 = vsel %vm5103_vm14, %v11159_v61, %v6373_v58 }
 0x677   : > { %v6376_v43 = vadd.f32 -1.0, %v7684_v4  ;;  %v5360_v45 = vsel %vm5104_vm0, %v5037_v7, %v6374_v21 }
 0x678   : > { %v5361_v10 = vsel %vm5105_vm15, %v5039_v12, %v6375_v52 }
 0x679   : > { %v5393_v3 = vpack.c.bf16 %v5361_v10, %v5359_v29  ;;  %v5362_v41 = vsel %vm5106_vm2, %v5041_v57, %v6376_v43 }
 0x67a   : > { %v5394_v37 = vpack.c.bf16 %v5362_v41, %v5360_v45 }
 0x67c   : > { %5662 = vmatprep.mubr.bf16.mxu1 %v5394_v37 }
 0x67d   : > { %5663 = vmatmul.mubr.bf16.gmra.mrb[28].mxu1 %v5393_v3 }
 0x6d7   : > { %v6686_v59 = vpop.f32.mrb[224].mxu1 }
 0x6d8   : > { %v6687_v35 = vpop.f32.mrb[225].mxu1 }
 0x6d9   : > { %v6689_v46 = vpop.f32.mrb[226].mxu1 }
 0x6da   : > { %v6690_v38 = vpop.f32.mrb[227].mxu1 }
 0x6df   : > { %v6692_v5 = vpop.f32.mrb[228].mxu1 }
 0x6e0   : > { %v6693_v54 = vpop.f32.mrb[229].mxu1 }
 0x6e1   : > { %v6695_v51 = vpop.f32.mrb[230].mxu1 }
 0x6e2   : > { %v6696_v6 = vpop.f32.mrb[231].mxu1 }
 0x6e7   : > { %v6698_v15 = vpop.f32.mrb[232].mxu1 }
 0x6e8   : > { %v6699_v40 = vpop.f32.mrb[233].mxu1 }
 0x6e9   : > { %v6701_v62 = vpop.f32.mrb[234].mxu1 }
 0x6ea   : > { %v6702_v16 = vpop.f32.mrb[235].mxu1 }
 0x6ef   : > { %v6704_v48 = vpop.f32.mrb[236].mxu1 }
 0x6f0   : > { %v6705_v13 = vpop.f32.mrb[237].mxu1 }
 0x6f1   : > { %v6707_v23 = vpop.f32.mrb[238].mxu1 }
 0x6f2   : > { %v6708_v61 = vpop.f32.mrb[239].mxu1 }
 0x6f3   : > { %v11183_v56 = vadd.f32 %v6708_v61, %v6707_v23 }
 0x6f7   : > { %v6710_v17 = vpop.f32.mrb[240].mxu1 }
 0x6f8   : > { %v6711_v53 = vpop.f32.mrb[241].mxu1 }
 0x6f9   : > { %v11185_v7 = vadd.f32 %v6711_v53, %v6710_v17  ;;  %v6713_v2 = vpop.f32.mrb[242].mxu1 }
 0x6fa   : > { %v6714_v34 = vpop.f32.mrb[243].mxu1 }
 0x6fb   : > { %v11187_v49 = vadd.f32 %v6714_v34, %v6713_v2  ;;  %v5685_v30 = vrot.slane %v11185_v7, 1 }
 0x6fd   : > { %v5686_v12 = vrot.slane %v11187_v49, 1  ;;  %5716 = vrot.lane.b32.xlu0 %v5685_v30, %s7695_s20 }
 0x6ff   : > { %v6716_v8 = vpop.f32.mrb[244].mxu1  ;;  %v5687_v27 = vsel %vm1573_vm1, %v5685_v30, %v5686_v12 }
 0x700   : > { %v6717_v25 = vpop.f32.mrb[245].mxu1 }
 0x701   : > { %v11193_v14 = vadd.f32 %v6717_v25, %v6716_v8  ;;  %v6719_v57 = vpop.f32.mrb[246].mxu1  ;;  %5718 = vrot.lane.b32.xlu0 %v5687_v27, %s7695_s20 }
 0x702   : > { %v6720_v47 = vpop.f32.mrb[247].mxu1 }
 0x703   : > { %v5688_v60 = vrot.slane %v11193_v14, 1  ;;  %v11197_v32 = vadd.f32 %v6720_v47, %v6719_v57 }
 0x705   : > { %v5690_v11 = vrot.slane %v11197_v32, 1  ;;  %v5689_v39 = vsel %vm1573_vm1, %v5686_v12, %v5688_v60 }
 0x706   : > { %5720 = vrot.lane.b32.xlu1 %v5689_v39, %s7695_s20 }
 0x707   : > { %v6722_v50 = vpop.f32.mrb[248].mxu1  ;;  %v5691_v9 = vsel %vm1573_vm1, %v5688_v60, %v5690_v11 }
 0x708   : > { %v6723_v1 = vpop.f32.mrb[249].mxu1 }
 0x709   : > { %v11202_v18 = vadd.f32 %v6723_v1, %v6722_v50  ;;  %v6725_v36 = vpop.f32.mrb[250].mxu1 }
 0x70a   : > { %v6726_v42 = vpop.f32.mrb[251].mxu1  ;;  %5722 = vrot.lane.b32.xlu1 %v5691_v9, %s7695_s20 }
 0x70b   : > { %v5692_v26 = vrot.slane %v11202_v18, 1  ;;  %v11207_v19 = vadd.f32 %v6726_v42, %v6725_v36 }
 0x70d   : > { %v5694_v24 = vrot.slane %v11207_v19, 1  ;;  %v5693_v33 = vsel %vm1573_vm1, %v5690_v11, %v5692_v26 }
 0x70e   : > { %5724 = vrot.lane.b32.xlu0 %v5693_v33, %s7695_s20 }
 0x70f   : > { %v6728_v20 = vpop.f32.mrb[252].mxu1  ;;  %v5695_v63 = vsel %vm1573_vm1, %v5692_v26, %v5694_v24 }
 0x710   : > { %v6729_v55 = vpop.f32.mrb[253].mxu1  ;;  %5726 = vrot.lane.b32.xlu1 %v5695_v63, %s7695_s20 }
 0x711   : > { %v11214_v28 = vadd.f32 %v6729_v55, %v6728_v20  ;;  %v6731_v44 = vpop.f32.mrb[254].mxu1 }
 0x712   : > { %v6732_v0 = vpop.f32.mrb[255].mxu1 }
 0x713   : > { %v5696_v22 = vrot.slane %v11214_v28, 1  ;;  %v11217_v58 = vadd.f32 %v6732_v0, %v6731_v44 }
 0x715   : > { %v5698_v31 = vrot.slane %v11217_v58, 1  ;;  %v5697_v21 = vsel %vm1573_vm1, %v5694_v24, %v5696_v22 }
 0x716   : > { %5728 = vrot.lane.b32.xlu0 %v5697_v21, %s7695_s20 }
 0x717   : > { %v6734_v4 = vpop.f32.mrb[0].mxu1  ;;  %v5699_v52 = vsel %vm1573_vm1, %v5696_v22, %v5698_v31 }
 0x718   : > { %v6735_v43 = vpop.f32.mrb[1].mxu1  ;;  %5730 = vrot.lane.b32.xlu1 %v5699_v52, %s7695_s20 }
 0x719   : > { %v11224_v29 = vadd.f32 %v6735_v43, %v6734_v4  ;;  %v6737_v10 = vpop.f32.mrb[2].mxu1  ;;  %v11269_v43 = vld [vmem:[%s11352_s7 + $0x3] ss:$0 sm:$0xff] }
 0x71a   : > { %v6738_v3 = vpop.f32.mrb[3].mxu1 }
 0x71b   : > { %v5700_v45 = vrot.slane %v11224_v29, 1  ;;  %v11227_v41 = vadd.f32 %v6738_v3, %v6737_v10 }
 0x71d   : > { %v5702_v37 = vrot.slane %v11227_v41, 1  ;;  %v5701_v59 = vsel %vm1573_vm1, %v5698_v31, %v5700_v45 }
 0x71e   : > { %5732 = vrot.lane.b32.xlu0 %v5701_v59, %s7695_s20 }
 0x71f   : > { %v6740_v35 = vpop.f32.mrb[4].mxu1  ;;  %v5703_v46 = vsel %vm1573_vm1, %v5700_v45, %v5702_v37 }
 0x720   : > { %v6741_v38 = vpop.f32.mrb[5].mxu1  ;;  %5734 = vrot.lane.b32.xlu1 %v5703_v46, %s7695_s20 }
 0x721   : > { %v11234_v5 = vadd.f32 %v6741_v38, %v6740_v35  ;;  %v6743_v54 = vpop.f32.mrb[6].mxu1 }
 0x722   : > { %v6744_v51 = vpop.f32.mrb[7].mxu1 }
 0x723   : > { %v5704_v6 = vrot.slane %v11234_v5, 1  ;;  %v11237_v15 = vadd.f32 %v6744_v51, %v6743_v54 }
 0x725   : > { %v5706_v40 = vrot.slane %v11237_v15, 1  ;;  %v5705_v62 = vsel %vm1573_vm1, %v5702_v37, %v5704_v6 }
 0x726   : > { %5736 = vrot.lane.b32.xlu0 %v5705_v62, %s7695_s20 }
 0x727   : > { %v6746_v16 = vpop.f32.mrb[8].mxu1  ;;  %v5707_v48 = vsel %vm1573_vm1, %v5704_v6, %v5706_v40 }
 0x728   : > { %v6747_v13 = vpop.f32.mrb[9].mxu1  ;;  %5738 = vrot.lane.b32.xlu1 %v5707_v48, %s7695_s20 }
 0x729   : > { %v11244_v23 = vadd.f32 %v6747_v13, %v6746_v16  ;;  %v6749_v61 = vpop.f32.mrb[10].mxu1 }
 0x72a   : > { %v6750_v17 = vpop.f32.mrb[11].mxu1 }
 0x72b   : > { %v5708_v53 = vrot.slane %v11244_v23, 1  ;;  %v11247_v2 = vadd.f32 %v6750_v17, %v6749_v61 }
 0x72d   : > { %v5710_v34 = vrot.slane %v11247_v2, 1  ;;  %v5709_v30 = vsel %vm1573_vm1, %v5706_v40, %v5708_v53 }
 0x72e   : > { %5740 = vrot.lane.b32.xlu0 %v5709_v30, %s7695_s20 }
 0x72f   : > { %v6752_v12 = vpop.f32.mrb[12].mxu1  ;;  %v5711_v8 = vsel %vm1573_vm1, %v5708_v53, %v5710_v34 }
 0x730   : > { %v6753_v27 = vpop.f32.mrb[13].mxu1  ;;  %5742 = vrot.lane.b32.xlu1 %v5711_v8, %s7695_s20 }
 0x731   : > { %v11254_v25 = vadd.f32 %v6753_v27, %v6752_v12  ;;  %v6755_v57 = vpop.f32.mrb[14].mxu1 }
 0x732   : > { %v6756_v47 = vpop.f32.mrb[15].mxu1 }
 0x733   : > { %v5712_v60 = vrot.slane %v11254_v25, 1  ;;  %v11257_v11 = vadd.f32 %v6756_v47, %v6755_v57 }
 0x735   : > { %v5714_v39 = vrot.slane %v11257_v11, 1  ;;  %v5713_v50 = vsel %vm1573_vm1, %v5710_v34, %v5712_v60 }
 0x736   : > { %5744 = vrot.lane.b32.xlu0 %v5713_v50, %s7695_s20 }
 0x737   : > { %v6758_v1 = vpop.f32.mrb[16].mxu1  ;;  %v5715_v36 = vsel %vm1573_vm1, %v5712_v60, %v5714_v39  ;;  %vm5806_vm1 = vcmask 31751  }
 0x738   : > { %v6759_v9 = vpop.f32.mrb[17].mxu1  ;;  %5746 = vrot.lane.b32.xlu1 %v5715_v36, %s7695_s20 }
 0x739   : > { %v6761_v42 = vpop.f32.mrb[18].mxu1 }
 0x73a   : > { %v6762_v26 = vpop.f32.mrb[19].mxu1  ;;  %5748 = vrot.lane.b32.xlu0 %v5714_v39, %s7695_s20 }
 0x73f   : > { %v6764_v24 = vpop.f32.mrb[20].mxu1 }
 0x740   : > { %v6765_v33 = vpop.f32.mrb[21].mxu1 }
 0x741   : > { %v6767_v20 = vpop.f32.mrb[22].mxu1 }
 0x742   : > { %v6768_v63 = vpop.f32.mrb[23].mxu1 }
 0x747   : > { %v6770_v55 = vpop.f32.mrb[24].mxu1 }
 0x748   : > { %v6771_v44 = vpop.f32.mrb[25].mxu1 }
 0x749   : > { %v6773_v0 = vpop.f32.mrb[26].mxu1 }
 0x74a   : > { %v6774_v22 = vpop.f32.mrb[27].mxu1 }
 0x750   : > { %v6776_v31 = vpop.f32.mrb[28].mxu1 }
 0x751   : > { %v6777_v21 = vpop.f32.mrb[29].mxu1 }
 0x752   : > { %v6779_v4 = vpop.f32.mrb[30].mxu1 }
 0x753   : > { %v6780_v52 = vpop.f32.mrb[31].mxu1 }
 0x76f   : > { %v5717_v10 = vpop.permute.xlu0 %5716 }
 0x770   : > { %v5767_v3 = vadd.f32 %v11183_v56, %v5717_v10 }
 0x772   : > { %v5789_v45 = vadd.f32 %v11269_v43, %v5767_v3 }
 0x773   : > { %v5719_v37 = vpop.permute.xlu0 %5718 }
 0x774   : > { %5807 = vst.msk [vmem:[%s11275_s26 - $0x7] sm:$0x80] %vm5806_vm1, %v5789_v45  ;;  %v5768_v59 = vadd.f32 %v11185_v7, %v5719_v37 }
 0x776   : > { %v5790_v56 = vadd.f32 %v11269_v43, %v5768_v59 }
 0x778   : > { %5809 = vst.msk [vmem:[%s11275_s26 + $0x1] sm:$0xff] %vm5808_vm3, %v5790_v56  ;;  %v5721_v35 = vpop.permute.xlu1 %5720 }
 0x779   : > { %v5769_v46 = vadd.f32 %v11187_v49, %v5721_v35 }
 0x77b   : > { %v5791_v38 = vadd.f32 %v11269_v43, %v5769_v46 }
 0x77c   : > { %v5723_v54 = vpop.permute.xlu1 %5722 }
 0x77d   : > { %5810 = vst.msk [vmem:[%s11275_s26 + $0x9] sm:$0xff] %vm5808_vm3, %v5791_v38  ;;  %v5770_v51 = vadd.f32 %v11193_v14, %v5723_v54 }
 0x77f   : > { %v5792_v7 = vadd.f32 %v11269_v43, %v5770_v51 }
 0x780   : > { %v5725_v6 = vpop.permute.xlu0 %5724 }
 0x781   : > { %5811 = vst.msk [vmem:[%s11275_s26 + $0x11] sm:$0xff] %vm5808_vm3, %v5792_v7  ;;  %v5771_v40 = vadd.f32 %v11197_v32, %v5725_v6 }
 0x782   : > { %v5727_v62 = vpop.permute.xlu1 %5726 }
 0x783   : > { %v5793_v16 = vadd.f32 %v11269_v43, %v5771_v40  ;;  %v5772_v49 = vadd.f32 %v11202_v18, %v5727_v62 }
 0x785   : > { %5812 = vst.msk [vmem:[%s11275_s26 + $0x19] sm:$0xff] %vm5808_vm3, %v5793_v16  ;;  %v5794_v48 = vadd.f32 %v11269_v43, %v5772_v49 }
 0x787   : > { %5813 = vst.msk [vmem:[%s11275_s26 + $0x21] sm:$0xff] %vm5808_vm3, %v5794_v48 }
 0x788   : > { %v5729_v14 = vpop.permute.xlu0 %5728 }
 0x789   : > { %v5773_v13 = vadd.f32 %v11207_v19, %v5729_v14 }
 0x78a   : > { %v5731_v61 = vpop.permute.xlu1 %5730 }
 0x78b   : > { %v5795_v17 = vadd.f32 %v11269_v43, %v5773_v13  ;;  %v5774_v32 = vadd.f32 %v11214_v28, %v5731_v61 }
 0x78d   : > { %5814 = vst.msk [vmem:[%s11275_s26 + $0x29] sm:$0xff] %vm5808_vm3, %v5795_v17  ;;  %v5796_v18 = vadd.f32 %v11269_v43, %v5774_v32 }
 0x78f   : > { %5815 = vst.msk [vmem:[%s11275_s26 + $0x31] sm:$0xff] %vm5808_vm3, %v5796_v18 }
 0x790   : > { %v5733_v53 = vpop.permute.xlu0 %5732 }
 0x791   : > { %v5775_v34 = vadd.f32 %v11217_v58, %v5733_v53 }
 0x792   : > { %v5735_v30 = vpop.permute.xlu1 %5734 }
 0x793   : > { %v5797_v12 = vadd.f32 %v11269_v43, %v5775_v34  ;;  %v5776_v19 = vadd.f32 %v11224_v29, %v5735_v30 }
 0x795   : > { %5816 = vst.msk [vmem:[%s11275_s26 + $0x39] sm:$0xff] %vm5808_vm3, %v5797_v12  ;;  %v5798_v28 = vadd.f32 %v11269_v43, %v5776_v19 }
 0x797   : > { %5817 = vst.msk [vmem:[%s11275_s26 + $0x41] sm:$0xff] %vm5808_vm3, %v5798_v28 }
 0x798   : > { %v5737_v8 = vpop.permute.xlu0 %5736 }
 0x799   : > { %v5777_v27 = vadd.f32 %v11227_v41, %v5737_v8 }
 0x79a   : > { %v5739_v57 = vpop.permute.xlu1 %5738 }
 0x79b   : > { %v5799_v47 = vadd.f32 %v11269_v43, %v5777_v27  ;;  %v5778_v58 = vadd.f32 %v11234_v5, %v5739_v57 }
 0x79d   : > { %5818 = vst.msk [vmem:[%s11275_s26 + $0x49] sm:$0xff] %vm5808_vm3, %v5799_v47  ;;  %v5800_v29 = vadd.f32 %v11269_v43, %v5778_v58 }
 0x79f   : > { %5819 = vst.msk [vmem:[%s11275_s26 + $0x51] sm:$0xff] %vm5808_vm3, %v5800_v29 }
 0x7a0   : > { %v5741_v60 = vpop.permute.xlu0 %5740 }
 0x7a1   : > { %v5779_v39 = vadd.f32 %v11237_v15, %v5741_v60 }
 0x7a2   : > { %v5743_v50 = vpop.permute.xlu1 %5742 }
 0x7a3   : > { %v5801_v1 = vadd.f32 %v11269_v43, %v5779_v39  ;;  %v5780_v41 = vadd.f32 %v11244_v23, %v5743_v50 }
 0x7a5   : > { %5820 = vst.msk [vmem:[%s11275_s26 + $0x59] sm:$0xff] %vm5808_vm3, %v5801_v1  ;;  %v5802_v5 = vadd.f32 %v11269_v43, %v5780_v41 }
 0x7a7   : > { %5821 = vst.msk [vmem:[%s11275_s26 + $0x61] sm:$0xff] %vm5808_vm3, %v5802_v5 }
 0x7a8   : > { %v5745_v36 = vpop.permute.xlu0 %5744 }
 0x7a9   : > { %v5781_v9 = vadd.f32 %v11247_v2, %v5745_v36 }
 0x7aa   : > { %v5747_v42 = vpop.permute.xlu1 %5746 }
 0x7ab   : > { %v5803_v26 = vadd.f32 %v11269_v43, %v5781_v9  ;;  %v5782_v15 = vadd.f32 %v11254_v25, %v5747_v42 }
 0x7ac   : > { %v5749_v24 = vpop.permute.xlu0 %5748 }
 0x7ad   : > { %5822 = vst.msk [vmem:[%s11275_s26 + $0x69] sm:$0xff] %vm5808_vm3, %v5803_v26  ;;  %v5804_v23 = vadd.f32 %v11269_v43, %v5782_v15  ;;  %v5783_v33 = vadd.f32 %v11257_v11, %v5749_v24 }
 0x7af   : > { %5823 = vst.msk [vmem:[%s11275_s26 + $0x71] sm:$0xff] %vm5808_vm3, %v5804_v23  ;;  %v5805_v20 = vadd.f32 %v11269_v43, %v5783_v33 }
 0x7b1   : > { %5825 = vst.msk [vmem:[%s11275_s26 + $0x79] sm:$0x7f] %vm5824_vm4, %v5805_v20 }
 0x7b2 PF: > { %s18_s27 = sadd.s32 1, %s7691_s27  }
 0x7b3   : > { %p15_p4 = scmp.ge.s32.totalorder %s18_s27, 4  }
 0x7b5   :  { %17 = sbr.rel (!%p15_p4) target bundleno = 1 (0x1), region = 84 }

</bundles_post_ra>
